<compile_context>
chip_gen: v7x
topology: tpu7x:2x2x1
jax: 0.10.0
libtpu: 0.0.40
codegen_flags: <defaults>
</compile_context>

<pallas_src>
import functools
import math

import jax
import jax.numpy as jnp
from jax.experimental import pallas as pl
from jax.experimental.pallas import tpu as pltpu

_EPS = 1e-5
_VMEM_SMALL = 32 * 1024 * 1024


def _round_up(x, m):
    return ((x + m - 1) // m) * m


def _pick_tiles(W):
    """M-tile and halo size for the padded-domain conv (halo >= W + 3)."""
    hal = _round_up(W + 3, 16)
    tm = 512
    while tm < 2 * hal:
        tm *= 2
    return tm, hal


def _conv_vmem_limit(tm, hal, cin_p, cout_p):
    """Scoped-VMEM limit sized from the actual tile footprint (+ headroom)."""
    bf2, f4, lane = 2, 4, 128
    per_buf = (2 * hal * cin_p * bf2            # halo block
               + tm * cin_p * bf2               # cur block
               + tm * lane * f4                 # (tm, 1) mask pads to 128 lanes
               + 9 * cin_p * cout_p * bf2       # weights (resident)
               + 8 * (cout_p + 2 * cin_p) * f4  # bias / in_scale / in_shift
               + tm * cout_p * bf2              # y output block
               + 8 * cout_p * f4)               # stats output block
    scratch = tm * cout_p * f4 + (tm + 2 * hal) * cin_p * bf2
    need = 2 * per_buf + scratch + (2 << 20)
    # Keep tiles such that `need` stays below ~48 MiB for v7x (64 MiB physical).
    return int(min(max(need, 32 << 20), 112 << 20))


# ----------------------------------------------------------------------------
# Pallas kernel 1: 3x3 conv as 9 shifted-window tap matmuls on the flattened
# padded image, with fused input-BN/ReLU/mask (optional) and fused masked
# BatchNorm statistics in the epilogue.
# ----------------------------------------------------------------------------
def _conv3x3_kernel(halo_ref, cur_ref, mask_ref, w_ref, bias_ref, isc_ref,
                    ish_ref, y_ref, stats_ref, acc_ref, a2_ref,
                    *, offs, tm, hal, fuse_in_bn):
    i = pl.program_id(0)

    # Stage the two tiny halo stripes (2*hal rows total).
    a2_ref[0:hal, :] = halo_ref[0, 0:hal, :]
    a2_ref[hal + tm:hal + tm + hal, :] = halo_ref[0, hal:2 * hal, :]

    # Stage the current M block.  For the second conv the previous layer's
    # BatchNorm + ReLU + ring-mask is fused here, so the intermediate
    # activation never makes a standalone normalize pass through HBM.
    if fuse_in_bn:
        xc = cur_ref[...].astype(jnp.float32)
        xc = jnp.maximum(xc * isc_ref[...] + ish_ref[...], 0.0) * mask_ref[...]
        a2_ref[hal:hal + tm, :] = xc.astype(a2_ref.dtype)
    else:
        a2_ref[hal:hal + tm, :] = cur_ref[...]

    # 9 static shifted-window tap matmuls, f32 accumulation on the MXU.
    for t, off in enumerate(offs):
        a_t = a2_ref[hal + off:hal + off + tm, :]
        d = jnp.dot(a_t, w_ref[t], preferred_element_type=jnp.float32)
        if t == 0:
            acc_ref[...] = d
        else:
            acc_ref[...] += d

    y = acc_ref[...] + bias_ref[...]
    y_ref[...] = y.astype(y_ref.dtype)

    # Fused BatchNorm statistics: masked sum / sum-of-squares accumulated into
    # a resident (8, Cout) output block (rows 0/1 used, padded for alignment).
    @pl.when(i == 0)
    def _():
        stats_ref[...] = jnp.zeros_like(stats_ref)

    ym = y * mask_ref[...]
    stats_ref[0:2, :] += jnp.concatenate(
        [jnp.sum(ym, axis=0, keepdims=True),
         jnp.sum(ym * ym, axis=0, keepdims=True)], axis=0)


def conv3x3_fused(cur, halo, mask, w9, bias, in_scale, in_shift,
                  *, offs, tm, hal, fuse_in_bn):
    """3x3 conv (pad=1) on the flattened padded-image domain.

    cur:      (P_pad, Cin_p) bf16 current-layer activation (raw, pre-BN when
              fuse_in_bn=True; padded-domain input with zero ring otherwise).
    halo:     (ni, 2*hal, Cin_p) bf16 halo rows (already normalized/masked).
    mask:     (P_pad, 1) f32 validity mask on the flattened padded grid.
    w9:       (9, Cin_p, Cout_p) bf16 tap-major weights (VMEM resident).
    bias:     (1, Cout_p) f32.
    in_scale/in_shift: (1, Cin_p) f32 affine of the previous BN (identity ok).
    Returns (y_raw (P_pad, Cout_p) bf16, stats (8, Cout_p) f32).
    """
    P_pad, cin_p = cur.shape
    _, _, cout_p = w9.shape
    ni = P_pad // tm
    kernel = functools.partial(_conv3x3_kernel, offs=offs, tm=tm, hal=hal,
                               fuse_in_bn=fuse_in_bn)
    return pl.pallas_call(
        kernel,
        out_shape=(jax.ShapeDtypeStruct((P_pad, cout_p), jnp.bfloat16),
                   jax.ShapeDtypeStruct((8, cout_p), jnp.float32)),
        grid=(ni,),
        in_specs=[
            pl.BlockSpec((1, 2 * hal, cin_p), lambda i: (i, 0, 0)),   # halo
            pl.BlockSpec((tm, cin_p), lambda i: (i, 0)),              # cur
            pl.BlockSpec((tm, 1), lambda i: (i, 0)),                  # mask
            pl.BlockSpec((9, cin_p, cout_p), lambda i: (0, 0, 0)),    # weights
            pl.BlockSpec((1, cout_p), lambda i: (0, 0)),              # bias
            pl.BlockSpec((1, cin_p), lambda i: (0, 0)),               # in_scale
            pl.BlockSpec((1, cin_p), lambda i: (0, 0)),               # in_shift
        ],
        out_specs=[
            pl.BlockSpec((tm, cout_p), lambda i: (i, 0)),
            pl.BlockSpec((8, cout_p), lambda i: (0, 0)),              # resident
        ],
        scratch_shapes=[
            pltpu.VMEM((tm, cout_p), jnp.float32),
            pltpu.VMEM((tm + 2 * hal, cin_p), jnp.bfloat16),
        ],
        compiler_params=pltpu.CompilerParams(
            dimension_semantics=("arbitrary",),   # resident stats accumulator
            vmem_limit_bytes=_conv_vmem_limit(tm, hal, cin_p, cout_p)),
    )(halo, cur, mask, w9, bias, in_scale, in_shift)


# ----------------------------------------------------------------------------
# Pallas kernel 2: final BatchNorm apply + ReLU + mask (memory-bound, tiled)
# ----------------------------------------------------------------------------
def _bn_apply_kernel(x_ref, sc_ref, sh_ref, m_ref, o_ref):
    x = x_ref[...].astype(jnp.float32)
    y = jnp.maximum(x * sc_ref[...] + sh_ref[...], 0.0) * m_ref[...]
    o_ref[...] = y.astype(o_ref.dtype)


def bn_apply(y, scale, shift, mask, tm):
    P_pad, cp = y.shape
    return pl.pallas_call(
        _bn_apply_kernel,
        out_shape=jax.ShapeDtypeStruct((P_pad, cp), jnp.bfloat16),
        grid=(P_pad // tm,),
        in_specs=[
            pl.BlockSpec((tm, cp), lambda i: (i, 0)),
            pl.BlockSpec((1, cp), lambda i: (0, 0)),
            pl.BlockSpec((1, cp), lambda i: (0, 0)),
            pl.BlockSpec((tm, 1), lambda i: (i, 0)),
        ],
        out_specs=pl.BlockSpec((tm, cp), lambda i: (i, 0)),
        compiler_params=pltpu.CompilerParams(
            dimension_semantics=("parallel",),
            vmem_limit_bytes=_VMEM_SMALL),
    )(y, scale.reshape(1, cp), shift.reshape(1, cp), mask)


# ----------------------------------------------------------------------------
# Glue (pure JAX): upsample, pad, concat, mask, halo gather, parameter padding
# ----------------------------------------------------------------------------
# TODO(synk): the ring mask could be computed in-kernel from broadcasted_iota
# (drops the (P_pad, 1) stream); kept as a precomputed input for robustness.
def _valid_row_mask(N, H, W, P_pad):
    """1.0 on rows of the flattened padded grid holding real pixels, else 0.0."""
    H2, W2 = H + 2, W + 2
    r = jnp.arange(P_pad, dtype=jnp.int32)
    col = r % W2
    row = (r // W2) % H2
    valid = ((col >= 1) & (col <= W) & (row >= 1) & (row <= H)
             & (r < N * H2 * W2))
    return valid.astype(jnp.float32).reshape(P_pad, 1)


def _gather_rows(arr, g):
    """Gather rows of `arr` at indices g (out-of-range rows -> zeros)."""
    n = arr.shape[0]
    rows = arr[jnp.clip(g, 0, n - 1)]
    valid = (g >= 0) & (g < n)
    return jnp.where(valid[..., None], rows, jnp.zeros((), arr.dtype))


def upsample_bilinear2x(x):
    """nn.Upsample(scale_factor=2, mode='bilinear', align_corners=True), NHWC."""
    N, H, W, C = x.shape
    Ho, Wo = 2 * H, 2 * W

    def coords(n_in, n_out):
        if n_in == 1:
            return jnp.zeros((n_out,), jnp.float32)
        return jnp.arange(n_out, dtype=jnp.float32) * ((n_in - 1) / (n_out - 1))

    ys = coords(H, Ho)
    xs = coords(W, Wo)
    y0 = jnp.floor(ys).astype(jnp.int32)
    y1 = jnp.minimum(y0 + 1, H - 1)
    wy = (ys - y0.astype(jnp.float32))[None, :, None, None]
    x0 = jnp.floor(xs).astype(jnp.int32)
    x1 = jnp.minimum(x0 + 1, W - 1)
    wx = (xs - x0.astype(jnp.float32))[None, None, :, None]

    rows0 = x[:, y0]
    rows1 = x[:, y1]
    top = rows0[:, :, x0] * (1.0 - wx) + rows0[:, :, x1] * wx
    bot = rows1[:, :, x0] * (1.0 - wx) + rows1[:, :, x1] * wx
    return top * (1.0 - wy) + bot * wy


def _up_concat(x_f, x_s, pad_ring, dtype):
    """Upsample x_f, diff-pad it, concat [x_s, x_f]; optionally add the 3x3
    conv ring padding in the same pad (one materialization, bf16)."""
    x_f = upsample_bilinear2x(x_f)
    dy = x_s.shape[1] - x_f.shape[1]
    dx = x_s.shape[2] - x_f.shape[2]
    r = 1 if pad_ring else 0
    x_f = jnp.pad(x_f.astype(dtype),
                  ((0, 0), (dy // 2 + r, dy - dy // 2 + r),
                   (dx // 2 + r, dx - dx // 2 + r), (0, 0)))
    x_s = jnp.pad(x_s.astype(dtype), ((0, 0), (r, r), (r, r), (0, 0)))
    return jnp.concatenate([x_s, x_f], axis=-1)   # torch.cat([x_s, x_f], dim=1)


def _pad_conv_params(w, b, gamma, beta, cin_p):
    """w: (3,3,Cin,Cout) -> (9, cin_p, cout_p) bf16; vectors zero-padded, f32."""
    kh, kw, cin, cout = w.shape
    assert kh == 3 and kw == 3 and cin <= cin_p
    cout_p = _round_up(cout, 128)
    w9 = jnp.pad(w.reshape(9, cin, cout),
                 ((0, 0), (0, cin_p - cin), (0, cout_p - cout)))
    b_p = jnp.pad(b, (0, cout_p - cout)).astype(jnp.float32).reshape(1, cout_p)
    g_p = jnp.pad(gamma, (0, cout_p - cout)).astype(jnp.float32)
    be_p = jnp.pad(beta, (0, cout_p - cout)).astype(jnp.float32)
    return w9.astype(jnp.bfloat16), b_p, g_p, be_p


def _bn_affine(stats, gamma, beta, count, eps):
    mean = stats[0] / count
    var = jnp.maximum(stats[1] / count - mean * mean, 0.0)   # biased variance
    scale = gamma * jax.lax.rsqrt(var + eps)
    shift = beta - mean * scale
    return scale, shift


# ----------------------------------------------------------------------------
# DoubleConv on the padded flattened domain
# ----------------------------------------------------------------------------
def double_conv(xp, p, eps=_EPS):
    """xp: (N, H+2, W+2, Cin) bf16 padded-domain input with exact zero ring."""
    N, H2, W2, Cin = xp.shape
    H, W = H2 - 2, W2 - 2
    tm, hal = _pick_tiles(W)
    P = N * H2 * W2
    P_pad = _round_up(P, tm)
    ni = P_pad // tm
    assert hal >= W + 3 and P_pad % tm == 0 and tm % 16 == 0

    offs = tuple((ky - 1) * W2 + (kx - 1) for ky in range(3) for kx in range(3))

    xf = xp.reshape(P, Cin)
    if P_pad > P:
        xf = jnp.pad(xf, ((0, P_pad - P), (0, 0)))

    mask = _valid_row_mask(N, H, W, P_pad)
    count = float(N * H * W)

    # Halo gather indices (global flattened-row indices, shared by both convs).
    base = jnp.arange(ni, dtype=jnp.int32)[:, None] * tm
    g = jnp.concatenate(
        [base + jnp.arange(-hal, 0, dtype=jnp.int32)[None, :],
         base + tm + jnp.arange(0, hal, dtype=jnp.int32)[None, :]], axis=1)

    ones_c = jnp.ones((1, Cin), jnp.float32)
    zeros_c = jnp.zeros((1, Cin), jnp.float32)

    # ---- conv1: 3x3 conv + fused masked BN statistics ----
    w9_1, b1, g1, be1 = _pad_conv_params(p["w1"], p["b1"], p["g1"], p["be1"],
                                         cin_p=Cin)
    halo1 = _gather_rows(xf, g)
    y1, st1 = conv3x3_fused(xf, halo1, mask, w9_1, b1, ones_c, zeros_c,
                            offs=offs, tm=tm, hal=hal, fuse_in_bn=False)
    sc1, sh1 = _bn_affine(st1, g1, be1, count, eps)

    # ---- conv2: BN1 + ReLU + mask fused into the A staging, fused BN2 stats ----
    c1p = y1.shape[1]
    w9_2, b2, g2, be2 = _pad_conv_params(p["w2"], p["b2"], p["g2"], p["be2"],
                                         cin_p=c1p)
    h_raw = _gather_rows(y1, g).astype(jnp.float32)
    h_msk = _gather_rows(mask, g)
    halo2 = (jnp.maximum(h_raw * sc1 + sh1, 0.0) * h_msk).astype(jnp.bfloat16)
    y2, st2 = conv3x3_fused(y1, halo2, mask, w9_2, b2,
                            sc1.reshape(1, c1p), sh1.reshape(1, c1p),
                            offs=offs, tm=tm, hal=hal, fuse_in_bn=True)
    sc2, sh2 = _bn_affine(st2, g2, be2, count, eps)

    # ---- final BN2 + ReLU (standalone tiled pass), crop, f32 ----
    z2 = bn_apply(y2, sc2, sh2, mask, tm)
    cout = p["w2"].shape[-1]
    out = z2[:P].reshape(N, H2, W2, -1)[:, 1:H + 1, 1:W + 1, :cout]
    return out.astype(jnp.float32)


def up_forward(params, x_f, x_s, eps=_EPS):
    """Up.forward(x_f, x_s) with NHWC tensors (bilinear=True path)."""
    xp = _up_concat(x_f, x_s, pad_ring=True, dtype=jnp.bfloat16)
    return double_conv(xp, params, eps)


# ----------------------------------------------------------------------------
# Pure-JAX f32 reference (loose numerical sanity check)
# ----------------------------------------------------------------------------
def _reference_up(params, x_f, x_s, eps=_EPS):
    x = _up_concat(x_f, x_s, pad_ring=False, dtype=jnp.float32)

    def conv_bn_relu(h, w, b, g, be):
        y = jax.lax.conv_general_dilated(
            h, w, window_strides=(1, 1), padding="SAME",
            dimension_numbers=("NHWC", "HWIO", "NHWC")) + b
        mean = jnp.mean(y, axis=(0, 1, 2))
        var = jnp.mean(jnp.square(y - mean), axis=(0, 1, 2))
        y = (y - mean) * jax.lax.rsqrt(var + eps) * g + be
        return jnp.maximum(y, 0.0)

    h = conv_bn_relu(x, params["w1"], params["b1"], params["g1"], params["be1"])
    h = conv_bn_relu(h, params["w2"], params["b2"], params["g2"], params["be2"])
    return h


# ----------------------------------------------------------------------------
# Deterministic synthetic parameters for Up(in_channels, out_channels, bilinear)
# ----------------------------------------------------------------------------
def init_up_params(key, in_channels, out_channels):
    mid = in_channels // 2          # DoubleConv(in, out, mid=in // 2)
    ks = jax.random.split(key, 8)

    def conv_w(k, cin, cout):
        return jax.random.normal(k, (3, 3, cin, cout), jnp.float32) \
            * (1.0 / math.sqrt(9 * cin))

    return dict(
        w1=conv_w(ks[0], in_channels, mid),
        b1=0.01 * jax.random.normal(ks[1], (mid,), jnp.float32),
        g1=1.0 + 0.05 * jax.random.normal(ks[2], (mid,), jnp.float32),
        be1=0.05 * jax.random.normal(ks[3], (mid,), jnp.float32),
        w2=conv_w(ks[4], mid, out_channels),
        b2=0.01 * jax.random.normal(ks[5], (out_channels,), jnp.float32),
        g2=1.0 + 0.05 * jax.random.normal(ks[6], (out_channels,), jnp.float32),
        be2=0.05 * jax.random.normal(ks[7], (out_channels,), jnp.float32),
    )


if __name__ == "__main__":
    in_channels, out_channels = 64, 32
    batch, spatial = 2, 16

    key = jax.random.PRNGKey(0)
    k_params, k_xf, k_xs = jax.random.split(key, 3)
    params = init_up_params(k_params, in_channels, out_channels)

    # PyTorch-style NCHW inputs for Up.forward(x_f, x_s):
    #   x_f: deeper feature map  (half spatial, in_channels // 2 channels)
    #   x_s: skip connection     (full spatial, in_channels // 2 channels)
    x_f_nchw = jax.random.normal(
        k_xf, (batch, in_channels // 2, spatial // 2, spatial // 2), jnp.float32)
    x_s_nchw = jax.random.normal(
        k_xs, (batch, in_channels // 2, spatial, spatial), jnp.float32)

    x_f = jnp.transpose(x_f_nchw, (0, 2, 3, 1))   # -> NHWC
    x_s = jnp.transpose(x_s_nchw, (0, 2, 3, 1))

    fwd = jax.jit(functools.partial(up_forward, params))
    out_nhwc = jax.block_until_ready(fwd(x_f, x_s))

    out = jnp.transpose(out_nhwc, (0, 3, 1, 2))   # back to NCHW
    assert out.shape == (batch, out_channels, spatial, spatial), out.shape
    assert bool(jnp.all(jnp.isfinite(out)))

    # Loose sanity check vs. a pure-JAX f32 reference (bf16 activations inside
    # the Pallas path introduce ~1e-2 level differences).
    ref = _reference_up(params, x_f, x_s)
    err = float(jnp.max(jnp.abs(out_nhwc - ref)))
    assert err < 0.25, f"max abs error vs reference: {err}"

    print("KERNEL_OK")
</pallas_src>

<mosaic_0001>
module attributes {stable_mosaic.version = 11 : i64} {
  func.func @_conv3x3_kernel(%arg0: i32, %arg1: memref<1x64x64xbf16, #tpu.memory_space<vmem>>, %arg2: memref<512x64xbf16, #tpu.memory_space<vmem>>, %arg3: memref<512x1xf32, #tpu.memory_space<vmem>>, %arg4: memref<9x64x128xbf16, #tpu.memory_space<vmem>>, %arg5: memref<1x128xf32, #tpu.memory_space<vmem>>, %arg6: memref<1x64xf32, #tpu.memory_space<vmem>>, %arg7: memref<1x64xf32, #tpu.memory_space<vmem>>, %arg8: memref<512x128xbf16, #tpu.memory_space<vmem>>, %arg9: memref<8x128xf32, #tpu.memory_space<vmem>>, %arg10: memref<512x128xf32, #tpu.memory_space<vmem>>, %arg11: memref<576x64xbf16, #tpu.memory_space<vmem>>) attributes {dimension_semantics = [#tpu.dimension_semantics<arbitrary>], iteration_bounds = array<i64: 2>, scalar_prefetch = 0 : i64, scratch_operands = 2 : i64, tpu.core_type = #tpu.core_type<tc>, window_params = [{transform_indices = @transform_0, window_bounds = array<i64: 1, 64, 64>}, {transform_indices = @transform_1, window_bounds = array<i64: 512, 64>}, {transform_indices = @transform_2, window_bounds = array<i64: 512, 1>}, {pipeline_mode = #tpu.pipeline_mode<synchronous>, transform_indices = @transform_3, window_bounds = array<i64: 9, 64, 128>}, {pipeline_mode = #tpu.pipeline_mode<synchronous>, transform_indices = @transform_4, window_bounds = array<i64: 1, 128>}, {pipeline_mode = #tpu.pipeline_mode<synchronous>, transform_indices = @transform_5, window_bounds = array<i64: 1, 64>}, {pipeline_mode = #tpu.pipeline_mode<synchronous>, transform_indices = @transform_6, window_bounds = array<i64: 1, 64>}, {transform_indices = @transform_7, window_bounds = array<i64: 512, 128>}, {pipeline_mode = #tpu.pipeline_mode<synchronous>, transform_indices = @transform_8, window_bounds = array<i64: 8, 128>}]} {
    %c0 = arith.constant 0 : index
    %c0_0 = arith.constant 0 : index
    %c0_1 = arith.constant 0 : index
    %0 = vector.load %arg1[%c0, %c0_0, %c0_1] : memref<1x64x64xbf16, #tpu.memory_space<vmem>>, vector<1x32x64xbf16>
    %1 = vector.shape_cast %0 : vector<1x32x64xbf16> to vector<32x64xbf16>
    %c0_2 = arith.constant 0 : index
    %c0_3 = arith.constant 0 : index
    %2 = vector.load %arg11[%c0_2, %c0_3] : memref<576x64xbf16, #tpu.memory_space<vmem>>, vector<32x64xbf16>
    tpu.vector_store %arg11[%c0_2, %c0_3], %1 {strides = array<i32>} : memref<576x64xbf16, #tpu.memory_space<vmem>>, vector<32x64xbf16>,
    %c0_4 = arith.constant 0 : index
    %c32 = arith.constant 32 : index
    %c0_5 = arith.constant 0 : index
    %3 = vector.load %arg1[%c0_4, %c32, %c0_5] : memref<1x64x64xbf16, #tpu.memory_space<vmem>>, vector<1x32x64xbf16>
    %4 = vector.shape_cast %3 : vector<1x32x64xbf16> to vector<32x64xbf16>
    %c544 = arith.constant 544 : index
    %c0_6 = arith.constant 0 : index
    %5 = vector.load %arg11[%c544, %c0_6] : memref<576x64xbf16, #tpu.memory_space<vmem>>, vector<32x64xbf16>
    tpu.vector_store %arg11[%c544, %c0_6], %4 {strides = array<i32>} : memref<576x64xbf16, #tpu.memory_space<vmem>>, vector<32x64xbf16>,
    %c0_7 = arith.constant 0 : index
    %c0_8 = arith.constant 0 : index
    %6 = vector.load %arg2[%c0_7, %c0_8] : memref<512x64xbf16, #tpu.memory_space<vmem>>, vector<512x64xbf16>
    %c32_9 = arith.constant 32 : index
    %c0_10 = arith.constant 0 : index
    %7 = vector.load %arg11[%c32_9, %c0_10] : memref<576x64xbf16, #tpu.memory_space<vmem>>, vector<512x64xbf16>
    tpu.vector_store %arg11[%c32_9, %c0_10], %6 {strides = array<i32>} : memref<576x64xbf16, #tpu.memory_space<vmem>>, vector<512x64xbf16>,
    %c13 = arith.constant 13 : index
    %c0_11 = arith.constant 0 : index
    %8 = vector.load %arg11[%c13, %c0_11] : memref<576x64xbf16, #tpu.memory_space<vmem>>, vector<512x64xbf16>
    %c0_12 = arith.constant 0 : index
    %c0_13 = arith.constant 0 : index
    %c0_14 = arith.constant 0 : index
    %9 = vector.load %arg4[%c0_12, %c0_13, %c0_14] : memref<9x64x128xbf16, #tpu.memory_space<vmem>>, vector<1x64x128xbf16>
    %10 = vector.shape_cast %9 : vector<1x64x128xbf16> to vector<64x128xbf16>
    %cst = arith.constant dense<0.000000e+00> : vector<512x128xf32>
    %11 = tpu.matmul %8, %10, %cst {dimension_numbers = #tpu.dot_dimension_numbers<[1], [0], [0], [1], [0, 0, 1, 1], [], []>} : vector<512x64xbf16>, vector<64x128xbf16>, vector<512x128xf32> -> vector<512x128xf32>
    %c0_15 = arith.constant 0 : index
    %c0_16 = arith.constant 0 : index
    %12 = vector.load %arg10[%c0_15, %c0_16] : memref<512x128xf32, #tpu.memory_space<vmem>>, vector<512x128xf32>
    tpu.vector_store %arg10[%c0_15, %c0_16], %11 {strides = array<i32>} : memref<512x128xf32, #tpu.memory_space<vmem>>, vector<512x128xf32>,
    %c14 = arith.constant 14 : index
    %c0_17 = arith.constant 0 : index
    %13 = vector.load %arg11[%c14, %c0_17] : memref<576x64xbf16, #tpu.memory_space<vmem>>, vector<512x64xbf16>
    %c1 = arith.constant 1 : index
    %c0_18 = arith.constant 0 : index
    %c0_19 = arith.constant 0 : index
    %14 = vector.load %arg4[%c1, %c0_18, %c0_19] : memref<9x64x128xbf16, #tpu.memory_space<vmem>>, vector<1x64x128xbf16>
    %15 = vector.shape_cast %14 : vector<1x64x128xbf16> to vector<64x128xbf16>
    %cst_20 = arith.constant dense<0.000000e+00> : vector<512x128xf32>
    %16 = tpu.matmul %13, %15, %cst_20 {dimension_numbers = #tpu.dot_dimension_numbers<[1], [0], [0], [1], [0, 0, 1, 1], [], []>} : vector<512x64xbf16>, vector<64x128xbf16>, vector<512x128xf32> -> vector<512x128xf32>
    %c0_21 = arith.constant 0 : index
    %c0_22 = arith.constant 0 : index
    %17 = vector.load %arg10[%c0_21, %c0_22] : memref<512x128xf32, #tpu.memory_space<vmem>>, vector<512x128xf32>
    %18 = arith.addf %17, %16 : vector<512x128xf32>
    %c0_23 = arith.constant 0 : index
    %c0_24 = arith.constant 0 : index
    %19 = vector.load %arg10[%c0_23, %c0_24] : memref<512x128xf32, #tpu.memory_space<vmem>>, vector<512x128xf32>
    tpu.vector_store %arg10[%c0_23, %c0_24], %18 {strides = array<i32>} : memref<512x128xf32, #tpu.memory_space<vmem>>, vector<512x128xf32>,
    %c15 = arith.constant 15 : index
    %c0_25 = arith.constant 0 : index
    %20 = vector.load %arg11[%c15, %c0_25] : memref<576x64xbf16, #tpu.memory_space<vmem>>, vector<512x64xbf16>
    %c2 = arith.constant 2 : index
    %c0_26 = arith.constant 0 : index
    %c0_27 = arith.constant 0 : index
    %21 = vector.load %arg4[%c2, %c0_26, %c0_27] : memref<9x64x128xbf16, #tpu.memory_space<vmem>>, vector<1x64x128xbf16>
    %22 = vector.shape_cast %21 : vector<1x64x128xbf16> to vector<64x128xbf16>
    %cst_28 = arith.constant dense<0.000000e+00> : vector<512x128xf32>
    %23 = tpu.matmul %20, %22, %cst_28 {dimension_numbers = #tpu.dot_dimension_numbers<[1], [0], [0], [1], [0, 0, 1, 1], [], []>} : vector<512x64xbf16>, vector<64x128xbf16>, vector<512x128xf32> -> vector<512x128xf32>
    %c0_29 = arith.constant 0 : index
    %c0_30 = arith.constant 0 : index
    %24 = vector.load %arg10[%c0_29, %c0_30] : memref<512x128xf32, #tpu.memory_space<vmem>>, vector<512x128xf32>
    %25 = arith.addf %24, %23 : vector<512x128xf32>
    %c0_31 = arith.constant 0 : index
    %c0_32 = arith.constant 0 : index
    %26 = vector.load %arg10[%c0_31, %c0_32] : memref<512x128xf32, #tpu.memory_space<vmem>>, vector<512x128xf32>
    tpu.vector_store %arg10[%c0_31, %c0_32], %25 {strides = array<i32>} : memref<512x128xf32, #tpu.memory_space<vmem>>, vector<512x128xf32>,
    %c31 = arith.constant 31 : index
    %c0_33 = arith.constant 0 : index
    %27 = vector.load %arg11[%c31, %c0_33] : memref<576x64xbf16, #tpu.memory_space<vmem>>, vector<512x64xbf16>
    %c3 = arith.constant 3 : index
    %c0_34 = arith.constant 0 : index
    %c0_35 = arith.constant 0 : index
    %28 = vector.load %arg4[%c3, %c0_34, %c0_35] : memref<9x64x128xbf16, #tpu.memory_space<vmem>>, vector<1x64x128xbf16>
    %29 = vector.shape_cast %28 : vector<1x64x128xbf16> to vector<64x128xbf16>
    %cst_36 = arith.constant dense<0.000000e+00> : vector<512x128xf32>
    %30 = tpu.matmul %27, %29, %cst_36 {dimension_numbers = #tpu.dot_dimension_numbers<[1], [0], [0], [1], [0, 0, 1, 1], [], []>} : vector<512x64xbf16>, vector<64x128xbf16>, vector<512x128xf32> -> vector<512x128xf32>
    %c0_37 = arith.constant 0 : index
    %c0_38 = arith.constant 0 : index
    %31 = vector.load %arg10[%c0_37, %c0_38] : memref<512x128xf32, #tpu.memory_space<vmem>>, vector<512x128xf32>
    %32 = arith.addf %31, %30 : vector<512x128xf32>
    %c0_39 = arith.constant 0 : index
    %c0_40 = arith.constant 0 : index
    %33 = vector.load %arg10[%c0_39, %c0_40] : memref<512x128xf32, #tpu.memory_space<vmem>>, vector<512x128xf32>
    tpu.vector_store %arg10[%c0_39, %c0_40], %32 {strides = array<i32>} : memref<512x128xf32, #tpu.memory_space<vmem>>, vector<512x128xf32>,
    %c32_41 = arith.constant 32 : index
    %c0_42 = arith.constant 0 : index
    %34 = vector.load %arg11[%c32_41, %c0_42] : memref<576x64xbf16, #tpu.memory_space<vmem>>, vector<512x64xbf16>
    %c4 = arith.constant 4 : index
    %c0_43 = arith.constant 0 : index
    %c0_44 = arith.constant 0 : index
    %35 = vector.load %arg4[%c4, %c0_43, %c0_44] : memref<9x64x128xbf16, #tpu.memory_space<vmem>>, vector<1x64x128xbf16>
    %36 = vector.shape_cast %35 : vector<1x64x128xbf16> to vector<64x128xbf16>
    %cst_45 = arith.constant dense<0.000000e+00> : vector<512x128xf32>
    %37 = tpu.matmul %34, %36, %cst_45 {dimension_numbers = #tpu.dot_dimension_numbers<[1], [0], [0], [1], [0, 0, 1, 1], [], []>} : vector<512x64xbf16>, vector<64x128xbf16>, vector<512x128xf32> -> vector<512x128xf32>
    %c0_46 = arith.constant 0 : index
    %c0_47 = arith.constant 0 : index
    %38 = vector.load %arg10[%c0_46, %c0_47] : memref<512x128xf32, #tpu.memory_space<vmem>>, vector<512x128xf32>
    %39 = arith.addf %38, %37 : vector<512x128xf32>
    %c0_48 = arith.constant 0 : index
    %c0_49 = arith.constant 0 : index
    %40 = vector.load %arg10[%c0_48, %c0_49] : memref<512x128xf32, #tpu.memory_space<vmem>>, vector<512x128xf32>
    tpu.vector_store %arg10[%c0_48, %c0_49], %39 {strides = array<i32>} : memref<512x128xf32, #tpu.memory_space<vmem>>, vector<512x128xf32>,
    %c33 = arith.constant 33 : index
    %c0_50 = arith.constant 0 : index
    %41 = vector.load %arg11[%c33, %c0_50] : memref<576x64xbf16, #tpu.memory_space<vmem>>, vector<512x64xbf16>
    %c5 = arith.constant 5 : index
    %c0_51 = arith.constant 0 : index
    %c0_52 = arith.constant 0 : index
    %42 = vector.load %arg4[%c5, %c0_51, %c0_52] : memref<9x64x128xbf16, #tpu.memory_space<vmem>>, vector<1x64x128xbf16>
    %43 = vector.shape_cast %42 : vector<1x64x128xbf16> to vector<64x128xbf16>
    %cst_53 = arith.constant dense<0.000000e+00> : vector<512x128xf32>
    %44 = tpu.matmul %41, %43, %cst_53 {dimension_numbers = #tpu.dot_dimension_numbers<[1], [0], [0], [1], [0, 0, 1, 1], [], []>} : vector<512x64xbf16>, vector<64x128xbf16>, vector<512x128xf32> -> vector<512x128xf32>
    %c0_54 = arith.constant 0 : index
    %c0_55 = arith.constant 0 : index
    %45 = vector.load %arg10[%c0_54, %c0_55] : memref<512x128xf32, #tpu.memory_space<vmem>>, vector<512x128xf32>
    %46 = arith.addf %45, %44 : vector<512x128xf32>
    %c0_56 = arith.constant 0 : index
    %c0_57 = arith.constant 0 : index
    %47 = vector.load %arg10[%c0_56, %c0_57] : memref<512x128xf32, #tpu.memory_space<vmem>>, vector<512x128xf32>
    tpu.vector_store %arg10[%c0_56, %c0_57], %46 {strides = array<i32>} : memref<512x128xf32, #tpu.memory_space<vmem>>, vector<512x128xf32>,
    %c49 = arith.constant 49 : index
    %c0_58 = arith.constant 0 : index
    %48 = vector.load %arg11[%c49, %c0_58] : memref<576x64xbf16, #tpu.memory_space<vmem>>, vector<512x64xbf16>
    %c6 = arith.constant 6 : index
    %c0_59 = arith.constant 0 : index
    %c0_60 = arith.constant 0 : index
    %49 = vector.load %arg4[%c6, %c0_59, %c0_60] : memref<9x64x128xbf16, #tpu.memory_space<vmem>>, vector<1x64x128xbf16>
    %50 = vector.shape_cast %49 : vector<1x64x128xbf16> to vector<64x128xbf16>
    %cst_61 = arith.constant dense<0.000000e+00> : vector<512x128xf32>
    %51 = tpu.matmul %48, %50, %cst_61 {dimension_numbers = #tpu.dot_dimension_numbers<[1], [0], [0], [1], [0, 0, 1, 1], [], []>} : vector<512x64xbf16>, vector<64x128xbf16>, vector<512x128xf32> -> vector<512x128xf32>
    %c0_62 = arith.constant 0 : index
    %c0_63 = arith.constant 0 : index
    %52 = vector.load %arg10[%c0_62, %c0_63] : memref<512x128xf32, #tpu.memory_space<vmem>>, vector<512x128xf32>
    %53 = arith.addf %52, %51 : vector<512x128xf32>
    %c0_64 = arith.constant 0 : index
    %c0_65 = arith.constant 0 : index
    %54 = vector.load %arg10[%c0_64, %c0_65] : memref<512x128xf32, #tpu.memory_space<vmem>>, vector<512x128xf32>
    tpu.vector_store %arg10[%c0_64, %c0_65], %53 {strides = array<i32>} : memref<512x128xf32, #tpu.memory_space<vmem>>, vector<512x128xf32>,
    %c50 = arith.constant 50 : index
    %c0_66 = arith.constant 0 : index
    %55 = vector.load %arg11[%c50, %c0_66] : memref<576x64xbf16, #tpu.memory_space<vmem>>, vector<512x64xbf16>
    %c7 = arith.constant 7 : index
    %c0_67 = arith.constant 0 : index
    %c0_68 = arith.constant 0 : index
    %56 = vector.load %arg4[%c7, %c0_67, %c0_68] : memref<9x64x128xbf16, #tpu.memory_space<vmem>>, vector<1x64x128xbf16>
    %57 = vector.shape_cast %56 : vector<1x64x128xbf16> to vector<64x128xbf16>
    %cst_69 = arith.constant dense<0.000000e+00> : vector<512x128xf32>
    %58 = tpu.matmul %55, %57, %cst_69 {dimension_numbers = #tpu.dot_dimension_numbers<[1], [0], [0], [1], [0, 0, 1, 1], [], []>} : vector<512x64xbf16>, vector<64x128xbf16>, vector<512x128xf32> -> vector<512x128xf32>
    %c0_70 = arith.constant 0 : index
    %c0_71 = arith.constant 0 : index
    %59 = vector.load %arg10[%c0_70, %c0_71] : memref<512x128xf32, #tpu.memory_space<vmem>>, vector<512x128xf32>
    %60 = arith.addf %59, %58 : vector<512x128xf32>
    %c0_72 = arith.constant 0 : index
    %c0_73 = arith.constant 0 : index
    %61 = vector.load %arg10[%c0_72, %c0_73] : memref<512x128xf32, #tpu.memory_space<vmem>>, vector<512x128xf32>
    tpu.vector_store %arg10[%c0_72, %c0_73], %60 {strides = array<i32>} : memref<512x128xf32, #tpu.memory_space<vmem>>, vector<512x128xf32>,
    %c51 = arith.constant 51 : index
    %c0_74 = arith.constant 0 : index
    %62 = vector.load %arg11[%c51, %c0_74] : memref<576x64xbf16, #tpu.memory_space<vmem>>, vector<512x64xbf16>
    %c8 = arith.constant 8 : index
    %c0_75 = arith.constant 0 : index
    %c0_76 = arith.constant 0 : index
    %63 = vector.load %arg4[%c8, %c0_75, %c0_76] : memref<9x64x128xbf16, #tpu.memory_space<vmem>>, vector<1x64x128xbf16>
    %64 = vector.shape_cast %63 : vector<1x64x128xbf16> to vector<64x128xbf16>
    %cst_77 = arith.constant dense<0.000000e+00> : vector<512x128xf32>
    %65 = tpu.matmul %62, %64, %cst_77 {dimension_numbers = #tpu.dot_dimension_numbers<[1], [0], [0], [1], [0, 0, 1, 1], [], []>} : vector<512x64xbf16>, vector<64x128xbf16>, vector<512x128xf32> -> vector<512x128xf32>
    %c0_78 = arith.constant 0 : index
    %c0_79 = arith.constant 0 : index
    %66 = vector.load %arg10[%c0_78, %c0_79] : memref<512x128xf32, #tpu.memory_space<vmem>>, vector<512x128xf32>
    %67 = arith.addf %66, %65 : vector<512x128xf32>
    %c0_80 = arith.constant 0 : index
    %c0_81 = arith.constant 0 : index
    %68 = vector.load %arg10[%c0_80, %c0_81] : memref<512x128xf32, #tpu.memory_space<vmem>>, vector<512x128xf32>
    tpu.vector_store %arg10[%c0_80, %c0_81], %67 {strides = array<i32>} : memref<512x128xf32, #tpu.memory_space<vmem>>, vector<512x128xf32>,
    %c0_82 = arith.constant 0 : index
    %c0_83 = arith.constant 0 : index
    %69 = vector.load %arg10[%c0_82, %c0_83] : memref<512x128xf32, #tpu.memory_space<vmem>>, vector<512x128xf32>
    %c0_84 = arith.constant 0 : index
    %c0_85 = arith.constant 0 : index
    %70 = vector.load %arg5[%c0_84, %c0_85] : memref<1x128xf32, #tpu.memory_space<vmem>>, vector<1x128xf32>
    %71 = vector.broadcast %70 : vector<1x128xf32> to vector<512x128xf32>
    %72 = arith.addf %69, %71 : vector<512x128xf32>
    %73 = arith.truncf %72 : vector<512x128xf32> to vector<512x128xbf16>
    %c0_86 = arith.constant 0 : index
    %c0_87 = arith.constant 0 : index
    %74 = vector.load %arg8[%c0_86, %c0_87] : memref<512x128xbf16, #tpu.memory_space<vmem>>, vector<512x128xbf16>
    tpu.vector_store %arg8[%c0_86, %c0_87], %73 {strides = array<i32>} : memref<512x128xbf16, #tpu.memory_space<vmem>>, vector<512x128xbf16>,
    %c0_i32 = arith.constant 0 : i32
    %75 = arith.cmpi eq, %arg0, %c0_i32 : i32
    %76 = arith.extui %75 : i1 to i32
    %c0_i32_88 = arith.constant 0 : i32
    %77 = arith.cmpi ne, %76, %c0_i32_88 : i32
    scf.if %77 {
      %cst_97 = arith.constant 0.000000e+00 : f32
      %90 = vector.broadcast %cst_97 : f32 to vector<8x128xf32>
      %c0_98 = arith.constant 0 : index
      %c0_99 = arith.constant 0 : index
      %91 = vector.load %arg9[%c0_98, %c0_99] : memref<8x128xf32, #tpu.memory_space<vmem>>, vector<8x128xf32>
      tpu.vector_store %arg9[%c0_98, %c0_99], %90 {strides = array<i32>} : memref<8x128xf32, #tpu.memory_space<vmem>>, vector<8x128xf32>,
    } else {
    }
    %c0_89 = arith.constant 0 : index
    %c0_90 = arith.constant 0 : index
    %78 = vector.load %arg3[%c0_89, %c0_90] : memref<512x1xf32, #tpu.memory_space<vmem>>, vector<512x1xf32>
    %79 = vector.broadcast %78 : vector<512x1xf32> to vector<512x128xf32>
    %80 = arith.mulf %72, %79 : vector<512x128xf32>
    %c0_91 = arith.constant 0 : index
    %c0_92 = arith.constant 0 : index
    %81 = vector.load %arg9[%c0_91, %c0_92] : memref<8x128xf32, #tpu.memory_space<vmem>>, vector<2x128xf32>
    %cst_93 = arith.constant dense<0.000000e+00> : vector<128xf32>
    %82 = vector.multi_reduction <add>, %80, %cst_93 [0] : vector<512x128xf32> to vector<128xf32>
    %83 = vector.shape_cast %82 : vector<128xf32> to vector<1x128xf32>
    %84 = arith.mulf %80, %80 : vector<512x128xf32>
    %cst_94 = arith.constant dense<0.000000e+00> : vector<128xf32>
    %85 = vector.multi_reduction <add>, %84, %cst_94 [0] : vector<512x128xf32> to vector<128xf32>
    %86 = vector.shape_cast %85 : vector<128xf32> to vector<1x128xf32>
    %87 = tpu.concatenate %83, %86 in 0 : vector<1x128xf32>, vector<1x128xf32> -> vector<2x128xf32>
    %88 = arith.addf %81, %87 : vector<2x128xf32>
    %c0_95 = arith.constant 0 : index
    %c0_96 = arith.constant 0 : index
    %89 = vector.load %arg9[%c0_95, %c0_96] : memref<8x128xf32, #tpu.memory_space<vmem>>, vector<2x128xf32>
    tpu.vector_store %arg9[%c0_95, %c0_96], %88 {strides = array<i32>} : memref<8x128xf32, #tpu.memory_space<vmem>>, vector<2x128xf32>,
    return
  }
  func.func @transform_0(%arg0: i32) -> (i32, i32, i32) {
    %c0_i32 = arith.constant 0 : i32
    %c0_i32_0 = arith.constant 0 : i32
    %c0_i32_1 = arith.constant 0 : i32
    return %arg0, %c0_i32, %c0_i32_0 : i32, i32, i32
  }
  func.func @transform_1(%arg0: i32) -> (i32, i32) {
    %c0_i32 = arith.constant 0 : i32
    %c0_i32_0 = arith.constant 0 : i32
    return %arg0, %c0_i32 : i32, i32
  }
  func.func @transform_2(%arg0: i32) -> (i32, i32) {
    %c0_i32 = arith.constant 0 : i32
    %c0_i32_0 = arith.constant 0 : i32
    return %arg0, %c0_i32 : i32, i32
  }
  func.func @transform_3(%arg0: i32) -> (i32, i32, i32) {
    %c0_i32 = arith.constant 0 : i32
    %c0_i32_0 = arith.constant 0 : i32
    %c0_i32_1 = arith.constant 0 : i32
    %c0_i32_2 = arith.constant 0 : i32
    return %c0_i32, %c0_i32_0, %c0_i32_1 : i32, i32, i32
  }
  func.func @transform_4(%arg0: i32) -> (i32, i32) {
    %c0_i32 = arith.constant 0 : i32
    %c0_i32_0 = arith.constant 0 : i32
    %c0_i32_1 = arith.constant 0 : i32
    return %c0_i32, %c0_i32_0 : i32, i32
  }
  func.func @transform_5(%arg0: i32) -> (i32, i32) {
    %c0_i32 = arith.constant 0 : i32
    %c0_i32_0 = arith.constant 0 : i32
    %c0_i32_1 = arith.constant 0 : i32
    return %c0_i32, %c0_i32_0 : i32, i32
  }
  func.func @transform_6(%arg0: i32) -> (i32, i32) {
    %c0_i32 = arith.constant 0 : i32
    %c0_i32_0 = arith.constant 0 : i32
    %c0_i32_1 = arith.constant 0 : i32
    return %c0_i32, %c0_i32_0 : i32, i32
  }
  func.func @transform_7(%arg0: i32) -> (i32, i32) {
    %c0_i32 = arith.constant 0 : i32
    %c0_i32_0 = arith.constant 0 : i32
    return %arg0, %c0_i32 : i32, i32
  }
  func.func @transform_8(%arg0: i32) -> (i32, i32) {
    %c0_i32 = arith.constant 0 : i32
    %c0_i32_0 = arith.constant 0 : i32
    %c0_i32_1 = arith.constant 0 : i32
    return %c0_i32, %c0_i32_0 : i32, i32
  }
}

module attributes {stable_mosaic.version = 11 : i64} {
  func.func @_conv3x3_kernel(%arg0: i32, %arg1: memref<1x64x128xbf16, #tpu.memory_space<vmem>>, %arg2: memref<512x128xbf16, #tpu.memory_space<vmem>>, %arg3: memref<512x1xf32, #tpu.memory_space<vmem>>, %arg4: memref<9x128x128xbf16, #tpu.memory_space<vmem>>, %arg5: memref<1x128xf32, #tpu.memory_space<vmem>>, %arg6: memref<1x128xf32, #tpu.memory_space<vmem>>, %arg7: memref<1x128xf32, #tpu.memory_space<vmem>>, %arg8: memref<512x128xbf16, #tpu.memory_space<vmem>>, %arg9: memref<8x128xf32, #tpu.memory_space<vmem>>, %arg10: memref<512x128xf32, #tpu.memory_space<vmem>>, %arg11: memref<576x128xbf16, #tpu.memory_space<vmem>>) attributes {dimension_semantics = [#tpu.dimension_semantics<arbitrary>], iteration_bounds = array<i64: 2>, scalar_prefetch = 0 : i64, scratch_operands = 2 : i64, tpu.core_type = #tpu.core_type<tc>, window_params = [{transform_indices = @transform_0, window_bounds = array<i64: 1, 64, 128>}, {transform_indices = @transform_1, window_bounds = array<i64: 512, 128>}, {transform_indices = @transform_2, window_bounds = array<i64: 512, 1>}, {pipeline_mode = #tpu.pipeline_mode<synchronous>, transform_indices = @transform_3, window_bounds = array<i64: 9, 128, 128>}, {pipeline_mode = #tpu.pipeline_mode<synchronous>, transform_indices = @transform_4, window_bounds = array<i64: 1, 128>}, {pipeline_mode = #tpu.pipeline_mode<synchronous>, transform_indices = @transform_5, window_bounds = array<i64: 1, 128>}, {pipeline_mode = #tpu.pipeline_mode<synchronous>, transform_indices = @transform_6, window_bounds = array<i64: 1, 128>}, {transform_indices = @transform_7, window_bounds = array<i64: 512, 128>}, {pipeline_mode = #tpu.pipeline_mode<synchronous>, transform_indices = @transform_8, window_bounds = array<i64: 8, 128>}]} {
    %c0 = arith.constant 0 : index
    %c0_0 = arith.constant 0 : index
    %c0_1 = arith.constant 0 : index
    %0 = vector.load %arg1[%c0, %c0_0, %c0_1] : memref<1x64x128xbf16, #tpu.memory_space<vmem>>, vector<1x32x128xbf16>
    %1 = vector.shape_cast %0 : vector<1x32x128xbf16> to vector<32x128xbf16>
    %c0_2 = arith.constant 0 : index
    %c0_3 = arith.constant 0 : index
    %2 = vector.load %arg11[%c0_2, %c0_3] : memref<576x128xbf16, #tpu.memory_space<vmem>>, vector<32x128xbf16>
    tpu.vector_store %arg11[%c0_2, %c0_3], %1 {strides = array<i32>} : memref<576x128xbf16, #tpu.memory_space<vmem>>, vector<32x128xbf16>,
    %c0_4 = arith.constant 0 : index
    %c32 = arith.constant 32 : index
    %c0_5 = arith.constant 0 : index
    %3 = vector.load %arg1[%c0_4, %c32, %c0_5] : memref<1x64x128xbf16, #tpu.memory_space<vmem>>, vector<1x32x128xbf16>
    %4 = vector.shape_cast %3 : vector<1x32x128xbf16> to vector<32x128xbf16>
    %c544 = arith.constant 544 : index
    %c0_6 = arith.constant 0 : index
    %5 = vector.load %arg11[%c544, %c0_6] : memref<576x128xbf16, #tpu.memory_space<vmem>>, vector<32x128xbf16>
    tpu.vector_store %arg11[%c544, %c0_6], %4 {strides = array<i32>} : memref<576x128xbf16, #tpu.memory_space<vmem>>, vector<32x128xbf16>,
    %c0_7 = arith.constant 0 : index
    %c0_8 = arith.constant 0 : index
    %6 = vector.load %arg2[%c0_7, %c0_8] : memref<512x128xbf16, #tpu.memory_space<vmem>>, vector<512x128xbf16>
    %7 = arith.extf %6 : vector<512x128xbf16> to vector<512x128xf32>
    %c0_9 = arith.constant 0 : index
    %c0_10 = arith.constant 0 : index
    %8 = vector.load %arg6[%c0_9, %c0_10] : memref<1x128xf32, #tpu.memory_space<vmem>>, vector<1x128xf32>
    %9 = vector.broadcast %8 : vector<1x128xf32> to vector<512x128xf32>
    %10 = arith.mulf %7, %9 : vector<512x128xf32>
    %c0_11 = arith.constant 0 : index
    %c0_12 = arith.constant 0 : index
    %11 = vector.load %arg7[%c0_11, %c0_12] : memref<1x128xf32, #tpu.memory_space<vmem>>, vector<1x128xf32>
    %12 = vector.broadcast %11 : vector<1x128xf32> to vector<512x128xf32>
    %13 = arith.addf %10, %12 : vector<512x128xf32>
    %cst = arith.constant 0.000000e+00 : f32
    %14 = vector.broadcast %cst : f32 to vector<512x128xf32>
    %15 = arith.maximumf %13, %14 : vector<512x128xf32>
    %c0_13 = arith.constant 0 : index
    %c0_14 = arith.constant 0 : index
    %16 = vector.load %arg3[%c0_13, %c0_14] : memref<512x1xf32, #tpu.memory_space<vmem>>, vector<512x1xf32>
    %17 = vector.broadcast %16 : vector<512x1xf32> to vector<512x128xf32>
    %18 = arith.mulf %15, %17 : vector<512x128xf32>
    %19 = arith.truncf %18 : vector<512x128xf32> to vector<512x128xbf16>
    %c32_15 = arith.constant 32 : index
    %c0_16 = arith.constant 0 : index
    %20 = vector.load %arg11[%c32_15, %c0_16] : memref<576x128xbf16, #tpu.memory_space<vmem>>, vector<512x128xbf16>
    tpu.vector_store %arg11[%c32_15, %c0_16], %19 {strides = array<i32>} : memref<576x128xbf16, #tpu.memory_space<vmem>>, vector<512x128xbf16>,
    %c13 = arith.constant 13 : index
    %c0_17 = arith.constant 0 : index
    %21 = vector.load %arg11[%c13, %c0_17] : memref<576x128xbf16, #tpu.memory_space<vmem>>, vector<512x128xbf16>
    %c0_18 = arith.constant 0 : index
    %c0_19 = arith.constant 0 : index
    %c0_20 = arith.constant 0 : index
    %22 = vector.load %arg4[%c0_18, %c0_19, %c0_20] : memref<9x128x128xbf16, #tpu.memory_space<vmem>>, vector<1x128x128xbf16>
    %23 = vector.shape_cast %22 : vector<1x128x128xbf16> to vector<128x128xbf16>
    %cst_21 = arith.constant dense<0.000000e+00> : vector<512x128xf32>
    %24 = tpu.matmul %21, %23, %cst_21 {dimension_numbers = #tpu.dot_dimension_numbers<[1], [0], [0], [1], [0, 0, 1, 1], [], []>} : vector<512x128xbf16>, vector<128x128xbf16>, vector<512x128xf32> -> vector<512x128xf32>
    %c0_22 = arith.constant 0 : index
    %c0_23 = arith.constant 0 : index
    %25 = vector.load %arg10[%c0_22, %c0_23] : memref<512x128xf32, #tpu.memory_space<vmem>>, vector<512x128xf32>
    tpu.vector_store %arg10[%c0_22, %c0_23], %24 {strides = array<i32>} : memref<512x128xf32, #tpu.memory_space<vmem>>, vector<512x128xf32>,
    %c14 = arith.constant 14 : index
    %c0_24 = arith.constant 0 : index
    %26 = vector.load %arg11[%c14, %c0_24] : memref<576x128xbf16, #tpu.memory_space<vmem>>, vector<512x128xbf16>
    %c1 = arith.constant 1 : index
    %c0_25 = arith.constant 0 : index
    %c0_26 = arith.constant 0 : index
    %27 = vector.load %arg4[%c1, %c0_25, %c0_26] : memref<9x128x128xbf16, #tpu.memory_space<vmem>>, vector<1x128x128xbf16>
    %28 = vector.shape_cast %27 : vector<1x128x128xbf16> to vector<128x128xbf16>
    %cst_27 = arith.constant dense<0.000000e+00> : vector<512x128xf32>
    %29 = tpu.matmul %26, %28, %cst_27 {dimension_numbers = #tpu.dot_dimension_numbers<[1], [0], [0], [1], [0, 0, 1, 1], [], []>} : vector<512x128xbf16>, vector<128x128xbf16>, vector<512x128xf32> -> vector<512x128xf32>
    %c0_28 = arith.constant 0 : index
    %c0_29 = arith.constant 0 : index
    %30 = vector.load %arg10[%c0_28, %c0_29] : memref<512x128xf32, #tpu.memory_space<vmem>>, vector<512x128xf32>
    %31 = arith.addf %30, %29 : vector<512x128xf32>
    %c0_30 = arith.constant 0 : index
    %c0_31 = arith.constant 0 : index
    %32 = vector.load %arg10[%c0_30, %c0_31] : memref<512x128xf32, #tpu.memory_space<vmem>>, vector<512x128xf32>
    tpu.vector_store %arg10[%c0_30, %c0_31], %31 {strides = array<i32>} : memref<512x128xf32, #tpu.memory_space<vmem>>, vector<512x128xf32>,
    %c15 = arith.constant 15 : index
    %c0_32 = arith.constant 0 : index
    %33 = vector.load %arg11[%c15, %c0_32] : memref<576x128xbf16, #tpu.memory_space<vmem>>, vector<512x128xbf16>
    %c2 = arith.constant 2 : index
    %c0_33 = arith.constant 0 : index
    %c0_34 = arith.constant 0 : index
    %34 = vector.load %arg4[%c2, %c0_33, %c0_34] : memref<9x128x128xbf16, #tpu.memory_space<vmem>>, vector<1x128x128xbf16>
    %35 = vector.shape_cast %34 : vector<1x128x128xbf16> to vector<128x128xbf16>
    %cst_35 = arith.constant dense<0.000000e+00> : vector<512x128xf32>
    %36 = tpu.matmul %33, %35, %cst_35 {dimension_numbers = #tpu.dot_dimension_numbers<[1], [0], [0], [1], [0, 0, 1, 1], [], []>} : vector<512x128xbf16>, vector<128x128xbf16>, vector<512x128xf32> -> vector<512x128xf32>
    %c0_36 = arith.constant 0 : index
    %c0_37 = arith.constant 0 : index
    %37 = vector.load %arg10[%c0_36, %c0_37] : memref<512x128xf32, #tpu.memory_space<vmem>>, vector<512x128xf32>
    %38 = arith.addf %37, %36 : vector<512x128xf32>
    %c0_38 = arith.constant 0 : index
    %c0_39 = arith.constant 0 : index
    %39 = vector.load %arg10[%c0_38, %c0_39] : memref<512x128xf32, #tpu.memory_space<vmem>>, vector<512x128xf32>
    tpu.vector_store %arg10[%c0_38, %c0_39], %38 {strides = array<i32>} : memref<512x128xf32, #tpu.memory_space<vmem>>, vector<512x128xf32>,
    %c31 = arith.constant 31 : index
    %c0_40 = arith.constant 0 : index
    %40 = vector.load %arg11[%c31, %c0_40] : memref<576x128xbf16, #tpu.memory_space<vmem>>, vector<512x128xbf16>
    %c3 = arith.constant 3 : index
    %c0_41 = arith.constant 0 : index
    %c0_42 = arith.constant 0 : index
    %41 = vector.load %arg4[%c3, %c0_41, %c0_42] : memref<9x128x128xbf16, #tpu.memory_space<vmem>>, vector<1x128x128xbf16>
    %42 = vector.shape_cast %41 : vector<1x128x128xbf16> to vector<128x128xbf16>
    %cst_43 = arith.constant dense<0.000000e+00> : vector<512x128xf32>
    %43 = tpu.matmul %40, %42, %cst_43 {dimension_numbers = #tpu.dot_dimension_numbers<[1], [0], [0], [1], [0, 0, 1, 1], [], []>} : vector<512x128xbf16>, vector<128x128xbf16>, vector<512x128xf32> -> vector<512x128xf32>
    %c0_44 = arith.constant 0 : index
    %c0_45 = arith.constant 0 : index
    %44 = vector.load %arg10[%c0_44, %c0_45] : memref<512x128xf32, #tpu.memory_space<vmem>>, vector<512x128xf32>
    %45 = arith.addf %44, %43 : vector<512x128xf32>
    %c0_46 = arith.constant 0 : index
    %c0_47 = arith.constant 0 : index
    %46 = vector.load %arg10[%c0_46, %c0_47] : memref<512x128xf32, #tpu.memory_space<vmem>>, vector<512x128xf32>
    tpu.vector_store %arg10[%c0_46, %c0_47], %45 {strides = array<i32>} : memref<512x128xf32, #tpu.memory_space<vmem>>, vector<512x128xf32>,
    %c32_48 = arith.constant 32 : index
    %c0_49 = arith.constant 0 : index
    %47 = vector.load %arg11[%c32_48, %c0_49] : memref<576x128xbf16, #tpu.memory_space<vmem>>, vector<512x128xbf16>
    %c4 = arith.constant 4 : index
    %c0_50 = arith.constant 0 : index
    %c0_51 = arith.constant 0 : index
    %48 = vector.load %arg4[%c4, %c0_50, %c0_51] : memref<9x128x128xbf16, #tpu.memory_space<vmem>>, vector<1x128x128xbf16>
    %49 = vector.shape_cast %48 : vector<1x128x128xbf16> to vector<128x128xbf16>
    %cst_52 = arith.constant dense<0.000000e+00> : vector<512x128xf32>
    %50 = tpu.matmul %47, %49, %cst_52 {dimension_numbers = #tpu.dot_dimension_numbers<[1], [0], [0], [1], [0, 0, 1, 1], [], []>} : vector<512x128xbf16>, vector<128x128xbf16>, vector<512x128xf32> -> vector<512x128xf32>
    %c0_53 = arith.constant 0 : index
    %c0_54 = arith.constant 0 : index
    %51 = vector.load %arg10[%c0_53, %c0_54] : memref<512x128xf32, #tpu.memory_space<vmem>>, vector<512x128xf32>
    %52 = arith.addf %51, %50 : vector<512x128xf32>
    %c0_55 = arith.constant 0 : index
    %c0_56 = arith.constant 0 : index
    %53 = vector.load %arg10[%c0_55, %c0_56] : memref<512x128xf32, #tpu.memory_space<vmem>>, vector<512x128xf32>
    tpu.vector_store %arg10[%c0_55, %c0_56], %52 {strides = array<i32>} : memref<512x128xf32, #tpu.memory_space<vmem>>, vector<512x128xf32>,
    %c33 = arith.constant 33 : index
    %c0_57 = arith.constant 0 : index
    %54 = vector.load %arg11[%c33, %c0_57] : memref<576x128xbf16, #tpu.memory_space<vmem>>, vector<512x128xbf16>
    %c5 = arith.constant 5 : index
    %c0_58 = arith.constant 0 : index
    %c0_59 = arith.constant 0 : index
    %55 = vector.load %arg4[%c5, %c0_58, %c0_59] : memref<9x128x128xbf16, #tpu.memory_space<vmem>>, vector<1x128x128xbf16>
    %56 = vector.shape_cast %55 : vector<1x128x128xbf16> to vector<128x128xbf16>
    %cst_60 = arith.constant dense<0.000000e+00> : vector<512x128xf32>
    %57 = tpu.matmul %54, %56, %cst_60 {dimension_numbers = #tpu.dot_dimension_numbers<[1], [0], [0], [1], [0, 0, 1, 1], [], []>} : vector<512x128xbf16>, vector<128x128xbf16>, vector<512x128xf32> -> vector<512x128xf32>
    %c0_61 = arith.constant 0 : index
    %c0_62 = arith.constant 0 : index
    %58 = vector.load %arg10[%c0_61, %c0_62] : memref<512x128xf32, #tpu.memory_space<vmem>>, vector<512x128xf32>
    %59 = arith.addf %58, %57 : vector<512x128xf32>
    %c0_63 = arith.constant 0 : index
    %c0_64 = arith.constant 0 : index
    %60 = vector.load %arg10[%c0_63, %c0_64] : memref<512x128xf32, #tpu.memory_space<vmem>>, vector<512x128xf32>
    tpu.vector_store %arg10[%c0_63, %c0_64], %59 {strides = array<i32>} : memref<512x128xf32, #tpu.memory_space<vmem>>, vector<512x128xf32>,
    %c49 = arith.constant 49 : index
    %c0_65 = arith.constant 0 : index
    %61 = vector.load %arg11[%c49, %c0_65] : memref<576x128xbf16, #tpu.memory_space<vmem>>, vector<512x128xbf16>
    %c6 = arith.constant 6 : index
    %c0_66 = arith.constant 0 : index
    %c0_67 = arith.constant 0 : index
    %62 = vector.load %arg4[%c6, %c0_66, %c0_67] : memref<9x128x128xbf16, #tpu.memory_space<vmem>>, vector<1x128x128xbf16>
    %63 = vector.shape_cast %62 : vector<1x128x128xbf16> to vector<128x128xbf16>
    %cst_68 = arith.constant dense<0.000000e+00> : vector<512x128xf32>
    %64 = tpu.matmul %61, %63, %cst_68 {dimension_numbers = #tpu.dot_dimension_numbers<[1], [0], [0], [1], [0, 0, 1, 1], [], []>} : vector<512x128xbf16>, vector<128x128xbf16>, vector<512x128xf32> -> vector<512x128xf32>
    %c0_69 = arith.constant 0 : index
    %c0_70 = arith.constant 0 : index
    %65 = vector.load %arg10[%c0_69, %c0_70] : memref<512x128xf32, #tpu.memory_space<vmem>>, vector<512x128xf32>
    %66 = arith.addf %65, %64 : vector<512x128xf32>
    %c0_71 = arith.constant 0 : index
    %c0_72 = arith.constant 0 : index
    %67 = vector.load %arg10[%c0_71, %c0_72] : memref<512x128xf32, #tpu.memory_space<vmem>>, vector<512x128xf32>
    tpu.vector_store %arg10[%c0_71, %c0_72], %66 {strides = array<i32>} : memref<512x128xf32, #tpu.memory_space<vmem>>, vector<512x128xf32>,
    %c50 = arith.constant 50 : index
    %c0_73 = arith.constant 0 : index
    %68 = vector.load %arg11[%c50, %c0_73] : memref<576x128xbf16, #tpu.memory_space<vmem>>, vector<512x128xbf16>
    %c7 = arith.constant 7 : index
    %c0_74 = arith.constant 0 : index
    %c0_75 = arith.constant 0 : index
    %69 = vector.load %arg4[%c7, %c0_74, %c0_75] : memref<9x128x128xbf16, #tpu.memory_space<vmem>>, vector<1x128x128xbf16>
    %70 = vector.shape_cast %69 : vector<1x128x128xbf16> to vector<128x128xbf16>
    %cst_76 = arith.constant dense<0.000000e+00> : vector<512x128xf32>
    %71 = tpu.matmul %68, %70, %cst_76 {dimension_numbers = #tpu.dot_dimension_numbers<[1], [0], [0], [1], [0, 0, 1, 1], [], []>} : vector<512x128xbf16>, vector<128x128xbf16>, vector<512x128xf32> -> vector<512x128xf32>
    %c0_77 = arith.constant 0 : index
    %c0_78 = arith.constant 0 : index
    %72 = vector.load %arg10[%c0_77, %c0_78] : memref<512x128xf32, #tpu.memory_space<vmem>>, vector<512x128xf32>
    %73 = arith.addf %72, %71 : vector<512x128xf32>
    %c0_79 = arith.constant 0 : index
    %c0_80 = arith.constant 0 : index
    %74 = vector.load %arg10[%c0_79, %c0_80] : memref<512x128xf32, #tpu.memory_space<vmem>>, vector<512x128xf32>
    tpu.vector_store %arg10[%c0_79, %c0_80], %73 {strides = array<i32>} : memref<512x128xf32, #tpu.memory_space<vmem>>, vector<512x128xf32>,
    %c51 = arith.constant 51 : index
    %c0_81 = arith.constant 0 : index
    %75 = vector.load %arg11[%c51, %c0_81] : memref<576x128xbf16, #tpu.memory_space<vmem>>, vector<512x128xbf16>
    %c8 = arith.constant 8 : index
    %c0_82 = arith.constant 0 : index
    %c0_83 = arith.constant 0 : index
    %76 = vector.load %arg4[%c8, %c0_82, %c0_83] : memref<9x128x128xbf16, #tpu.memory_space<vmem>>, vector<1x128x128xbf16>
    %77 = vector.shape_cast %76 : vector<1x128x128xbf16> to vector<128x128xbf16>
    %cst_84 = arith.constant dense<0.000000e+00> : vector<512x128xf32>
    %78 = tpu.matmul %75, %77, %cst_84 {dimension_numbers = #tpu.dot_dimension_numbers<[1], [0], [0], [1], [0, 0, 1, 1], [], []>} : vector<512x128xbf16>, vector<128x128xbf16>, vector<512x128xf32> -> vector<512x128xf32>
    %c0_85 = arith.constant 0 : index
    %c0_86 = arith.constant 0 : index
    %79 = vector.load %arg10[%c0_85, %c0_86] : memref<512x128xf32, #tpu.memory_space<vmem>>, vector<512x128xf32>
    %80 = arith.addf %79, %78 : vector<512x128xf32>
    %c0_87 = arith.constant 0 : index
    %c0_88 = arith.constant 0 : index
    %81 = vector.load %arg10[%c0_87, %c0_88] : memref<512x128xf32, #tpu.memory_space<vmem>>, vector<512x128xf32>
    tpu.vector_store %arg10[%c0_87, %c0_88], %80 {strides = array<i32>} : memref<512x128xf32, #tpu.memory_space<vmem>>, vector<512x128xf32>,
    %c0_89 = arith.constant 0 : index
    %c0_90 = arith.constant 0 : index
    %82 = vector.load %arg10[%c0_89, %c0_90] : memref<512x128xf32, #tpu.memory_space<vmem>>, vector<512x128xf32>
    %c0_91 = arith.constant 0 : index
    %c0_92 = arith.constant 0 : index
    %83 = vector.load %arg5[%c0_91, %c0_92] : memref<1x128xf32, #tpu.memory_space<vmem>>, vector<1x128xf32>
    %84 = vector.broadcast %83 : vector<1x128xf32> to vector<512x128xf32>
    %85 = arith.addf %82, %84 : vector<512x128xf32>
    %86 = arith.truncf %85 : vector<512x128xf32> to vector<512x128xbf16>
    %c0_93 = arith.constant 0 : index
    %c0_94 = arith.constant 0 : index
    %87 = vector.load %arg8[%c0_93, %c0_94] : memref<512x128xbf16, #tpu.memory_space<vmem>>, vector<512x128xbf16>
    tpu.vector_store %arg8[%c0_93, %c0_94], %86 {strides = array<i32>} : memref<512x128xbf16, #tpu.memory_space<vmem>>, vector<512x128xbf16>,
    %c0_i32 = arith.constant 0 : i32
    %88 = arith.cmpi eq, %arg0, %c0_i32 : i32
    %89 = arith.extui %88 : i1 to i32
    %c0_i32_95 = arith.constant 0 : i32
    %90 = arith.cmpi ne, %89, %c0_i32_95 : i32
    scf.if %90 {
      %cst_104 = arith.constant 0.000000e+00 : f32
      %103 = vector.broadcast %cst_104 : f32 to vector<8x128xf32>
      %c0_105 = arith.constant 0 : index
      %c0_106 = arith.constant 0 : index
      %104 = vector.load %arg9[%c0_105, %c0_106] : memref<8x128xf32, #tpu.memory_space<vmem>>, vector<8x128xf32>
      tpu.vector_store %arg9[%c0_105, %c0_106], %103 {strides = array<i32>} : memref<8x128xf32, #tpu.memory_space<vmem>>, vector<8x128xf32>,
    } else {
    }
    %c0_96 = arith.constant 0 : index
    %c0_97 = arith.constant 0 : index
    %91 = vector.load %arg3[%c0_96, %c0_97] : memref<512x1xf32, #tpu.memory_space<vmem>>, vector<512x1xf32>
    %92 = vector.broadcast %91 : vector<512x1xf32> to vector<512x128xf32>
    %93 = arith.mulf %85, %92 : vector<512x128xf32>
    %c0_98 = arith.constant 0 : index
    %c0_99 = arith.constant 0 : index
    %94 = vector.load %arg9[%c0_98, %c0_99] : memref<8x128xf32, #tpu.memory_space<vmem>>, vector<2x128xf32>
    %cst_100 = arith.constant dense<0.000000e+00> : vector<128xf32>
    %95 = vector.multi_reduction <add>, %93, %cst_100 [0] : vector<512x128xf32> to vector<128xf32>
    %96 = vector.shape_cast %95 : vector<128xf32> to vector<1x128xf32>
    %97 = arith.mulf %93, %93 : vector<512x128xf32>
    %cst_101 = arith.constant dense<0.000000e+00> : vector<128xf32>
    %98 = vector.multi_reduction <add>, %97, %cst_101 [0] : vector<512x128xf32> to vector<128xf32>
    %99 = vector.shape_cast %98 : vector<128xf32> to vector<1x128xf32>
    %100 = tpu.concatenate %96, %99 in 0 : vector<1x128xf32>, vector<1x128xf32> -> vector<2x128xf32>
    %101 = arith.addf %94, %100 : vector<2x128xf32>
    %c0_102 = arith.constant 0 : index
    %c0_103 = arith.constant 0 : index
    %102 = vector.load %arg9[%c0_102, %c0_103] : memref<8x128xf32, #tpu.memory_space<vmem>>, vector<2x128xf32>
    tpu.vector_store %arg9[%c0_102, %c0_103], %101 {strides = array<i32>} : memref<8x128xf32, #tpu.memory_space<vmem>>, vector<2x128xf32>,
    return
  }
  func.func @transform_0(%arg0: i32) -> (i32, i32, i32) {
    %c0_i32 = arith.constant 0 : i32
    %c0_i32_0 = arith.constant 0 : i32
    %c0_i32_1 = arith.constant 0 : i32
    return %arg0, %c0_i32, %c0_i32_0 : i32, i32, i32
  }
  func.func @transform_1(%arg0: i32) -> (i32, i32) {
    %c0_i32 = arith.constant 0 : i32
    %c0_i32_0 = arith.constant 0 : i32
    return %arg0, %c0_i32 : i32, i32
  }
  func.func @transform_2(%arg0: i32) -> (i32, i32) {
    %c0_i32 = arith.constant 0 : i32
    %c0_i32_0 = arith.constant 0 : i32
    return %arg0, %c0_i32 : i32, i32
  }
  func.func @transform_3(%arg0: i32) -> (i32, i32, i32) {
    %c0_i32 = arith.constant 0 : i32
    %c0_i32_0 = arith.constant 0 : i32
    %c0_i32_1 = arith.constant 0 : i32
    %c0_i32_2 = arith.constant 0 : i32
    return %c0_i32, %c0_i32_0, %c0_i32_1 : i32, i32, i32
  }
  func.func @transform_4(%arg0: i32) -> (i32, i32) {
    %c0_i32 = arith.constant 0 : i32
    %c0_i32_0 = arith.constant 0 : i32
    %c0_i32_1 = arith.constant 0 : i32
    return %c0_i32, %c0_i32_0 : i32, i32
  }
  func.func @transform_5(%arg0: i32) -> (i32, i32) {
    %c0_i32 = arith.constant 0 : i32
    %c0_i32_0 = arith.constant 0 : i32
    %c0_i32_1 = arith.constant 0 : i32
    return %c0_i32, %c0_i32_0 : i32, i32
  }
  func.func @transform_6(%arg0: i32) -> (i32, i32) {
    %c0_i32 = arith.constant 0 : i32
    %c0_i32_0 = arith.constant 0 : i32
    %c0_i32_1 = arith.constant 0 : i32
    return %c0_i32, %c0_i32_0 : i32, i32
  }
  func.func @transform_7(%arg0: i32) -> (i32, i32) {
    %c0_i32 = arith.constant 0 : i32
    %c0_i32_0 = arith.constant 0 : i32
    return %arg0, %c0_i32 : i32, i32
  }
  func.func @transform_8(%arg0: i32) -> (i32, i32) {
    %c0_i32 = arith.constant 0 : i32
    %c0_i32_0 = arith.constant 0 : i32
    %c0_i32_1 = arith.constant 0 : i32
    return %c0_i32, %c0_i32_0 : i32, i32
  }
}

module attributes {stable_mosaic.version = 11 : i64} {
  func.func @_bn_apply_kernel(%arg0: i32, %arg1: memref<512x128xbf16, #tpu.memory_space<vmem>>, %arg2: memref<1x128xf32, #tpu.memory_space<vmem>>, %arg3: memref<1x128xf32, #tpu.memory_space<vmem>>, %arg4: memref<512x1xf32, #tpu.memory_space<vmem>>, %arg5: memref<512x128xbf16, #tpu.memory_space<vmem>>) attributes {dimension_semantics = [#tpu.dimension_semantics<parallel>], iteration_bounds = array<i64: 2>, scalar_prefetch = 0 : i64, scratch_operands = 0 : i64, tpu.core_type = #tpu.core_type<tc>, window_params = [{transform_indices = @transform_0, window_bounds = array<i64: 512, 128>}, {pipeline_mode = #tpu.pipeline_mode<synchronous>, transform_indices = @transform_1, window_bounds = array<i64: 1, 128>}, {pipeline_mode = #tpu.pipeline_mode<synchronous>, transform_indices = @transform_2, window_bounds = array<i64: 1, 128>}, {transform_indices = @transform_3, window_bounds = array<i64: 512, 1>}, {transform_indices = @transform_4, window_bounds = array<i64: 512, 128>}]} {
    %c0 = arith.constant 0 : index
    %c0_0 = arith.constant 0 : index
    %0 = vector.load %arg1[%c0, %c0_0] : memref<512x128xbf16, #tpu.memory_space<vmem>>, vector<512x128xbf16>
    %1 = arith.extf %0 : vector<512x128xbf16> to vector<512x128xf32>
    %c0_1 = arith.constant 0 : index
    %c0_2 = arith.constant 0 : index
    %2 = vector.load %arg2[%c0_1, %c0_2] : memref<1x128xf32, #tpu.memory_space<vmem>>, vector<1x128xf32>
    %3 = vector.broadcast %2 : vector<1x128xf32> to vector<512x128xf32>
    %4 = arith.mulf %1, %3 : vector<512x128xf32>
    %c0_3 = arith.constant 0 : index
    %c0_4 = arith.constant 0 : index
    %5 = vector.load %arg3[%c0_3, %c0_4] : memref<1x128xf32, #tpu.memory_space<vmem>>, vector<1x128xf32>
    %6 = vector.broadcast %5 : vector<1x128xf32> to vector<512x128xf32>
    %7 = arith.addf %4, %6 : vector<512x128xf32>
    %cst = arith.constant 0.000000e+00 : f32
    %8 = vector.broadcast %cst : f32 to vector<512x128xf32>
    %9 = arith.maximumf %7, %8 : vector<512x128xf32>
    %c0_5 = arith.constant 0 : index
    %c0_6 = arith.constant 0 : index
    %10 = vector.load %arg4[%c0_5, %c0_6] : memref<512x1xf32, #tpu.memory_space<vmem>>, vector<512x1xf32>
    %11 = vector.broadcast %10 : vector<512x1xf32> to vector<512x128xf32>
    %12 = arith.mulf %9, %11 : vector<512x128xf32>
    %13 = arith.truncf %12 : vector<512x128xf32> to vector<512x128xbf16>
    %c0_7 = arith.constant 0 : index
    %c0_8 = arith.constant 0 : index
    %14 = vector.load %arg5[%c0_7, %c0_8] : memref<512x128xbf16, #tpu.memory_space<vmem>>, vector<512x128xbf16>
    tpu.vector_store %arg5[%c0_7, %c0_8], %13 {strides = array<i32>} : memref<512x128xbf16, #tpu.memory_space<vmem>>, vector<512x128xbf16>,
    return
  }
  func.func @transform_0(%arg0: i32) -> (i32, i32) {
    %c0_i32 = arith.constant 0 : i32
    %c0_i32_0 = arith.constant 0 : i32
    return %arg0, %c0_i32 : i32, i32
  }
  func.func @transform_1(%arg0: i32) -> (i32, i32) {
    %c0_i32 = arith.constant 0 : i32
    %c0_i32_0 = arith.constant 0 : i32
    %c0_i32_1 = arith.constant 0 : i32
    return %c0_i32, %c0_i32_0 : i32, i32
  }
  func.func @transform_2(%arg0: i32) -> (i32, i32) {
    %c0_i32 = arith.constant 0 : i32
    %c0_i32_0 = arith.constant 0 : i32
    %c0_i32_1 = arith.constant 0 : i32
    return %c0_i32, %c0_i32_0 : i32, i32
  }
  func.func @transform_3(%arg0: i32) -> (i32, i32) {
    %c0_i32 = arith.constant 0 : i32
    %c0_i32_0 = arith.constant 0 : i32
    return %arg0, %c0_i32 : i32, i32
  }
  func.func @transform_4(%arg0: i32) -> (i32, i32) {
    %c0_i32 = arith.constant 0 : i32
    %c0_i32_0 = arith.constant 0 : i32
    return %arg0, %c0_i32 : i32, i32
  }
}

</mosaic_0001>

<bundles_post_ra>
// kernel: up_forward.5
= control target key start
LH: loop header
LB: loop body
LE: loop exit
PB: predicated region body
PF: predicated region fallthrough
CT: control target
= control target key end

     0   :  { %s1931_s15 = smov 0   ;;  %s2231_s0 = inlined_call_operand.vmem [shape: bf16[1024,128], index: 0, kind: input, shape index: {}]   ;;  %s2232_s1 = inlined_call_operand.vmem [shape: f32[1,128], index: 1, kind: input, shape index: {}]   ;;  %s2233_s2 = inlined_call_operand.vmem [shape: f32[1,128], index: 2, kind: input, shape index: {}]   ;;  %s2234_s3 = inlined_call_operand.vmem [shape: f32[1024,1], index: 3, kind: input, shape index: {}]   ;;  %s2235_s4 = inlined_call_operand.vmem [shape: bf16[1024,128], index: 4, kind: output, shape index: {}]  }
   0x1 LB: > { %s1393_s16 = sadd.s32 4294967295, %s1903_s15   ;;  %p1397_p0 = scmp.ge.s32.totalorder %s1903_s15, 1  ;;  %s1903_s15 = sphi %s1931_s15, %s14_s15  }
   0x2   : > { %p174_p1 = scmp.lt.s32.totalorder %s1903_s15, 3 }
   0x4   : > { %p175_p2 = pnand %p1397_p0, %p174_p1 }
   0x5   : > { %s1398_s17 = sshll.u32 (!%p175_p2), %s1393_s16, 6  ;;  %v1905_v0 = vmov (!%p175_p2), 0  }
   0x6   : > { %178 = sbr.rel (%p175_p2) target bundleno = 274 (0x112), region = 36  ;;  %1896 = vset.pattern.permute.xlu1 (!%p175_p2), %v1905_v0  ;;  %1895 = vset.pattern.permute.xlu0 (!%p175_p2), %v1905_v0  ;;  %p206_p3 = scmp.lt.s32.totalorder (!%p175_p2), %s1398_s17, 127 }
   0xd   : > { %s2237_s17 = smov (!%p206_p3, %s1398_s17), 127 }
   0xe   : > { %s1401_s18 = sshll.u32 %s2237_s17, 3  ;;  %s1399_s22 = sshll.u32 %s2237_s17, 2 }
   0xf   : > { %s1945_s21 = scalar_lea.vmem %s2234_s3, %s1401_s18  ;;  %s2011_s25 = scalar_lea.vmem %s2231_s0, %s1399_s22 }
  0x10   : > { %v559_v1 = vld [vmem:[%s1945_s21 + $0x10] sm:$0xff]  ;;  %v557_v2 = vld [vmem:[%s1945_s21] sm:$0xff]  ;;  %v560_v3 = vld [vmem:[%s1945_s21 + $0x18] sm:$0xff]  ;;  %s2059_s6 = scalar_lea.vmem %s2235_s4, %s1399_s22 }
  0x11   : > { %633 = vperm.xlu1 %1896, %v559_v1   ;;  %623 = vperm.xlu0 %1895, %v557_v2   ;;  %v558_v4 = vld [vmem:[%s1945_s21 + $0x8] sm:$0xff]  ;;  %v561_v6 = vld [vmem:[%s1945_s21 + $0x20] sm:$0xff]  ;;  %v564_v7 = vld [vmem:[%s1945_s21 + $0x38] sm:$0xff] }
  0x12   : > { %v562_v5 = vld [vmem:[%s1945_s21 + $0x28] sm:$0xff]  ;;  %v563_v8 = vld [vmem:[%s1945_s21 + $0x30] sm:$0xff]  ;;  %v565_v10 = vld [vmem:[%s1945_s21 + $0x40] sm:$0xff] }
  0x13   : > { %v566_v9 = vld [vmem:[%s1945_s21 + $0x48] sm:$0xff]  ;;  %v568_v11 = vld [vmem:[%s1945_s21 + $0x58] sm:$0xff]  ;;  %v567_v12 = vld [vmem:[%s1945_s21 + $0x50] sm:$0xff] }
  0x14   : > { %v570_v13 = vld [vmem:[%s1945_s21 + $0x68] sm:$0xff]  ;;  %v569_v14 = vld [vmem:[%s1945_s21 + $0x60] sm:$0xff]  ;;  %v572_v15 = vld [vmem:[%s1945_s21 + $0x78] sm:$0xff] }
  0x15   : > { %638 = vperm.xlu1 %1896, %v560_v3   ;;  %628 = vperm.xlu0 %1895, %v558_v4   ;;  %v571_v16 = vld [vmem:[%s1945_s21 + $0x70] sm:$0xff]  ;;  %v574_v17 = vld [vmem:[%s1945_s21 + $0x88] sm:$0xff]  ;;  %v573_v18 = vld [vmem:[%s1945_s21 + $0x80] sm:$0xff] }
  0x16   : > { %v576_v19 = vld [vmem:[%s1945_s21 + $0x98] sm:$0xff]  ;;  %v575_v20 = vld [vmem:[%s1945_s21 + $0x90] sm:$0xff]  ;;  %v578_v21 = vld [vmem:[%s1945_s21 + $0xa8] sm:$0xff] }
  0x17   : > { %v577_v22 = vld [vmem:[%s1945_s21 + $0xa0] sm:$0xff]  ;;  %v580_v23 = vld [vmem:[%s1945_s21 + $0xb8] sm:$0xff]  ;;  %v579_v24 = vld [vmem:[%s1945_s21 + $0xb0] sm:$0xff] }
  0x18   : > { %v582_v25 = vld [vmem:[%s1945_s21 + $0xc8] sm:$0xff]  ;;  %v581_v26 = vld [vmem:[%s1945_s21 + $0xc0] sm:$0xff]  ;;  %v584_v27 = vld [vmem:[%s1945_s21 + $0xd8] sm:$0xff] }
  0x19   : > { %648 = vperm.xlu1 %1896, %v562_v5   ;;  %643 = vperm.xlu0 %1895, %v561_v6   ;;  %v583_v28 = vld [vmem:[%s1945_s21 + $0xd0] sm:$0xff]  ;;  %v586_v29 = vld [vmem:[%s1945_s21 + $0xe8] sm:$0xff]  ;;  %v585_v30 = vld [vmem:[%s1945_s21 + $0xe0] sm:$0xff] }
  0x1a   : > { %v588_v31 = vld [vmem:[%s1945_s21 + $0xf8] sm:$0xff]  ;;  %v587_v32 = vld [vmem:[%s1945_s21 + $0xf0] sm:$0xff]  ;;  %v590_v33 = vld [vmem:[%s1945_s21 + $0x108] sm:$0xff] }
  0x1b   : > { %v589_v34 = vld [vmem:[%s1945_s21 + $0x100] sm:$0xff]  ;;  %v592_v35 = vld [vmem:[%s1945_s21 + $0x118] sm:$0xff]  ;;  %v591_v36 = vld [vmem:[%s1945_s21 + $0x110] sm:$0xff] }
  0x1c   : > { %v594_v37 = vld [vmem:[%s1945_s21 + $0x128] sm:$0xff]  ;;  %v593_v38 = vld [vmem:[%s1945_s21 + $0x120] sm:$0xff]  ;;  %v596_v39 = vld [vmem:[%s1945_s21 + $0x138] sm:$0xff] }
  0x1d   : > { %658 = vperm.xlu1 %1896, %v564_v7   ;;  %653 = vperm.xlu0 %1895, %v563_v8   ;;  %v595_v40 = vld [vmem:[%s1945_s21 + $0x130] sm:$0xff]  ;;  %v598_v41 = vld [vmem:[%s1945_s21 + $0x148] sm:$0xff]  ;;  %v597_v42 = vld [vmem:[%s1945_s21 + $0x140] sm:$0xff] }
  0x1e   : > { %v600_v43 = vld [vmem:[%s1945_s21 + $0x158] sm:$0xff]  ;;  %v599_v44 = vld [vmem:[%s1945_s21 + $0x150] sm:$0xff]  ;;  %v602_v45 = vld [vmem:[%s1945_s21 + $0x168] sm:$0xff] }
  0x1f   : > { %v601_v46 = vld [vmem:[%s1945_s21 + $0x160] sm:$0xff]  ;;  %v604_v47 = vld [vmem:[%s1945_s21 + $0x178] sm:$0xff]  ;;  %v603_v48 = vld [vmem:[%s1945_s21 + $0x170] sm:$0xff] }
  0x20   : > { %v606_v49 = vld [vmem:[%s1945_s21 + $0x188] sm:$0xff]  ;;  %v605_v50 = vld [vmem:[%s1945_s21 + $0x180] sm:$0xff]  ;;  %v608_v51 = vld [vmem:[%s1945_s21 + $0x198] sm:$0xff] }
  0x21   : > { %668 = vperm.xlu1 %1896, %v566_v9   ;;  %663 = vperm.xlu0 %1895, %v565_v10   ;;  %v607_v52 = vld [vmem:[%s1945_s21 + $0x190] sm:$0xff]  ;;  %v610_v53 = vld [vmem:[%s1945_s21 + $0x1a8] sm:$0xff]  ;;  %v609_v54 = vld [vmem:[%s1945_s21 + $0x1a0] sm:$0xff] }
  0x22   : > { %v612_v55 = vld [vmem:[%s1945_s21 + $0x1b8] sm:$0xff]  ;;  %v611_v56 = vld [vmem:[%s1945_s21 + $0x1b0] sm:$0xff]  ;;  %v614_v57 = vld [vmem:[%s1945_s21 + $0x1c8] sm:$0xff] }
  0x23   : > { %v613_v58 = vld [vmem:[%s1945_s21 + $0x1c0] sm:$0xff]  ;;  %v1824_v59 = vld [vmem:[%s2011_s25 + $0x8] sm:$0xff]   ;;  %v616_v60 = vld [vmem:[%s1945_s21 + $0x1d8] sm:$0xff] }
  0x24   : > { %v615_v61 = vld [vmem:[%s1945_s21 + $0x1d0] sm:$0xff]  ;;  %v1537_v62 = vld [vmem:[%s2011_s25] sm:$0xff]   ;;  %v1542_v63 = vunpack.c.l.bf16 %v1824_v59  ;;  %v1543_v3 = vunpack.c.h.bf16 %v1824_v59  ;;  %v618_v5 = vld [vmem:[%s1945_s21 + $0x1e8] sm:$0xff] }
  0x25   : > { %678 = vperm.xlu1 %1896, %v568_v11   ;;  %673 = vperm.xlu0 %1895, %v567_v12   ;;  %v1825_v0 = vld [vmem:[%s2011_s25 + $0x10] sm:$0xff]   ;;  %v2021_v1 = vld [vmem:[%s2232_s1] ss:$0 sm:$0xff]  ;;  %v1538_v2 = vunpack.c.l.bf16 %v1537_v62  ;;  %v1539_v4 = vunpack.c.h.bf16 %v1537_v62  ;;  %v1826_v10 = vld [vmem:[%s2011_s25 + $0x18] sm:$0xff]  }
  0x26   : > { %v617_v6 = vld [vmem:[%s1945_s21 + $0x1e0] sm:$0xff]  ;;  %v1547_v7 = vunpack.c.h.bf16 %v1825_v0  ;;  %v1546_v8 = vunpack.c.l.bf16 %v1825_v0  ;;  %v360_v9 = vmul.f32 %v1542_v63, %v2021_v1  ;;  %v1830_v0 = vld [vmem:[%s2011_s25 + $0x38] sm:$0xff]  }
  0x27   : > { %v2030_v11 = vld [vmem:[%s2233_s2] ss:$0 sm:$0xff]  ;;  %v358_v12 = vmul.f32 %v1538_v2, %v2021_v1 }
  0x29   : > { %688 = vperm.xlu1 %1896, %v570_v13   ;;  %683 = vperm.xlu0 %1895, %v569_v14   ;;  %v361_v13 = vmul.f32 %v1543_v3, %v2021_v1  ;;  %v359_v14 = vmul.f32 %v1539_v4, %v2021_v1 }
  0x2d   : > { %698 = vperm.xlu1 %1896, %v572_v15   ;;  %693 = vperm.xlu0 %1895, %v571_v16   ;;  %v620_v15 = vld [vmem:[%s1945_s21 + $0x1f8] sm:$0xff]  ;;  %v619_v16 = vld [vmem:[%s1945_s21 + $0x1f0] sm:$0xff] }
  0x31   : > { %708 = vperm.xlu1 %1896, %v574_v17   ;;  %703 = vperm.xlu0 %1895, %v573_v18   ;;  %v363_v17 = vmul.f32 %v1547_v7, %v2021_v1  ;;  %v362_v18 = vmul.f32 %v1546_v8, %v2021_v1  ;;  %v1567_v8 = vunpack.c.h.bf16 %v1830_v0 }
  0x35   : > { %718 = vperm.xlu1 %1896, %v576_v19   ;;  %713 = vperm.xlu0 %1895, %v575_v20   ;;  %v1551_v19 = vunpack.c.h.bf16 %v1826_v10  ;;  %v1550_v20 = vunpack.c.l.bf16 %v1826_v10 }
  0x39   : > { %728 = vperm.xlu1 %1896, %v578_v21   ;;  %723 = vperm.xlu0 %1895, %v577_v22   ;;  %v431_v21 = vadd.f32 %v2030_v11, %v360_v9  ;;  %v429_v22 = vadd.f32 %v2030_v11, %v358_v12 }
  0x3d   : > { %738 = vperm.xlu1 %1896, %v580_v23   ;;  %733 = vperm.xlu0 %1895, %v579_v24   ;;  %v432_v23 = vadd.f32 %v2030_v11, %v361_v13  ;;  %v430_v24 = vadd.f32 %v2030_v11, %v359_v14 }
  0x41   : > { %748 = vperm.xlu1 %1896, %v582_v25   ;;  %743 = vperm.xlu0 %1895, %v581_v26   ;;  %v1827_v25 = vld [vmem:[%s2011_s25 + $0x20] sm:$0xff]   ;;  %v434_v26 = vadd.f32 %v2030_v11, %v363_v17 }
  0x45   : > { %758 = vperm.xlu1 %1896, %v584_v27   ;;  %753 = vperm.xlu0 %1895, %v583_v28   ;;  %v433_v27 = vadd.f32 %v2030_v11, %v362_v18  ;;  %v365_v28 = vmul.f32 %v1551_v19, %v2021_v1 }
  0x49   : > { %768 = vperm.xlu1 %1896, %v586_v29   ;;  %763 = vperm.xlu0 %1895, %v585_v30   ;;  %v364_v29 = vmul.f32 %v1550_v20, %v2021_v1  ;;  %v1831_v20 = vld [vmem:[%s2011_s25 + $0x40] sm:$0xff]  }
  0x4d   : > { %778 = vperm.xlu1 %1896, %v588_v31   ;;  %773 = vperm.xlu0 %1895, %v587_v32   ;;  %v1555_v32 = vunpack.c.h.bf16 %v1827_v25 }
  0x51   : > { %788 = vperm.xlu1 %1896, %v590_v33   ;;  %783 = vperm.xlu0 %1895, %v589_v34   ;;  %v1554_v33 = vunpack.c.l.bf16 %v1827_v25  ;;  %v495_v34 = vmax.f32 %v431_v21, 0.0 }
  0x55   : > { %798 = vperm.xlu1 %1896, %v592_v35   ;;  %793 = vperm.xlu0 %1895, %v591_v36   ;;  %v493_v35 = vmax.f32 %v429_v22, 0.0  ;;  %v496_v36 = vmax.f32 %v432_v23, 0.0  ;;  %v373_v23 = vmul.f32 %v1567_v8, %v2021_v1 }
  0x59   : > { %808 = vperm.xlu1 %1896, %v594_v37   ;;  %803 = vperm.xlu0 %1895, %v593_v38   ;;  %v494_v37 = vmax.f32 %v430_v24, 0.0  ;;  %v1828_v38 = vld [vmem:[%s2011_s25 + $0x28] sm:$0xff]  }
  0x5d   : > { %818 = vperm.xlu1 %1896, %v596_v39   ;;  %813 = vperm.xlu0 %1895, %v595_v40   ;;  %v498_v39 = vmax.f32 %v434_v26, 0.0  ;;  %v497_v40 = vmax.f32 %v433_v27, 0.0 }
  0x61   : > { %828 = vperm.xlu1 %1896, %v598_v41   ;;  %823 = vperm.xlu0 %1895, %v597_v42   ;;  %v436_v41 = vadd.f32 %v2030_v11, %v365_v28  ;;  %v435_v42 = vadd.f32 %v2030_v11, %v364_v29  ;;  %v1571_v29 = vunpack.c.h.bf16 %v1831_v20 }
  0x65   : > { %838 = vperm.xlu1 %1896, %v600_v43   ;;  %833 = vperm.xlu0 %1895, %v599_v44  }
  0x69   : > { %848 = vperm.xlu1 %1896, %v602_v45   ;;  %843 = vperm.xlu0 %1895, %v601_v46   ;;  %v367_v45 = vmul.f32 %v1555_v32, %v2021_v1  ;;  %v366_v46 = vmul.f32 %v1554_v33, %v2021_v1  ;;  %v1570_v33 = vunpack.c.l.bf16 %v1831_v20 }
  0x6b   : > { %v437_v4 = vadd.f32 %v2030_v11, %v366_v46 }
  0x6d   : > { %858 = vperm.xlu1 %1896, %v604_v47   ;;  %853 = vperm.xlu0 %1895, %v603_v48   ;;  %v1559_v47 = vunpack.c.h.bf16 %v1828_v38  ;;  %v1558_v48 = vunpack.c.l.bf16 %v1828_v38  ;;  %v501_v18 = vmax.f32 %v437_v4, 0.0 }
  0x6f   : > { %v369_v62 = vmul.f32 %v1559_v47, %v2021_v1  ;;  %v374_v47 = vmul.f32 %v1570_v33, %v2021_v1 }
  0x71   : > { %868 = vperm.xlu1 %1896, %v606_v49   ;;  %863 = vperm.xlu0 %1895, %v605_v50   ;;  %v1829_v49 = vld [vmem:[%s2011_s25 + $0x30] sm:$0xff]   ;;  %v440_v13 = vadd.f32 %v2030_v11, %v369_v62 }
  0x72   : > { %v1562_v63 = vunpack.c.l.bf16 %v1829_v49 }
  0x73   : > { %v504_v26 = vmax.f32 %v440_v13, 0.0 }
  0x74   : > { %v370_v14 = vmul.f32 %v1562_v63, %v2021_v1 }
  0x75   : > { %878 = vperm.xlu1 %1896, %v608_v51   ;;  %873 = vperm.xlu0 %1895, %v607_v52  }
  0x76   : > { %v441_v27 = vadd.f32 %v2030_v11, %v370_v14 }
  0x79   : > { %888 = vperm.xlu1 %1896, %v610_v53   ;;  %883 = vperm.xlu0 %1895, %v609_v54  }
  0x7d   : > { %898 = vperm.xlu1 %1896, %v612_v55   ;;  %893 = vperm.xlu0 %1895, %v611_v56   ;;  %v500_v56 = vmax.f32 %v436_v41, 0.0 }
  0x81   : > { %908 = vperm.xlu1 %1896, %v614_v57   ;;  %903 = vperm.xlu0 %1895, %v613_v58   ;;  %v1563_v57 = vunpack.c.h.bf16 %v1829_v49 }
  0x83   : > { %v371_v7 = vmul.f32 %v1563_v57, %v2021_v1 }
  0x85   : > { %918 = vperm.xlu1 %1896, %v616_v60   ;;  %913 = vperm.xlu0 %1895, %v615_v61   ;;  %v499_v60 = vmax.f32 %v435_v42, 0.0  ;;  %v438_v61 = vadd.f32 %v2030_v11, %v367_v45  ;;  %v442_v22 = vadd.f32 %v2030_v11, %v371_v7  ;;  %v375_v42 = vmul.f32 %v1571_v29, %v2021_v1 }
  0x87   : > { %v502_v12 = vmax.f32 %v438_v61, 0.0  ;;  %v445_v61 = vadd.f32 %v2030_v11, %v374_v47 }
  0x89   : > { %928 = vperm.xlu1 %1896, %v618_v5   ;;  %923 = vperm.xlu0 %1895, %v617_v6   ;;  %v368_v5 = vmul.f32 %v1558_v48, %v2021_v1  ;;  %v509_v13 = vmax.f32 %v445_v61, 0.0 }
  0x8b   : > { %v439_v19 = vadd.f32 %v2030_v11, %v368_v5 }
  0x8d   : > { %938 = vperm.xlu1 %1896, %v620_v15   ;;  %933 = vperm.xlu0 %1895, %v619_v16   ;;  %v1566_v15 = vunpack.c.l.bf16 %v1830_v0  ;;  %v503_v32 = vmax.f32 %v439_v19, 0.0 }
  0x8f   : > { %v372_v28 = vmul.f32 %v1566_v15, %v2021_v1 }
  0x90   : > { %v634_v30 = vpop.permute.xlu1 %633  ;;  %v624_v31 = vpop.permute.xlu0 %623 }
  0x91   : > { %v943_v50 = vmul.f32 %v634_v30, %v495_v34  ;;  %v941_v51 = vmul.f32 %v624_v31, %v493_v35  ;;  %v1832_v34 = vld [vmem:[%s2011_s25 + $0x48] sm:$0xff]   ;;  %v443_v41 = vadd.f32 %v2030_v11, %v372_v28 }
  0x92   : > { %v1574_v48 = vunpack.c.l.bf16 %v1832_v34 }
  0x94   : > { %v639_v43 = vpop.permute.xlu1 %638  ;;  %v629_v44 = vpop.permute.xlu0 %628  ;;  %v376_v62 = vmul.f32 %v1574_v48, %v2021_v1 }
  0x95   : > { %v944_v52 = vmul.f32 %v639_v43, %v496_v36  ;;  %v942_v53 = vmul.f32 %v629_v44, %v494_v37  ;;  %v506_v36 = vmax.f32 %v442_v22, 0.0  ;;  %v444_v37 = vadd.f32 %v2030_v11, %v373_v23  ;;  %v1833_v44 = vld [vmem:[%s2011_s25 + $0x50] sm:$0xff]  }
  0x96   : > { %v1575_v43 = vunpack.c.h.bf16 %v1832_v34  ;;  %v1578_v57 = vunpack.c.l.bf16 %v1833_v44  ;;  %v447_v14 = vadd.f32 %v2030_v11, %v376_v62 }
  0x97   : > { %v1672_v54 = vpack.c.bf16 %v944_v52, %v943_v50  ;;  %v1667_v55 = vpack.c.bf16 %v942_v53, %v941_v51  ;;  %v508_v50 = vmax.f32 %v444_v37, 0.0  ;;  %v1579_v51 = vunpack.c.h.bf16 %v1833_v44 }
  0x98   : > { %v649_v58 = vpop.permute.xlu1 %648  ;;  %v644_v59 = vpop.permute.xlu0 %643  ;;  %v378_v7 = vmul.f32 %v1578_v57, %v2021_v1  ;;  %v511_v28 = vmax.f32 %v447_v14, 0.0 }
  0x99   : > { %1855 = vst [vmem:[%s2059_s6 + $0x8] sm:$0xff] %v1672_v54   ;;  %1668 = vst [vmem:[%s2059_s6] sm:$0xff] %v1667_v55   ;;  %v946_v2 = vmul.f32 %v649_v58, %v498_v39  ;;  %v945_v3 = vmul.f32 %v644_v59, %v497_v40  ;;  %v505_v40 = vmax.f32 %v441_v27, 0.0  ;;  %v507_v54 = vmax.f32 %v443_v41, 0.0  ;;  %v1834_v58 = vld [vmem:[%s2011_s25 + $0x58] sm:$0xff]  }
  0x9a   : > { %v446_v55 = vadd.f32 %v2030_v11, %v375_v42  ;;  %v379_v0 = vmul.f32 %v1579_v51, %v2021_v1  ;;  %v1582_v8 = vunpack.c.l.bf16 %v1834_v58  ;;  %v1837_v42 = vld [vmem:[%s2011_s25 + $0x70] sm:$0xff]  }
  0x9b   : > { %v1677_v6 = vpack.c.bf16 %v946_v2, %v945_v3  ;;  %v1583_v2 = vunpack.c.h.bf16 %v1834_v58  ;;  %v1594_v51 = vunpack.c.l.bf16 %v1837_v42 }
  0x9c   : > { %v659_v9 = vpop.permute.xlu1 %658  ;;  %v654_v10 = vpop.permute.xlu0 %653  ;;  %v510_v5 = vmax.f32 %v446_v55, 0.0  ;;  %v450_v20 = vadd.f32 %v2030_v11, %v379_v0  ;;  %v380_v22 = vmul.f32 %v1582_v8, %v2021_v1 }
  0x9d   : > { %1856 = vst [vmem:[%s2059_s6 + $0x10] sm:$0xff] %v1677_v6   ;;  %v948_v16 = vmul.f32 %v659_v9, %v500_v56  ;;  %v947_v17 = vmul.f32 %v654_v10, %v499_v60  ;;  %v377_v56 = vmul.f32 %v1575_v43, %v2021_v1  ;;  %v1835_v9 = vld [vmem:[%s2011_s25 + $0x60] sm:$0xff]  }
  0x9e   : > { %v1586_v23 = vunpack.c.l.bf16 %v1835_v9  ;;  %v514_v34 = vmax.f32 %v450_v20, 0.0  ;;  %v451_v41 = vadd.f32 %v2030_v11, %v380_v22  ;;  %v1840_v22 = vld [vmem:[%s2011_s25 + $0x88] sm:$0xff]  }
  0x9f   : > { %v1682_v21 = vpack.c.bf16 %v948_v16, %v947_v17  ;;  %v448_v6 = vadd.f32 %v2030_v11, %v377_v56  ;;  %v381_v16 = vmul.f32 %v1583_v2, %v2021_v1  ;;  %v1587_v17 = vunpack.c.h.bf16 %v1835_v9  ;;  %v1838_v56 = vld [vmem:[%s2011_s25 + $0x78] sm:$0xff]  }
  0xa0   : > { %v669_v24 = vpop.permute.xlu1 %668  ;;  %v664_v25 = vpop.permute.xlu0 %663  ;;  %v515_v55 = vmax.f32 %v451_v41, 0.0  ;;  %v386_v2 = vmul.f32 %v1594_v51, %v2021_v1 }
  0xa1   : > { %1857 = vst [vmem:[%s2059_s6 + $0x18] sm:$0xff] %v1682_v21   ;;  %v950_v30 = vmul.f32 %v669_v24, %v502_v12  ;;  %v949_v31 = vmul.f32 %v664_v25, %v501_v18  ;;  %v449_v21 = vadd.f32 %v2030_v11, %v378_v7  ;;  %v1836_v24 = vld [vmem:[%s2011_s25 + $0x68] sm:$0xff]   ;;  %v512_v27 = vmax.f32 %v448_v6, 0.0 }
  0xa2   : > { %v1590_v37 = vunpack.c.l.bf16 %v1836_v24  ;;  %v1599_v6 = vunpack.c.h.bf16 %v1838_v56  ;;  %v1598_v7 = vunpack.c.l.bf16 %v1838_v56 }
  0xa3   : > { %v1687_v35 = vpack.c.bf16 %v950_v30, %v949_v31  ;;  %v383_v30 = vmul.f32 %v1587_v17, %v2021_v1  ;;  %v1591_v31 = vunpack.c.h.bf16 %v1836_v24  ;;  %v457_v17 = vadd.f32 %v2030_v11, %v386_v2 }
  0xa4   : > { %v679_v38 = vpop.permute.xlu1 %678  ;;  %v674_v39 = vpop.permute.xlu0 %673  ;;  %v389_v20 = vmul.f32 %v1599_v6, %v2021_v1 }
  0xa5   : > { %1858 = vst [vmem:[%s2059_s6 + $0x20] sm:$0xff] %v1687_v35   ;;  %v952_v45 = vmul.f32 %v679_v38, %v504_v26  ;;  %v951_v46 = vmul.f32 %v674_v39, %v503_v32  ;;  %v452_v35 = vadd.f32 %v2030_v11, %v381_v16  ;;  %v454_v44 = vadd.f32 %v2030_v11, %v383_v30 }
  0xa6   : > { %v1607_v30 = vunpack.c.h.bf16 %v1840_v22 }
  0xa7   : > { %v1692_v49 = vpack.c.bf16 %v952_v45, %v951_v46  ;;  %v385_v45 = vmul.f32 %v1591_v31, %v2021_v1  ;;  %v518_v58 = vmax.f32 %v454_v44, 0.0  ;;  %v1606_v31 = vunpack.c.l.bf16 %v1840_v22 }
  0xa8   : > { %v689_v52 = vpop.permute.xlu1 %688  ;;  %v684_v53 = vpop.permute.xlu0 %683 }
  0xa9   : > { %1859 = vst [vmem:[%s2059_s6 + $0x28] sm:$0xff] %v1692_v49   ;;  %v954_v59 = vmul.f32 %v689_v52, %v506_v36  ;;  %v953_v60 = vmul.f32 %v684_v53, %v505_v40  ;;  %v382_v36 = vmul.f32 %v1586_v23, %v2021_v1  ;;  %v513_v40 = vmax.f32 %v449_v21, 0.0 }
  0xaa   : > { %v384_v49 = vmul.f32 %v1590_v37, %v2021_v1  ;;  %v388_v21 = vmul.f32 %v1598_v7, %v2021_v1 }
  0xab   : > { %v1697_v63 = vpack.c.bf16 %v954_v59, %v953_v60  ;;  %v453_v48 = vadd.f32 %v2030_v11, %v382_v36  ;;  %v456_v59 = vadd.f32 %v2030_v11, %v385_v45  ;;  %v1841_v36 = vld [vmem:[%s2011_s25 + $0x90] sm:$0xff]  }
  0xac   : > { %v699_v3 = vpop.permute.xlu1 %698  ;;  %v694_v4 = vpop.permute.xlu0 %693  ;;  %v1611_v44 = vunpack.c.h.bf16 %v1841_v36  ;;  %v1610_v45 = vunpack.c.l.bf16 %v1841_v36 }
  0xad   : > { %1860 = vst [vmem:[%s2059_s6 + $0x30] sm:$0xff] %v1697_v63   ;;  %v956_v10 = vmul.f32 %v699_v3, %v508_v50  ;;  %v955_v12 = vmul.f32 %v694_v4, %v507_v54  ;;  %v1595_v50 = vunpack.c.h.bf16 %v1837_v42  ;;  %v516_v54 = vmax.f32 %v452_v35, 0.0  ;;  %v1839_v3 = vld [vmem:[%s2011_s25 + $0x80] sm:$0xff]  }
  0xae   : > { %v517_v62 = vmax.f32 %v453_v48, 0.0  ;;  %v455_v63 = vadd.f32 %v2030_v11, %v384_v49  ;;  %v1603_v9 = vunpack.c.h.bf16 %v1839_v3  ;;  %v520_v14 = vmax.f32 %v456_v59, 0.0 }
  0xaf   : > { %v1702_v15 = vpack.c.bf16 %v956_v10, %v955_v12  ;;  %v387_v0 = vmul.f32 %v1595_v50, %v2021_v1  ;;  %v1602_v10 = vunpack.c.l.bf16 %v1839_v3  ;;  %v459_v35 = vadd.f32 %v2030_v11, %v388_v21  ;;  %v1842_v50 = vld [vmem:[%s2011_s25 + $0x98] sm:$0xff]  }
  0xb0   : > { %v709_v18 = vpop.permute.xlu1 %708  ;;  %v704_v19 = vpop.permute.xlu0 %703  ;;  %v391_v24 = vmul.f32 %v1603_v9, %v2021_v1  ;;  %v393_v42 = vmul.f32 %v1607_v30, %v2021_v1  ;;  %v394_v59 = vmul.f32 %v1610_v45, %v2021_v1  ;;  %v1845_v30 = vld [vmem:[%s2011_s25 + $0xb0] sm:$0xff]  }
  0xb1   : > { %1861 = vst [vmem:[%s2059_s6 + $0x38] sm:$0xff] %v1702_v15   ;;  %v958_v25 = vmul.f32 %v709_v18, %v510_v5  ;;  %v957_v26 = vmul.f32 %v704_v19, %v509_v13  ;;  %v519_v15 = vmax.f32 %v455_v63, 0.0  ;;  %v458_v16 = vadd.f32 %v2030_v11, %v387_v0 }
  0xb2   : > { %v523_v49 = vmax.f32 %v459_v35, 0.0  ;;  %v464_v56 = vadd.f32 %v2030_v11, %v393_v42  ;;  %v1615_v63 = vunpack.c.h.bf16 %v1842_v50  ;;  %v1614_v0 = vunpack.c.l.bf16 %v1842_v50 }
  0xb3   : > { %v1707_v29 = vpack.c.bf16 %v958_v25, %v957_v26  ;;  %v390_v25 = vmul.f32 %v1602_v10, %v2021_v1  ;;  %v465_v10 = vadd.f32 %v2030_v11, %v394_v59 }
  0xb4   : > { %v719_v32 = vpop.permute.xlu1 %718  ;;  %v714_v33 = vpop.permute.xlu0 %713  ;;  %v528_v7 = vmax.f32 %v464_v56, 0.0 }
  0xb5   : > { %1862 = vst [vmem:[%s2059_s6 + $0x40] sm:$0xff] %v1707_v29   ;;  %v960_v38 = vmul.f32 %v719_v32, %v512_v27  ;;  %v959_v39 = vmul.f32 %v714_v33, %v511_v28  ;;  %v522_v28 = vmax.f32 %v458_v16, 0.0  ;;  %v521_v29 = vmax.f32 %v457_v17, 0.0  ;;  %v1844_v16 = vld [vmem:[%s2011_s25 + $0xa8] sm:$0xff]  }
  0xb7   : > { %v1712_v43 = vpack.c.bf16 %v960_v38, %v959_v39  ;;  %v462_v38 = vadd.f32 %v2030_v11, %v391_v24  ;;  %v461_v39 = vadd.f32 %v2030_v11, %v390_v25  ;;  %v1623_v24 = vunpack.c.h.bf16 %v1844_v16 }
  0xb8   : > { %v729_v46 = vpop.permute.xlu1 %728  ;;  %v724_v47 = vpop.permute.xlu0 %723  ;;  %v1622_v25 = vunpack.c.l.bf16 %v1844_v16 }
  0xb9   : > { %1863 = vst [vmem:[%s2059_s6 + $0x48] sm:$0xff] %v1712_v43   ;;  %v962_v52 = vmul.f32 %v729_v46, %v514_v34  ;;  %v961_v53 = vmul.f32 %v724_v47, %v513_v40  ;;  %v460_v34 = vadd.f32 %v2030_v11, %v389_v20  ;;  %v392_v43 = vmul.f32 %v1606_v31, %v2021_v1 }
  0xba   : > { %v401_v36 = vmul.f32 %v1623_v24, %v2021_v1  ;;  %v1849_v24 = vld [vmem:[%s2011_s25 + $0xd0] sm:$0xff]  }
  0xbb   : > { %v1717_v57 = vpack.c.bf16 %v962_v52, %v961_v53  ;;  %v524_v48 = vmax.f32 %v460_v34, 0.0  ;;  %v526_v52 = vmax.f32 %v462_v38, 0.0  ;;  %v525_v53 = vmax.f32 %v461_v39, 0.0 }
  0xbc   : > { %v739_v60 = vpop.permute.xlu1 %738  ;;  %v734_v61 = vpop.permute.xlu0 %733  ;;  %v1627_v38 = vunpack.c.h.bf16 %v1845_v30  ;;  %v1626_v39 = vunpack.c.l.bf16 %v1845_v30  ;;  %v472_v50 = vadd.f32 %v2030_v11, %v401_v36 }
  0xbd   : > { %1864 = vst [vmem:[%s2059_s6 + $0x50] sm:$0xff] %v1717_v57   ;;  %v964_v4 = vmul.f32 %v739_v60, %v516_v54  ;;  %v963_v5 = vmul.f32 %v734_v61, %v515_v55  ;;  %v463_v57 = vadd.f32 %v2030_v11, %v392_v43  ;;  %v1843_v60 = vld [vmem:[%s2011_s25 + $0xa0] sm:$0xff]  }
  0xbe   : > { %v1619_v3 = vunpack.c.h.bf16 %v1843_v60 }
  0xbf   : > { %v1722_v8 = vpack.c.bf16 %v964_v4, %v963_v5  ;;  %v1618_v4 = vunpack.c.l.bf16 %v1843_v60 }
  0xc0   : > { %v749_v12 = vpop.permute.xlu1 %748  ;;  %v744_v13 = vpop.permute.xlu0 %743 }
  0xc1   : > { %1865 = vst [vmem:[%s2059_s6 + $0x58] sm:$0xff] %v1722_v8   ;;  %v966_v18 = vmul.f32 %v749_v12, %v518_v58  ;;  %v965_v19 = vmul.f32 %v744_v13, %v517_v62  ;;  %v395_v58 = vmul.f32 %v1611_v44, %v2021_v1  ;;  %v527_v8 = vmax.f32 %v463_v57, 0.0  ;;  %v1846_v44 = vld [vmem:[%s2011_s25 + $0xb8] sm:$0xff]  }
  0xc2   : > { %v1631_v57 = vunpack.c.h.bf16 %v1846_v44 }
  0xc3   : > { %v1727_v23 = vpack.c.bf16 %v966_v18, %v965_v19  ;;  %v466_v9 = vadd.f32 %v2030_v11, %v395_v58  ;;  %v399_v18 = vmul.f32 %v1619_v3, %v2021_v1  ;;  %v398_v19 = vmul.f32 %v1618_v4, %v2021_v1 }
  0xc4   : > { %v759_v26 = vpop.permute.xlu1 %758  ;;  %v754_v27 = vpop.permute.xlu0 %753  ;;  %v1630_v58 = vunpack.c.l.bf16 %v1846_v44 }
  0xc5   : > { %1866 = vst [vmem:[%s2059_s6 + $0x60] sm:$0xff] %v1727_v23   ;;  %v968_v32 = vmul.f32 %v759_v26, %v520_v14  ;;  %v967_v33 = vmul.f32 %v754_v27, %v519_v15  ;;  %v397_v14 = vmul.f32 %v1615_v63, %v2021_v1  ;;  %v396_v15 = vmul.f32 %v1614_v0, %v2021_v1 }
  0xc6   : > { %v530_v22 = vmax.f32 %v466_v9, 0.0  ;;  %v529_v23 = vmax.f32 %v465_v10, 0.0  ;;  %v536_v0 = vmax.f32 %v472_v50, 0.0  ;;  %v1848_v9 = vld [vmem:[%s2011_s25 + $0xc8] sm:$0xff]  }
  0xc7   : > { %v1732_v37 = vpack.c.bf16 %v968_v32, %v967_v33  ;;  %v470_v32 = vadd.f32 %v2030_v11, %v399_v18  ;;  %v469_v33 = vadd.f32 %v2030_v11, %v398_v19  ;;  %v1639_v18 = vunpack.c.h.bf16 %v1848_v9 }
  0xc8   : > { %v769_v40 = vpop.permute.xlu1 %768  ;;  %v764_v41 = vpop.permute.xlu0 %763  ;;  %v1638_v19 = vunpack.c.l.bf16 %v1848_v9 }
  0xc9   : > { %1867 = vst [vmem:[%s2059_s6 + $0x68] sm:$0xff] %v1732_v37   ;;  %v970_v46 = vmul.f32 %v769_v40, %v522_v28  ;;  %v969_v47 = vmul.f32 %v764_v41, %v521_v29  ;;  %v468_v28 = vadd.f32 %v2030_v11, %v397_v14  ;;  %v467_v29 = vadd.f32 %v2030_v11, %v396_v15 }
  0xca   : > { %v400_v37 = vmul.f32 %v1622_v25, %v2021_v1  ;;  %v409_v30 = vmul.f32 %v1639_v18, %v2021_v1  ;;  %v1853_v18 = vld [vmem:[%s2011_s25 + $0xf0] sm:$0xff]  }
  0xcb   : > { %v1737_v51 = vpack.c.bf16 %v970_v46, %v969_v47  ;;  %v532_v42 = vmax.f32 %v468_v28, 0.0  ;;  %v531_v43 = vmax.f32 %v467_v29, 0.0  ;;  %v534_v46 = vmax.f32 %v470_v32, 0.0 }
  0xcc   : > { %v779_v54 = vpop.permute.xlu1 %778  ;;  %v774_v55 = vpop.permute.xlu0 %773  ;;  %v533_v47 = vmax.f32 %v469_v33, 0.0  ;;  %v1643_v32 = vunpack.c.h.bf16 %v1849_v24  ;;  %v1642_v33 = vunpack.c.l.bf16 %v1849_v24  ;;  %v480_v44 = vadd.f32 %v2030_v11, %v409_v30 }
  0xcd   : > { %1868 = vst [vmem:[%s2059_s6 + $0x70] sm:$0xff] %v1737_v51   ;;  %v972_v61 = vmul.f32 %v779_v54, %v524_v48  ;;  %v971_v62 = vmul.f32 %v774_v55, %v523_v49  ;;  %v471_v51 = vadd.f32 %v2030_v11, %v400_v37  ;;  %v1847_v54 = vld [vmem:[%s2011_s25 + $0xc0] sm:$0xff]  }
  0xce   : > { %v1635_v60 = vunpack.c.h.bf16 %v1847_v54 }
  0xcf   : > { %v1742_v2 = vpack.c.bf16 %v972_v61, %v971_v62  ;;  %v1634_v61 = vunpack.c.l.bf16 %v1847_v54 }
  0xd0   : > { %v789_v5 = vpop.permute.xlu1 %788  ;;  %v784_v6 = vpop.permute.xlu0 %783 }
  0xd1   : > { %1869 = vst [vmem:[%s2059_s6 + $0x78] sm:$0xff] %v1742_v2   ;;  %v974_v12 = vmul.f32 %v789_v5, %v526_v52  ;;  %v973_v13 = vmul.f32 %v784_v6, %v525_v53  ;;  %v403_v52 = vmul.f32 %v1627_v38, %v2021_v1  ;;  %v402_v53 = vmul.f32 %v1626_v39, %v2021_v1  ;;  %v1850_v38 = vld [vmem:[%s2011_s25 + $0xd8] sm:$0xff]  }
  0xd2   : > { %v535_v2 = vmax.f32 %v471_v51, 0.0  ;;  %v1647_v51 = vunpack.c.h.bf16 %v1850_v38 }
  0xd3   : > { %v1747_v17 = vpack.c.bf16 %v974_v12, %v973_v13  ;;  %v474_v3 = vadd.f32 %v2030_v11, %v403_v52  ;;  %v473_v4 = vadd.f32 %v2030_v11, %v402_v53  ;;  %v407_v12 = vmul.f32 %v1635_v60, %v2021_v1 }
  0xd4   : > { %v799_v20 = vpop.permute.xlu1 %798  ;;  %v794_v21 = vpop.permute.xlu0 %793  ;;  %v406_v13 = vmul.f32 %v1634_v61, %v2021_v1  ;;  %v1646_v52 = vunpack.c.l.bf16 %v1850_v38 }
  0xd5   : > { %1870 = vst [vmem:[%s2059_s6 + $0x80] sm:$0xff] %v1747_v17   ;;  %v976_v26 = vmul.f32 %v799_v20, %v528_v7  ;;  %v975_v27 = vmul.f32 %v794_v21, %v527_v8  ;;  %v405_v7 = vmul.f32 %v1631_v57, %v2021_v1  ;;  %v404_v8 = vmul.f32 %v1630_v58, %v2021_v1 }
  0xd6   : > { %v538_v16 = vmax.f32 %v474_v3, 0.0  ;;  %v537_v17 = vmax.f32 %v473_v4, 0.0  ;;  %v544_v58 = vmax.f32 %v480_v44, 0.0  ;;  %v1852_v3 = vld [vmem:[%s2011_s25 + $0xe8] sm:$0xff]  }
  0xd7   : > { %v1752_v31 = vpack.c.bf16 %v976_v26, %v975_v27  ;;  %v478_v26 = vadd.f32 %v2030_v11, %v407_v12  ;;  %v477_v27 = vadd.f32 %v2030_v11, %v406_v13  ;;  %v1655_v12 = vunpack.c.h.bf16 %v1852_v3 }
  0xd8   : > { %v809_v34 = vpop.permute.xlu1 %808  ;;  %v804_v35 = vpop.permute.xlu0 %803  ;;  %v1654_v13 = vunpack.c.l.bf16 %v1852_v3 }
  0xd9   : > { %1871 = vst [vmem:[%s2059_s6 + $0x88] sm:$0xff] %v1752_v31   ;;  %v978_v40 = vmul.f32 %v809_v34, %v530_v22  ;;  %v977_v41 = vmul.f32 %v804_v35, %v529_v23  ;;  %v476_v22 = vadd.f32 %v2030_v11, %v405_v7  ;;  %v475_v23 = vadd.f32 %v2030_v11, %v404_v8 }
  0xda   : > { %v408_v31 = vmul.f32 %v1638_v19, %v2021_v1  ;;  %v417_v24 = vmul.f32 %v1655_v12, %v2021_v1 }
  0xdb   : > { %v1757_v45 = vpack.c.bf16 %v978_v40, %v977_v41  ;;  %v540_v36 = vmax.f32 %v476_v22, 0.0  ;;  %v539_v37 = vmax.f32 %v475_v23, 0.0  ;;  %v542_v40 = vmax.f32 %v478_v26, 0.0 }
  0xdc   : > { %v819_v48 = vpop.permute.xlu1 %818  ;;  %v814_v49 = vpop.permute.xlu0 %813  ;;  %v541_v41 = vmax.f32 %v477_v27, 0.0  ;;  %v1659_v26 = vunpack.c.h.bf16 %v1853_v18  ;;  %v1658_v27 = vunpack.c.l.bf16 %v1853_v18  ;;  %v488_v38 = vadd.f32 %v2030_v11, %v417_v24 }
  0xdd   : > { %1872 = vst [vmem:[%s2059_s6 + $0x90] sm:$0xff] %v1757_v45   ;;  %v980_v55 = vmul.f32 %v819_v48, %v532_v42  ;;  %v979_v56 = vmul.f32 %v814_v49, %v531_v43  ;;  %v479_v45 = vadd.f32 %v2030_v11, %v408_v31  ;;  %v1851_v48 = vld [vmem:[%s2011_s25 + $0xe0] sm:$0xff]  }
  0xde   : > { %v1651_v54 = vunpack.c.h.bf16 %v1851_v48 }
  0xdf   : > { %v1762_v59 = vpack.c.bf16 %v980_v55, %v979_v56  ;;  %v1650_v55 = vunpack.c.l.bf16 %v1851_v48 }
  0xe0   : > { %v829_v62 = vpop.permute.xlu1 %828  ;;  %v824_v63 = vpop.permute.xlu0 %823 }
  0xe1   : > { %1873 = vst [vmem:[%s2059_s6 + $0x98] sm:$0xff] %v1762_v59   ;;  %v982_v5 = vmul.f32 %v829_v62, %v534_v46  ;;  %v981_v6 = vmul.f32 %v824_v63, %v533_v47  ;;  %v411_v46 = vmul.f32 %v1643_v32, %v2021_v1  ;;  %v410_v47 = vmul.f32 %v1642_v33, %v2021_v1  ;;  %v1854_v32 = vld [vmem:[%s2011_s25 + $0xf8] sm:$0xff]  }
  0xe2   : > { %v543_v59 = vmax.f32 %v479_v45, 0.0  ;;  %v1663_v44 = vunpack.c.h.bf16 %v1854_v32  ;;  %v1662_v45 = vunpack.c.l.bf16 %v1854_v32 }
  0xe3   : > { %v1767_v10 = vpack.c.bf16 %v982_v5, %v981_v6  ;;  %v482_v60 = vadd.f32 %v2030_v11, %v411_v46  ;;  %v481_v61 = vadd.f32 %v2030_v11, %v410_v47  ;;  %v415_v5 = vmul.f32 %v1651_v54, %v2021_v1 }
  0xe4   : > { %v839_v14 = vpop.permute.xlu1 %838  ;;  %v834_v15 = vpop.permute.xlu0 %833  ;;  %v414_v6 = vmul.f32 %v1650_v55, %v2021_v1  ;;  %v421_v55 = vmul.f32 %v1663_v44, %v2021_v1 }
  0xe5   : > { %1874 = vst [vmem:[%s2059_s6 + $0xa0] sm:$0xff] %v1767_v10   ;;  %v984_v20 = vmul.f32 %v839_v14, %v536_v0  ;;  %v983_v21 = vmul.f32 %v834_v15, %v535_v2  ;;  %v413_v0 = vmul.f32 %v1647_v51, %v2021_v1  ;;  %v412_v2 = vmul.f32 %v1646_v52, %v2021_v1 }
  0xe6   : > { %v546_v9 = vmax.f32 %v482_v60, 0.0  ;;  %v545_v10 = vmax.f32 %v481_v61, 0.0 }
  0xe7   : > { %v1772_v25 = vpack.c.bf16 %v984_v20, %v983_v21  ;;  %v486_v20 = vadd.f32 %v2030_v11, %v415_v5  ;;  %v485_v21 = vadd.f32 %v2030_v11, %v414_v6 }
  0xe8   : > { %v849_v28 = vpop.permute.xlu1 %848  ;;  %v844_v29 = vpop.permute.xlu0 %843 }
  0xe9   : > { %1875 = vst [vmem:[%s2059_s6 + $0xa8] sm:$0xff] %v1772_v25   ;;  %v986_v34 = vmul.f32 %v849_v28, %v538_v16  ;;  %v985_v35 = vmul.f32 %v844_v29, %v537_v17  ;;  %v484_v16 = vadd.f32 %v2030_v11, %v413_v0  ;;  %v483_v17 = vadd.f32 %v2030_v11, %v412_v2 }
  0xea   : > { %v416_v25 = vmul.f32 %v1654_v13, %v2021_v1  ;;  %v492_v0 = vadd.f32 %v2030_v11, %v421_v55 }
  0xeb   : > { %v1777_v39 = vpack.c.bf16 %v986_v34, %v985_v35  ;;  %v548_v30 = vmax.f32 %v484_v16, 0.0  ;;  %v547_v31 = vmax.f32 %v483_v17, 0.0  ;;  %v550_v34 = vmax.f32 %v486_v20, 0.0 }
  0xec   : > { %v859_v42 = vpop.permute.xlu1 %858  ;;  %v854_v43 = vpop.permute.xlu0 %853  ;;  %v549_v35 = vmax.f32 %v485_v21, 0.0 }
  0xed   : > { %1876 = vst [vmem:[%s2059_s6 + $0xb0] sm:$0xff] %v1777_v39   ;;  %v988_v49 = vmul.f32 %v859_v42, %v540_v36  ;;  %v987_v50 = vmul.f32 %v854_v43, %v539_v37  ;;  %v487_v39 = vadd.f32 %v2030_v11, %v416_v25 }
  0xef   : > { %v1782_v53 = vpack.c.bf16 %v988_v49, %v987_v50  ;;  %v552_v49 = vmax.f32 %v488_v38, 0.0  ;;  %v551_v50 = vmax.f32 %v487_v39, 0.0 }
  0xf0   : > { %v869_v56 = vpop.permute.xlu1 %868  ;;  %v864_v57 = vpop.permute.xlu0 %863 }
  0xf1   : > { %1877 = vst [vmem:[%s2059_s6 + $0xb8] sm:$0xff] %v1782_v53   ;;  %v990_v62 = vmul.f32 %v869_v56, %v542_v40  ;;  %v989_v63 = vmul.f32 %v864_v57, %v541_v41  ;;  %v419_v40 = vmul.f32 %v1659_v26, %v2021_v1  ;;  %v418_v41 = vmul.f32 %v1658_v27, %v2021_v1 }
  0xf2   : > { %v420_v56 = vmul.f32 %v1662_v45, %v2021_v1 }
  0xf3   : > { %v1787_v4 = vpack.c.bf16 %v990_v62, %v989_v63  ;;  %v490_v51 = vadd.f32 %v2030_v11, %v419_v40  ;;  %v489_v52 = vadd.f32 %v2030_v11, %v418_v41 }
  0xf4   : > { %v879_v7 = vpop.permute.xlu1 %878  ;;  %v874_v8 = vpop.permute.xlu0 %873  ;;  %v491_v2 = vadd.f32 %v2030_v11, %v420_v56 }
  0xf5   : > { %1878 = vst [vmem:[%s2059_s6 + $0xc0] sm:$0xff] %v1787_v4   ;;  %v992_v14 = vmul.f32 %v879_v7, %v544_v58  ;;  %v991_v15 = vmul.f32 %v874_v8, %v543_v59  ;;  %v554_v60 = vmax.f32 %v490_v51, 0.0  ;;  %v553_v61 = vmax.f32 %v489_v52, 0.0 }
  0xf6   : > { %v556_v7 = vmax.f32 %v492_v0, 0.0  ;;  %v555_v8 = vmax.f32 %v491_v2, 0.0 }
  0xf7   : > { %v1792_v19 = vpack.c.bf16 %v992_v14, %v991_v15 }
  0xf8   : > { %v889_v22 = vpop.permute.xlu1 %888  ;;  %v884_v23 = vpop.permute.xlu0 %883 }
  0xf9   : > { %1879 = vst [vmem:[%s2059_s6 + $0xc8] sm:$0xff] %v1792_v19   ;;  %v994_v28 = vmul.f32 %v889_v22, %v546_v9  ;;  %v993_v29 = vmul.f32 %v884_v23, %v545_v10 }
  0xfb   : > { %v1797_v33 = vpack.c.bf16 %v994_v28, %v993_v29 }
  0xfc   : > { %v899_v36 = vpop.permute.xlu1 %898  ;;  %v894_v37 = vpop.permute.xlu0 %893 }
  0xfd   : > { %1880 = vst [vmem:[%s2059_s6 + $0xd0] sm:$0xff] %v1797_v33   ;;  %v996_v42 = vmul.f32 %v899_v36, %v548_v30  ;;  %v995_v43 = vmul.f32 %v894_v37, %v547_v31 }
  0xff   : > { %v1802_v46 = vpack.c.bf16 %v996_v42, %v995_v43 }
 0x100   : > { %v909_v47 = vpop.permute.xlu1 %908  ;;  %v904_v48 = vpop.permute.xlu0 %903 }
 0x101   : > { %1881 = vst [vmem:[%s2059_s6 + $0xd8] sm:$0xff] %v1802_v46   ;;  %v998_v53 = vmul.f32 %v909_v47, %v550_v34  ;;  %v997_v54 = vmul.f32 %v904_v48, %v549_v35 }
 0x103   : > { %v1807_v57 = vpack.c.bf16 %v998_v53, %v997_v54 }
 0x104   : > { %v919_v58 = vpop.permute.xlu1 %918  ;;  %v914_v59 = vpop.permute.xlu0 %913 }
 0x105   : > { %1882 = vst [vmem:[%s2059_s6 + $0xe0] sm:$0xff] %v1807_v57   ;;  %v1000_v62 = vmul.f32 %v919_v58, %v552_v49  ;;  %v999_v63 = vmul.f32 %v914_v59, %v551_v50 }
 0x107   : > { %v1812_v3 = vpack.c.bf16 %v1000_v62, %v999_v63 }
 0x108   : > { %v929_v4 = vpop.permute.xlu1 %928  ;;  %v924_v5 = vpop.permute.xlu0 %923 }
 0x109   : > { %1883 = vst [vmem:[%s2059_s6 + $0xe8] sm:$0xff] %v1812_v3   ;;  %v1002_v6 = vmul.f32 %v929_v4, %v554_v60  ;;  %v1001_v1 = vmul.f32 %v924_v5, %v553_v61 }
 0x10b   : > { %v1817_v9 = vpack.c.bf16 %v1002_v6, %v1001_v1 }
 0x10c   : > { %v939_v10 = vpop.permute.xlu1 %938  ;;  %v934_v12 = vpop.permute.xlu0 %933 }
 0x10d   : > { %1884 = vst [vmem:[%s2059_s6 + $0xf0] sm:$0xff] %v1817_v9   ;;  %v1004_v13 = vmul.f32 %v939_v10, %v556_v7  ;;  %v1003_v14 = vmul.f32 %v934_v12, %v555_v8 }
 0x10f   : > { %v1822_v15 = vpack.c.bf16 %v1004_v13, %v1003_v14 }
 0x111   : > { %1885 = vst [vmem:[%s2059_s6 + $0xf8] sm:$0xff] %v1822_v15  }
 0x112 PF: > { %s14_s15 = sadd.s32 1, %s1903_s15  }
 0x113   : > { %p11_p4 = scmp.ge.s32.totalorder %s14_s15, 4  }
 0x115   :  { %13 = sbr.rel (!%p11_p4) target bundleno = 1 (0x1), region = 69 }

// kernel: up_forward.3
= control target key start
LH: loop header
LB: loop body
LE: loop exit
PB: predicated region body
PF: predicated region fallthrough
CT: control target
= control target key end

     0   :  { %s11763_s27 = smov 0   ;;  %s14315_s0 = inlined_call_operand.vmem [shape: bf16[2,64,64], index: 0, kind: input, shape index: {}]   ;;  %s14316_s1 = inlined_call_operand.vmem [shape: bf16[1024,64], index: 1, kind: input, shape index: {}]   ;;  %s14317_s2 = inlined_call_operand.vmem [shape: f32[1024,1], index: 2, kind: input, shape index: {}]   ;;  %s14318_s3 = inlined_call_operand.vmem [shape: bf16[9,64,128], index: 3, kind: input, shape index: {}]   ;;  %s14319_s4 = inlined_call_operand.vmem [shape: f32[1,128], index: 4, kind: input, shape index: {}]   ;;  %s14320_s5 = inlined_call_operand.vmem [shape: f32[1,64], index: 5, kind: input, shape index: {}]   ;;  %s14321_s6 = inlined_call_operand.vmem [shape: f32[1,64], index: 6, kind: input, shape index: {}]   ;;  %s14322_s7 = inlined_call_operand.vmem [shape: bf16[1024,128], index: 7, kind: output, shape index: {0}]   ;;  %s14323_s8 = inlined_call_operand.vmem [shape: f32[8,128], index: 8, kind: output, shape index: {1}]  }
   0x1 LB: > { %s11769_s5 = sadd.s32 4294967295, %s11714_s27   ;;  %p9371_p0 = scmp.ge.s32.totalorder %s11714_s27, 1  ;;  %s11714_s27 = sphi %s11763_s27, %s19_s27  }
   0x2   : > { %p282_p1 = scmp.lt.s32.totalorder %s11714_s27, 3 }
   0x4   : > { %p283_p2 = pnand %p9371_p0, %p282_p1 }
   0x6   : > { %286 = sbr.rel (%p283_p2) target bundleno = 1110 (0x456), region = 48 }
   0xd   : > { %v11630_v0 = vld [vmem:[%s14318_s3 + $0x80] sm:$0xff]   ;;  %s9374_s29 = sshll.u32 %s11769_s5, 6  ;;  %v11631_v1 = vld [vmem:[%s14318_s3 + $0x88] sm:$0xff]   ;;  %v11633_v3 = vld [vmem:[%s14318_s3 + $0x90] sm:$0xff]   ;;  %p326_p4 = scmp.lt.s32.totalorder %s11769_s5, 1  ;;  %vm366_vm0 = vcmask 523264  }
   0xe   : > { %p332_p3 = scmp.lt.s32.totalorder %s9374_s29, 127  ;;  %10740 = vmatprep.subr.bf16.mxu0 %v11630_v0  ;;  %v11632_v2 = vld [vmem:[%s14318_s3] sm:$0xff]   ;;  %v11634_v4 = vld [vmem:[%s14318_s3 + $0x8] sm:$0xff]   ;;  %v11635_v5 = vld [vmem:[%s14318_s3 + $0x98] sm:$0xff]   ;;  %vm716_vm1 = vsmask.f32 1280 }
   0xf   : > { %10741 = vmatpush3.bf16.msra.mxu0 %v11630_v0  ;;  %10452 = vmatprep.subr.bf16.mxu1 %v11632_v2  ;;  %v11636_v6 = vld [vmem:[%s14318_s3 + $0x10] sm:$0xff]   ;;  %s327_s28 = scalar_select %p326_p4, %s11769_s5, 1  ;;  %v11639_v9 = vld [vmem:[%s14318_s3 + $0x18] sm:$0xff]   ;;  %v11830_v10 = vld [vmem:[%s14318_s3 + $0x20] sm:$0xff]   ;;  %vm4719_vm2 = vsmask.f32 7424 }
  0x10   : > { %s14453_s29 = smov (!%p332_p3, %s9374_s29), 127  ;;  %10742 = vmatprep.subr.bf16.mxu0 %v11631_v1  ;;  %10453 = vmatpush3.bf16.msra.mxu1 %v11632_v2  ;;  %v11643_v13 = vld [vmem:[%s14318_s3 + $0xa0] sm:$0xff]   ;;  %v11648_v26 = vld [vmem:[%s14318_s3 + $0xa8] sm:$0xff]   ;;  %v11654_v58 = vld [vmem:[%s14318_s3 + $0xb0] sm:$0xff]   ;;  %vm1561_vm3 = vcmask 1040384   ;;  %vm6559_vm5 = vcmask 1046528  }
  0x11   : > { %s9375_s16 = sshll.u32 %s14453_s29, 2  ;;  %10454 = vmatprep.subr.bf16.mxu1 %v11634_v4  ;;  %s9377_s24 = sshll.u32 %s14453_s29, 3  ;;  %v11653_v57 = vld [vmem:[%s14318_s3 + $0x28] sm:$0xff]   ;;  %vm2270_vm4 = vsmask.f32 256 }
  0x12   : > { %s11804_s23 = scalar_lea.vmem %s14316_s1, %s9375_s16  ;;  %s11810_s6 = scalar_lea.vmem %s14317_s2, %s9377_s24  ;;  %vm7268_vm6 = vsmask.f32 6400 }
  0x13   : > { %10743 = vmatpush3.bf16.msra.mxu0 %v11631_v1  ;;  %v11637_v7 = vld [vmem:[%s11804_s23] sm:$0xff]   ;;  %v11638_v8 = vld [vmem:[%s11804_s23 + $0x8] sm:$0xff]   ;;  %s9872_s10 = sshll.u32 %s327_s28, 5  ;;  %v11644_v14 = vld [vmem:[%s11804_s23 + $0x10] sm:$0xff]   ;;  %s13868_s30 = scalar_lea.vmem %s14322_s7, %s9375_s16 }
  0x14   : > { %10744 = vmatprep.subr.bf16.mxu0 %v11633_v3  ;;  %10455 = vmatpush3.bf16.msra.mxu1 %v11634_v4  ;;  %643 = vst.msk [vmem:[#allocation3 + $0x10] sm:$0xff] %vm366_vm0, %v11637_v7  ;;  %644 = vst.msk [vmem:[#allocation3 + $0x18] sm:$0xff] %vm366_vm0, %v11638_v8  ;;  %s11825_s13 = scalar_lea.vmem %s14315_s0, %s9872_s10  ;;  %v11645_v16 = vld [vmem:[%s11804_s23 + $0x18] sm:$0xff]   ;;  %v11646_v20 = vld [vmem:[%s11804_s23 + $0x20] sm:$0xff]   ;;  %p9869_p5 = scmp.ne.s32.totalorder %s11769_s5, 0 }
  0x15   : > { %10456 = vmatprep.subr.bf16.mxu1 %v11636_v6  ;;  %v11640_v11 = vld [vmem:[%s11825_s13] sm:$0xff]   ;;  %v11641_v12 = vld [vmem:[%s11825_s13 + $0x8] sm:$0xff]   ;;  %645 = vst.msk [vmem:[#allocation3 + $0x20] sm:$0xff] %vm366_vm0, %v11644_v14  ;;  %646 = vst.msk [vmem:[#allocation3 + $0x28] sm:$0xff] %vm366_vm0, %v11645_v16 }
  0x16   : > { %367 = vst.msk [vmem:[#allocation3] sm:$0xff] %vm366_vm0, %v11640_v11  ;;  %368 = vst.msk [vmem:[#allocation3 + $0x8] sm:$0xff] %vm366_vm0, %v11641_v12  ;;  %v11647_v25 = vld [vmem:[%s11804_s23 + $0x28] sm:$0xff]   ;;  %v11649_v29 = vld [vmem:[%s11804_s23 + $0x30] sm:$0xff]  }
  0x17   : > { %10745 = vmatpush3.bf16.msra.mxu0 %v11633_v3  ;;  %647 = vst.msk [vmem:[#allocation3 + $0x30] sm:$0xff] %vm366_vm0, %v11646_v20  ;;  %648 = vst.msk [vmem:[#allocation3 + $0x38] sm:$0xff] %vm366_vm0, %v11647_v25  ;;  %v11650_v36 = vld [vmem:[%s11804_s23 + $0x38] sm:$0xff]   ;;  %v11651_v37 = vld [vmem:[%s11804_s23 + $0x40] sm:$0xff]  }
  0x18   : > { %10746 = vmatprep.subr.bf16.mxu0 %v11635_v5  ;;  %10457 = vmatpush3.bf16.msra.mxu1 %v11636_v6  ;;  %649 = vst.msk [vmem:[#allocation3 + $0x40] sm:$0xff] %vm366_vm0, %v11649_v29  ;;  %650 = vst.msk [vmem:[#allocation3 + $0x48] sm:$0xff] %vm366_vm0, %v11650_v36  ;;  %v11652_v46 = vld [vmem:[%s11804_s23 + $0x48] sm:$0xff]   ;;  %v11655_v63 = vld [vmem:[%s11804_s23 + $0x50] sm:$0xff]  }
  0x19   : > { %10458 = vmatprep.subr.bf16.mxu1 %v11639_v9  ;;  %651 = vst.msk [vmem:[#allocation3 + $0x50] sm:$0xff] %vm366_vm0, %v11651_v37  ;;  %652 = vst.msk [vmem:[#allocation3 + $0x58] sm:$0xff] %vm366_vm0, %v11652_v46  ;;  %v11656_v8 = vld [vmem:[%s11804_s23 + $0x58] sm:$0xff]   ;;  %v11664_v36 = vld [vmem:[%s11804_s23 + $0x80] sm:$0xff]  }
  0x1a   : > { %653 = vst.msk [vmem:[#allocation3 + $0x60] sm:$0xff] %vm366_vm0, %v11655_v63  ;;  %654 = vst.msk [vmem:[#allocation3 + $0x68] sm:$0xff] %vm366_vm0, %v11656_v8  ;;  %v11659_v25 = vld [vmem:[%s14318_s3 + $0xb8] sm:$0xff]  }
  0x1b   : > { %10747 = vmatpush3.bf16.msra.mxu0 %v11635_v5  ;;  %v11840_v15 = vld [vmem:[#allocation3 + $0x10] sm:$0xff]  ;;  %v11845_v17 = vld [vmem:[#allocation3 + $0x18] sm:$0xff]  ;;  %659 = vst.msk [vmem:[#allocation3 + $0x90] sm:$0xff] %vm366_vm0, %v11664_v36 }
  0x1c   : > { %10812 = vmatprep.subr.bf16.mxu0 %v11643_v13  ;;  %10748 = vmatprep.mubr.msk.bf16.mxu0 %vm366_vm0, %v11840_v15  ;;  %v735_v18 = vshrl.u32 %v11840_v15, 16  ;;  %v738_v19 = vshll.u32 %v11840_v15, 16  ;;  %v744_v21 = vshrl.u32 %v11845_v17, 16  ;;  %v747_v22 = vshll.u32 %v11845_v17, 16  ;;  %v11875_v39 = vld [vmem:[#allocation3 + $0x20] sm:$0xff]  ;;  %v11879_v45 = vld [vmem:[#allocation3 + $0x28] sm:$0xff] }
  0x1d   : > { %10459 = vmatpush3.bf16.msra.mxu1 %v11639_v9  ;;  %v675_v30 = vld [vmem:[#allocation3] sm:$0xc0]  ;;  %v676_v31 = vld [vmem:[#allocation3 + $0x8] sm:$0xff]  ;;  %v753_v47 = vshrl.u32 %v11875_v39, 16  ;;  %v756_v48 = vshll.u32 %v11875_v39, 16  ;;  %v762_v50 = vshrl.u32 %v11879_v45, 16 }
  0x1e   : > { %10749 = vmatmul.mubr.msk.bf16.vlgmr.msra.gmra.mrb[0].mxu0 %vm366_vm0, %v11845_v17  ;;  %10524 = vmatprep.subr.bf16.mxu1 %v11830_v10  ;;  %v737_v23 = vrot.slane %v735_v18, 6  ;;  %v740_v24 = vrot.slane %v738_v19, 7  ;;  %v746_v27 = vrot.slane %v744_v21, 6  ;;  %v749_v28 = vrot.slane %v747_v22, 7  ;;  %v11888_v49 = vld [vmem:[#allocation3 + $0x30] sm:$0xff]  ;;  %v11915_v0 = vld [vmem:[#allocation3 + $0x38] sm:$0xff] }
  0x1f   : > { %10813 = vmatpush3.bf16.msra.mxu0 %v11643_v13  ;;  %v718_v32 = vshrl.u32 %v675_v30, 16  ;;  %v721_v33 = vshll.u32 %v675_v30, 16  ;;  %v726_v34 = vshrl.u32 %v676_v31, 16  ;;  %v729_v35 = vshll.u32 %v676_v31, 16  ;;  %10752 = vmatprep.mubr.msk.bf16.mxu0 %vm366_vm0, %v11875_v39  ;;  %v11921_v4 = vld [vmem:[#allocation3 + $0x40] sm:$0xff]  ;;  %v11658_v13 = vld [vmem:[%s11804_s23 + $0x68] sm:$0xff]  }
  0x20   : > { %10814 = vmatprep.subr.bf16.mxu0 %v11648_v26  ;;  %v741_v38 = vor.u32 %v740_v24, %v737_v23  ;;  %v750_v40 = vor.u32 %v749_v28, %v746_v27  ;;  %v765_v51 = vshll.u32 %v11879_v45, 16  ;;  %v755_v55 = vrot.slane %v753_v47, 6  ;;  %v11657_v9 = vld [vmem:[%s11804_s23 + $0x60] sm:$0xff]   ;;  %v11940_v16 = vld [vmem:[#allocation3 + $0x48] sm:$0xff]  ;;  %656 = vst.msk [vmem:[#allocation3 + $0x78] sm:$0xff] %vm366_vm0, %v11658_v13  ;;  %v11954_v27 = vld [vmem:[#allocation3 + $0x50] sm:$0xff] }
  0x21   : > { %v720_v41 = vrot.slane %v718_v32, 6  ;;  %v723_v42 = vrot.slane %v721_v33, 7  ;;  %v728_v43 = vrot.slane %v726_v34, 6  ;;  %v731_v44 = vrot.slane %v729_v35, 7  ;;  %655 = vst.msk [vmem:[#allocation3 + $0x70] sm:$0xff] %vm366_vm0, %v11657_v9  ;;  %v11660_v31 = vld [vmem:[%s11804_s23 + $0x70] sm:$0xff]  }
  0x22   : > { %v751_v54 = vsel %vm716_vm1, %v741_v38, %v750_v40  ;;  %v758_v56 = vrot.slane %v756_v48, 7  ;;  %v764_v61 = vrot.slane %v762_v50, 6  ;;  %v767_v62 = vrot.slane %v765_v51, 7  ;;  %v11661_v32 = vld [vmem:[%s11804_s23 + $0x78] sm:$0xff]   ;;  %657 = vst.msk [vmem:[#allocation3 + $0x80] sm:$0xff] %vm366_vm0, %v11660_v31  ;;  %v11662_v34 = vld [vmem:[%s14318_s3 + $0x30] sm:$0xff]  }
  0x23   : > { %10815 = vmatpush3.bf16.msra.mxu0 %v11648_v26  ;;  %v724_v52 = vor.u32 %v723_v42, %v720_v41  ;;  %v732_v53 = vor.u32 %v731_v44, %v728_v43  ;;  %v771_v2 = vshrl.u32 %v11888_v49, 16  ;;  %v774_v3 = vshll.u32 %v11888_v49, 16  ;;  %658 = vst.msk [vmem:[#allocation3 + $0x88] sm:$0xff] %vm366_vm0, %v11661_v32  ;;  %v11973_v35 = vld [vmem:[%s14318_s3 + $0xc0] sm:$0xff]   ;;  %v11665_v44 = vld [vmem:[%s11804_s23 + $0x88] sm:$0xff]   ;;  %v11990_v46 = vld [vmem:[#allocation3 + $0x58] sm:$0xff] }
  0x24   : > { %10816 = vmatprep.subr.bf16.mxu0 %v11654_v58  ;;  %v759_v1 = vor.u32 %v758_v56, %v755_v55  ;;  %v768_v5 = vor.u32 %v767_v62, %v764_v61  ;;  %v780_v6 = vshrl.u32 %v11915_v0, 16  ;;  %v783_v7 = vshll.u32 %v11915_v0, 16  ;;  %660 = vst.msk [vmem:[#allocation3 + $0x98] sm:$0xff] %vm366_vm0, %v11665_v44  ;;  %v11996_v55 = vld [vmem:[#allocation3 + $0x60] sm:$0xff]  ;;  %v11666_v56 = vld [vmem:[%s11804_s23 + $0x90] sm:$0xff]   ;;  %v11669_v62 = vld [vmem:[%s11804_s23 + $0xa8] sm:$0xff]  }
  0x25   : > { %v733_v59 = vsel %vm716_vm1, %v724_v52, %v732_v53  ;;  %v742_v60 = vsel %vm716_vm1, %v732_v53, %v741_v38  ;;  %v773_v11 = vrot.slane %v771_v2, 6  ;;  %v776_v12 = vrot.slane %v774_v3, 7  ;;  %661 = vst.msk [vmem:[#allocation3 + $0xa0] sm:$0xff] %vm366_vm0, %v11666_v56  ;;  %v11668_v61 = vld [vmem:[%s11804_s23 + $0xa0] sm:$0xff]   ;;  %664 = vst.msk [vmem:[#allocation3 + $0xb8] sm:$0xff] %vm366_vm0, %v11669_v62 }
  0x26   : > { %10753 = vmatmul.mubr.msk.bf16.gmra.mrb[4].mxu0 %vm366_vm0, %v11879_v45  ;;  %10460 = vmatprep.mubr.msk.bf16.mxu1 %vm366_vm0, %v733_v59  ;;  %v769_v14 = vsel %vm716_vm1, %v759_v1, %v768_v5  ;;  %v782_v20 = vrot.slane %v780_v6, 6  ;;  %v785_v23 = vrot.slane %v783_v7, 7  ;;  %v789_v24 = vshrl.u32 %v11921_v4, 16  ;;  %663 = vst.msk [vmem:[#allocation3 + $0xb0] sm:$0xff] %vm366_vm0, %v11668_v61  ;;  %v11682_v45 = vld [vmem:[%s14318_s3 + $0xd0] sm:$0xff]  }
  0x27   : > { %10756 = vmatprep.mubr.msk.bf16.mxu0 %vm366_vm0, %v11888_v49  ;;  %10461 = vmatmul.mubr.msk.bf16.vlgmr.msra.gmra.mrb[0].mxu1 %vm366_vm0, %v742_v60  ;;  %v792_v26 = vshll.u32 %v11921_v4, 16  ;;  %v777_v28 = vor.u32 %v776_v12, %v773_v11  ;;  %v798_v29 = vshrl.u32 %v11940_v16, 16  ;;  %v801_v30 = vshll.u32 %v11940_v16, 16  ;;  %v11670_v11 = vld [vmem:[%s11804_s23 + $0xb0] sm:$0xff]   ;;  %v12023_v12 = vld [vmem:[#allocation3 + $0x68] sm:$0xff] }
  0x28   : > { %10817 = vmatpush3.bf16.msra.mxu0 %v11654_v58  ;;  %10525 = vmatpush3.bf16.msra.mxu1 %v11830_v10  ;;  %v760_v10 = vsel %vm716_vm1, %v750_v40, %v759_v1  ;;  %v786_v33 = vor.u32 %v785_v23, %v782_v20  ;;  %v791_v38 = vrot.slane %v789_v24, 6  ;;  %v807_v53 = vshrl.u32 %v11954_v27, 16  ;;  %665 = vst.msk [vmem:[#allocation3 + $0xc0] sm:$0xff] %vm366_vm0, %v11670_v11  ;;  %v11671_v20 = vld [vmem:[%s11804_s23 + $0xb8] sm:$0xff]  }
  0x29   : > { %10464 = vmatprep.mubr.msk.bf16.mxu1 %vm366_vm0, %v751_v54  ;;  %10526 = vmatprep.subr.bf16.mxu1 %v11653_v57  ;;  %v778_v37 = vsel %vm716_vm1, %v768_v5, %v777_v28  ;;  %v794_v40 = vrot.slane %v792_v26, 7  ;;  %v800_v42 = vrot.slane %v798_v29, 6  ;;  %v803_v43 = vrot.slane %v801_v30, 7  ;;  %666 = vst.msk [vmem:[#allocation3 + $0xc8] sm:$0xff] %vm366_vm0, %v11671_v20  ;;  %v12063_v61 = vld [vmem:[#allocation3 + $0x80] sm:$0xff] }
  0x2a   : > { %10818 = vmatprep.subr.bf16.mxu0 %v11659_v25  ;;  %v787_v41 = vsel %vm716_vm1, %v777_v28, %v786_v33  ;;  %v810_v54 = vshll.u32 %v11954_v27, 16  ;;  %v816_v59 = vshrl.u32 %v11990_v46, 16  ;;  %v819_v60 = vshll.u32 %v11990_v46, 16  ;;  %v11672_v28 = vld [vmem:[%s14318_s3 + $0x38] sm:$0xff]   ;;  %v12097_v15 = vld [vmem:[#allocation3 + $0x88] sm:$0xff] }
  0x2b   : > { %v795_v52 = vor.u32 %v794_v40, %v791_v38  ;;  %v804_v58 = vor.u32 %v803_v43, %v800_v42  ;;  %v809_v1 = vrot.slane %v807_v53, 6  ;;  %v825_v13 = vshrl.u32 %v11996_v55, 16  ;;  %v11674_v42 = vld [vmem:[%s11804_s23 + $0xc0] sm:$0xff]   ;;  %v12055_v43 = vld [vmem:[#allocation3 + $0x78] sm:$0xff] }
  0x2c   : > { %10527 = vmatpush3.bf16.msra.mxu1 %v11653_v57  ;;  %10819 = vmatpush3.bf16.msra.mxu0 %v11659_v25  ;;  %v11667_v57 = vld [vmem:[%s11804_s23 + $0x98] sm:$0xff]   ;;  %v812_v5 = vrot.slane %v810_v54, 7  ;;  %v818_v9 = vrot.slane %v816_v59, 6  ;;  %v828_v25 = vshll.u32 %v11996_v55, 16  ;;  %v834_v32 = vshrl.u32 %v12023_v12, 16  ;;  %667 = vst.msk [vmem:[#allocation3 + $0xd0] sm:$0xff] %vm366_vm0, %v11674_v42 }
  0x2d   : > { %10528 = vmatprep.subr.bf16.mxu1 %v11662_v34  ;;  %10884 = vmatprep.subr.bf16.mxu0 %v11973_v35  ;;  %662 = vst.msk [vmem:[#allocation3 + $0xa8] sm:$0xff] %vm366_vm0, %v11667_v57  ;;  %v796_v63 = vsel %vm716_vm1, %v786_v33, %v795_v52  ;;  %v805_v8 = vsel %vm716_vm1, %v795_v52, %v804_v58  ;;  %v837_v33 = vshll.u32 %v12023_v12, 16  ;;  %v827_v36 = vrot.slane %v825_v13, 6  ;;  %v11675_v52 = vld [vmem:[%s11804_s23 + $0xc8] sm:$0xff]  }
  0x2e   : > { %10757 = vmatmul.mubr.msk.bf16.gmra.mrb[8].mxu0 %vm366_vm0, %v11915_v0  ;;  %v813_v23 = vor.u32 %v812_v5, %v809_v1  ;;  %v836_v40 = vrot.slane %v834_v32, 6  ;;  %v4725_v44 = vrot.slane %v738_v19, 1  ;;  %v852_v62 = vshrl.u32 %v12055_v43, 16  ;;  %668 = vst.msk [vmem:[#allocation3 + $0xd8] sm:$0xff] %vm366_vm0, %v11675_v52  ;;  %v11676_v19 = vld [vmem:[%s11804_s23 + $0xd0] sm:$0xff]   ;;  %v11677_v5 = vld [vmem:[%s11804_s23 + $0xd8] sm:$0xff]  }
  0x2f   : > { %10760 = vmatprep.mubr.msk.bf16.mxu0 %vm366_vm0, %v11921_v4  ;;  %10465 = vmatmul.mubr.msk.bf16.gmra.mrb[4].mxu1 %vm366_vm0, %v760_v10  ;;  %v821_v10 = vrot.slane %v819_v60, 7  ;;  %v855_v1 = vshll.u32 %v12055_v43, 16  ;;  %669 = vst.msk [vmem:[#allocation3 + $0xe0] sm:$0xff] %vm366_vm0, %v11676_v19  ;;  %670 = vst.msk [vmem:[#allocation3 + $0xe8] sm:$0xff] %vm366_vm0, %v11677_v5  ;;  %v873_v52 = vshll.u32 %v12097_v15, 16  ;;  %v4746_v5 = vrot.slane %v765_v51, 1 }
  0x30   : > { %10468 = vmatprep.mubr.msk.bf16.mxu1 %vm366_vm0, %v769_v14  ;;  %10529 = vmatpush3.bf16.msra.mxu1 %v11662_v34  ;;  %v12027_v14 = vld [vmem:[#allocation3 + $0x70] sm:$0xff]  ;;  %v814_v34 = vsel %vm716_vm1, %v804_v58, %v813_v23  ;;  %v4726_v20 = vor.u32 %v4725_v44, %v735_v18  ;;  %v870_v44 = vshrl.u32 %v12097_v15, 16 }
  0x31   : > { %v822_v31 = vor.u32 %v821_v10, %v818_v9  ;;  %10530 = vmatprep.subr.bf16.mxu1 %v11672_v28  ;;  %v843_v57 = vshrl.u32 %v12027_v14, 16  ;;  %v846_v58 = vshll.u32 %v12027_v14, 16  ;;  %v875_v51 = vrot.slane %v873_v52, 7 }
  0x33   : > { %v823_v38 = vsel %vm716_vm1, %v813_v23, %v822_v31  ;;  %v845_v10 = vrot.slane %v843_v57, 6  ;;  %v848_v11 = vrot.slane %v846_v58, 7  ;;  %v11678_v23 = vld [vmem:[%s11804_s23 + $0xe0] sm:$0xff]  }
  0x34   : > { %10531 = vmatpush3.bf16.msra.mxu1 %v11672_v28  ;;  %v11679_v28 = vld [vmem:[%s11804_s23 + $0xe8] sm:$0xff]   ;;  %671 = vst.msk [vmem:[#allocation3 + $0xf0] sm:$0xff] %vm366_vm0, %v11678_v23 }
  0x35   : > { %672 = vst.msk [vmem:[#allocation3 + $0xf8] sm:$0xff] %vm366_vm0, %v11679_v28  ;;  %v849_v18 = vor.u32 %v848_v11, %v845_v10 }
  0x36   : > { %10761 = vmatmul.mubr.msk.bf16.gmra.mrb[12].mxu0 %vm366_vm0, %v11940_v16 }
  0x37   : > { %10764 = vmatprep.mubr.msk.bf16.mxu0 %vm366_vm0, %v11954_v27  ;;  %10469 = vmatmul.mubr.msk.bf16.gmra.mrb[8].mxu1 %vm366_vm0, %v778_v37  ;;  %v830_v37 = vrot.slane %v828_v25, 7 }
  0x38   : > { %10472 = vmatprep.mubr.msk.bf16.mxu1 %vm366_vm0, %v787_v41  ;;  %v839_v41 = vrot.slane %v837_v33, 7 }
  0x39   : > { %v831_v56 = vor.u32 %v830_v37, %v827_v36  ;;  %v11680_v36 = vld [vmem:[%s11804_s23 + $0xf0] sm:$0xff]   ;;  %v861_v37 = vshrl.u32 %v12063_v61, 16 }
  0x3a   : > { %673 = vst.msk [vmem:[#allocation3 + $0x100] sm:$0xff] %vm366_vm0, %v11680_v36 }
  0x3b   : > { %v832_v9 = vsel %vm716_vm1, %v822_v31, %v831_v56  ;;  %v857_v31 = vrot.slane %v855_v1, 7  ;;  %v863_v10 = vrot.slane %v861_v37, 6 }
  0x3e   : > { %10765 = vmatmul.mubr.msk.bf16.gmra.mrb[16].mxu0 %vm366_vm0, %v11990_v46  ;;  %v12283_v46 = vld [vmem:[#allocation3 + $0xd0] sm:$0xff] }
  0x3f   : > { %10768 = vmatprep.mubr.msk.bf16.mxu0 %vm366_vm0, %v11996_v55  ;;  %10473 = vmatmul.mubr.msk.bf16.gmra.mrb[12].mxu1 %vm366_vm0, %v796_v63  ;;  %v840_v63 = vor.u32 %v839_v41, %v836_v40  ;;  %v12107_v41 = vld [vmem:[%s14318_s3 + $0x40] sm:$0xff]  }
  0x40   : > { %10476 = vmatprep.mubr.msk.bf16.mxu1 %vm366_vm0, %v805_v8  ;;  %v4730_v8 = vrot.slane %v747_v22, 1  ;;  %v854_v22 = vrot.slane %v852_v62, 6  ;;  %10596 = vmatprep.subr.bf16.mxu1 %v12107_v41 }
  0x42   : > { %v4731_v40 = vsel %vm4719_vm2, %v4726_v20, %v4730_v8  ;;  %v858_v42 = vor.u32 %v857_v31, %v854_v22  ;;  %v4734_v19 = vor.u32 %v4730_v8, %v744_v21  ;;  %v12126_v20 = vld [vmem:[#allocation3 + $0x90] sm:$0xff]  ;;  %v872_v21 = vrot.slane %v870_v44, 6  ;;  %v11673_v31 = vld [vmem:[%s14318_s3 + $0xc8] sm:$0xff]  }
  0x43   : > { %v879_v23 = vshrl.u32 %v12126_v20, 16  ;;  %v882_v28 = vshll.u32 %v12126_v20, 16 }
  0x44   : > { %v859_v17 = vsel %vm716_vm1, %v849_v18, %v858_v42  ;;  %v876_v36 = vor.u32 %v875_v51, %v872_v21 }
  0x46   : > { %10769 = vmatmul.mubr.msk.bf16.gmra.mrb[20].mxu0 %vm366_vm0, %v12023_v12 }
  0x47   : > { %10772 = vmatprep.mubr.msk.bf16.mxu0 %vm366_vm0, %v12027_v14  ;;  %10477 = vmatmul.mubr.msk.bf16.gmra.mrb[16].mxu1 %vm366_vm0, %v814_v34  ;;  %v841_v34 = vsel %vm716_vm1, %v831_v56, %v840_v63  ;;  %v4738_v56 = vrot.slane %v756_v48, 1 }
  0x48   : > { %10480 = vmatprep.mubr.msk.bf16.mxu1 %vm366_vm0, %v823_v38  ;;  %v864_v38 = vshll.u32 %v12063_v61, 16 }
  0x49   : > { %v4742_v48 = vor.u32 %v4738_v56, %v753_v47  ;;  %v4739_v8 = vsel %vm4719_vm2, %v4734_v19, %v4738_v56  ;;  %v884_v56 = vrot.slane %v882_v28, 7  ;;  %v4750_v19 = vor.u32 %v4746_v5, %v762_v50  ;;  %v11685_v50 = vld [vmem:[%s11804_s23 + $0xf8] sm:$0xff]  }
  0x4a   : > { %v866_v11 = vrot.slane %v864_v38, 7  ;;  %674 = vst.msk [vmem:[#allocation3 + $0x108] sm:$0xff] %vm366_vm0, %v11685_v50 }
  0x4b   : > { %v4747_v47 = vsel %vm4719_vm2, %v4742_v48, %v4746_v5 }
  0x4c   : > { %v867_v39 = vor.u32 %v866_v11, %v863_v10  ;;  %v4762_v10 = vrot.slane %v783_v7, 1  ;;  %v12175_v7 = vld [vmem:[#allocation3 + $0xa8] sm:$0xff] }
  0x4e   : > { %10773 = vmatmul.mubr.msk.bf16.gmra.mrb[24].mxu0 %vm366_vm0, %v12055_v43  ;;  %v877_v5 = vsel %vm716_vm1, %v867_v39, %v876_v36 }
  0x4f   : > { %10776 = vmatprep.mubr.msk.bf16.mxu0 %vm366_vm0, %v12063_v61  ;;  %10481 = vmatmul.mubr.msk.bf16.gmra.mrb[20].mxu1 %vm366_vm0, %v832_v9  ;;  %v850_v9 = vsel %vm716_vm1, %v840_v63, %v849_v18  ;;  %v12135_v63 = vld [vmem:[#allocation3 + $0x98] sm:$0xff]  ;;  %v4754_v18 = vrot.slane %v774_v3, 1  ;;  %v868_v3 = vsel %vm716_vm1, %v858_v42, %v867_v39  ;;  %v11686_v42 = vld [vmem:[%s11825_s13 + $0x10] sm:$0xff]  }
  0x50   : > { %10484 = vmatprep.mubr.msk.bf16.mxu1 %vm366_vm0, %v841_v34  ;;  %v888_v34 = vshrl.u32 %v12135_v63, 16  ;;  %v891_v22 = vshll.u32 %v12135_v63, 16  ;;  %385 = vst.msk [vmem:[#allocation3 + $0x110] sm:$0xff] %vm366_vm0, %v11686_v42 }
  0x52   : > { %v890_v11 = vrot.slane %v888_v34, 6  ;;  %v893_v48 = vrot.slane %v891_v22, 7 }
  0x54   : > { %v894_v39 = vor.u32 %v893_v48, %v890_v11 }
  0x56   : > { %10777 = vmatmul.mubr.msk.bf16.gmra.mrb[28].mxu0 %vm366_vm0, %v12097_v15 }
  0x57   : > { %10820 = vmatprep.mubr.msk.bf16.mxu0 %vm366_vm0, %v4731_v40  ;;  %10485 = vmatmul.mubr.msk.bf16.gmra.mrb[24].mxu1 %vm366_vm0, %v850_v9  ;;  %v881_v40 = vrot.slane %v879_v23, 6  ;;  %v12159_v9 = vld [vmem:[#allocation3 + $0xa0] sm:$0xff] }
  0x58   : > { %10488 = vmatprep.mubr.msk.bf16.mxu1 %vm366_vm0, %v859_v17  ;;  %v4755_v17 = vsel %vm4719_vm2, %v4750_v19, %v4754_v18  ;;  %v897_v49 = vshrl.u32 %v12159_v9, 16  ;;  %v900_v21 = vshll.u32 %v12159_v9, 16  ;;  %v4766_v19 = vor.u32 %v4762_v10, %v780_v6 }
  0x5a   : > { %v902_v48 = vrot.slane %v900_v21, 7 }
  0x5e   : > { %10821 = vmatmul.mubr.msk.bf16.vlgmr.msra.gmra.mrb[0].mxu0 %vm366_vm0, %v4739_v8  ;;  %v11684_v8 = vld [vmem:[%s14318_s3 + $0xd8] sm:$0xff]  }
  0x5f   : > { %10885 = vmatpush3.bf16.msra.mxu0 %v11973_v35  ;;  %10824 = vmatprep.mubr.msk.bf16.mxu0 %vm366_vm0, %v4747_v47  ;;  %v4758_v35 = vor.u32 %v4754_v18, %v771_v2  ;;  %v885_v2 = vor.u32 %v884_v56, %v881_v40  ;;  %v906_v47 = vshrl.u32 %v12175_v7, 16  ;;  %v909_v18 = vshll.u32 %v12175_v7, 16 }
  0x60   : > { %10886 = vmatprep.subr.bf16.mxu0 %v11673_v31  ;;  %10489 = vmatmul.mubr.msk.bf16.gmra.mrb[28].mxu1 %vm366_vm0, %v868_v3  ;;  %v4778_v40 = vrot.slane %v801_v30, 1  ;;  %v899_v56 = vrot.slane %v897_v49, 6  ;;  %v12201_v3 = vld [vmem:[#allocation3 + $0xb0] sm:$0xff]  ;;  %v12211_v30 = vld [vmem:[%s14318_s3 + $0xe0] sm:$0xff]  }
  0x61   : > { %10492 = vmatprep.mubr.msk.bf16.mxu1 %vm366_vm0, %v877_v5  ;;  %v4763_v51 = vsel %vm4719_vm2, %v4758_v35, %v4762_v10  ;;  %v886_v11 = vsel %vm716_vm1, %v876_v36, %v885_v2  ;;  %v895_v0 = vsel %vm716_vm1, %v885_v2, %v894_v39  ;;  %v908_v6 = vrot.slane %v906_v47, 6  ;;  %v12218_v10 = vld [vmem:[#allocation3 + $0xb8] sm:$0xff] }
  0x62   : > { %v911_v36 = vrot.slane %v909_v18, 7  ;;  %v915_v35 = vshrl.u32 %v12201_v3, 16  ;;  %v924_v42 = vshrl.u32 %v12218_v10, 16  ;;  %v4786_v2 = vrot.slane %v810_v54, 1 }
  0x63   : > { %10887 = vmatpush3.bf16.msra.mxu0 %v11673_v31  ;;  %v4770_v31 = vrot.slane %v792_v26, 1 }
  0x64   : > { %10888 = vmatprep.subr.bf16.mxu0 %v11682_v45  ;;  %v912_v5 = vor.u32 %v911_v36, %v908_v6  ;;  %v4790_v54 = vor.u32 %v4786_v2, %v807_v53  ;;  %v926_v16 = vrot.slane %v924_v42, 6 }
  0x65   : > { %v4774_v26 = vor.u32 %v4770_v31, %v789_v24  ;;  %v4771_v4 = vsel %vm4719_vm2, %v4766_v19, %v4770_v31  ;;  %v903_v24 = vor.u32 %v902_v48, %v899_v56  ;;  %v4794_v31 = vrot.slane %v819_v60, 1  ;;  %v12251_v60 = vld [vmem:[#allocation3 + $0xc8] sm:$0xff] }
  0x66   : > { %10825 = vmatmul.mubr.msk.bf16.gmra.mrb[4].mxu0 %vm366_vm0, %v4755_v17  ;;  %v927_v17 = vshll.u32 %v12218_v10, 16  ;;  %v917_v19 = vrot.slane %v915_v35, 6  ;;  %v14328_v6 = vshrl.u32 %v12251_v60, 16  ;;  %v945_v36 = vshll.u32 %v12251_v60, 16 }
  0x67   : > { %10828 = vmatprep.mubr.msk.bf16.mxu0 %vm366_vm0, %v4763_v51  ;;  %10889 = vmatpush3.bf16.msra.mxu0 %v11682_v45  ;;  %v918_v45 = vshll.u32 %v12201_v3, 16  ;;  %v4779_v50 = vsel %vm4719_vm2, %v4774_v26, %v4778_v40  ;;  %v4782_v51 = vor.u32 %v4778_v40, %v798_v29  ;;  %v904_v56 = vsel %vm716_vm1, %v894_v39, %v903_v24 }
  0x68   : > { %10890 = vmatprep.subr.bf16.mxu0 %v11684_v8  ;;  %10493 = vmatmul.mubr.msk.bf16.gmra.mrb[32].mxu1 %vm366_vm0, %v886_v11  ;;  %v913_v48 = vsel %vm716_vm1, %v903_v24, %v912_v5  ;;  %v929_v29 = vrot.slane %v927_v17, 7  ;;  %v4795_v53 = vsel %vm4719_vm2, %v4790_v54, %v4794_v31  ;;  %v944_v54 = vrot.slane %v14328_v6, 6 }
  0x69   : > { %10496 = vmatprep.mubr.msk.bf16.mxu1 %vm366_vm0, %v895_v0  ;;  %v920_v11 = vrot.slane %v918_v45, 7  ;;  %v4787_v39 = vsel %vm4719_vm2, %v4782_v51, %v4786_v2  ;;  %v4798_v2 = vor.u32 %v4794_v31, %v816_v59  ;;  %v12271_v51 = vld [vmem:[#allocation3 + $0x98] sm:$0xff]  ;;  %v14327_v31 = vshrl.u32 %v12283_v46, 16 }
  0x6a   : > { %v930_v0 = vor.u32 %v929_v29, %v926_v16  ;;  %v12285_v59 = vld [vmem:[#allocation3 + $0xd8] sm:$0xff]  ;;  %v954_v16 = vshll.u32 %v12283_v46, 16 }
  0x6b   : > { %10891 = vmatpush3.bf16.msra.mxu0 %v11684_v8  ;;  %v12235_v8 = vld [vmem:[#allocation3 + $0xc0] sm:$0xff]  ;;  %v921_v27 = vor.u32 %v920_v11, %v917_v19 }
  0x6c   : > { %10956 = vmatprep.subr.bf16.mxu0 %v12211_v30  ;;  %v933_v40 = vshrl.u32 %v12235_v8, 16  ;;  %v936_v26 = vshll.u32 %v12235_v8, 16 }
  0x6d   : > { %v931_v11 = vsel %vm716_vm1, %v921_v27, %v930_v0 }
  0x6e   : > { %10829 = vmatmul.mubr.msk.bf16.gmra.mrb[8].mxu0 %vm366_vm0, %v4771_v4  ;;  %v4802_v4 = vrot.slane %v828_v25, 1  ;;  %v935_v24 = vrot.slane %v933_v40, 6  ;;  %v4810_v25 = vrot.slane %v837_v33, 1  ;;  %v1601_v33 = vrot.slane %v12159_v9, 7 }
  0x6f   : > { %10832 = vmatprep.mubr.msk.bf16.mxu0 %vm366_vm0, %v4779_v50  ;;  %v938_v50 = vrot.slane %v936_v26, 7 }
  0x70   : > { %10497 = vmatmul.mubr.msk.bf16.gmra.mrb[36].mxu1 %vm366_vm0, %v904_v56  ;;  %v922_v56 = vsel %vm716_vm1, %v912_v5, %v921_v27  ;;  %v4806_v19 = vor.u32 %v4802_v4, %v825_v13  ;;  %v14324_v5 = vrot.slane %v12271_v51, 7  ;;  %v4803_v13 = vsel %vm4719_vm2, %v4798_v2, %v4802_v4 }
  0x71   : > { %10500 = vmatprep.mubr.msk.bf16.mxu1 %vm366_vm0, %v913_v48  ;;  %v947_v48 = vrot.slane %v945_v36, 7  ;;  %v939_v55 = vor.u32 %v938_v50, %v935_v24  ;;  %v14326_v24 = vshll.u32 %v12285_v59, 16  ;;  %v1603_v50 = vrot.slane %v12175_v7, 7 }
  0x72   : > { %v4811_v29 = vsel %vm4719_vm2, %v4806_v19, %v4810_v25  ;;  %v12302_v4 = vsel %vm1561_vm3, %v14324_v5, %v1601_v33  ;;  %v1605_v2 = vrot.slane %v12201_v3, 7 }
  0x73   : > { %v948_v27 = vor.u32 %v947_v48, %v944_v54  ;;  %v953_v54 = vrot.slane %v14327_v31, 6  ;;  %v956_v48 = vrot.slane %v954_v16, 7 }
  0x74   : > { %v12325_v12 = vsel %vm1561_vm3, %v1603_v50, %v1605_v2 }
  0x75   : > { %v949_v14 = vsel %vm716_vm1, %v939_v55, %v948_v27 }
  0x76   : > { %10833 = vmatmul.mubr.msk.bf16.gmra.mrb[12].mxu0 %vm366_vm0, %v4787_v39  ;;  %v4818_v39 = vrot.slane %v846_v58, 1  ;;  %v4814_v58 = vor.u32 %v4810_v25, %v834_v32  ;;  %v1607_v25 = vrot.slane %v12218_v10, 7 }
  0x77   : > { %10836 = vmatprep.mubr.msk.bf16.mxu0 %vm366_vm0, %v4795_v53  ;;  %v14325_v53 = vshrl.u32 %v12285_v59, 16 }
  0x78   : > { %10501 = vmatmul.mubr.msk.bf16.gmra.mrb[40].mxu1 %vm366_vm0, %v922_v56  ;;  %v940_v56 = vsel %vm716_vm1, %v930_v0, %v939_v55  ;;  %v4822_v19 = vor.u32 %v4818_v39, %v843_v57  ;;  %v12322_v0 = vsel %vm1561_vm3, %v1601_v33, %v1603_v50  ;;  %v965_v57 = vrot.slane %v14326_v24, 7 }
  0x79   : > { %10504 = vmatprep.mubr.msk.bf16.mxu1 %vm366_vm0, %v931_v11  ;;  %v4826_v11 = vrot.slane %v855_v1, 1  ;;  %v962_v32 = vrot.slane %v14325_v53, 6  ;;  %v12332_v1 = vld [vmem:[#allocation3 + $0xe8] sm:$0xff]  ;;  %v1609_v33 = vrot.slane %v12235_v8, 7  ;;  %v4819_v50 = vsel %vm4719_vm2, %v4814_v58, %v4818_v39 }
  0x7a   : > { %v12343_v53 = vsel %vm1561_vm3, %v1605_v2, %v1607_v25  ;;  %v957_v24 = vor.u32 %v956_v48, %v953_v54  ;;  %v14330_v39 = vshll.u32 %v12332_v1, 16  ;;  %v1611_v58 = vrot.slane %v12251_v60, 7 }
  0x7b   : > { %v4827_v5 = vsel %vm4719_vm2, %v4822_v19, %v4826_v11  ;;  %v12349_v6 = vsel %vm1561_vm3, %v1607_v25, %v1609_v33  ;;  %v1613_v19 = vrot.slane %v12283_v46, 7  ;;  %v4842_v2 = vrot.slane %v873_v52, 1 }
  0x7c   : > { %v4830_v54 = vor.u32 %v4826_v11, %v852_v62  ;;  %v983_v62 = vrot.slane %v14330_v39, 7 }
  0x7e   : > { %10837 = vmatmul.mubr.msk.bf16.gmra.mrb[16].mxu0 %vm366_vm0, %v4803_v13  ;;  %v12319_v13 = vld [vmem:[#allocation3 + $0xe0] sm:$0xff] }
  0x7f   : > { %10840 = vmatprep.mubr.msk.bf16.mxu0 %vm366_vm0, %v4811_v29  ;;  %v4834_v29 = vrot.slane %v864_v38, 1  ;;  %v14331_v55 = vshrl.u32 %v12319_v13, 16  ;;  %v972_v31 = vshll.u32 %v12319_v13, 16  ;;  %v14329_v38 = vshrl.u32 %v12332_v1, 16 }
  0x80   : > { %10505 = vmatmul.mubr.msk.bf16.gmra.mrb[44].mxu1 %vm366_vm0, %v940_v56  ;;  %v966_v56 = vor.u32 %v965_v57, %v962_v32  ;;  %v12366_v32 = vsel %vm1561_vm3, %v1611_v58, %v1613_v19  ;;  %v958_v57 = vsel %vm716_vm1, %v948_v27, %v957_v24  ;;  %v1617_v39 = vrot.slane %v12319_v13, 7 }
  0x81   : > { %10508 = vmatprep.mubr.msk.bf16.mxu1 %vm366_vm0, %v949_v14  ;;  %v4838_v48 = vor.u32 %v4834_v29, %v861_v37  ;;  %v12363_v14 = vsel %vm1561_vm3, %v1609_v33, %v1611_v58  ;;  %v971_v25 = vrot.slane %v14331_v55, 6  ;;  %v974_v52 = vrot.slane %v972_v31, 7  ;;  %v12378_v37 = vld [vmem:[#allocation3 + $0xf0] sm:$0xff] }
  0x82   : > { %v967_v43 = vsel %vm716_vm1, %v957_v24, %v966_v56  ;;  %v980_v61 = vrot.slane %v14329_v38, 6  ;;  %v4835_v27 = vsel %vm4719_vm2, %v4830_v54, %v4834_v29  ;;  %v4850_v33 = vrot.slane %v882_v28, 1 }
  0x83   : > { %v4843_v11 = vsel %vm4719_vm2, %v4838_v48, %v4842_v2  ;;  %v1615_v24 = vrot.slane %v12285_v59, 7  ;;  %v987_v58 = vshrl.u32 %v12378_v37, 16  ;;  %v990_v38 = vshll.u32 %v12378_v37, 16 }
  0x84   : > { %v984_v55 = vor.u32 %v983_v62, %v980_v61  ;;  %v4846_v48 = vor.u32 %v4842_v2, %v870_v44  ;;  %v707_v61 = vld [vmem:[#allocation3 + $0x100] sm:$0x7f]  ;;  %v4858_v62 = vrot.slane %v891_v22, 1 }
  0x85   : > { %v12395_v54 = vsel %vm1561_vm3, %v1613_v19, %v1615_v24  ;;  %v12399_v28 = vsel %vm1561_vm3, %v1615_v24, %v1617_v39  ;;  %v992_v19 = vrot.slane %v990_v38, 7  ;;  %v1621_v24 = vrot.slane %v12378_v37, 7 }
  0x86   : > { %10841 = vmatmul.mubr.msk.bf16.gmra.mrb[20].mxu0 %vm366_vm0, %v4819_v50  ;;  %v975_v50 = vor.u32 %v974_v52, %v971_v25  ;;  %v4854_v25 = vor.u32 %v4850_v33, %v879_v23  ;;  %v4851_v20 = vsel %vm4719_vm2, %v4846_v48, %v4850_v33  ;;  %v1005_v23 = vshrl.u32 %v707_v61, 16 }
  0x87   : > { %10844 = vmatprep.mubr.msk.bf16.mxu0 %vm366_vm0, %v4827_v5  ;;  %v12380_v5 = vld [vmem:[#allocation3 + $0xf8] sm:$0xff]  ;;  %v4866_v33 = vrot.slane %v900_v21, 1 }
  0x88   : > { %10509 = vmatmul.mubr.msk.bf16.gmra.mrb[48].mxu1 %vm366_vm0, %v958_v57  ;;  %v14332_v57 = vshrl.u32 %v12380_v5, 16  ;;  %v999_v29 = vshll.u32 %v12380_v5, 16  ;;  %v976_v52 = vsel %vm716_vm1, %v966_v56, %v975_v50  ;;  %v1619_v56 = vrot.slane %v12332_v1, 7 }
  0x89   : > { %10512 = vmatprep.mubr.msk.bf16.mxu1 %vm366_vm0, %v967_v43  ;;  %v989_v43 = vrot.slane %v987_v58, 6  ;;  %v4859_v22 = vsel %vm4719_vm2, %v4854_v25, %v4858_v62  ;;  %v4862_v25 = vor.u32 %v4858_v62, %v888_v34  ;;  %v1623_v63 = vrot.slane %v12380_v5, 7 }
  0x8a   : > { %v998_v15 = vrot.slane %v14332_v57, 6  ;;  %v1001_v44 = vrot.slane %v999_v29, 7  ;;  %v12425_v57 = vsel %vm1561_vm3, %v1617_v39, %v1619_v56  ;;  %v12431_v48 = vsel %vm1561_vm3, %v1619_v56, %v1621_v24 }
  0x8b   : > { %v993_v2 = vor.u32 %v992_v19, %v989_v43  ;;  %v4870_v39 = vor.u32 %v4866_v33, %v897_v49  ;;  %v1518_v49 = vld [vmem:[#allocation3 + $0x100] sm:$0x7f]  ;;  %v12451_v62 = vsel %vm1561_vm3, %v1621_v24, %v1623_v63  ;;  %v4890_v24 = vrot.slane %v927_v17, 1 }
  0x8c   : > { %v4898_v17 = vrot.slane %v936_v26, 1  ;;  %v11683_v26 = vld [vmem:[%s14318_s3 + $0x48] sm:$0xff]  }
  0x8d   : > { %v994_v43 = vsel %vm716_vm1, %v984_v55, %v993_v2 }
  0x8e   : > { %10845 = vmatmul.mubr.msk.bf16.gmra.mrb[24].mxu0 %vm366_vm0, %v4835_v27  ;;  %v985_v27 = vsel %vm716_vm1, %v975_v50, %v984_v55  ;;  %v1002_v50 = vor.u32 %v1001_v44, %v998_v15  ;;  %v12442_v15 = vld [vmem:[#allocation3 + $0x8] sm:$0xff]  ;;  %v4867_v44 = vsel %vm4719_vm2, %v4862_v25, %v4866_v33  ;;  %v4902_v25 = vor.u32 %v4898_v17, %v933_v40 }
  0x8f   : > { %10848 = vmatprep.mubr.msk.bf16.mxu0 %vm366_vm0, %v4843_v11  ;;  %v1008_v11 = vshll.u32 %v707_v61, 16  ;;  %v4874_v61 = vrot.slane %v909_v18, 1  ;;  %v1563_v18 = vrot.slane %v12442_v15, 7 }
  0x90   : > { %10513 = vmatmul.mubr.msk.bf16.gmra.mrb[52].mxu1 %vm366_vm0, %v976_v52  ;;  %v1007_v52 = vrot.slane %v1005_v23, 6  ;;  %v1003_v21 = vsel %vm716_vm1, %v993_v2, %v1002_v50  ;;  %v4882_v23 = vrot.slane %v918_v45, 1  ;;  %v12470_v45 = vld [vmem:[#allocation3 + $0x18] sm:$0xff] }
  0x91   : > { %10516 = vmatprep.mubr.msk.bf16.mxu1 %vm366_vm0, %v985_v27  ;;  %v1010_v19 = vrot.slane %v1008_v11, 7  ;;  %v1486_v27 = vld [vmem:[#allocation3] sm:$0x80]  ;;  %v4875_v9 = vsel %vm4719_vm2, %v4870_v39, %v4874_v61  ;;  %v4878_v56 = vor.u32 %v4874_v61, %v906_v47  ;;  %v5624_v10 = vshrl.u32 %v12470_v45, 16 }
  0x92   : > { %v1562_v55 = vrot.slane %v1486_v27, 7  ;;  %v12489_v39 = vld [vmem:[#allocation3 + $0x20] sm:$0xff]  ;;  %v5626_v27 = vshll.u32 %v12470_v45, 16 }
  0x93   : > { %v1011_v34 = vor.u32 %v1010_v19, %v1007_v52  ;;  %v12468_v52 = vld [vmem:[#allocation3 + $0x10] sm:$0xff]  ;;  %v4883_v7 = vsel %vm4719_vm2, %v4878_v56, %v4882_v23  ;;  %v1569_v8 = vrot.slane %v12489_v39, 7 }
  0x94   : > { %v1564_v33 = vsel %vm1561_vm3, %v1562_v55, %v1563_v18  ;;  %v1565_v47 = vrot.slane %v12468_v52, 7 }
  0x95   : > { %v1012_v11 = vsel %vm716_vm1, %v1002_v50, %v1011_v34  ;;  %v4894_v50 = vor.u32 %v4890_v24, %v924_v42  ;;  %v5635_v42 = vshrl.u32 %v12489_v39, 16 }
  0x96   : > { %10849 = vmatmul.mubr.msk.bf16.gmra.mrb[28].mxu0 %vm366_vm0, %v4851_v20  ;;  %v1625_v20 = vrot.slane %v1518_v49, 7  ;;  %v1566_v19 = vsel %vm1561_vm3, %v1563_v18, %v1565_v47  ;;  %v11687_v49 = vld [vmem:[%s14318_s3 + $0x50] sm:$0xff]  }
  0x97   : > { %10852 = vmatprep.mubr.msk.bf16.mxu0 %vm366_vm0, %v4859_v22  ;;  %v4886_v22 = vor.u32 %v4882_v23, %v915_v35  ;;  %v1567_v35 = vrot.slane %v12470_v45, 7  ;;  %v4899_v40 = vsel %vm4719_vm2, %v4894_v50, %v4898_v17  ;;  %v2302_v34 = vrot.slane %v5635_v42, 7 }
  0x98   : > { %10517 = vmatmul.mubr.msk.bf16.gmra.mrb[56].mxu1 %vm366_vm0, %v994_v43  ;;  %v12460_v2 = vsel %vm1561_vm3, %v1623_v63, %v1625_v20  ;;  %v4906_v43 = vrot.slane %v945_v36, 1  ;;  %v2294_v63 = vrot.slane %v5624_v10, 7  ;;  %v14378_v20 = vshrl.u32 %v12251_v60, 16 }
  0x99   : > { %10520 = vmatprep.mubr.msk.bf16.mxu1 %vm366_vm0, %v1003_v21  ;;  %v4891_v3 = vsel %vm4719_vm2, %v4886_v22, %v4890_v24  ;;  %v1568_v61 = vsel %vm1561_vm3, %v1565_v47, %v1567_v35  ;;  %v12495_v21 = vld [vmem:[#allocation3 + $0x28] sm:$0xff]  ;;  %v1570_v56 = vsel %vm1561_vm3, %v1567_v35, %v1569_v8  ;;  %v12536_v47 = vld [vmem:[#allocation3 + $0x30] sm:$0xff] }
  0x9a   : > { %v4907_v36 = vsel %vm4719_vm2, %v4902_v25, %v4906_v43  ;;  %v12520_v55 = vor.u32 %v5626_v27, %v2294_v63  ;;  %v4910_v23 = vor.u32 %v4906_v43, %v14378_v20  ;;  %v5643_v60 = vshrl.u32 %v12495_v21, 16 }
  0x9b   : > { %v5651_v35 = vshrl.u32 %v12536_v47, 16  ;;  %v5639_v50 = vshll.u32 %v12495_v21, 16  ;;  %v1573_v43 = vrot.slane %v12536_v47, 7 }
  0x9c   : > { %v2310_v25 = vrot.slane %v5643_v60, 7 }
  0x9e   : > { %10853 = vmatmul.mubr.msk.bf16.gmra.mrb[32].mxu0 %vm366_vm0, %v4867_v44  ;;  %v5631_v44 = vshll.u32 %v12489_v39, 16 }
  0x9f   : > { %10856 = vmatprep.mubr.msk.bf16.mxu0 %vm366_vm0, %v4875_v9  ;;  %v1571_v9 = vrot.slane %v12495_v21, 7 }
  0xa0   : > { %10521 = vmatmul.mubr.msk.bf16.gmra.mrb[60].mxu1 %vm366_vm0, %v1012_v11  ;;  %v2305_v18 = vor.u32 %v5631_v44, %v2302_v34  ;;  %v14379_v11 = vshrl.u32 %v12283_v46, 16  ;;  %v12542_v46 = vld [vmem:[#allocation3 + $0x38] sm:$0xff] }
  0xa1   : > { %10532 = vmatprep.mubr.msk.bf16.mxu1 %vm366_vm0, %v1564_v33 }
  0xa2   : > { %v12533_v33 = vsel %vm2270_vm4, %v2294_v63, %v2305_v18  ;;  %v4930_v63 = vrot.slane %v972_v31, 1 }
  0xa6   : > { %10857 = vmatmul.mubr.msk.bf16.gmra.mrb[36].mxu0 %vm366_vm0, %v4883_v7  ;;  %v1572_v7 = vsel %vm1561_vm3, %v1569_v8, %v1571_v9  ;;  %v1575_v8 = vrot.slane %v12542_v46, 7 }
  0xa7   : > { %10860 = vmatprep.mubr.msk.bf16.mxu0 %vm366_vm0, %v4891_v3  ;;  %v11689_v3 = vld [vmem:[%s14318_s3 + $0x58] sm:$0xff]  }
  0xa8   : > { %10533 = vmatmul.mubr.msk.bf16.vlgmr.msra.gmra.mrb[0].mxu1 %vm366_vm0, %v1566_v19 }
  0xa9   : > { %10597 = vmatpush3.bf16.msra.mxu1 %v12107_v41  ;;  %10536 = vmatprep.mubr.msk.bf16.mxu1 %vm366_vm0, %v1568_v61  ;;  %v4914_v41 = vrot.slane %v954_v16, 1  ;;  %v14380_v16 = vshll.u32 %v12285_v59, 16  ;;  %v5647_v61 = vshll.u32 %v12536_v47, 16 }
  0xaa   : > { %10598 = vmatprep.subr.bf16.mxu1 %v11683_v26 }
  0xab   : > { %v4918_v22 = vor.u32 %v4914_v41, %v14379_v11  ;;  %v4922_v24 = vrot.slane %v14380_v16, 1  ;;  %v4915_v17 = vsel %vm4719_vm2, %v4910_v23, %v4914_v41  ;;  %v14381_v41 = vshrl.u32 %v12285_v59, 16 }
  0xac   : > { %v1574_v23 = vsel %vm1561_vm3, %v1571_v9, %v1573_v43  ;;  %v14335_v59 = vshrl.u32 %v12542_v46, 16 }
  0xad   : > { %10599 = vmatpush3.bf16.msra.mxu1 %v11683_v26  ;;  %v4923_v19 = vsel %vm4719_vm2, %v4918_v22, %v4922_v24  ;;  %v2318_v26 = vrot.slane %v5651_v35, 7  ;;  %v4926_v18 = vor.u32 %v4922_v24, %v14381_v41  ;;  %v14383_v22 = vshll.u32 %v12332_v1, 16 }
  0xae   : > { %10861 = vmatmul.mubr.msk.bf16.gmra.mrb[40].mxu0 %vm366_vm0, %v4899_v40  ;;  %10600 = vmatprep.subr.bf16.mxu1 %v11687_v49  ;;  %v12560_v40 = vld [vmem:[%s14318_s3 + $0x60] sm:$0xff]   ;;  %v5655_v24 = vshll.u32 %v12542_v46, 16  ;;  %v4946_v41 = vrot.slane %v990_v38, 1  ;;  %v4954_v38 = vrot.slane %v999_v29, 1 }
  0xaf   : > { %10864 = vmatprep.mubr.msk.bf16.mxu0 %vm366_vm0, %v4907_v36  ;;  %v2313_v36 = vor.u32 %v5639_v50, %v2310_v25  ;;  %v4938_v16 = vrot.slane %v14383_v22, 1  ;;  %v4931_v9 = vsel %vm4719_vm2, %v4926_v18, %v4930_v63 }
  0xb0   : > { %10537 = vmatmul.mubr.msk.bf16.gmra.mrb[4].mxu1 %vm366_vm0, %v1570_v56  ;;  %v14382_v56 = vshrl.u32 %v12319_v13, 16 }
  0xb1   : > { %10540 = vmatprep.mubr.msk.bf16.mxu1 %vm366_vm0, %v1572_v7  ;;  %10601 = vmatpush3.bf16.msra.mxu1 %v11687_v49  ;;  %v2321_v49 = vor.u32 %v5647_v61, %v2318_v26  ;;  %v12573_v20 = vsel %vm2270_vm4, %v2302_v34, %v2313_v36  ;;  %v1576_v7 = vsel %vm1561_vm3, %v1573_v43, %v1575_v8  ;;  %v12588_v34 = vld [vmem:[#allocation3 + $0x48] sm:$0xff] }
  0xb2   : > { %10602 = vmatprep.subr.bf16.mxu1 %v11689_v3  ;;  %v4934_v11 = vor.u32 %v4930_v63, %v14382_v56  ;;  %v5671_v47 = vshll.u32 %v12588_v34, 16 }
  0xb3   : > { %v12581_v31 = vsel %vm2270_vm4, %v2310_v25, %v2321_v49  ;;  %v1579_v49 = vrot.slane %v12588_v34, 7 }
  0xb4   : > { %v4939_v43 = vsel %vm4719_vm2, %v4934_v11, %v4938_v16  ;;  %v4707_v11 = vld [vmem:[#allocation3 + $0x100] sm:$0xff] }
  0xb5   : > { %10603 = vmatpush3.bf16.msra.mxu1 %v11689_v3  ;;  %v2326_v3 = vrot.slane %v14335_v59, 7  ;;  %v4964_v29 = vshrl.u32 %v4707_v11, 16  ;;  %v12649_v59 = vld [vmem:[#allocation3 + $0x68] sm:$0xff] }
  0xb6   : > { %10865 = vmatmul.mubr.msk.bf16.gmra.mrb[44].mxu0 %vm366_vm0, %v4915_v17  ;;  %v12584_v17 = vld [vmem:[#allocation3 + $0x40] sm:$0xff]  ;;  %10668 = vmatprep.subr.bf16.mxu1 %v12560_v40 }
  0xb7   : > { %10868 = vmatprep.mubr.msk.bf16.mxu0 %vm366_vm0, %v4923_v19  ;;  %v14333_v13 = vshrl.u32 %v12584_v17, 16  ;;  %v1577_v25 = vrot.slane %v12584_v17, 7  ;;  %v14334_v19 = vshll.u32 %v12584_v17, 16  ;;  %v2329_v63 = vor.u32 %v5655_v24, %v2326_v3 }
  0xb8   : > { %10541 = vmatmul.mubr.msk.bf16.gmra.mrb[8].mxu1 %vm366_vm0, %v1574_v23  ;;  %v14384_v23 = vshrl.u32 %v12332_v1, 16  ;;  %v4708_v1 = vld [vmem:[#allocation3 + $0x108] sm:$0xff] }
  0xb9   : > { %10544 = vmatprep.mubr.msk.bf16.mxu1 %vm366_vm0, %v1576_v7  ;;  %v12602_v36 = vrot.slane %v14333_v13, 7  ;;  %v12617_v22 = vsel %vm2270_vm4, %v2318_v26, %v2329_v63  ;;  %v1578_v7 = vsel %vm1561_vm3, %v1575_v8, %v1577_v25  ;;  %v4960_v26 = vshll.u32 %v4707_v11, 16 }
  0xba   : > { %v4942_v56 = vor.u32 %v4938_v16, %v14384_v23  ;;  %v12630_v16 = vld [vmem:[#allocation3 + $0x58] sm:$0xff] }
  0xbb   : > { %v2337_v18 = vor.u32 %v14334_v19, %v12602_v36  ;;  %v12628_v19 = vld [vmem:[#allocation3 + $0x50] sm:$0xff]  ;;  %v12639_v63 = vrot.slane %v4960_v26, 1 }
  0xbc   : > { %v4947_v8 = vsel %vm4719_vm2, %v4942_v56, %v4946_v41  ;;  %v1581_v37 = vrot.slane %v12628_v19, 7 }
  0xbd   : > { %v12625_v13 = vsel %vm2270_vm4, %v2326_v3, %v2337_v18  ;;  %v4968_v3 = vshll.u32 %v4708_v1, 16  ;;  %v14385_v18 = vshrl.u32 %v12380_v5, 16  ;;  %v4966_v56 = vor.u32 %v4964_v29, %v12639_v63  ;;  %v11695_v29 = vld [vmem:[%s11825_s13 + $0x18] sm:$0xff]  }
  0xbe   : > { %10869 = vmatmul.mubr.msk.bf16.gmra.mrb[48].mxu0 %vm366_vm0, %v4931_v9  ;;  %v4950_v9 = vor.u32 %v4946_v41, %v987_v58  ;;  %v1582_v41 = vsel %vm1561_vm3, %v1579_v49, %v1581_v37  ;;  %v4972_v5 = vshrl.u32 %v4708_v1, 16  ;;  %386 = vst.msk [vmem:[#allocation3 + $0x118] sm:$0xff] %vm366_vm0, %v11695_v29  ;;  %v12700_v29 = vld [vmem:[#allocation3 + $0x88] sm:$0xff] }
  0xbf   : > { %10872 = vmatprep.mubr.msk.bf16.mxu0 %vm366_vm0, %v4939_v43  ;;  %v1580_v43 = vsel %vm1561_vm3, %v1577_v25, %v1579_v49  ;;  %v1583_v25 = vrot.slane %v12630_v16, 7  ;;  %v4958_v23 = vor.u32 %v4954_v38, %v14385_v18 }
  0xc0   : > { %10545 = vmatmul.mubr.msk.bf16.gmra.mrb[12].mxu1 %vm366_vm0, %v1578_v7  ;;  %v4955_v58 = vsel %vm4719_vm2, %v4950_v9, %v4954_v38  ;;  %v4970_v7 = vrot.slane %v4968_v3, 1  ;;  %v4709_v9 = vld [vmem:[#allocation3 + $0x110] sm:$0x1] }
  0xc1   : > { %10548 = vmatprep.mubr.msk.bf16.mxu1 %vm366_vm0, %v1580_v43  ;;  %v1584_v11 = vsel %vm1561_vm3, %v1581_v37, %v1583_v25  ;;  %v12647_v43 = vld [vmem:[#allocation3 + $0x60] sm:$0xff]  ;;  %v4963_v26 = vsel %vm4719_vm2, %v4958_v23, %v12639_v63  ;;  %v4976_v38 = vshll.u32 %v4709_v9, 16  ;;  %v5628_v37 = vrot.slane %v5626_v27, 1  ;;  %v12677_v9 = vld [vmem:[#allocation3 + $0x78] sm:$0xff] }
  0xc2   : > { %v1585_v49 = vrot.slane %v12647_v43, 7  ;;  %v12666_v1 = vor.u32 %v4972_v5, %v4970_v7 }
  0xc3   : > { %v4978_v3 = vrot.slane %v4976_v38, 1  ;;  %v5629_v23 = vor.u32 %v5628_v37, %v5624_v10  ;;  %v5649_v38 = vrot.slane %v5647_v61, 1  ;;  %v12698_v37 = vld [vmem:[#allocation3 + $0x80] sm:$0xff]  ;;  %v5657_v61 = vrot.slane %v5655_v24, 1  ;;  %v11692_v24 = vld [vmem:[%s14318_s3 + $0xf0] sm:$0xff]  }
  0xc4   : > { %v1586_v18 = vsel %vm1561_vm3, %v1583_v25, %v1585_v49  ;;  %v5641_v25 = vrot.slane %v5639_v50, 1  ;;  %v1595_v50 = vrot.slane %v12700_v29, 7 }
  0xc6   : > { %10873 = vmatmul.mubr.msk.bf16.gmra.mrb[52].mxu0 %vm366_vm0, %v4947_v8  ;;  %v12657_v8 = vsel %vm4719_vm2, %v4966_v56, %v4970_v7  ;;  %v12675_v56 = vld [vmem:[#allocation3 + $0x70] sm:$0xff]  ;;  %v4979_v7 = vsel %vm4719_vm2, %v12666_v1, %v4978_v3  ;;  %v5645_v5 = vor.u32 %v5643_v60, %v5641_v25  ;;  %v11690_v60 = vld [vmem:[%s14318_s3 + $0xe8] sm:$0xff]  }
  0xc7   : > { %10876 = vmatprep.mubr.msk.bf16.mxu0 %vm366_vm0, %v4955_v58  ;;  %v1587_v58 = vrot.slane %v12649_v59, 7  ;;  %v1589_v45 = vrot.slane %v12675_v56, 7 }
  0xc8   : > { %10549 = vmatmul.mubr.msk.bf16.gmra.mrb[16].mxu1 %vm366_vm0, %v1582_v41  ;;  %v5633_v41 = vrot.slane %v5631_v44, 1  ;;  %v1591_v44 = vrot.slane %v12677_v9, 7  ;;  %v5650_v21 = vsel %vm4719_vm2, %v5645_v5, %v5649_v38 }
  0xc9   : > { %10552 = vmatprep.mubr.msk.bf16.mxu1 %vm366_vm0, %v1584_v11  ;;  %v1588_v27 = vsel %vm1561_vm3, %v1585_v49, %v1587_v58 }
  0xca   : > { %v5634_v10 = vsel %vm4719_vm2, %v5629_v23, %v5633_v41  ;;  %v5637_v11 = vor.u32 %v5635_v42, %v5633_v41  ;;  %v1592_v49 = vsel %vm1561_vm3, %v1589_v45, %v1591_v44  ;;  %v1593_v42 = vrot.slane %v12698_v37, 7 }
  0xcb   : > { %v14387_v41 = vshll.u32 %v12584_v17, 16 }
  0xcc   : > { %v5642_v39 = vsel %vm4719_vm2, %v5637_v11, %v5641_v25  ;;  %v1594_v3 = vsel %vm1561_vm3, %v1591_v44, %v1593_v42  ;;  %v5679_v44 = vshll.u32 %v12628_v19, 16  ;;  %v11694_v25 = vld [vmem:[%s14318_s3 + $0xf8] sm:$0xff]   ;;  %v5673_v11 = vrot.slane %v5671_v47, 1 }
  0xce   : > { %10877 = vmatmul.mubr.msk.bf16.gmra.mrb[56].mxu0 %vm366_vm0, %v4963_v26  ;;  %v1590_v26 = vsel %vm1561_vm3, %v1587_v58, %v1589_v45  ;;  %v5653_v58 = vor.u32 %v5651_v35, %v5649_v38 }
  0xcf   : > { %10880 = vmatprep.mubr.msk.bf16.mxu0 %vm366_vm0, %v12657_v8 }
  0xd0   : > { %10553 = vmatmul.mubr.msk.bf16.gmra.mrb[20].mxu1 %vm366_vm0, %v1586_v18  ;;  %v14386_v18 = vshrl.u32 %v12542_v46, 16  ;;  %v5658_v35 = vsel %vm4719_vm2, %v5653_v58, %v5657_v61 }
  0xd1   : > { %10556 = vmatprep.mubr.msk.bf16.mxu1 %vm366_vm0, %v1588_v27  ;;  %v5665_v27 = vrot.slane %v14387_v41, 1 }
  0xd2   : > { %v5661_v23 = vor.u32 %v14386_v18, %v5657_v61  ;;  %v5683_v61 = vshrl.u32 %v12628_v19, 16  ;;  %v5695_v18 = vshll.u32 %v12647_v43, 16  ;;  %v5613_v19 = vld [vmem:[#allocation3 + $0x118] sm:$0x1] }
  0xd4   : > { %v5666_v45 = vsel %vm4719_vm2, %v5661_v23, %v5665_v27 }
  0xd6   : > { %10881 = vmatmul.mubr.msk.bf16.gmra.mrb[60].mxu0 %vm366_vm0, %v4979_v7  ;;  %v12727_v7 = vld [vmem:[#allocation3 + $0x90] sm:$0xff] }
  0xd7   : > { %10892 = vmatprep.mubr.msk.bf16.mxu0 %vm366_vm0, %v5634_v10  ;;  %v1597_v46 = vrot.slane %v12727_v7, 7  ;;  %v5675_v10 = vshrl.u32 %v12588_v34, 16 }
  0xd8   : > { %10557 = vmatmul.mubr.msk.bf16.gmra.mrb[24].mxu1 %vm366_vm0, %v1590_v26  ;;  %v14388_v26 = vshrl.u32 %v12584_v17, 16 }
  0xd9   : > { %10560 = vmatprep.mubr.msk.bf16.mxu1 %vm366_vm0, %v1592_v49  ;;  %v1598_v38 = vsel %vm1561_vm3, %v1595_v50, %v1597_v46  ;;  %v5677_v49 = vor.u32 %v5675_v10, %v5673_v11 }
  0xda   : > { %v5669_v5 = vor.u32 %v14388_v26, %v5665_v27 }
  0xde   : > { %10893 = vmatmul.mubr.msk.bf16.vlgmr.msra.gmra.mrb[0].mxu0 %vm366_vm0, %v5642_v39  ;;  %v5681_v39 = vrot.slane %v5679_v44, 1 }
  0xdf   : > { %10957 = vmatpush3.bf16.msra.mxu0 %v12211_v30  ;;  %10896 = vmatprep.mubr.msk.bf16.mxu0 %vm366_vm0, %v5650_v21  ;;  %v1596_v30 = vsel %vm1561_vm3, %v1593_v42, %v1595_v50  ;;  %v12754_v42 = vld [vmem:[%s14318_s3 + $0x100] sm:$0xff]   ;;  %v14389_v21 = vrot.slane %v12271_v51, 7  ;;  %v5674_v50 = vsel %vm4719_vm2, %v5669_v5, %v5673_v11  ;;  %v5711_v11 = vshll.u32 %v12675_v56, 16 }
  0xe0   : > { %10958 = vmatprep.subr.bf16.mxu0 %v11690_v60  ;;  %10561 = vmatmul.mubr.msk.bf16.gmra.mrb[28].mxu1 %vm366_vm0, %v1594_v3  ;;  %v5682_v58 = vsel %vm4719_vm2, %v5677_v49, %v5681_v39  ;;  %v5691_v3 = vshrl.u32 %v12630_v16, 16  ;;  %v5685_v41 = vor.u32 %v5683_v61, %v5681_v39  ;;  %v5715_v39 = vshrl.u32 %v12675_v56, 16 }
  0xe1   : > { %10564 = vmatprep.mubr.msk.bf16.mxu1 %vm366_vm0, %v1596_v30  ;;  %v1600_v17 = vsel %vm1561_vm3, %v1597_v46, %v14389_v21  ;;  %v5703_v30 = vshll.u32 %v12649_v59, 16  ;;  %v5699_v46 = vshrl.u32 %v12647_v43, 16 }
  0xe2   : > { %v2382_v43 = vrot.slane %v5715_v39, 7 }
  0xe3   : > { %10959 = vmatpush3.bf16.msra.mxu0 %v11690_v60  ;;  %v5687_v60 = vshll.u32 %v12630_v16, 16  ;;  %v5705_v26 = vrot.slane %v5703_v30, 1 }
  0xe4   : > { %10960 = vmatprep.subr.bf16.mxu0 %v11692_v24 }
  0xe5   : > { %v5689_v23 = vrot.slane %v5687_v60, 1 }
  0xe6   : > { %10897 = vmatmul.mubr.msk.bf16.gmra.mrb[4].mxu0 %vm366_vm0, %v5658_v35 }
  0xe7   : > { %10900 = vmatprep.mubr.msk.bf16.mxu0 %vm366_vm0, %v5666_v45  ;;  %10961 = vmatpush3.bf16.msra.mxu0 %v11692_v24  ;;  %v5693_v27 = vor.u32 %v5691_v3, %v5689_v23  ;;  %v5697_v24 = vrot.slane %v5695_v18, 1  ;;  %v5690_v35 = vsel %vm4719_vm2, %v5685_v41, %v5689_v23  ;;  %v14341_v41 = vshll.u32 %v12700_v29, 16 }
  0xe8   : > { %10962 = vmatprep.subr.bf16.mxu0 %v11694_v25  ;;  %10565 = vmatmul.mubr.msk.bf16.gmra.mrb[32].mxu1 %vm366_vm0, %v1598_v38  ;;  %v5719_v38 = vshll.u32 %v12677_v9, 16 }
  0xe9   : > { %10568 = vmatprep.mubr.msk.bf16.mxu1 %vm366_vm0, %v1600_v17  ;;  %v5698_v45 = vsel %vm4719_vm2, %v5693_v27, %v5697_v24  ;;  %v5723_v17 = vshrl.u32 %v12677_v9, 16  ;;  %v14390_v9 = vshrl.u32 %v12700_v29, 16 }
  0xeb   : > { %10963 = vmatpush3.bf16.msra.mxu0 %v11694_v25  ;;  %v5707_v25 = vshrl.u32 %v12649_v59, 16 }
  0xec   : > { %11028 = vmatprep.subr.bf16.mxu0 %v12754_v42 }
  0xed   : > { %v5709_v5 = vor.u32 %v5707_v25, %v5705_v26 }
  0xee   : > { %10901 = vmatmul.mubr.msk.bf16.gmra.mrb[8].mxu0 %vm366_vm0, %v5674_v50  ;;  %v14342_v50 = vshll.u32 %v12698_v37, 16 }
  0xef   : > { %10904 = vmatprep.mubr.msk.bf16.mxu0 %vm366_vm0, %v5682_v58  ;;  %v5721_v58 = vrot.slane %v5719_v38, 1 }
  0xf0   : > { %10569 = vmatmul.mubr.msk.bf16.gmra.mrb[36].mxu1 %vm366_vm0, %v12302_v4  ;;  %v5701_v4 = vor.u32 %v5699_v46, %v5697_v24  ;;  %v5731_v24 = vshrl.u32 %v12698_v37, 16 }
  0xf1   : > { %10572 = vmatprep.mubr.msk.bf16.mxu1 %vm366_vm0, %v12322_v0  ;;  %v5713_v0 = vrot.slane %v5711_v11, 1  ;;  %v5725_v23 = vor.u32 %v5723_v17, %v5721_v58 }
  0xf2   : > { %v5706_v49 = vsel %vm4719_vm2, %v5701_v4, %v5705_v26  ;;  %v14338_v26 = vshll.u32 %v12727_v7, 16  ;;  %v5737_v4 = vrot.slane %v14341_v41, 1  ;;  %v2398_v56 = vrot.slane %v5731_v24, 7 }
  0xf3   : > { %v5714_v21 = vsel %vm4719_vm2, %v5709_v5, %v5713_v0 }
  0xf6   : > { %10905 = vmatmul.mubr.msk.bf16.gmra.mrb[12].mxu0 %vm366_vm0, %v5690_v35 }
  0xf7   : > { %10908 = vmatprep.mubr.msk.bf16.mxu0 %vm366_vm0, %v5698_v45  ;;  %v14347_v45 = vshrl.u32 %v12700_v29, 16 }
  0xf8   : > { %10573 = vmatmul.mubr.msk.bf16.gmra.mrb[40].mxu1 %vm366_vm0, %v12325_v12  ;;  %v5717_v12 = vor.u32 %v5715_v39, %v5713_v0  ;;  %v12838_v0 = vld [vmem:[#allocation3 + $0xa0] sm:$0xff] }
  0xf9   : > { %10576 = vmatprep.mubr.msk.bf16.mxu1 %vm366_vm0, %v12343_v53  ;;  %v5729_v53 = vrot.slane %v14342_v50, 1  ;;  %v5741_v5 = vor.u32 %v14347_v45, %v5737_v4  ;;  %v12888_v50 = vld [vmem:[#allocation3 + $0xc0] sm:$0xff] }
  0xfa   : > { %v5722_v27 = vsel %vm4719_vm2, %v5717_v12, %v5721_v58  ;;  %v14340_v58 = vshrl.u32 %v12727_v7, 16 }
  0xfb   : > { %v5730_v35 = vsel %vm4719_vm2, %v5725_v23, %v5729_v53  ;;  %v14339_v23 = vshrl.u32 %v12271_v51, 16 }
  0xfe   : > { %10909 = vmatmul.mubr.msk.bf16.gmra.mrb[16].mxu0 %vm366_vm0, %v5706_v49  ;;  %v14336_v49 = vshll.u32 %v12271_v51, 16 }
  0xff   : > { %10912 = vmatprep.mubr.msk.bf16.mxu0 %vm366_vm0, %v5714_v21 }
 0x100   : > { %10577 = vmatmul.mubr.msk.bf16.gmra.mrb[44].mxu1 %vm366_vm0, %v12349_v6  ;;  %v5733_v6 = vor.u32 %v5731_v24, %v5729_v53  ;;  %v14337_v53 = vshll.u32 %v12838_v0, 16  ;;  %v11699_v24 = vld [vmem:[%s14318_s3 + $0x108] sm:$0xff]  }
 0x101   : > { %10580 = vmatprep.mubr.msk.bf16.mxu1 %vm366_vm0, %v12363_v14  ;;  %v5745_v14 = vrot.slane %v14338_v26, 1  ;;  %v2276_v26 = vshrl.u32 %v12442_v15, 16 }
 0x102   : > { %v5738_v21 = vsel %vm4719_vm2, %v5733_v6, %v5737_v4  ;;  %v5761_v4 = vrot.slane %v14337_v53, 1  ;;  %v12862_v6 = vld [vmem:[#allocation3 + $0xb0] sm:$0xff] }
 0x103   : > { %v5746_v12 = vsel %vm4719_vm2, %v5741_v5, %v5745_v14  ;;  %v14344_v53 = vshll.u32 %v12862_v6, 16  ;;  %v2278_v41 = vrot.slane %v2276_v26, 7 }
 0x106   : > { %10913 = vmatmul.mubr.msk.bf16.gmra.mrb[20].mxu0 %vm366_vm0, %v5722_v27  ;;  %v5753_v27 = vrot.slane %v14336_v49, 1 }
 0x107   : > { %10916 = vmatprep.mubr.msk.bf16.mxu0 %vm366_vm0, %v5730_v35  ;;  %v12856_v35 = vld [vmem:[#allocation3 + $0xa8] sm:$0xff] }
 0x108   : > { %10581 = vmatmul.mubr.msk.bf16.gmra.mrb[48].mxu1 %vm366_vm0, %v12366_v32  ;;  %v5749_v32 = vor.u32 %v14340_v58, %v5745_v14  ;;  %v14343_v5 = vshll.u32 %v12856_v35, 16  ;;  %v14345_v49 = vshrl.u32 %v12856_v35, 16 }
 0x109   : > { %10584 = vmatprep.mubr.msk.bf16.mxu1 %vm366_vm0, %v12395_v54  ;;  %v5757_v54 = vor.u32 %v14339_v23, %v5753_v27  ;;  %v2228_v23 = vld [vmem:[#allocation3] sm:$0x80] }
 0x10a   : > { %v2272_v58 = vshrl.u32 %v2228_v23, 16  ;;  %v14349_v23 = vshll.u32 %v12888_v50, 16 }
 0x10b   : > { %v5762_v14 = vsel %vm4719_vm2, %v5757_v54, %v5761_v4  ;;  %v5777_v54 = vrot.slane %v14344_v53, 1  ;;  %v2284_v53 = vshrl.u32 %v12468_v52, 16 }
 0x10e   : > { %10917 = vmatmul.mubr.msk.bf16.gmra.mrb[24].mxu0 %vm366_vm0, %v5738_v21  ;;  %v5754_v21 = vsel %vm4719_vm2, %v5749_v32, %v5753_v27 }
 0x10f   : > { %10920 = vmatprep.mubr.msk.bf16.mxu0 %vm366_vm0, %v5746_v12  ;;  %v14346_v12 = vshrl.u32 %v12838_v0, 16 }
 0x110   : > { %10585 = vmatmul.mubr.msk.bf16.gmra.mrb[52].mxu1 %vm366_vm0, %v12399_v28  ;;  %v5769_v28 = vrot.slane %v14343_v5, 1 }
 0x111   : > { %10588 = vmatprep.mubr.msk.bf16.mxu1 %vm366_vm0, %v12425_v57  ;;  %v5765_v27 = vor.u32 %v14346_v12, %v5761_v4  ;;  %v12881_v57 = vld [vmem:[#allocation3 + $0xb8] sm:$0xff] }
 0x112   : > { %v5773_v32 = vor.u32 %v14345_v49, %v5769_v28  ;;  %v14348_v5 = vshll.u32 %v12881_v57, 16  ;;  %v2274_v49 = vrot.slane %v2272_v58, 7  ;;  %v5793_v58 = vrot.slane %v14349_v23, 1 }
 0x113   : > { %v5770_v4 = vsel %vm4719_vm2, %v5765_v27, %v5769_v28  ;;  %v12907_v28 = vld [vmem:[#allocation3 + $0xc8] sm:$0xff]  ;;  %v2286_v27 = vrot.slane %v2284_v53, 7  ;;  %v5795_v53 = vshrl.u32 %v12888_v50, 16 }
 0x114   : > { %v5778_v26 = vsel %vm4719_vm2, %v5773_v32, %v5777_v54  ;;  %v2287_v32 = vshll.u32 %v12468_v52, 16  ;;  %v5803_v23 = vshrl.u32 %v12907_v28, 16 }
 0x116   : > { %10921 = vmatmul.mubr.msk.bf16.gmra.mrb[28].mxu0 %vm366_vm0, %v5754_v21  ;;  %v2279_v21 = vshll.u32 %v12442_v15, 16  ;;  %v5787_v15 = vshrl.u32 %v12881_v57, 16  ;;  %v2289_v52 = vor.u32 %v2287_v32, %v2286_v27 }
 0x117   : > { %10924 = vmatprep.mubr.msk.bf16.mxu0 %vm366_vm0, %v5762_v14  ;;  %v5779_v14 = vshrl.u32 %v12862_v6, 16 }
 0x118   : > { %10589 = vmatmul.mubr.msk.bf16.gmra.mrb[56].mxu1 %vm366_vm0, %v12431_v48  ;;  %v2281_v12 = vor.u32 %v2279_v21, %v2278_v41  ;;  %v5785_v48 = vrot.slane %v14348_v5, 1 }
 0x119   : > { %10592 = vmatprep.mubr.msk.bf16.mxu1 %vm366_vm0, %v12451_v62  ;;  %v5781_v62 = vor.u32 %v5779_v14, %v5777_v54 }
 0x11a   : > { %v5789_v45 = vor.u32 %v5787_v15, %v5785_v48  ;;  %v2282_v21 = vsel %vm2270_vm4, %v2274_v49, %v2281_v12 }
 0x11b   : > { %v5786_v54 = vsel %vm4719_vm2, %v5781_v62, %v5785_v48  ;;  %v12932_v48 = vld [vmem:[#allocation3 + $0xd8] sm:$0xff]  ;;  %v2290_v62 = vsel %vm2270_vm4, %v2278_v41, %v2289_v52 }
 0x11c   : > { %v5794_v5 = vsel %vm4719_vm2, %v5789_v45, %v5793_v58 }
 0x11e   : > { %10925 = vmatmul.mubr.msk.bf16.gmra.mrb[32].mxu0 %vm366_vm0, %v5770_v4  ;;  %v12915_v4 = vld [vmem:[#allocation3 + $0xd0] sm:$0xff] }
 0x11f   : > { %10928 = vmatprep.mubr.msk.bf16.mxu0 %vm366_vm0, %v5778_v26  ;;  %v14351_v26 = vshll.u32 %v12907_v28, 16  ;;  %v14350_v49 = vshll.u32 %v12915_v4, 16  ;;  %v5811_v52 = vshrl.u32 %v12915_v4, 16 }
 0x120   : > { %10593 = vmatmul.mubr.msk.bf16.gmra.mrb[60].mxu1 %vm366_vm0, %v12460_v2  ;;  %v5797_v2 = vor.u32 %v5795_v53, %v5793_v58  ;;  %v14352_v58 = vshll.u32 %v12932_v48, 16 }
 0x121   : > { %10604 = vmatprep.mubr.msk.bf16.mxu1 %vm366_vm0, %v2282_v21  ;;  %v5801_v12 = vrot.slane %v14351_v26, 1  ;;  %v5809_v32 = vrot.slane %v14350_v49, 1  ;;  %v2298_v21 = vsel %vm2270_vm4, %v2286_v27, %v12520_v55  ;;  %v14354_v27 = vshrl.u32 %v12932_v48, 16  ;;  %v11696_v26 = vld [vmem:[%s14318_s3 + $0x70] sm:$0xff]  }
 0x123   : > { %v5805_v45 = vor.u32 %v5803_v23, %v5801_v12  ;;  %v5802_v41 = vsel %vm4719_vm2, %v5797_v2, %v5801_v12  ;;  %v5817_v12 = vrot.slane %v14352_v58, 1  ;;  %v12964_v2 = vld [vmem:[#allocation3 + $0xe8] sm:$0xff] }
 0x125   : > { %v5810_v55 = vsel %vm4719_vm2, %v5805_v45, %v5809_v32 }
 0x126   : > { %10929 = vmatmul.mubr.msk.bf16.gmra.mrb[36].mxu0 %vm366_vm0, %v5786_v54  ;;  %v12941_v54 = vld [vmem:[#allocation3 + $0xe0] sm:$0xff] }
 0x127   : > { %10932 = vmatprep.mubr.msk.bf16.mxu0 %vm366_vm0, %v5794_v5  ;;  %v11693_v5 = vld [vmem:[%s14318_s3 + $0x68] sm:$0xff]   ;;  %v14353_v49 = vshll.u32 %v12941_v54, 16  ;;  %v5827_v58 = vshrl.u32 %v12941_v54, 16 }
 0x128   : > { %10605 = vmatmul.mubr.msk.bf16.vlgmr.msra.gmra.mrb[0].mxu1 %vm366_vm0, %v2290_v62  ;;  %v5821_v62 = vor.u32 %v14354_v27, %v5817_v12 }
 0x129   : > { %10669 = vmatpush3.bf16.msra.mxu1 %v12560_v40  ;;  %10608 = vmatprep.mubr.msk.bf16.mxu1 %vm366_vm0, %v2298_v21  ;;  %v5813_v40 = vor.u32 %v5811_v52, %v5809_v32  ;;  %v5825_v45 = vrot.slane %v14353_v49, 1  ;;  %v12970_v21 = vld [vmem:[#allocation3 + $0xf0] sm:$0xff]  ;;  %v14357_v49 = vshrl.u32 %v12964_v2, 16 }
 0x12a   : > { %10670 = vmatprep.subr.bf16.mxu1 %v11693_v5  ;;  %v14355_v27 = vshll.u32 %v12970_v21, 16 }
 0x12b   : > { %v5818_v32 = vsel %vm4719_vm2, %v5813_v40, %v5817_v12  ;;  %v5829_v12 = vor.u32 %v5827_v58, %v5825_v45  ;;  %v12991_v40 = vld [vmem:[#allocation3 + $0xf8] sm:$0xff] }
 0x12d   : > { %10671 = vmatpush3.bf16.msra.mxu1 %v11693_v5  ;;  %v5826_v5 = vsel %vm4719_vm2, %v5821_v62, %v5825_v45  ;;  %v5841_v62 = vrot.slane %v14355_v27, 1  ;;  %v5847_v45 = vshll.u32 %v12991_v40, 16  ;;  %v5843_v27 = vshrl.u32 %v12970_v21, 16 }
 0x12e   : > { %10933 = vmatmul.mubr.msk.bf16.gmra.mrb[40].mxu0 %vm366_vm0, %v5802_v41  ;;  %10672 = vmatprep.subr.bf16.mxu1 %v11696_v26  ;;  %v11698_v41 = vld [vmem:[%s14318_s3 + $0x78] sm:$0xff]  }
 0x12f   : > { %10936 = vmatprep.mubr.msk.bf16.mxu0 %vm366_vm0, %v5810_v55  ;;  %v14356_v55 = vshll.u32 %v12964_v2, 16 }
 0x130   : > { %10609 = vmatmul.mubr.msk.bf16.gmra.mrb[4].mxu1 %vm366_vm0, %v12533_v33 }
 0x131   : > { %10612 = vmatprep.mubr.msk.bf16.mxu1 %vm366_vm0, %v12573_v20  ;;  %10673 = vmatpush3.bf16.msra.mxu1 %v11696_v26  ;;  %v5833_v33 = vrot.slane %v14356_v55, 1  ;;  %v2342_v26 = vrot.slane %v5675_v10, 7 }
 0x132   : > { %10674 = vmatprep.subr.bf16.mxu1 %v11698_v41 }
 0x133   : > { %v5837_v20 = vor.u32 %v14357_v49, %v5833_v33  ;;  %v2345_v55 = vor.u32 %v5671_v47, %v2342_v26  ;;  %v5849_v49 = vrot.slane %v5847_v45, 1  ;;  %v2358_v47 = vrot.slane %v5691_v3, 7 }
 0x135   : > { %10675 = vmatpush3.bf16.msra.mxu1 %v11698_v41  ;;  %v5842_v10 = vsel %vm4719_vm2, %v5837_v20, %v5841_v62  ;;  %v5851_v41 = vshrl.u32 %v12991_v40, 16  ;;  %v2346_v34 = vsel %vm2270_vm4, %v12602_v36, %v2345_v55  ;;  %v2361_v3 = vor.u32 %v5687_v60, %v2358_v47 }
 0x136   : > { %10937 = vmatmul.mubr.msk.bf16.gmra.mrb[44].mxu0 %vm366_vm0, %v5818_v32  ;;  %v13002_v32 = vld [vmem:[%s14318_s3 + $0x80] sm:$0xff]   ;;  %v5879_v60 = vshll.u32 %v5613_v19, 16  ;;  %v13100_v19 = vld [vmem:[#allocation3 + $0x38] sm:$0xff] }
 0x137   : > { %10940 = vmatprep.mubr.msk.bf16.mxu0 %vm366_vm0, %v5826_v5  ;;  %11100 = vmatprep.subr.bf16.mxu1 %v13002_v32  ;;  %v5834_v5 = vsel %vm4719_vm2, %v5829_v12, %v5833_v33  ;;  %v5853_v33 = vor.u32 %v5851_v41, %v5849_v49  ;;  %v13030_v12 = vld [vmem:[#allocation3 + $0x110] sm:$0xff] }
 0x138   : > { %10613 = vmatmul.mubr.msk.bf16.gmra.mrb[8].mxu1 %vm366_vm0, %v12581_v31  ;;  %v5845_v31 = vor.u32 %v5843_v27, %v5841_v62  ;;  %v5871_v36 = vshll.u32 %v13030_v12, 16  ;;  %v5875_v16 = vshrl.u32 %v13030_v12, 16 }
 0x139   : > { %10616 = vmatprep.mubr.msk.bf16.mxu1 %vm366_vm0, %v12617_v22  ;;  %v2350_v22 = vrot.slane %v5683_v61, 7  ;;  %v5858_v62 = vsel %vm4719_vm2, %v5853_v33, %v12639_v63  ;;  %v2374_v63 = vrot.slane %v5707_v25, 7 }
 0x13a   : > { %v5850_v20 = vsel %vm4719_vm2, %v5845_v31, %v5849_v49  ;;  %v2366_v49 = vrot.slane %v5699_v46, 7  ;;  %v5873_v55 = vrot.slane %v5871_v36, 1  ;;  %v13060_v31 = vld [vmem:[#allocation3 + $0x20] sm:$0xff] }
 0x13b   : > { %v2353_v61 = vor.u32 %v5679_v44, %v2350_v22  ;;  %v2362_v44 = vsel %vm2270_vm4, %v2350_v22, %v2361_v3  ;;  %v5881_v22 = vrot.slane %v5879_v60, 1 }
 0x13c   : > { %v5874_v46 = vsel %vm4719_vm2, %v12666_v1, %v5873_v55  ;;  %v5877_v25 = vor.u32 %v5875_v16, %v5873_v55  ;;  %v6561_v1 = vrot.slane %v13060_v31, 1  ;;  %v13107_v16 = vld [vmem:[#allocation3 + $0x40] sm:$0xff] }
 0x13e   : > { %10941 = vmatmul.mubr.msk.bf16.gmra.mrb[48].mxu0 %vm366_vm0, %v5834_v5  ;;  %v2377_v5 = vor.u32 %v5703_v30, %v2374_v63  ;;  %v2390_v30 = vrot.slane %v5723_v17, 7 }
 0x13f   : > { %10944 = vmatprep.mubr.msk.bf16.mxu0 %vm366_vm0, %v5842_v10  ;;  %v6484_v10 = vld [vmem:[#allocation3 + $0x18] sm:$0xfe] }
 0x140   : > { %10617 = vmatmul.mubr.msk.bf16.gmra.mrb[12].mxu1 %vm366_vm0, %v12625_v13  ;;  %v2354_v13 = vsel %vm2270_vm4, %v2342_v26, %v2353_v61  ;;  %v2369_v26 = vor.u32 %v5695_v18, %v2366_v49  ;;  %v6560_v18 = vrot.slane %v6484_v10, 1  ;;  %v2378_v59 = vsel %vm2270_vm4, %v2366_v49, %v2377_v5  ;;  %v13082_v61 = vld [vmem:[#allocation3 + $0x30] sm:$0xff] }
 0x141   : > { %10620 = vmatprep.mubr.msk.bf16.mxu1 %vm366_vm0, %v2346_v34  ;;  %v2385_v34 = vor.u32 %v5711_v11, %v2382_v43  ;;  %v6565_v11 = vrot.slane %v13082_v61, 1  ;;  %v6569_v5 = vrot.slane %v13107_v16, 1 }
 0x142   : > { %v2370_v33 = vsel %vm2270_vm4, %v2358_v47, %v2369_v26  ;;  %v6562_v39 = vsel %vm6559_vm5, %v6560_v18, %v6561_v1  ;;  %v13078_v47 = vld [vmem:[#allocation3 + $0x28] sm:$0xff]  ;;  %v14393_v26 = vshrl.u32 %v12727_v7, 16 }
 0x143   : > { %v6563_v17 = vrot.slane %v13078_v47, 1 }
 0x145   : > { %v6564_v3 = vsel %vm6559_vm5, %v6561_v1, %v6563_v17  ;;  %v6566_v55 = vsel %vm6559_vm5, %v6563_v17, %v6565_v11  ;;  %v13129_v1 = vld [vmem:[#allocation3 + $0x48] sm:$0xff] }
 0x146   : > { %10945 = vmatmul.mubr.msk.bf16.gmra.mrb[52].mxu0 %vm366_vm0, %v5850_v20  ;;  %v2393_v20 = vor.u32 %v5719_v38, %v2390_v30  ;;  %v2406_v38 = vrot.slane %v14390_v9, 7  ;;  %v14399_v9 = vshll.u32 %v12838_v0, 16 }
 0x147   : > { %10948 = vmatprep.mubr.msk.bf16.mxu0 %vm366_vm0, %v5858_v62  ;;  %v2386_v62 = vsel %vm2270_vm4, %v2374_v63, %v2385_v34  ;;  %v13136_v34 = vld [vmem:[#allocation3 + $0x50] sm:$0xff] }
 0x148   : > { %10621 = vmatmul.mubr.msk.bf16.gmra.mrb[16].mxu1 %vm366_vm0, %v2354_v13  ;;  %v2394_v36 = vsel %vm2270_vm4, %v2382_v43, %v2393_v20  ;;  %v14391_v13 = vshll.u32 %v12698_v37, 16  ;;  %v6567_v37 = vrot.slane %v13100_v19, 1  ;;  %v14397_v20 = vshrl.u32 %v12838_v0, 16 }
 0x149   : > { %10624 = vmatprep.mubr.msk.bf16.mxu1 %vm366_vm0, %v2362_v44  ;;  %v14392_v44 = vshll.u32 %v12700_v29, 16  ;;  %v11700_v29 = vld [vmem:[%s14318_s3 + $0x110] sm:$0xff]  }
 0x14a   : > { %v2401_v49 = vor.u32 %v14391_v13, %v2398_v56  ;;  %v6570_v18 = vsel %vm6559_vm5, %v6567_v37, %v6569_v5  ;;  %v2430_v17 = vrot.slane %v14397_v20, 7  ;;  %v13154_v13 = vld [vmem:[#allocation3 + $0x58] sm:$0xff] }
 0x14b   : > { %v2409_v63 = vor.u32 %v14392_v44, %v2406_v38  ;;  %v6575_v44 = vrot.slane %v13154_v13, 1 }
 0x14c   : > { %v2402_v60 = vsel %vm2270_vm4, %v2390_v30, %v2401_v49  ;;  %v14396_v30 = vshll.u32 %v12271_v51, 16  ;;  %v14400_v49 = vshll.u32 %v12856_v35, 16 }
 0x14d   : > { %v2410_v10 = vsel %vm2270_vm4, %v2398_v56, %v2409_v63  ;;  %v14398_v56 = vshrl.u32 %v12856_v35, 16 }
 0x14e   : > { %10949 = vmatmul.mubr.msk.bf16.gmra.mrb[56].mxu0 %vm366_vm0, %v12657_v8  ;;  %v5882_v8 = vsel %vm4719_vm2, %v5877_v25, %v5881_v22  ;;  %v6568_v22 = vsel %vm6559_vm5, %v6565_v11, %v6567_v37  ;;  %v2446_v37 = vrot.slane %v5779_v14, 7  ;;  %v14402_v14 = vshll.u32 %v12881_v57, 16 }
 0x14f   : > { %10952 = vmatprep.mubr.msk.bf16.mxu0 %vm366_vm0, %v5874_v46  ;;  %v2414_v46 = vrot.slane %v14393_v26, 7  ;;  %v2438_v11 = vrot.slane %v14398_v56, 7  ;;  %v13202_v56 = vld [vmem:[#allocation3 + $0x80] sm:$0xff] }
 0x150   : > { %10625 = vmatmul.mubr.msk.bf16.gmra.mrb[20].mxu1 %vm366_vm0, %v2370_v33  ;;  %v14395_v33 = vshll.u32 %v12727_v7, 16  ;;  %v6571_v7 = vrot.slane %v13129_v1, 1 }
 0x151   : > { %10628 = vmatprep.mubr.msk.bf16.mxu1 %vm366_vm0, %v2378_v59  ;;  %v11701_v59 = vld [vmem:[%s14318_s3 + $0x118] sm:$0xff]  }
 0x152   : > { %v2417_v43 = vor.u32 %v14395_v33, %v2414_v46  ;;  %v13180_v33 = vld [vmem:[#allocation3 + $0x70] sm:$0xff] }
 0x156   : > { %10953 = vmatmul.mubr.msk.bf16.gmra.mrb[60].mxu0 %vm366_vm0, %v5882_v8 }
 0x157   : > { %10964 = vmatprep.mubr.msk.bf16.mxu0 %vm366_vm0, %v6562_v39  ;;  %v2418_v39 = vsel %vm2270_vm4, %v2406_v38, %v2417_v43  ;;  %v2433_v38 = vor.u32 %v14399_v9, %v2430_v17  ;;  %v6585_v9 = vrot.slane %v13202_v56, 1 }
 0x158   : > { %10629 = vmatmul.mubr.msk.bf16.gmra.mrb[24].mxu1 %vm366_vm0, %v2386_v62  ;;  %v6573_v62 = vrot.slane %v13136_v34, 1 }
 0x159   : > { %10632 = vmatprep.mubr.msk.bf16.mxu1 %vm366_vm0, %v2394_v36  ;;  %v6572_v36 = vsel %vm6559_vm5, %v6569_v5, %v6571_v7 }
 0x15a   : > { %v6576_v5 = vsel %vm6559_vm5, %v6573_v62, %v6575_v44 }
 0x15e   : > { %10965 = vmatmul.mubr.msk.bf16.vlgmr.msra.gmra.mrb[0].mxu0 %vm366_vm0, %v6564_v3  ;;  %v6574_v3 = vsel %vm6559_vm5, %v6571_v7, %v6573_v62  ;;  %v13198_v62 = vld [vmem:[#allocation3 + $0x78] sm:$0xff] }
 0x15f   : > { %11029 = vmatpush3.bf16.msra.mxu0 %v12754_v42  ;;  %10968 = vmatprep.mubr.msk.bf16.mxu0 %vm366_vm0, %v6566_v55  ;;  %v14394_v42 = vshrl.u32 %v12271_v51, 16  ;;  %v2441_v55 = vor.u32 %v14400_v49, %v2438_v11 }
 0x160   : > { %11030 = vmatprep.subr.bf16.mxu0 %v11699_v24  ;;  %10633 = vmatmul.mubr.msk.bf16.gmra.mrb[28].mxu1 %vm366_vm0, %v2402_v60 }
 0x161   : > { %v2422_v25 = vrot.slane %v14394_v42, 7  ;;  %10636 = vmatprep.mubr.msk.bf16.mxu1 %vm366_vm0, %v2410_v10  ;;  %v2442_v26 = vsel %vm2270_vm4, %v2430_v17, %v2441_v55 }
 0x163   : > { %11031 = vmatpush3.bf16.msra.mxu0 %v11699_v24  ;;  %v2425_v8 = vor.u32 %v14396_v30, %v2422_v25  ;;  %v13158_v24 = vld [vmem:[#allocation3 + $0x60] sm:$0xff]  ;;  %v2434_v63 = vsel %vm2270_vm4, %v2422_v25, %v2433_v38  ;;  %v13176_v25 = vld [vmem:[#allocation3 + $0x68] sm:$0xff] }
 0x164   : > { %11032 = vmatprep.subr.bf16.mxu0 %v11700_v29  ;;  %v6577_v60 = vrot.slane %v13158_v24, 1 }
 0x165   : > { %v2426_v51 = vsel %vm2270_vm4, %v2414_v46, %v2425_v8  ;;  %v2454_v46 = vrot.slane %v5787_v15, 7  ;;  %v6579_v15 = vrot.slane %v13176_v25, 1  ;;  %v2470_v8 = vrot.slane %v5803_v23, 7 }
 0x166   : > { %10969 = vmatmul.mubr.msk.bf16.gmra.mrb[4].mxu0 %vm366_vm0, %v6568_v22  ;;  %v6578_v42 = vsel %vm6559_vm5, %v6575_v44, %v6577_v60  ;;  %v6583_v23 = vrot.slane %v13198_v62, 1  ;;  %v14406_v44 = vshll.u32 %v12915_v4, 16 }
 0x167   : > { %10972 = vmatprep.mubr.msk.bf16.mxu0 %vm366_vm0, %v6570_v18  ;;  %11033 = vmatpush3.bf16.msra.mxu0 %v11700_v29  ;;  %v14401_v29 = vshll.u32 %v12862_v6, 16  ;;  %v2457_v22 = vor.u32 %v14402_v14, %v2454_v46  ;;  %v2462_v18 = vrot.slane %v5795_v53, 7  ;;  %v6580_v7 = vsel %vm6559_vm5, %v6577_v60, %v6579_v15  ;;  %v13220_v60 = vld [vmem:[#allocation3 + $0x88] sm:$0xff] }
 0x168   : > { %11034 = vmatprep.subr.bf16.mxu0 %v11701_v59  ;;  %10637 = vmatmul.mubr.msk.bf16.gmra.mrb[32].mxu1 %vm366_vm0, %v2418_v39  ;;  %v14403_v39 = vshll.u32 %v12888_v50, 16  ;;  %v14404_v53 = vshll.u32 %v12907_v28, 16 }
 0x169   : > { %10640 = vmatprep.mubr.msk.bf16.mxu1 %vm366_vm0, %v2426_v51  ;;  %v2449_v10 = vor.u32 %v14401_v29, %v2446_v37  ;;  %v2458_v30 = vsel %vm2270_vm4, %v2446_v37, %v2457_v22  ;;  %v6586_v37 = vsel %vm6559_vm5, %v6583_v23, %v6585_v9  ;;  %v14408_v22 = vshrl.u32 %v12964_v2, 16 }
 0x16a   : > { %v2465_v20 = vor.u32 %v14403_v39, %v2462_v18  ;;  %v2473_v51 = vor.u32 %v14404_v53, %v2470_v8  ;;  %v6593_v53 = vrot.slane %v12838_v0, 1 }
 0x16b   : > { %11035 = vmatpush3.bf16.msra.mxu0 %v11701_v59  ;;  %v2450_v43 = vsel %vm2270_vm4, %v2438_v11, %v2449_v10  ;;  %v6581_v59 = vrot.slane %v13180_v33, 1  ;;  %v2494_v10 = vrot.slane %v5827_v58, 7  ;;  %v14410_v58 = vshll.u32 %v12964_v2, 16 }
 0x16c   : > { %v2466_v11 = vsel %vm2270_vm4, %v2454_v46, %v2465_v20  ;;  %v2474_v38 = vsel %vm2270_vm4, %v2462_v18, %v2473_v51  ;;  %v13224_v46 = vld [vmem:[#allocation3 + $0x90] sm:$0xff]  ;;  %v14409_v18 = vshll.u32 %v12941_v54, 16 }
 0x16d   : > { %v6582_v17 = vsel %vm6559_vm5, %v6579_v15, %v6581_v59  ;;  %v6584_v55 = vsel %vm6559_vm5, %v6581_v59, %v6583_v23  ;;  %v2502_v15 = vrot.slane %v14408_v22, 7  ;;  %v2518_v23 = vrot.slane %v5851_v41, 7 }
 0x16e   : > { %10973 = vmatmul.mubr.msk.bf16.gmra.mrb[8].mxu0 %vm366_vm0, %v6572_v36  ;;  %v2478_v36 = vrot.slane %v5811_v52, 7  ;;  %v14407_v52 = vshll.u32 %v12932_v48, 16  ;;  %v2497_v59 = vor.u32 %v14409_v18, %v2494_v10  ;;  %v3195_v18 = vshrl.u32 %v13060_v31, 16 }
 0x16f   : > { %10976 = vmatprep.mubr.msk.bf16.mxu0 %vm366_vm0, %v6574_v3  ;;  %v14405_v3 = vshrl.u32 %v12932_v48, 16 }
 0x170   : > { %10641 = vmatmul.mubr.msk.bf16.gmra.mrb[36].mxu1 %vm366_vm0, %v2434_v63  ;;  %v2481_v63 = vor.u32 %v14406_v44, %v2478_v36  ;;  %v6595_v44 = vrot.slane %v12856_v35, 1 }
 0x171   : > { %10644 = vmatprep.mubr.msk.bf16.mxu1 %vm366_vm0, %v2442_v26  ;;  %v2486_v49 = vrot.slane %v14405_v3, 7 }
 0x172   : > { %v2482_v29 = vsel %vm2270_vm4, %v2470_v8, %v2481_v63  ;;  %v13242_v8 = vld [vmem:[#allocation3 + $0x98] sm:$0xff] }
 0x173   : > { %v2489_v26 = vor.u32 %v14407_v52, %v2486_v49  ;;  %v6591_v39 = vrot.slane %v13242_v8, 1  ;;  %v2498_v20 = vsel %vm2270_vm4, %v2486_v49, %v2497_v59  ;;  %v2521_v49 = vor.u32 %v5847_v45, %v2518_v23 }
 0x174   : > { %v6599_v59 = vrot.slane %v12881_v57, 1 }
 0x175   : > { %v2490_v14 = vsel %vm2270_vm4, %v2478_v36, %v2489_v26  ;;  %v3133_v36 = vld [vmem:[#allocation3 + $0x10] sm:$0xff]  ;;  %v6594_v0 = vsel %vm6559_vm5, %v6591_v39, %v6593_v53  ;;  %v6597_v26 = vrot.slane %v12862_v6, 1 }
 0x176   : > { %10977 = vmatmul.mubr.msk.bf16.gmra.mrb[12].mxu0 %vm366_vm0, %v6576_v5  ;;  %v6587_v5 = vrot.slane %v13220_v60, 1  ;;  %v3179_v41 = vshrl.u32 %v3133_v36, 16 }
 0x177   : > { %10980 = vmatprep.mubr.msk.bf16.mxu0 %vm366_vm0, %v6578_v42  ;;  %v6589_v42 = vrot.slane %v13224_v46, 1 }
 0x178   : > { %10645 = vmatmul.mubr.msk.bf16.gmra.mrb[40].mxu1 %vm366_vm0, %v2450_v43  ;;  %v6588_v43 = vsel %vm6559_vm5, %v6585_v9, %v6587_v5  ;;  %v3181_v45 = vrot.slane %v3179_v41, 7 }
 0x179   : > { %10648 = vmatprep.mubr.msk.bf16.mxu1 %vm366_vm0, %v2458_v30  ;;  %v6590_v30 = vsel %vm6559_vm5, %v6587_v5, %v6589_v42  ;;  %v6592_v9 = vsel %vm6559_vm5, %v6589_v42, %v6591_v39  ;;  %v3134_v42 = vld [vmem:[#allocation3 + $0x18] sm:$0xff]  ;;  %v6601_v39 = vrot.slane %v12888_v50, 1 }
 0x17a   : > { %v3187_v22 = vshrl.u32 %v3134_v42, 16 }
 0x17e   : > { %10981 = vmatmul.mubr.msk.bf16.gmra.mrb[16].mxu0 %vm366_vm0, %v6580_v7  ;;  %v2505_v7 = vor.u32 %v14410_v58, %v2502_v15  ;;  %v3189_v58 = vrot.slane %v3187_v22, 7 }
 0x17f   : > { %10984 = vmatprep.mubr.msk.bf16.mxu0 %vm366_vm0, %v6582_v17  ;;  %v2510_v17 = vrot.slane %v5843_v27, 7 }
 0x180   : > { %10649 = vmatmul.mubr.msk.bf16.gmra.mrb[44].mxu1 %vm366_vm0, %v2466_v11  ;;  %v2506_v51 = vsel %vm2270_vm4, %v2494_v10, %v2505_v7  ;;  %v13256_v11 = vld [vmem:[#allocation3 + $0x100] sm:$0xff]  ;;  %v3182_v10 = vshll.u32 %v3133_v36, 16  ;;  %v3190_v7 = vshll.u32 %v3134_v42, 16  ;;  %v6602_v36 = vsel %vm6559_vm5, %v6599_v59, %v6601_v39 }
 0x181   : > { %10652 = vmatprep.mubr.msk.bf16.mxu1 %vm366_vm0, %v2474_v38  ;;  %v14411_v38 = vshll.u32 %v12970_v21, 16  ;;  %v2524_v27 = vshrl.u32 %v13256_v11, 16  ;;  %v2527_v52 = vshll.u32 %v13256_v11, 16  ;;  %v2522_v5 = vsel %vm2270_vm4, %v2510_v17, %v2521_v49 }
 0x182   : > { %v3184_v6 = vor.u32 %v3182_v10, %v3181_v45  ;;  %v3192_v57 = vor.u32 %v3190_v7, %v3189_v58  ;;  %v6605_v49 = vrot.slane %v12915_v4, 1  ;;  %v3219_v4 = vshrl.u32 %v13100_v19, 16 }
 0x183   : > { %v2513_v3 = vor.u32 %v14411_v38, %v2510_v17  ;;  %v3197_v17 = vrot.slane %v3195_v18, 7  ;;  %v6603_v38 = vrot.slane %v12907_v28, 1  ;;  %v3222_v42 = vshll.u32 %v13100_v19, 16 }
 0x184   : > { %v3221_v10 = vrot.slane %v3219_v4, 7  ;;  %v3243_v7 = vshrl.u32 %v13136_v34, 16 }
 0x185   : > { %v2514_v63 = vsel %vm2270_vm4, %v2502_v15, %v2513_v3  ;;  %v6598_v15 = vsel %vm6559_vm5, %v6595_v44, %v6597_v26  ;;  %v3193_v3 = vsel %vm2270_vm4, %v3181_v45, %v3192_v57  ;;  %v6604_v28 = vsel %vm6559_vm5, %v6601_v39, %v6603_v38  ;;  %v11705_v39 = vld [vmem:[%s14318_s3 + $0x98] sm:$0xff]  }
 0x186   : > { %10985 = vmatmul.mubr.msk.bf16.gmra.mrb[20].mxu0 %vm366_vm0, %v6584_v55  ;;  %v3132_v55 = vld [vmem:[#allocation3 + $0x8] sm:$0x80]  ;;  %v3238_v57 = vshll.u32 %v13129_v1, 16 }
 0x187   : > { %10988 = vmatprep.mubr.msk.bf16.mxu0 %vm366_vm0, %v6586_v37  ;;  %v13271_v37 = vrot.slane %v2524_v27, 7 }
 0x188   : > { %10653 = vmatmul.mubr.msk.bf16.gmra.mrb[48].mxu1 %vm366_vm0, %v2482_v29  ;;  %v3175_v29 = vshrl.u32 %v3132_v55, 16 }
 0x189   : > { %10656 = vmatprep.mubr.msk.bf16.mxu1 %vm366_vm0, %v2490_v14  ;;  %v6596_v14 = vsel %vm6559_vm5, %v6593_v53, %v6595_v44  ;;  %v13280_v35 = vor.u32 %v2527_v52, %v13271_v37  ;;  %v3198_v53 = vshll.u32 %v13060_v31, 16  ;;  %v3214_v44 = vshll.u32 %v13082_v61, 16 }
 0x18a   : > { %v6606_v52 = vsel %vm6559_vm5, %v6603_v38, %v6605_v49  ;;  %v3245_v38 = vrot.slane %v3243_v7, 7 }
 0x18b   : > { %v3200_v50 = vor.u32 %v3198_v53, %v3197_v17 }
 0x18d   : > { %v3201_v41 = vsel %vm2270_vm4, %v3189_v58, %v3200_v50 }
 0x18e   : > { %10989 = vmatmul.mubr.msk.bf16.gmra.mrb[24].mxu0 %vm366_vm0, %v6588_v43  ;;  %v3177_v43 = vrot.slane %v3175_v29, 7  ;;  %v11703_v29 = vld [vmem:[%s14318_s3 + $0x88] sm:$0xff]  }
 0x18f   : > { %10992 = vmatprep.mubr.msk.bf16.mxu0 %vm366_vm0, %v6590_v30  ;;  %v2530_v30 = vsel %vm2270_vm4, %v2518_v23, %v13280_v35  ;;  %v3203_v23 = vshrl.u32 %v13078_v47, 16 }
 0x190   : > { %10657 = vmatmul.mubr.msk.bf16.gmra.mrb[52].mxu1 %vm366_vm0, %v2498_v20  ;;  %v3185_v20 = vsel %vm2270_vm4, %v3177_v43, %v3184_v6  ;;  %v3230_v43 = vshll.u32 %v13107_v16, 16 }
 0x191   : > { %10660 = vmatprep.mubr.msk.bf16.mxu1 %vm366_vm0, %v2506_v51  ;;  %v6600_v51 = vsel %vm6559_vm5, %v6597_v26, %v6599_v59  ;;  %v3205_v27 = vrot.slane %v3203_v23, 7  ;;  %v3235_v59 = vshrl.u32 %v13129_v1, 16 }
 0x196   : > { %10993 = vmatmul.mubr.msk.bf16.gmra.mrb[28].mxu0 %vm366_vm0, %v6592_v9  ;;  %v3211_v9 = vshrl.u32 %v13082_v61, 16 }
 0x197   : > { %10996 = vmatprep.mubr.msk.bf16.mxu0 %vm366_vm0, %v6594_v0  ;;  %v3206_v0 = vshll.u32 %v13078_v47, 16 }
 0x198   : > { %10661 = vmatmul.mubr.msk.bf16.gmra.mrb[56].mxu1 %vm366_vm0, %v2514_v63  ;;  %v3213_v55 = vrot.slane %v3211_v9, 7 }
 0x199   : > { %10664 = vmatprep.mubr.msk.bf16.mxu1 %vm366_vm0, %v2522_v5  ;;  %v3208_v63 = vor.u32 %v3206_v0, %v3205_v27  ;;  %v3227_v5 = vshrl.u32 %v13107_v16, 16 }
 0x19a   : > { %v3216_v26 = vor.u32 %v3214_v44, %v3213_v55 }
 0x19b   : > { %v3209_v45 = vsel %vm2270_vm4, %v3197_v17, %v3208_v63 }
 0x19c   : > { %v3217_v22 = vsel %vm2270_vm4, %v3205_v27, %v3216_v26  ;;  %v3254_v26 = vshll.u32 %v13154_v13, 16 }
 0x19e   : > { %10997 = vmatmul.mubr.msk.bf16.gmra.mrb[32].mxu0 %vm366_vm0, %v6596_v14  ;;  %v6609_v14 = vrot.slane %v12941_v54, 1  ;;  %v3224_v54 = vor.u32 %v3222_v42, %v3221_v10 }
 0x19f   : > { %11000 = vmatprep.mubr.msk.bf16.mxu0 %vm366_vm0, %v6598_v15  ;;  %v3229_v15 = vrot.slane %v3227_v5, 7 }
 0x1a0   : > { %10665 = vmatmul.mubr.msk.bf16.gmra.mrb[60].mxu1 %vm366_vm0, %v2530_v30  ;;  %v3225_v17 = vsel %vm2270_vm4, %v3213_v55, %v3224_v54  ;;  %v3259_v55 = vshrl.u32 %v13158_v24, 16  ;;  %v7226_v54 = vld [vmem:[#allocation3 + $0x18] sm:$0xfe] }
 0x1a1   : > { %10676 = vmatprep.mubr.msk.bf16.mxu1 %vm366_vm0, %v3185_v20  ;;  %v3232_v58 = vor.u32 %v3230_v43, %v3229_v15  ;;  %v6611_v20 = vrot.slane %v12964_v2, 1 }
 0x1a3   : > { %v3233_v50 = vsel %vm2270_vm4, %v3221_v10, %v3232_v58  ;;  %v6612_v2 = vsel %vm6559_vm5, %v6609_v14, %v6611_v20  ;;  %v3262_v10 = vshll.u32 %v13158_v24, 16  ;;  %v3270_v58 = vshll.u32 %v13176_v25, 16 }
 0x1a6   : > { %11001 = vmatmul.mubr.msk.bf16.gmra.mrb[36].mxu0 %vm366_vm0, %v6600_v51  ;;  %v3237_v51 = vrot.slane %v3235_v59, 7 }
 0x1a7   : > { %11004 = vmatprep.mubr.msk.bf16.mxu0 %vm366_vm0, %v6602_v36  ;;  %v6613_v36 = vrot.slane %v12970_v21, 1 }
 0x1a8   : > { %10677 = vmatmul.mubr.msk.bf16.vlgmr.msra.gmra.mrb[0].mxu1 %vm366_vm0, %v3193_v3  ;;  %v3246_v3 = vshll.u32 %v13136_v34, 16  ;;  %v3240_v27 = vor.u32 %v3238_v57, %v3237_v51 }
 0x1a9   : > { %11104 = vmatpush3.bf16.msra.mxu1 %v13002_v32  ;;  %10680 = vmatprep.mubr.msk.bf16.mxu1 %vm366_vm0, %v3201_v41  ;;  %v6607_v32 = vrot.slane %v12932_v48, 1  ;;  %v11704_v48 = vld [vmem:[%s14318_s3 + $0x90] sm:$0xff]   ;;  %v6614_v21 = vsel %vm6559_vm5, %v6611_v20, %v6613_v36  ;;  %v6621_v20 = vrot.slane %v13030_v12, 1  ;;  %v3283_v12 = vshrl.u32 %v13198_v62, 16 }
 0x1aa   : > { %11101 = vmatprep.subr.bf16.mxu1 %v11703_v29  ;;  %v3248_v41 = vor.u32 %v3246_v3, %v3245_v38  ;;  %v3241_v63 = vsel %vm2270_vm4, %v3229_v15, %v3240_v27  ;;  %v13397_v15 = vld [vmem:[#allocation3 + $0x108] sm:$0xff]  ;;  %v3278_v27 = vshll.u32 %v13180_v33, 16 }
 0x1ab   : > { %v6608_v6 = vsel %vm6559_vm5, %v6605_v49, %v6607_v32  ;;  %v6610_v30 = vsel %vm6559_vm5, %v6607_v32, %v6609_v14  ;;  %v3251_v49 = vshrl.u32 %v13154_v13, 16  ;;  %v3267_v14 = vshrl.u32 %v13176_v25, 16 }
 0x1ac   : > { %v3249_v32 = vsel %vm2270_vm4, %v3237_v51, %v3248_v41  ;;  %v7270_v51 = vshrl.u32 %v7226_v54, 16 }
 0x1ad   : > { %11105 = vmatpush3.bf16.msra.mxu1 %v11703_v29  ;;  %v6617_v29 = vrot.slane %v13256_v11, 1 }
 0x1ae   : > { %11005 = vmatmul.mubr.msk.bf16.gmra.mrb[40].mxu0 %vm366_vm0, %v6604_v28  ;;  %11102 = vmatprep.subr.bf16.mxu1 %v11704_v48  ;;  %v6615_v28 = vrot.slane %v12991_v40, 1 }
 0x1af   : > { %11008 = vmatprep.mubr.msk.bf16.mxu0 %vm366_vm0, %v6606_v52  ;;  %v3253_v52 = vrot.slane %v3251_v49, 7 }
 0x1b0   : > { %10681 = vmatmul.mubr.msk.bf16.gmra.mrb[4].mxu1 %vm366_vm0, %v3209_v45  ;;  %v3261_v45 = vrot.slane %v3259_v55, 7  ;;  %v6616_v40 = vsel %vm6559_vm5, %v6613_v36, %v6615_v28  ;;  %v6618_v11 = vsel %vm6559_vm5, %v6615_v28, %v6617_v29  ;;  %v7273_v36 = vshll.u32 %v7226_v54, 16  ;;  %v6516_v28 = vld [vmem:[#allocation3 + $0x118] sm:$0x1] }
 0x1b1   : > { %10684 = vmatprep.mubr.msk.bf16.mxu1 %vm366_vm0, %v3217_v22  ;;  %11106 = vmatpush3.bf16.msra.mxu1 %v11704_v48  ;;  %v3256_v22 = vor.u32 %v3254_v26, %v3253_v52  ;;  %v6623_v54 = vrot.slane %v6516_v28, 1  ;;  %v7301_v28 = vrot.slane %v3214_v44, 2 }
 0x1b2   : > { %11103 = vmatprep.subr.bf16.mxu1 %v11705_v39  ;;  %v3264_v48 = vor.u32 %v3262_v10, %v3261_v45 }
 0x1b5   : > { %11107 = vmatpush3.bf16.msra.mxu1 %v11705_v39  ;;  %v6619_v39 = vrot.slane %v13397_v15, 1 }
 0x1b6   : > { %11009 = vmatmul.mubr.msk.bf16.gmra.mrb[44].mxu0 %vm366_vm0, %v6608_v6  ;;  %v3275_v6 = vshrl.u32 %v13180_v33, 16 }
 0x1b7   : > { %11012 = vmatprep.mubr.msk.bf16.mxu0 %vm366_vm0, %v6610_v30  ;;  %v3269_v30 = vrot.slane %v3267_v14, 7  ;;  %v6620_v41 = vsel %vm6559_vm5, %v6617_v29, %v6619_v39  ;;  %v3291_v29 = vshrl.u32 %v13202_v56, 16 }
 0x1b8   : > { %10685 = vmatmul.mubr.msk.bf16.gmra.mrb[8].mxu1 %vm366_vm0, %v3225_v17  ;;  %v3257_v17 = vsel %vm2270_vm4, %v3245_v38, %v3256_v22  ;;  %v6622_v38 = vsel %vm6559_vm5, %v6619_v39, %v6621_v20 }
 0x1b9   : > { %10688 = vmatprep.mubr.msk.bf16.mxu1 %vm366_vm0, %v3233_v50  ;;  %v3265_v50 = vsel %vm2270_vm4, %v3253_v52, %v3264_v48  ;;  %v7275_v52 = vrot.slane %v7273_v36, 2  ;;  %v3286_v48 = vshll.u32 %v13198_v62, 16 }
 0x1be   : > { %11013 = vmatmul.mubr.msk.bf16.gmra.mrb[48].mxu0 %vm366_vm0, %v6612_v2  ;;  %v3277_v2 = vrot.slane %v3275_v6, 7 }
 0x1bf   : > { %11016 = vmatprep.mubr.msk.bf16.mxu0 %vm366_vm0, %v6614_v21  ;;  %v3272_v21 = vor.u32 %v3270_v58, %v3269_v30 }
 0x1c0   : > { %10689 = vmatmul.mubr.msk.bf16.gmra.mrb[12].mxu1 %vm366_vm0, %v3241_v63  ;;  %v7272_v63 = vrot.slane %v7270_v51, 1  ;;  %v3280_v22 = vor.u32 %v3278_v27, %v3277_v2  ;;  %v3294_v51 = vshll.u32 %v13202_v56, 16 }
 0x1c1   : > { %10692 = vmatprep.mubr.msk.bf16.mxu1 %vm366_vm0, %v3249_v32  ;;  %v7280_v32 = vrot.slane %v3195_v18, 1  ;;  %v3273_v18 = vsel %vm2270_vm4, %v3261_v45, %v3272_v21  ;;  %v7289_v45 = vrot.slane %v3203_v23, 1  ;;  %v7292_v21 = vrot.slane %v3206_v0, 2 }
 0x1c2   : > { %v7276_v39 = vor.u32 %v7275_v52, %v7272_v63  ;;  %v3307_v23 = vshrl.u32 %v13224_v46, 16 }
 0x1c3   : > { %v7293_v47 = vor.u32 %v7292_v21, %v7289_v45 }
 0x1c4   : > { %v3309_v44 = vrot.slane %v3307_v23, 7 }
 0x1c6   : > { %11017 = vmatmul.mubr.msk.bf16.gmra.mrb[52].mxu0 %vm366_vm0, %v6616_v40  ;;  %v7283_v40 = vrot.slane %v3198_v53, 2  ;;  %v3281_v53 = vsel %vm2270_vm4, %v3269_v30, %v3280_v22  ;;  %v3299_v30 = vshrl.u32 %v13220_v60, 16 }
 0x1c7   : > { %11020 = vmatprep.mubr.msk.bf16.mxu0 %vm366_vm0, %v6618_v11  ;;  %v3285_v11 = vrot.slane %v3283_v12, 7 }
 0x1c8   : > { %10693 = vmatmul.mubr.msk.bf16.gmra.mrb[16].mxu1 %vm366_vm0, %v3257_v17  ;;  %v7284_v31 = vor.u32 %v7283_v40, %v7280_v32  ;;  %v3293_v17 = vrot.slane %v3291_v29, 7  ;;  %v3301_v63 = vrot.slane %v3299_v30, 7  ;;  %v3310_v32 = vshll.u32 %v13224_v46, 16  ;;  %v13466_v40 = vld [vmem:[#allocation3 + $0xa0] sm:$0xff] }
 0x1c9   : > { %10696 = vmatprep.mubr.msk.bf16.mxu1 %vm366_vm0, %v3265_v50  ;;  %v3288_v36 = vor.u32 %v3286_v48, %v3285_v11  ;;  %v6624_v50 = vsel %vm6559_vm5, %v6621_v20, %v6623_v54  ;;  %v7307_v54 = vrot.slane %v3219_v4, 1  ;;  %v3323_v4 = vshrl.u32 %v13466_v40, 16 }
 0x1ca   : > { %v3296_v20 = vor.u32 %v3294_v51, %v3293_v17  ;;  %v7294_v22 = vsel %vm7268_vm6, %v7284_v31, %v7293_v47  ;;  %v3326_v21 = vshll.u32 %v13466_v40, 16 }
 0x1cb   : > { %v3289_v0 = vsel %vm2270_vm4, %v3277_v2, %v3288_v36  ;;  %v3315_v2 = vshrl.u32 %v13242_v8, 16  ;;  %v3312_v36 = vor.u32 %v3310_v32, %v3309_v44 }
 0x1cc   : > { %v3297_v61 = vsel %vm2270_vm4, %v3285_v11, %v3296_v20 }
 0x1cd   : > { %v3317_v19 = vrot.slane %v3315_v2, 7  ;;  %v3313_v16 = vsel %vm2270_vm4, %v3301_v63, %v3312_v36  ;;  %v7343_v36 = vrot.slane %v3251_v49, 1 }
 0x1ce   : > { %11021 = vmatmul.mubr.msk.bf16.gmra.mrb[56].mxu0 %vm366_vm0, %v6620_v41  ;;  %v7285_v41 = vsel %vm7268_vm6, %v7276_v39, %v7284_v31  ;;  %v7319_v31 = vrot.slane %v3230_v43, 2  ;;  %v3325_v43 = vrot.slane %v3323_v4, 7 }
 0x1cf   : > { %11024 = vmatprep.mubr.msk.bf16.mxu0 %vm366_vm0, %v6622_v38  ;;  %v7298_v38 = vrot.slane %v3211_v9, 1  ;;  %v3302_v9 = vshll.u32 %v13220_v60, 16 }
 0x1d0   : > { %10697 = vmatmul.mubr.msk.bf16.gmra.mrb[20].mxu1 %vm366_vm0, %v3273_v18  ;;  %v7310_v18 = vrot.slane %v3222_v42, 2  ;;  %v3318_v42 = vshll.u32 %v13242_v8, 16 }
 0x1d1   : > { %10700 = vmatprep.mubr.msk.bf16.mxu1 %vm366_vm0, %v3281_v53  ;;  %v7302_v52 = vor.u32 %v7301_v28, %v7298_v38  ;;  %v3304_v11 = vor.u32 %v3302_v9, %v3301_v63  ;;  %v7316_v53 = vrot.slane %v3227_v5, 1  ;;  %v13498_v38 = vld [vmem:[#allocation3 + $0xb0] sm:$0xff] }
 0x1d2   : > { %v3320_v28 = vor.u32 %v3318_v42, %v3317_v19 }
 0x1d3   : > { %v7303_v39 = vsel %vm7268_vm6, %v7293_v47, %v7302_v52  ;;  %v3305_v5 = vsel %vm2270_vm4, %v3293_v17, %v3304_v11  ;;  %v7320_v45 = vor.u32 %v7319_v31, %v7316_v53  ;;  %v7325_v17 = vrot.slane %v3235_v59, 1  ;;  %v13530_v53 = vld [vmem:[#allocation3 + $0xc0] sm:$0xff] }
 0x1d4   : > { %v7328_v47 = vrot.slane %v3238_v57, 2  ;;  %v3339_v59 = vshrl.u32 %v13498_v38, 16  ;;  %v3321_v57 = vsel %vm2270_vm4, %v3309_v44, %v3320_v28  ;;  %v3355_v49 = vshrl.u32 %v13530_v53, 16 }
 0x1d6   : > { %11025 = vmatmul.mubr.msk.bf16.gmra.mrb[60].mxu0 %vm366_vm0, %v6624_v50  ;;  %v7311_v50 = vor.u32 %v7310_v18, %v7307_v54  ;;  %v7329_v1 = vor.u32 %v7328_v47, %v7325_v17  ;;  %v13524_v18 = vld [vmem:[#allocation3 + $0xb8] sm:$0xff]  ;;  %v3341_v11 = vrot.slane %v3339_v59, 7  ;;  %v3358_v47 = vshll.u32 %v13530_v53, 16 }
 0x1d7   : > { %11036 = vmatprep.mubr.msk.bf16.mxu0 %vm366_vm0, %v7285_v41  ;;  %v13496_v41 = vld [vmem:[#allocation3 + $0xa8] sm:$0xff]  ;;  %v3347_v31 = vshrl.u32 %v13524_v18, 16 }
 0x1d8   : > { %10701 = vmatmul.mubr.msk.bf16.gmra.mrb[24].mxu1 %vm366_vm0, %v3289_v0  ;;  %v7312_v20 = vsel %vm7268_vm6, %v7302_v52, %v7311_v50  ;;  %v3331_v0 = vshrl.u32 %v13496_v41, 16  ;;  %v7321_v63 = vsel %vm7268_vm6, %v7311_v50, %v7320_v45  ;;  %v3328_v52 = vor.u32 %v3326_v21, %v3325_v43 }
 0x1d9   : > { %10704 = vmatprep.mubr.msk.bf16.mxu1 %vm366_vm0, %v3297_v61  ;;  %v7334_v61 = vrot.slane %v3243_v7, 1  ;;  %v3334_v7 = vshll.u32 %v13496_v41, 16  ;;  %v7330_v44 = vsel %vm7268_vm6, %v7320_v45, %v7329_v1  ;;  %v7346_v50 = vrot.slane %v3254_v26, 2 }
 0x1da   : > { %v3333_v54 = vrot.slane %v3331_v0, 7  ;;  %v7355_v45 = vrot.slane %v3262_v10, 2  ;;  %v3349_v13 = vrot.slane %v3347_v31, 7  ;;  %v3350_v26 = vshll.u32 %v13524_v18, 16 }
 0x1db   : > { %v3357_v10 = vrot.slane %v3355_v49, 7 }
 0x1de   : > { %11037 = vmatmul.mubr.msk.bf16.vlgmr.msra.gmra.mrb[0].mxu0 %vm366_vm0, %v7294_v22  ;;  %v7337_v22 = vrot.slane %v3246_v3, 2  ;;  %v3329_v3 = vsel %vm2270_vm4, %v3317_v19, %v3328_v52  ;;  %v3336_v19 = vor.u32 %v3334_v7, %v3333_v54 }
 0x1df   : > { %11040 = vmatprep.mubr.msk.bf16.mxu0 %vm366_vm0, %v7303_v39  ;;  %v3342_v39 = vshll.u32 %v13498_v38, 16 }
 0x1e0   : > { %10705 = vmatmul.mubr.msk.bf16.gmra.mrb[28].mxu1 %vm366_vm0, %v3305_v5  ;;  %v7338_v34 = vor.u32 %v7337_v22, %v7334_v61  ;;  %v13562_v61 = vld [vmem:[#allocation3 + $0xd0] sm:$0xff]  ;;  %v3352_v22 = vor.u32 %v3350_v26, %v3349_v13 }
 0x1e1   : > { %10708 = vmatprep.mubr.msk.bf16.mxu1 %vm366_vm0, %v3313_v16  ;;  %v7352_v16 = vrot.slane %v3259_v55, 1  ;;  %v3344_v28 = vor.u32 %v3342_v39, %v3341_v11  ;;  %v3337_v55 = vsel %vm2270_vm4, %v3325_v43, %v3336_v19  ;;  %v7361_v43 = vrot.slane %v3267_v14, 1 }
 0x1e2   : > { %v7339_v5 = vsel %vm7268_vm6, %v7329_v1, %v7338_v34  ;;  %v7364_v1 = vrot.slane %v3270_v58, 2  ;;  %v3371_v14 = vshrl.u32 %v13562_v61, 16  ;;  %v3353_v58 = vsel %vm2270_vm4, %v3341_v11, %v3352_v22 }
 0x1e3   : > { %v7356_v17 = vor.u32 %v7355_v45, %v7352_v16  ;;  %v3345_v24 = vsel %vm2270_vm4, %v3333_v54, %v3344_v28  ;;  %v13594_v16 = vld [vmem:[#allocation3 + $0xe0] sm:$0xff]  ;;  %v7379_v28 = vrot.slane %v3283_v12, 1 }
 0x1e4   : > { %v7365_v25 = vor.u32 %v7364_v1, %v7361_v43  ;;  %v3373_v19 = vrot.slane %v3371_v14, 7  ;;  %v3387_v12 = vshrl.u32 %v13594_v16, 16  ;;  %v3390_v1 = vshll.u32 %v13594_v16, 16 }
 0x1e6   : > { %11041 = vmatmul.mubr.msk.bf16.gmra.mrb[4].mxu0 %vm366_vm0, %v7312_v20  ;;  %v7347_v20 = vor.u32 %v7346_v50, %v7343_v36  ;;  %v13588_v50 = vld [vmem:[#allocation3 + $0xd8] sm:$0xff]  ;;  %v7366_v11 = vsel %vm7268_vm6, %v7356_v17, %v7365_v25 }
 0x1e7   : > { %11044 = vmatprep.mubr.msk.bf16.mxu0 %vm366_vm0, %v7321_v63  ;;  %v13560_v63 = vld [vmem:[#allocation3 + $0xc8] sm:$0xff]  ;;  %v3379_v45 = vshrl.u32 %v13588_v50, 16 }
 0x1e8   : > { %10709 = vmatmul.mubr.msk.bf16.gmra.mrb[32].mxu1 %vm366_vm0, %v3321_v57  ;;  %v7348_v52 = vsel %vm7268_vm6, %v7338_v34, %v7347_v20  ;;  %v3363_v57 = vshrl.u32 %v13560_v63, 16  ;;  %v7357_v54 = vsel %vm7268_vm6, %v7347_v20, %v7356_v17  ;;  %v3360_v34 = vor.u32 %v3358_v47, %v3357_v10 }
 0x1e9   : > { %10712 = vmatprep.mubr.msk.bf16.mxu1 %vm366_vm0, %v3329_v3  ;;  %v7370_v3 = vrot.slane %v3275_v6, 1  ;;  %v3366_v6 = vshll.u32 %v13560_v63, 16  ;;  %v7382_v20 = vrot.slane %v3286_v48, 2  ;;  %v7391_v17 = vrot.slane %v3294_v51, 2 }
 0x1ea   : > { %v3365_v36 = vrot.slane %v3363_v57, 7  ;;  %v3381_v62 = vrot.slane %v3379_v45, 7  ;;  %v3382_v48 = vshll.u32 %v13588_v50, 16  ;;  %v3389_v51 = vrot.slane %v3387_v12, 7 }
 0x1ee   : > { %11045 = vmatmul.mubr.msk.bf16.gmra.mrb[8].mxu0 %vm366_vm0, %v7330_v44  ;;  %v7373_v44 = vrot.slane %v3278_v27, 2  ;;  %v3361_v27 = vsel %vm2270_vm4, %v3349_v13, %v3360_v34  ;;  %v3368_v13 = vor.u32 %v3366_v6, %v3365_v36 }
 0x1ef   : > { %11048 = vmatprep.mubr.msk.bf16.mxu0 %vm366_vm0, %v7339_v5  ;;  %v3374_v5 = vshll.u32 %v13562_v61, 16 }
 0x1f0   : > { %10713 = vmatmul.mubr.msk.bf16.gmra.mrb[36].mxu1 %vm366_vm0, %v3337_v55  ;;  %v7374_v33 = vor.u32 %v7373_v44, %v7370_v3  ;;  %v13626_v3 = vld [vmem:[#allocation3 + $0xf0] sm:$0xff]  ;;  %v3384_v44 = vor.u32 %v3382_v48, %v3381_v62 }
 0x1f1   : > { %10716 = vmatprep.mubr.msk.bf16.mxu1 %vm366_vm0, %v3345_v24  ;;  %v7388_v24 = vrot.slane %v3291_v29, 1  ;;  %v3376_v22 = vor.u32 %v3374_v5, %v3373_v19  ;;  %v3369_v29 = vsel %vm2270_vm4, %v3357_v10, %v3368_v13  ;;  %v7397_v10 = vrot.slane %v3299_v30, 1 }
 0x1f2   : > { %v7375_v55 = vsel %vm7268_vm6, %v7365_v25, %v7374_v33  ;;  %v7400_v25 = vrot.slane %v3302_v9, 2  ;;  %v3403_v30 = vshrl.u32 %v13626_v3, 16  ;;  %v3385_v9 = vsel %vm2270_vm4, %v3373_v19, %v3384_v44 }
 0x1f3   : > { %v7392_v43 = vor.u32 %v7391_v17, %v7388_v24  ;;  %v3377_v56 = vsel %vm2270_vm4, %v3365_v36, %v3376_v22  ;;  %v3406_v24 = vshll.u32 %v13626_v3, 16  ;;  %v7415_v22 = vrot.slane %v3315_v2, 1 }
 0x1f4   : > { %v7401_v60 = vor.u32 %v7400_v25, %v7397_v10 }
 0x1f6   : > { %11049 = vmatmul.mubr.msk.bf16.gmra.mrb[12].mxu0 %vm366_vm0, %v7348_v52  ;;  %v7383_v52 = vor.u32 %v7382_v20, %v7379_v28  ;;  %v13652_v20 = vld [vmem:[#allocation3 + $0xf8] sm:$0xff]  ;;  %v7402_v17 = vsel %vm7268_vm6, %v7392_v43, %v7401_v60 }
 0x1f7   : > { %11052 = vmatprep.mubr.msk.bf16.mxu0 %vm366_vm0, %v7357_v54  ;;  %v13624_v54 = vld [vmem:[#allocation3 + $0xe8] sm:$0xff]  ;;  %v3411_v19 = vshrl.u32 %v13652_v20, 16 }
 0x1f8   : > { %10717 = vmatmul.mubr.msk.bf16.gmra.mrb[40].mxu1 %vm366_vm0, %v3353_v58  ;;  %v7384_v34 = vsel %vm7268_vm6, %v7374_v33, %v7383_v52  ;;  %v3395_v58 = vshrl.u32 %v13624_v54, 16  ;;  %v7393_v36 = vsel %vm7268_vm6, %v7383_v52, %v7392_v43  ;;  %v3392_v33 = vor.u32 %v3390_v1, %v3389_v51 }
 0x1f9   : > { %10720 = vmatprep.mubr.msk.bf16.mxu1 %vm366_vm0, %v3361_v27  ;;  %v7406_v27 = vrot.slane %v3307_v23, 1  ;;  %v3398_v23 = vshll.u32 %v13624_v54, 16  ;;  %v7418_v52 = vrot.slane %v3318_v42, 2  ;;  %v7427_v43 = vrot.slane %v3326_v21, 2 }
 0x1fa   : > { %v3397_v28 = vrot.slane %v3395_v58, 7  ;;  %v3393_v13 = vsel %vm2270_vm4, %v3381_v62, %v3392_v33  ;;  %v3413_v2 = vrot.slane %v3411_v19, 7  ;;  %v3414_v42 = vshll.u32 %v13652_v20, 16 }
 0x1fc   : > { %v3400_v62 = vor.u32 %v3398_v23, %v3397_v28  ;;  %v3416_v21 = vor.u32 %v3414_v42, %v3413_v2 }
 0x1fe   : > { %11053 = vmatmul.mubr.msk.bf16.gmra.mrb[16].mxu0 %vm366_vm0, %v7366_v11  ;;  %v7409_v11 = vrot.slane %v3310_v32, 2  ;;  %v3401_v10 = vsel %vm2270_vm4, %v3389_v51, %v3400_v62  ;;  %v3427_v51 = vshrl.u32 %v13397_v15, 16  ;;  %v7463_v62 = vrot.slane %v3358_v47, 2 }
 0x1ff   : > { %11056 = vmatprep.mubr.msk.bf16.mxu0 %vm366_vm0, %v7375_v55  ;;  %v3405_v55 = vrot.slane %v3403_v30, 7 }
 0x200   : > { %10721 = vmatmul.mubr.msk.bf16.gmra.mrb[44].mxu1 %vm366_vm0, %v3369_v29  ;;  %v7410_v32 = vor.u32 %v7409_v11, %v7406_v27  ;;  %v7433_v27 = vrot.slane %v3331_v0, 1  ;;  %v7436_v11 = vrot.slane %v3334_v7, 2  ;;  %v3429_v7 = vrot.slane %v3427_v51, 7 }
 0x201   : > { %10724 = vmatprep.mubr.msk.bf16.mxu1 %vm366_vm0, %v3377_v56  ;;  %v7424_v56 = vrot.slane %v3323_v4, 1  ;;  %v3408_v44 = vor.u32 %v3406_v24, %v3405_v55 }
 0x202   : > { %v7411_v29 = vsel %vm7268_vm6, %v7401_v60, %v7410_v32  ;;  %v7442_v60 = vrot.slane %v3339_v59, 1  ;;  %v7437_v0 = vor.u32 %v7436_v11, %v7433_v27 }
 0x203   : > { %v7428_v25 = vor.u32 %v7427_v43, %v7424_v56  ;;  %v3409_v4 = vsel %vm2270_vm4, %v3397_v28, %v3408_v44  ;;  %v3417_v28 = vsel %vm2270_vm4, %v3405_v55, %v3416_v21  ;;  %v7469_v43 = vrot.slane %v3363_v57, 1 }
 0x204   : > { %v7478_v44 = vrot.slane %v3371_v14, 1  ;;  %v7490_v14 = vrot.slane %v3382_v48, 2 }
 0x205   : > { %v7438_v59 = vsel %vm7268_vm6, %v7428_v25, %v7437_v0 }
 0x206   : > { %11057 = vmatmul.mubr.msk.bf16.gmra.mrb[20].mxu0 %vm366_vm0, %v7384_v34  ;;  %v7419_v34 = vor.u32 %v7418_v52, %v7415_v22  ;;  %v7454_v22 = vrot.slane %v3350_v26, 2 }
 0x207   : > { %11060 = vmatprep.mubr.msk.bf16.mxu0 %vm366_vm0, %v7393_v36 }
 0x208   : > { %10725 = vmatmul.mubr.msk.bf16.gmra.mrb[48].mxu1 %vm366_vm0, %v3385_v9  ;;  %v7420_v36 = vsel %vm7268_vm6, %v7410_v32, %v7419_v34  ;;  %v7429_v33 = vsel %vm7268_vm6, %v7419_v34, %v7428_v25  ;;  %v7445_v9 = vrot.slane %v3342_v39, 2  ;;  %v3430_v32 = vshll.u32 %v13397_v15, 16 }
 0x209   : > { %10728 = vmatprep.mubr.msk.bf16.mxu1 %vm366_vm0, %v3393_v13  ;;  %v7451_v39 = vrot.slane %v3347_v31, 1  ;;  %v7496_v34 = vrot.slane %v3387_v12, 1  ;;  %v7508_v12 = vrot.slane %v3398_v23, 2  ;;  %v7514_v25 = vrot.slane %v3403_v30, 1 }
 0x20a   : > { %v7446_v13 = vor.u32 %v7445_v9, %v7442_v60  ;;  %v3432_v55 = vor.u32 %v3430_v32, %v3429_v7  ;;  %v7523_v30 = vrot.slane %v3411_v19, 1  ;;  %v7257_v60 = vld [vmem:[#allocation3 + $0x110] sm:$0xff] }
 0x20b   : > { %v7455_v31 = vor.u32 %v7454_v22, %v7451_v39 }
 0x20c   : > { %v7447_v52 = vsel %vm7268_vm6, %v7437_v0, %v7446_v13  ;;  %v3433_v26 = vsel %vm2270_vm4, %v13271_v37, %v3432_v55  ;;  %v7481_v37 = vrot.slane %v3374_v5, 2  ;;  %v7548_v0 = vshrl.u32 %v7257_v60, 16 }
 0x20d   : > { %v7456_v56 = vsel %vm7268_vm6, %v7446_v13, %v7455_v31 }
 0x20e   : > { %11061 = vmatmul.mubr.msk.bf16.gmra.mrb[24].mxu0 %vm366_vm0, %v7402_v17  ;;  %v3425_v17 = vsel %vm2270_vm4, %v3413_v2, %v13280_v35  ;;  %v7460_v35 = vrot.slane %v3355_v49, 1  ;;  %v7472_v49 = vrot.slane %v3366_v6, 2  ;;  %v7482_v57 = vor.u32 %v7481_v37, %v7478_v44 }
 0x20f   : > { %11064 = vmatprep.mubr.msk.bf16.mxu0 %vm366_vm0, %v7411_v29  ;;  %v7550_v13 = vrot.slane %v7548_v0, 1 }
 0x210   : > { %10729 = vmatmul.mubr.msk.bf16.gmra.mrb[52].mxu1 %vm366_vm0, %v3401_v10  ;;  %v7464_v29 = vor.u32 %v7463_v62, %v7460_v35  ;;  %v7473_v2 = vor.u32 %v7472_v49, %v7469_v43  ;;  %v7499_v10 = vrot.slane %v3390_v1, 2 }
 0x211   : > { %10732 = vmatprep.mubr.msk.bf16.mxu1 %vm366_vm0, %v3409_v4  ;;  %v7517_v4 = vrot.slane %v3406_v24, 2  ;;  %v7526_v24 = vrot.slane %v3414_v42, 2  ;;  %v7544_v42 = vrot.slane %v3430_v32, 2 }
 0x212   : > { %v7465_v47 = vsel %vm7268_vm6, %v7455_v31, %v7464_v29  ;;  %v7474_v6 = vsel %vm7268_vm6, %v7464_v29, %v7473_v2  ;;  %v7483_v5 = vsel %vm7268_vm6, %v7473_v2, %v7482_v57 }
 0x213   : > { %v7518_v21 = vor.u32 %v7517_v4, %v7514_v25 }
 0x216   : > { %11065 = vmatmul.mubr.msk.bf16.gmra.mrb[28].mxu0 %vm366_vm0, %v7420_v36 }
 0x217   : > { %11068 = vmatprep.mubr.msk.bf16.mxu0 %vm366_vm0, %v7429_v33 }
 0x218   : > { %10733 = vmatmul.mubr.msk.bf16.gmra.mrb[56].mxu1 %vm366_vm0, %v3417_v28  ;;  %v7551_v28 = vshll.u32 %v7257_v60, 16 }
 0x219   : > { %10736 = vmatprep.mubr.msk.bf16.mxu1 %vm366_vm0, %v3425_v17 }
 0x21a   : > { %v7553_v17 = vrot.slane %v7551_v28, 2 }
 0x21c   : > { %v7554_v55 = vor.u32 %v7553_v17, %v7550_v13 }
 0x21e   : > { %11069 = vmatmul.mubr.msk.bf16.gmra.mrb[32].mxu0 %vm366_vm0, %v7438_v59  ;;  %v7258_v59 = vld [vmem:[#allocation3 + $0x118] sm:$0x3] }
 0x21f   : > { %11072 = vmatprep.mubr.msk.bf16.mxu0 %vm366_vm0, %v7447_v52  ;;  %v7557_v39 = vshrl.u32 %v7258_v59, 16  ;;  %v7560_v22 = vshll.u32 %v7258_v59, 16 }
 0x220   : > { %10737 = vmatmul.mubr.msk.bf16.gmra.mrb[60].mxu1 %vm366_vm0, %v3433_v26 }
 0x221   : > { %10780 = vmatprep.mubr.msk.bf16.mxu1 %vm366_vm0, %v13224_v46  ;;  %v7487_v46 = vrot.slane %v3379_v45, 1  ;;  %v7500_v45 = vor.u32 %v7499_v10, %v7496_v34  ;;  %v7559_v32 = vrot.slane %v7557_v39, 1 }
 0x226   : > { %11073 = vmatmul.mubr.msk.bf16.gmra.mrb[36].mxu0 %vm366_vm0, %v7456_v56 }
 0x227   : > { %11076 = vmatprep.mubr.msk.bf16.mxu0 %vm366_vm0, %v7465_v47 }
 0x228   : > { %10781 = vmatmul.mubr.msk.bf16.vlgmr.msra.gmra.mrb[32].mxu1 %vm366_vm0, %v13242_v8  ;;  %v7491_v8 = vor.u32 %v7490_v14, %v7487_v46 }
 0x229   : > { %10784 = vmatprep.mubr.msk.bf16.mxu1 %vm366_vm0, %v13466_v40  ;;  %v7505_v40 = vrot.slane %v3395_v58, 1 }
 0x22a   : > { %v7492_v48 = vsel %vm7268_vm6, %v7482_v57, %v7491_v8  ;;  %v7501_v1 = vsel %vm7268_vm6, %v7491_v8, %v7500_v45 }
 0x22b   : > { %v7509_v58 = vor.u32 %v7508_v12, %v7505_v40 }
 0x22d   : > { %v7519_v27 = vsel %vm7268_vm6, %v7509_v58, %v7518_v21 }
 0x22e   : > { %11077 = vmatmul.mubr.msk.bf16.gmra.mrb[40].mxu0 %vm366_vm0, %v7474_v6 }
 0x22f   : > { %11080 = vmatprep.mubr.msk.bf16.mxu0 %vm366_vm0, %v7483_v5 }
 0x230   : > { %10785 = vmatmul.mubr.msk.bf16.gmra.mrb[36].mxu1 %vm366_vm0, %v13496_v41  ;;  %v7255_v41 = vld [vmem:[#allocation3 + $0x100] sm:$0xff] }
 0x231   : > { %10788 = vmatprep.mubr.msk.bf16.mxu1 %vm366_vm0, %v13498_v38  ;;  %v7530_v36 = vshrl.u32 %v7255_v41, 16  ;;  %v7533_v23 = vshll.u32 %v7255_v41, 16  ;;  %v7510_v38 = vsel %vm7268_vm6, %v7500_v45, %v7509_v58 }
 0x233   : > { %v7532_v11 = vrot.slane %v7530_v36, 1  ;;  %v7535_v33 = vrot.slane %v7533_v23, 2 }
 0x235   : > { %v7536_v9 = vor.u32 %v7535_v33, %v7532_v11 }
 0x236   : > { %11081 = vmatmul.mubr.msk.bf16.gmra.mrb[44].mxu0 %vm366_vm0, %v7492_v48 }
 0x237   : > { %11084 = vmatprep.mubr.msk.bf16.mxu0 %vm366_vm0, %v7501_v1 }
 0x238   : > { %10789 = vmatmul.mubr.msk.bf16.gmra.mrb[40].mxu1 %vm366_vm0, %v13524_v18  ;;  %v7527_v18 = vor.u32 %v7526_v24, %v7523_v30 }
 0x239   : > { %10792 = vmatprep.mubr.msk.bf16.mxu1 %vm366_vm0, %v13530_v53  ;;  %v7541_v53 = vrot.slane %v3427_v51, 1 }
 0x23a   : > { %v7528_v19 = vsel %vm7268_vm6, %v7518_v21, %v7527_v18  ;;  %v7537_v7 = vsel %vm7268_vm6, %v7527_v18, %v7536_v9 }
 0x23e   : > { %11085 = vmatmul.mubr.msk.bf16.gmra.mrb[48].mxu0 %vm366_vm0, %v7510_v38 }
 0x23f   : > { %11088 = vmatprep.mubr.msk.bf16.mxu0 %vm366_vm0, %v7519_v27 }
 0x240   : > { %10793 = vmatmul.mubr.msk.bf16.gmra.mrb[44].mxu1 %vm366_vm0, %v13560_v63  ;;  %v7545_v63 = vor.u32 %v7544_v42, %v7541_v53 }
 0x241   : > { %10796 = vmatprep.mubr.msk.bf16.mxu1 %vm366_vm0, %v13562_v61  ;;  %v7562_v61 = vrot.slane %v7560_v22, 2 }
 0x242   : > { %v7546_v51 = vsel %vm7268_vm6, %v7536_v9, %v7545_v63  ;;  %v7555_v52 = vsel %vm7268_vm6, %v7545_v63, %v7554_v55 }
 0x243   : > { %v7563_v35 = vor.u32 %v7562_v61, %v7559_v32 }
 0x245   : > { %v7564_v62 = vsel %vm7268_vm6, %v7554_v55, %v7563_v35 }
 0x246   : > { %11089 = vmatmul.mubr.msk.bf16.gmra.mrb[52].mxu0 %vm366_vm0, %v7528_v19 }
 0x247   : > { %11092 = vmatprep.mubr.msk.bf16.mxu0 %vm366_vm0, %v7537_v7 }
 0x248   : > { %10797 = vmatmul.mubr.msk.bf16.gmra.mrb[48].mxu1 %vm366_vm0, %v13588_v50 }
 0x249   : > { %10800 = vmatprep.mubr.msk.bf16.mxu1 %vm366_vm0, %v13594_v16 }
 0x24e   : > { %11093 = vmatmul.mubr.msk.bf16.gmra.mrb[56].mxu0 %vm366_vm0, %v7546_v51 }
 0x24f   : > { %11096 = vmatprep.mubr.msk.bf16.mxu0 %vm366_vm0, %v7555_v52 }
 0x250   : > { %10801 = vmatmul.mubr.msk.bf16.gmra.mrb[52].mxu1 %vm366_vm0, %v13624_v54 }
 0x251   : > { %10804 = vmatprep.mubr.msk.bf16.mxu1 %vm366_vm0, %v13626_v3 }
 0x256   : > { %11097 = vmatmul.mubr.msk.bf16.gmra.mrb[60].mxu0 %vm366_vm0, %v7564_v62 }
 0x258   : > { %10805 = vmatmul.mubr.msk.bf16.gmra.mrb[56].mxu1 %vm366_vm0, %v13652_v20 }
 0x259   : > { %10808 = vmatprep.mubr.msk.bf16.mxu1 %vm366_vm0, %v7255_v41  ;;  %v13848_v41 = vld [vmem:[%s14319_s4] ss:$0 sm:$0xff] }
 0x260   : > { %10809 = vmatmul.mubr.msk.bf16.gmra.mrb[60].mxu1 %vm366_vm0, %v13397_v15 }
 0x27b   : > { %v10678_v50 = vpop.f32.mrb[0].mxu1 }
 0x27c   : > { %v3588_v16 = vpop.f32.mrb[1].mxu1 }
 0x27d   : > { %v10679_v31 = vpop.f32.mrb[2].mxu1 }
 0x27e   : > { %v3591_v26 = vpop.f32.mrb[3].mxu1 }
 0x283   : > { %v10682_v54 = vpop.f32.mrb[4].mxu1 }
 0x284   : > { %v3604_v29 = vpop.f32.mrb[5].mxu1 }
 0x285   : > { %v10683_v56 = vpop.f32.mrb[6].mxu1 }
 0x286   : > { %v3607_v43 = vpop.f32.mrb[7].mxu1 }
 0x28b   : > { %v10686_v49 = vpop.f32.mrb[8].mxu1 }
 0x28c   : > { %v3620_v3 = vpop.f32.mrb[9].mxu1 }
 0x28d   : > { %v10687_v47 = vpop.f32.mrb[10].mxu1 }
 0x28e   : > { %v3623_v44 = vpop.f32.mrb[11].mxu1 }
 0x293   : > { %v13813_v37 = vpop.f32.mrb[12].mxu1 }
 0x294   : > { %v13815_v20 = vpop.f32.mrb[13].mxu1 }
 0x295   : > { %v13817_v2 = vpop.f32.mrb[14].mxu1 }
 0x296   : > { %v13819_v57 = vpop.f32.mrb[15].mxu1 }
 0x29b   : > { %v13821_v15 = vpop.f32.mrb[16].mxu1 }
 0x29c   : > { %v13823_v6 = vpop.f32.mrb[17].mxu1 }
 0x29d   : > { %v13825_v46 = vpop.f32.mrb[18].mxu1 }
 0x29e   : > { %v13827_v14 = vpop.f32.mrb[19].mxu1 }
 0x2a3   : > { %v13829_v5 = vpop.f32.mrb[20].mxu1 }
 0x2a4   : > { %v13831_v34 = vpop.f32.mrb[21].mxu1 }
 0x2a5   : > { %v13833_v10 = vpop.f32.mrb[22].mxu1 }
 0x2a6   : > { %v13835_v8 = vpop.f32.mrb[23].mxu1 }
 0x2ab   : > { %v13837_v45 = vpop.f32.mrb[24].mxu1 }
 0x2ac   : > { %v13839_v48 = vpop.f32.mrb[25].mxu1 }
 0x2ad   : > { %v13841_v40 = vpop.f32.mrb[26].mxu1 }
 0x2ae   : > { %v13843_v12 = vpop.f32.mrb[27].mxu1 }
 0x2b1   : > { %v11038_v1 = vpop.f32.mrb[0].mxu0 }
 0x2b2   : > { %v11108_v25 = vadd.f32 %v11038_v1, %v10678_v50  ;;  %v7719_v4 = vpop.f32.mrb[1].mxu0 }
 0x2b3   : > { %v11109_v58 = vadd.f32 %v7719_v4, %v3588_v16  ;;  %v11039_v21 = vpop.f32.mrb[2].mxu0  ;;  %v13850_v30 = vpop.f32.mrb[28].mxu1 }
 0x2b4   : > { %v11110_v36 = vadd.f32 %v11039_v21, %v10679_v31  ;;  %v7722_v23 = vpop.f32.mrb[3].mxu0  ;;  %v13853_v24 = vadd.f32 %v11108_v25, %v13848_v41  ;;  %v13858_v11 = vpop.f32.mrb[29].mxu1 }
 0x2b5   : > { %v11111_v38 = vadd.f32 %v7722_v23, %v3591_v26  ;;  %v13861_v33 = vadd.f32 %v11109_v58, %v13848_v41  ;;  %v13873_v18 = vpop.f32.mrb[30].mxu1 }
 0x2b6   : > { %v13856_v27 = vadd.f32 %v11110_v36, %v13848_v41  ;;  %v13877_v0 = vpop.f32.mrb[31].mxu1 }
 0x2b7   : > { %v13871_v60 = vadd.f32 %v11111_v38, %v13848_v41 }
 0x2b8   : > { %v9945_v9 = vpack.c.bf16 %v13856_v27, %v13853_v24 }
 0x2b9   : > { %v9940_v28 = vpack.c.bf16 %v13871_v60, %v13861_v33  ;;  %v11042_v19 = vpop.f32.mrb[4].mxu0 }
 0x2ba   : > { %10097 = vst [vmem:[%s13868_s30 + $0x8] sm:$0xff] %v9945_v9   ;;  %v11112_v53 = vadd.f32 %v11042_v19, %v10682_v54  ;;  %v7735_v42 = vpop.f32.mrb[5].mxu0 }
 0x2bb   : > { %9941 = vst [vmem:[%s13868_s30] sm:$0xff] %v9940_v28   ;;  %v11113_v7 = vadd.f32 %v7735_v42, %v3604_v29  ;;  %v11043_v13 = vpop.f32.mrb[6].mxu0 }
 0x2bc   : > { %v11114_v17 = vadd.f32 %v11043_v13, %v10683_v56  ;;  %v7738_v59 = vpop.f32.mrb[7].mxu0  ;;  %v13884_v39 = vadd.f32 %v11112_v53, %v13848_v41 }
 0x2bd   : > { %v11115_v63 = vadd.f32 %v7738_v59, %v3607_v43  ;;  %v13890_v55 = vadd.f32 %v11113_v7, %v13848_v41 }
 0x2be   : > { %v13887_v22 = vadd.f32 %v11114_v17, %v13848_v41 }
 0x2bf   : > { %v13893_v51 = vadd.f32 %v11115_v63, %v13848_v41 }
 0x2c0   : > { %v9955_v32 = vpack.c.bf16 %v13887_v22, %v13884_v39 }
 0x2c1   : > { %v9950_v61 = vpack.c.bf16 %v13893_v51, %v13890_v55  ;;  %v11046_v52 = vpop.f32.mrb[8].mxu0 }
 0x2c2   : > { %10099 = vst [vmem:[%s13868_s30 + $0x18] sm:$0xff] %v9955_v32   ;;  %v11116_v35 = vadd.f32 %v11046_v52, %v10686_v49  ;;  %v7751_v62 = vpop.f32.mrb[9].mxu0 }
 0x2c3   : > { %10098 = vst [vmem:[%s13868_s30 + $0x10] sm:$0xff] %v9950_v61   ;;  %v11117_v50 = vadd.f32 %v7751_v62, %v3620_v3  ;;  %v11047_v16 = vpop.f32.mrb[10].mxu0 }
 0x2c4   : > { %v11118_v31 = vadd.f32 %v11047_v16, %v10687_v47  ;;  %v7754_v26 = vpop.f32.mrb[11].mxu0  ;;  %v13902_v29 = vadd.f32 %v11116_v35, %v13848_v41 }
 0x2c5   : > { %v11119_v54 = vadd.f32 %v7754_v26, %v3623_v44  ;;  %v13908_v43 = vadd.f32 %v11117_v50, %v13848_v41 }
 0x2c6   : > { %v13905_v56 = vadd.f32 %v11118_v31, %v13848_v41 }
 0x2c7   : > { %v13911_v1 = vadd.f32 %v11119_v54, %v13848_v41 }
 0x2c8   : > { %v9965_v49 = vpack.c.bf16 %v13905_v56, %v13902_v29 }
 0x2c9   : > { %v9960_v3 = vpack.c.bf16 %v13911_v1, %v13908_v43  ;;  %v11050_v47 = vpop.f32.mrb[12].mxu0 }
 0x2ca   : > { %10101 = vst [vmem:[%s13868_s30 + $0x28] sm:$0xff] %v9965_v49   ;;  %v11120_v44 = vadd.f32 %v11050_v47, %v13813_v37  ;;  %v7767_v25 = vpop.f32.mrb[13].mxu0 }
 0x2cb   : > { %10100 = vst [vmem:[%s13868_s30 + $0x20] sm:$0xff] %v9960_v3   ;;  %v11121_v4 = vadd.f32 %v7767_v25, %v13815_v20  ;;  %v11051_v58 = vpop.f32.mrb[14].mxu0 }
 0x2cc   : > { %v11122_v21 = vadd.f32 %v11051_v58, %v13817_v2  ;;  %v7770_v36 = vpop.f32.mrb[15].mxu0  ;;  %v13924_v38 = vadd.f32 %v11120_v44, %v13848_v41 }
 0x2cd   : > { %v11123_v23 = vadd.f32 %v7770_v36, %v13819_v57  ;;  %v13930_v28 = vadd.f32 %v11121_v4, %v13848_v41 }
 0x2ce   : > { %v13927_v9 = vadd.f32 %v11122_v21, %v13848_v41 }
 0x2cf   : > { %v13933_v37 = vadd.f32 %v11123_v23, %v13848_v41 }
 0x2d0   : > { %v9975_v20 = vpack.c.bf16 %v13927_v9, %v13924_v38 }
 0x2d1   : > { %v9970_v2 = vpack.c.bf16 %v13933_v37, %v13930_v28  ;;  %v11054_v19 = vpop.f32.mrb[16].mxu0 }
 0x2d2   : > { %10103 = vst [vmem:[%s13868_s30 + $0x38] sm:$0xff] %v9975_v20   ;;  %v11124_v57 = vadd.f32 %v11054_v19, %v13821_v15  ;;  %v7783_v53 = vpop.f32.mrb[17].mxu0 }
 0x2d3   : > { %10102 = vst [vmem:[%s13868_s30 + $0x30] sm:$0xff] %v9970_v2   ;;  %v11125_v42 = vadd.f32 %v7783_v53, %v13823_v6  ;;  %v11055_v7 = vpop.f32.mrb[18].mxu0 }
 0x2d4   : > { %v11126_v13 = vadd.f32 %v11055_v7, %v13825_v46  ;;  %v7786_v17 = vpop.f32.mrb[19].mxu0  ;;  %v13946_v63 = vadd.f32 %v11124_v57, %v13848_v41 }
 0x2d5   : > { %v11127_v59 = vadd.f32 %v7786_v17, %v13827_v14  ;;  %v13952_v61 = vadd.f32 %v11125_v42, %v13848_v41 }
 0x2d6   : > { %v13949_v32 = vadd.f32 %v11126_v13, %v13848_v41 }
 0x2d7   : > { %v13955_v15 = vadd.f32 %v11127_v59, %v13848_v41 }
 0x2d8   : > { %v9985_v6 = vpack.c.bf16 %v13949_v32, %v13946_v63 }
 0x2d9   : > { %v9980_v46 = vpack.c.bf16 %v13955_v15, %v13952_v61  ;;  %v11058_v52 = vpop.f32.mrb[20].mxu0 }
 0x2da   : > { %10105 = vst [vmem:[%s13868_s30 + $0x48] sm:$0xff] %v9985_v6   ;;  %v11128_v14 = vadd.f32 %v11058_v52, %v13829_v5  ;;  %v7799_v35 = vpop.f32.mrb[21].mxu0 }
 0x2db   : > { %10104 = vst [vmem:[%s13868_s30 + $0x40] sm:$0xff] %v9980_v46   ;;  %v11129_v62 = vadd.f32 %v7799_v35, %v13831_v34  ;;  %v11059_v50 = vpop.f32.mrb[22].mxu0 }
 0x2dc   : > { %v11130_v16 = vadd.f32 %v11059_v50, %v13833_v10  ;;  %v7802_v31 = vpop.f32.mrb[23].mxu0  ;;  %v13968_v54 = vadd.f32 %v11128_v14, %v13848_v41 }
 0x2dd   : > { %v11131_v26 = vadd.f32 %v7802_v31, %v13835_v8  ;;  %v13974_v3 = vadd.f32 %v11129_v62, %v13848_v41 }
 0x2de   : > { %v13971_v49 = vadd.f32 %v11130_v16, %v13848_v41 }
 0x2df   : > { %v13977_v5 = vadd.f32 %v11131_v26, %v13848_v41 }
 0x2e0   : > { %v9995_v34 = vpack.c.bf16 %v13971_v49, %v13968_v54 }
 0x2e1   : > { %v9990_v10 = vpack.c.bf16 %v13977_v5, %v13974_v3  ;;  %v11062_v47 = vpop.f32.mrb[24].mxu0 }
 0x2e2   : > { %10107 = vst [vmem:[%s13868_s30 + $0x58] sm:$0xff] %v9995_v34   ;;  %v11132_v8 = vadd.f32 %v11062_v47, %v13837_v45  ;;  %v7815_v44 = vpop.f32.mrb[25].mxu0 }
 0x2e3   : > { %10106 = vst [vmem:[%s13868_s30 + $0x50] sm:$0xff] %v9990_v10   ;;  %v11133_v25 = vadd.f32 %v7815_v44, %v13839_v48  ;;  %v11063_v4 = vpop.f32.mrb[26].mxu0 }
 0x2e4   : > { %v11134_v58 = vadd.f32 %v11063_v4, %v13841_v40  ;;  %v7818_v21 = vpop.f32.mrb[27].mxu0  ;;  %v13990_v23 = vadd.f32 %v11132_v8, %v13848_v41 }
 0x2e5   : > { %v11135_v36 = vadd.f32 %v7818_v21, %v13843_v12  ;;  %v13996_v2 = vadd.f32 %v11133_v25, %v13848_v41 }
 0x2e6   : > { %v13993_v20 = vadd.f32 %v11134_v58, %v13848_v41 }
 0x2e7   : > { %v13999_v45 = vadd.f32 %v11135_v36, %v13848_v41 }
 0x2e8   : > { %v10005_v48 = vpack.c.bf16 %v13993_v20, %v13990_v23 }
 0x2e9   : > { %v10000_v40 = vpack.c.bf16 %v13999_v45, %v13996_v2  ;;  %v11066_v19 = vpop.f32.mrb[28].mxu0 }
 0x2ea   : > { %10109 = vst [vmem:[%s13868_s30 + $0x68] sm:$0xff] %v10005_v48   ;;  %v11136_v12 = vadd.f32 %v11066_v19, %v13850_v30  ;;  %v7831_v57 = vpop.f32.mrb[29].mxu0 }
 0x2eb   : > { %10108 = vst [vmem:[%s13868_s30 + $0x60] sm:$0xff] %v10000_v40   ;;  %v11137_v53 = vadd.f32 %v7831_v57, %v13858_v11  ;;  %v11067_v42 = vpop.f32.mrb[30].mxu0 }
 0x2ec   : > { %v11138_v7 = vadd.f32 %v11067_v42, %v13873_v18  ;;  %v7834_v13 = vpop.f32.mrb[31].mxu0  ;;  %v14012_v59 = vadd.f32 %v11136_v12, %v13848_v41 }
 0x2ed   : > { %v11139_v17 = vadd.f32 %v7834_v13, %v13877_v0  ;;  %v14018_v46 = vadd.f32 %v11137_v53, %v13848_v41 }
 0x2ee   : > { %v14015_v6 = vadd.f32 %v11138_v7, %v13848_v41 }
 0x2ef   : > { %v14021_v30 = vadd.f32 %v11139_v17, %v13848_v41 }
 0x2f0   : > { %v10015_v11 = vpack.c.bf16 %v14015_v6, %v14012_v59 }
 0x2f1   : > { %v10010_v18 = vpack.c.bf16 %v14021_v30, %v14018_v46  ;;  %v11070_v52 = vpop.f32.mrb[32].mxu0 }
 0x2f2   : > { %10111 = vst [vmem:[%s13868_s30 + $0x78] sm:$0xff] %v10015_v11   ;;  %v7847_v0 = vpop.f32.mrb[33].mxu0 }
 0x2f3   : > { %10110 = vst [vmem:[%s13868_s30 + $0x70] sm:$0xff] %v10010_v18   ;;  %v11071_v14 = vpop.f32.mrb[34].mxu0 }
 0x2f4   : > { %v7850_v35 = vpop.f32.mrb[35].mxu0 }
 0x2f9   : > { %v11074_v62 = vpop.f32.mrb[36].mxu0 }
 0x2fa   : > { %v7863_v50 = vpop.f32.mrb[37].mxu0 }
 0x2fb   : > { %v11075_v16 = vpop.f32.mrb[38].mxu0  ;;  %v10782_v26 = vpop.f32.mrb[32].mxu1 }
 0x2fc   : > { %v7866_v31 = vpop.f32.mrb[39].mxu0  ;;  %v11140_v34 = vadd.f32 %v11070_v52, %v10782_v26  ;;  %v4358_v10 = vpop.f32.mrb[33].mxu1 }
 0x2fd   : > { %v11141_v47 = vadd.f32 %v7847_v0, %v4358_v10  ;;  %v10783_v8 = vpop.f32.mrb[34].mxu1 }
 0x2fe   : > { %v11142_v44 = vadd.f32 %v11071_v14, %v10783_v8  ;;  %v4361_v25 = vpop.f32.mrb[35].mxu1  ;;  %v14030_v36 = vadd.f32 %v11140_v34, %v13848_v41 }
 0x2ff   : > { %v11143_v58 = vadd.f32 %v7850_v35, %v4361_v25  ;;  %v14036_v19 = vadd.f32 %v11141_v47, %v13848_v41 }
 0x300   : > { %v14033_v48 = vadd.f32 %v11142_v44, %v13848_v41 }
 0x301   : > { %v11078_v4 = vpop.f32.mrb[40].mxu0  ;;  %v14039_v12 = vadd.f32 %v11143_v58, %v13848_v41 }
 0x302   : > { %v7879_v21 = vpop.f32.mrb[41].mxu0  ;;  %v10025_v53 = vpack.c.bf16 %v14033_v48, %v14030_v36 }
 0x303   : > { %v11079_v40 = vpop.f32.mrb[42].mxu0  ;;  %v10020_v42 = vpack.c.bf16 %v14039_v12, %v14036_v19  ;;  %v10786_v7 = vpop.f32.mrb[36].mxu1 }
 0x304   : > { %v7882_v57 = vpop.f32.mrb[43].mxu0  ;;  %10113 = vst [vmem:[%s13868_s30 + $0x88] sm:$0xff] %v10025_v53   ;;  %v11144_v13 = vadd.f32 %v11074_v62, %v10786_v7  ;;  %v4374_v17 = vpop.f32.mrb[37].mxu1 }
 0x305   : > { %10112 = vst [vmem:[%s13868_s30 + $0x80] sm:$0xff] %v10020_v42   ;;  %v11145_v11 = vadd.f32 %v7863_v50, %v4374_v17  ;;  %v10787_v18 = vpop.f32.mrb[38].mxu1 }
 0x306   : > { %v11146_v52 = vadd.f32 %v11075_v16, %v10787_v18  ;;  %v4377_v0 = vpop.f32.mrb[39].mxu1  ;;  %v14048_v34 = vadd.f32 %v11144_v13, %v13848_v41 }
 0x307   : > { %v11147_v35 = vadd.f32 %v7866_v31, %v4377_v0  ;;  %v14054_v62 = vadd.f32 %v11145_v11, %v13848_v41 }
 0x308   : > { %14412 = vst [vmem:[#allocation4_spill] sm:$0xff] %v14048_v34  ;;  %v14051_v10 = vadd.f32 %v11146_v52, %v13848_v41 }
 0x309   : > { %v11082_v14 = vpop.f32.mrb[44].mxu0  ;;  %v14057_v50 = vadd.f32 %v11147_v35, %v13848_v41 }
 0x30a   : > { %v7895_v26 = vpop.f32.mrb[45].mxu0  ;;  %14413 = vst [vmem:[#allocation5_spill] sm:$0xff] %v14051_v10  ;;  %v10035_v16 = vpack.c.bf16 %v14051_v10, %v14048_v34 }
 0x30b   : > { %v11083_v47 = vpop.f32.mrb[46].mxu0  ;;  %v10030_v31 = vpack.c.bf16 %v14057_v50, %v14054_v62  ;;  %v10790_v44 = vpop.f32.mrb[40].mxu1 }
 0x30c   : > { %v7898_v8 = vpop.f32.mrb[47].mxu0  ;;  %10115 = vst [vmem:[%s13868_s30 + $0x98] sm:$0xff] %v10035_v16   ;;  %v11148_v25 = vadd.f32 %v11078_v4, %v10790_v44  ;;  %v4390_v58 = vpop.f32.mrb[41].mxu1 }
 0x30d   : > { %10114 = vst [vmem:[%s13868_s30 + $0x90] sm:$0xff] %v10030_v31   ;;  %v11149_v53 = vadd.f32 %v7879_v21, %v4390_v58  ;;  %v10791_v42 = vpop.f32.mrb[42].mxu1 }
 0x30e   : > { %v11150_v7 = vadd.f32 %v11079_v40, %v10791_v42  ;;  %v4393_v13 = vpop.f32.mrb[43].mxu1  ;;  %v14066_v52 = vadd.f32 %v11148_v25, %v13848_v41 }
 0x30f   : > { %v11151_v11 = vadd.f32 %v7882_v57, %v4393_v13  ;;  %v14072_v4 = vadd.f32 %v11149_v53, %v13848_v41 }
 0x310   : > { %14414 = vst [vmem:[#allocation6_spill] sm:$0xff] %v14066_v52  ;;  %v14069_v0 = vadd.f32 %v11150_v7, %v13848_v41 }
 0x311   : > { %v11086_v17 = vpop.f32.mrb[48].mxu0  ;;  %14416 = vst [vmem:[#allocation8_spill] sm:$0xff] %v14072_v4  ;;  %v14075_v21 = vadd.f32 %v11151_v11, %v13848_v41 }
 0x312   : > { %v7911_v18 = vpop.f32.mrb[49].mxu0  ;;  %14415 = vst [vmem:[#allocation7_spill] sm:$0xff] %v14069_v0  ;;  %v10045_v40 = vpack.c.bf16 %v14069_v0, %v14066_v52 }
 0x313   : > { %v11087_v35 = vpop.f32.mrb[50].mxu0  ;;  %14417 = vst [vmem:[#allocation9_spill] sm:$0xff] %v14075_v21  ;;  %v10040_v57 = vpack.c.bf16 %v14075_v21, %v14072_v4  ;;  %v10794_v31 = vpop.f32.mrb[44].mxu1 }
 0x314   : > { %v7914_v16 = vpop.f32.mrb[51].mxu0  ;;  %10117 = vst [vmem:[%s13868_s30 + $0xa8] sm:$0xff] %v10045_v40   ;;  %v11152_v44 = vadd.f32 %v11082_v14, %v10794_v31  ;;  %v4406_v25 = vpop.f32.mrb[45].mxu1 }
 0x315   : > { %10116 = vst [vmem:[%s13868_s30 + $0xa0] sm:$0xff] %v10040_v57   ;;  %v11153_v58 = vadd.f32 %v7895_v26, %v4406_v25  ;;  %v10795_v42 = vpop.f32.mrb[46].mxu1 }
 0x316   : > { %v11154_v53 = vadd.f32 %v11083_v47, %v10795_v42  ;;  %v4409_v7 = vpop.f32.mrb[47].mxu1  ;;  %v14084_v34 = vadd.f32 %v11152_v44, %v13848_v41 }
 0x317   : > { %v11155_v11 = vadd.f32 %v7898_v8, %v4409_v7  ;;  %v14090_v14 = vadd.f32 %v11153_v58, %v13848_v41 }
 0x318   : > { %14418 = vst [vmem:[#allocation10_spill] sm:$0xff] %v14084_v34  ;;  %v14087_v0 = vadd.f32 %v11154_v53, %v13848_v41 }
 0x319   : > { %v11090_v13 = vpop.f32.mrb[52].mxu0  ;;  %14420 = vst [vmem:[#allocation12_spill] sm:$0xff] %v14090_v14  ;;  %v14093_v26 = vadd.f32 %v11155_v11, %v13848_v41 }
 0x31a   : > { %v7927_v10 = vpop.f32.mrb[53].mxu0  ;;  %14419 = vst [vmem:[#allocation11_spill] sm:$0xff] %v14087_v0  ;;  %v10055_v47 = vpack.c.bf16 %v14087_v0, %v14084_v34 }
 0x31b   : > { %v11091_v52 = vpop.f32.mrb[54].mxu0  ;;  %14421 = vst [vmem:[#allocation13_spill] sm:$0xff] %v14093_v26  ;;  %v10050_v8 = vpack.c.bf16 %v14093_v26, %v14090_v14  ;;  %v10798_v57 = vpop.f32.mrb[48].mxu1 }
 0x31c   : > { %v7930_v40 = vpop.f32.mrb[55].mxu0  ;;  %10119 = vst [vmem:[%s13868_s30 + $0xb8] sm:$0xff] %v10055_v47   ;;  %v11156_v31 = vadd.f32 %v11086_v17, %v10798_v57  ;;  %v4422_v44 = vpop.f32.mrb[49].mxu1 }
 0x31d   : > { %10118 = vst [vmem:[%s13868_s30 + $0xb0] sm:$0xff] %v10050_v8   ;;  %v11157_v25 = vadd.f32 %v7911_v18, %v4422_v44  ;;  %v10799_v42 = vpop.f32.mrb[50].mxu1 }
 0x31e   : > { %v11158_v58 = vadd.f32 %v11087_v35, %v10799_v42  ;;  %v4425_v53 = vpop.f32.mrb[51].mxu1  ;;  %v14102_v4 = vadd.f32 %v11156_v31, %v13848_v41 }
 0x31f   : > { %v11159_v11 = vadd.f32 %v7914_v16, %v4425_v53  ;;  %v14108_v17 = vadd.f32 %v11157_v25, %v13848_v41 }
 0x320   : > { %14422 = vst [vmem:[#allocation14_spill] sm:$0xff] %v14102_v4  ;;  %v14105_v0 = vadd.f32 %v11158_v58, %v13848_v41 }
 0x321   : > { %v11094_v7 = vpop.f32.mrb[56].mxu0  ;;  %v14111_v18 = vadd.f32 %v11159_v11, %v13848_v41 }
 0x322   : > { %v7943_v21 = vpop.f32.mrb[57].mxu0  ;;  %14423 = vst [vmem:[#allocation15_spill] sm:$0xff] %v14105_v0  ;;  %v10065_v35 = vpack.c.bf16 %v14105_v0, %v14102_v4 }
 0x323   : > { %v11095_v34 = vpop.f32.mrb[58].mxu0  ;;  %v10060_v16 = vpack.c.bf16 %v14111_v18, %v14108_v17  ;;  %v10802_v8 = vpop.f32.mrb[52].mxu1 }
 0x324   : > { %v7946_v47 = vpop.f32.mrb[59].mxu0  ;;  %10121 = vst [vmem:[%s13868_s30 + $0xc8] sm:$0xff] %v10065_v35   ;;  %v11160_v57 = vadd.f32 %v11090_v13, %v10802_v8  ;;  %v4438_v31 = vpop.f32.mrb[53].mxu1 }
 0x325   : > { %10120 = vst [vmem:[%s13868_s30 + $0xc0] sm:$0xff] %v10060_v16   ;;  %v11161_v44 = vadd.f32 %v7927_v10, %v4438_v31  ;;  %v10803_v42 = vpop.f32.mrb[54].mxu1 }
 0x326   : > { %v11162_v25 = vadd.f32 %v11091_v52, %v10803_v42  ;;  %v4441_v58 = vpop.f32.mrb[55].mxu1  ;;  %v14120_v14 = vadd.f32 %v11160_v57, %v13848_v41 }
 0x327   : > { %v11163_v11 = vadd.f32 %v7930_v40, %v4441_v58  ;;  %v14126_v13 = vadd.f32 %v11161_v44, %v13848_v41 }
 0x328   : > { %14424 = vst [vmem:[#allocation16_spill] sm:$0xff] %v14120_v14  ;;  %v14123_v0 = vadd.f32 %v11162_v25, %v13848_v41 }
 0x329   : > { %v11098_v53 = vpop.f32.mrb[60].mxu0  ;;  %v14129_v10 = vadd.f32 %v11163_v11, %v13848_v41 }
 0x32a   : > { %v7959_v26 = vpop.f32.mrb[61].mxu0  ;;  %14425 = vst [vmem:[#allocation17_spill] sm:$0xff] %v14123_v0  ;;  %v10075_v52 = vpack.c.bf16 %v14123_v0, %v14120_v14 }
 0x32b   : > { %v11099_v4 = vpop.f32.mrb[62].mxu0  ;;  %v10070_v40 = vpack.c.bf16 %v14129_v10, %v14126_v13  ;;  %v10806_v16 = vpop.f32.mrb[56].mxu1 }
 0x32c   : > { %v7962_v35 = vpop.f32.mrb[63].mxu0  ;;  %10123 = vst [vmem:[%s13868_s30 + $0xd8] sm:$0xff] %v10075_v52   ;;  %v11164_v8 = vadd.f32 %v11094_v7, %v10806_v16  ;;  %v4454_v57 = vpop.f32.mrb[57].mxu1 }
 0x32d   : > { %10122 = vst [vmem:[%s13868_s30 + $0xd0] sm:$0xff] %v10070_v40   ;;  %v11165_v31 = vadd.f32 %v7943_v21, %v4454_v57  ;;  %v10807_v44 = vpop.f32.mrb[58].mxu1 }
 0x32e   : > { %v11166_v42 = vadd.f32 %v11095_v34, %v10807_v44  ;;  %v4457_v25 = vpop.f32.mrb[59].mxu1  ;;  %v14138_v11 = vadd.f32 %v11164_v8, %v13848_v41 }
 0x32f   : > { %v11167_v58 = vadd.f32 %v7946_v47, %v4457_v25  ;;  %v14144_v14 = vadd.f32 %v11165_v31, %v13848_v41 }
 0x330   : > { %14426 = vst [vmem:[#allocation18_spill] sm:$0xff] %v14138_v11  ;;  %v14141_v0 = vadd.f32 %v11166_v42, %v13848_v41 }
 0x331   : > { %v14147_v52 = vadd.f32 %v11167_v58, %v13848_v41 }
 0x332   : > { %14427 = vst [vmem:[#allocation19_spill] sm:$0xff] %v14141_v0  ;;  %v10085_v7 = vpack.c.bf16 %v14141_v0, %v14138_v11 }
 0x333   : > { %v10080_v34 = vpack.c.bf16 %v14147_v52, %v14144_v14  ;;  %v10810_v21 = vpop.f32.mrb[60].mxu1 }
 0x334   : > { %10125 = vst [vmem:[%s13868_s30 + $0xe8] sm:$0xff] %v10085_v7   ;;  %v11168_v47 = vadd.f32 %v11098_v53, %v10810_v21  ;;  %v4470_v40 = vpop.f32.mrb[61].mxu1 }
 0x335   : > { %10124 = vst [vmem:[%s13868_s30 + $0xe0] sm:$0xff] %v10080_v34   ;;  %v11169_v16 = vadd.f32 %v7959_v26, %v4470_v40  ;;  %v10811_v8 = vpop.f32.mrb[62].mxu1  ;;  %v11716_v26 = vmov (!%p9869_p5), 0.0  }
 0x336   : > { %v11170_v57 = vadd.f32 %v11099_v4, %v10811_v8  ;;  %v4473_v31 = vpop.f32.mrb[63].mxu1  ;;  %v14156_v42 = vadd.f32 %v11168_v47, %v13848_v41  ;;  %8625 = vst [vmem:[%s14323_s8] sm:$0xff] (!%p9869_p5), %v11716_v26 }
 0x337   : > { %v11171_v44 = vadd.f32 %v7962_v35, %v4473_v31  ;;  %v14162_v58 = vadd.f32 %v11169_v16, %v13848_v41  ;;  %8624 = sbr.rel (%p9869_p5) target bundleno = 830 (0x33e), region = 52 }
 0x338   : > { %14428 = vst [vmem:[#allocation20_spill] sm:$0xff] %v14156_v42  ;;  %v14159_v25 = vadd.f32 %v11170_v57, %v13848_v41 }
 0x339   : > { %14430 = vst [vmem:[#allocation22_spill] sm:$0xff] %v14162_v58  ;;  %v14165_v7 = vadd.f32 %v11171_v44, %v13848_v41 }
 0x33a   : > { %14429 = vst [vmem:[#allocation21_spill] sm:$0xff] %v14159_v25  ;;  %v10095_v53 = vpack.c.bf16 %v14159_v25, %v14156_v42 }
 0x33b   : > { %14431 = vst [vmem:[#allocation23_spill] sm:$0xff] %v14165_v7  ;;  %v10090_v4 = vpack.c.bf16 %v14165_v7, %v14162_v58 }
 0x33c   : > { %10127 = vst [vmem:[%s13868_s30 + $0xf8] sm:$0xff] %v10095_v53  }
 0x33d   : > { %10126 = vst [vmem:[%s13868_s30 + $0xf0] sm:$0xff] %v10090_v4  }
 0x33e PF: > { %v8628_v41 = vld [vmem:[%s11810_s6 + $0x10] sm:$0xff]  ;;  %v8626_v35 = vld [vmem:[%s11810_s6] sm:$0xff]  ;;  %v11717_v34 = vmov 0   ;;  %v8629_v21 = vld [vmem:[%s11810_s6 + $0x18] sm:$0xff] }
 0x33f   : > { %11707 = vset.pattern.permute.xlu1 %v11717_v34  ;;  %11706 = vset.pattern.permute.xlu0 %v11717_v34  ;;  %v8627_v47 = vld [vmem:[%s11810_s6 + $0x8] sm:$0xff]  ;;  %v8630_v16 = vld [vmem:[%s11810_s6 + $0x20] sm:$0xff]  ;;  %v8633_v8 = vld [vmem:[%s11810_s6 + $0x38] sm:$0xff] }
 0x340   : > { %8702 = vperm.xlu1 %11707, %v8628_v41   ;;  %8692 = vperm.xlu0 %11706, %v8626_v35   ;;  %v8631_v40 = vld [vmem:[%s11810_s6 + $0x28] sm:$0xff]  ;;  %v8632_v57 = vld [vmem:[%s11810_s6 + $0x30] sm:$0xff]  ;;  %v8634_v44 = vld [vmem:[%s11810_s6 + $0x40] sm:$0xff] }
 0x341   : > { %v8635_v31 = vld [vmem:[%s11810_s6 + $0x48] sm:$0xff]  ;;  %v8637_v53 = vld [vmem:[%s11810_s6 + $0x58] sm:$0xff]  ;;  %v8636_v4 = vld [vmem:[%s11810_s6 + $0x50] sm:$0xff] }
 0x342   : > { %v8639_v26 = vld [vmem:[%s11810_s6 + $0x68] sm:$0xff]  ;;  %v8638_v41 = vld [vmem:[%s11810_s6 + $0x60] sm:$0xff]  ;;  %v8641_v35 = vld [vmem:[%s11810_s6 + $0x78] sm:$0xff] }
 0x343   : > { %v8640_v34 = vld [vmem:[%s11810_s6 + $0x70] sm:$0xff] }
 0x344   : > { %8707 = vperm.xlu1 %11707, %v8629_v21   ;;  %8697 = vperm.xlu0 %11706, %v8627_v47   ;;  %v8643_v21 = vld [vmem:[%s11810_s6 + $0x88] sm:$0xff]  ;;  %v8642_v47 = vld [vmem:[%s11810_s6 + $0x80] sm:$0xff] }
 0x348   : > { %8717 = vperm.xlu1 %11707, %v8631_v40   ;;  %8712 = vperm.xlu0 %11706, %v8630_v16   ;;  %v8645_v40 = vld [vmem:[%s11810_s6 + $0x98] sm:$0xff]  ;;  %v8644_v16 = vld [vmem:[%s11810_s6 + $0x90] sm:$0xff] }
 0x34c   : > { %8727 = vperm.xlu1 %11707, %v8633_v8   ;;  %8722 = vperm.xlu0 %11706, %v8632_v57   ;;  %v8647_v8 = vld [vmem:[%s11810_s6 + $0xa8] sm:$0xff]  ;;  %v8646_v57 = vld [vmem:[%s11810_s6 + $0xa0] sm:$0xff] }
 0x350   : > { %8737 = vperm.xlu1 %11707, %v8635_v31   ;;  %8732 = vperm.xlu0 %11706, %v8634_v44   ;;  %v8649_v31 = vld [vmem:[%s11810_s6 + $0xb8] sm:$0xff]  ;;  %v8648_v44 = vld [vmem:[%s11810_s6 + $0xb0] sm:$0xff] }
 0x354   : > { %8747 = vperm.xlu1 %11707, %v8637_v53   ;;  %8742 = vperm.xlu0 %11706, %v8636_v4   ;;  %v8651_v53 = vld [vmem:[%s11810_s6 + $0xc8] sm:$0xff]  ;;  %v8650_v4 = vld [vmem:[%s11810_s6 + $0xc0] sm:$0xff] }
 0x358   : > { %8757 = vperm.xlu1 %11707, %v8639_v26   ;;  %8752 = vperm.xlu0 %11706, %v8638_v41   ;;  %v8653_v26 = vld [vmem:[%s11810_s6 + $0xd8] sm:$0xff]  ;;  %v8652_v41 = vld [vmem:[%s11810_s6 + $0xd0] sm:$0xff] }
 0x35c   : > { %8767 = vperm.xlu1 %11707, %v8641_v35   ;;  %8762 = vperm.xlu0 %11706, %v8640_v34   ;;  %v8655_v35 = vld [vmem:[%s11810_s6 + $0xe8] sm:$0xff]  ;;  %v8654_v34 = vld [vmem:[%s11810_s6 + $0xe0] sm:$0xff] }
 0x360   : > { %8777 = vperm.xlu1 %11707, %v8643_v21   ;;  %8772 = vperm.xlu0 %11706, %v8642_v47   ;;  %v8657_v21 = vld [vmem:[%s11810_s6 + $0xf8] sm:$0xff]  ;;  %v8656_v47 = vld [vmem:[%s11810_s6 + $0xf0] sm:$0xff] }
 0x364   : > { %8787 = vperm.xlu1 %11707, %v8645_v40   ;;  %8782 = vperm.xlu0 %11706, %v8644_v16   ;;  %v8659_v40 = vld [vmem:[%s11810_s6 + $0x108] sm:$0xff]  ;;  %v8658_v16 = vld [vmem:[%s11810_s6 + $0x100] sm:$0xff] }
 0x368   : > { %8797 = vperm.xlu1 %11707, %v8647_v8   ;;  %8792 = vperm.xlu0 %11706, %v8646_v57   ;;  %v8661_v8 = vld [vmem:[%s11810_s6 + $0x118] sm:$0xff]  ;;  %v8660_v57 = vld [vmem:[%s11810_s6 + $0x110] sm:$0xff] }
 0x36c   : > { %8807 = vperm.xlu1 %11707, %v8649_v31   ;;  %8802 = vperm.xlu0 %11706, %v8648_v44   ;;  %v8663_v31 = vld [vmem:[%s11810_s6 + $0x128] sm:$0xff]  ;;  %v8662_v44 = vld [vmem:[%s11810_s6 + $0x120] sm:$0xff] }
 0x370   : > { %8817 = vperm.xlu1 %11707, %v8651_v53   ;;  %8812 = vperm.xlu0 %11706, %v8650_v4   ;;  %v8665_v53 = vld [vmem:[%s11810_s6 + $0x138] sm:$0xff]  ;;  %v8664_v4 = vld [vmem:[%s11810_s6 + $0x130] sm:$0xff] }
 0x374   : > { %8827 = vperm.xlu1 %11707, %v8653_v26   ;;  %8822 = vperm.xlu0 %11706, %v8652_v41   ;;  %v8667_v26 = vld [vmem:[%s11810_s6 + $0x148] sm:$0xff]  ;;  %v8666_v41 = vld [vmem:[%s11810_s6 + $0x140] sm:$0xff] }
 0x378   : > { %8837 = vperm.xlu1 %11707, %v8655_v35   ;;  %8832 = vperm.xlu0 %11706, %v8654_v34   ;;  %v8669_v35 = vld [vmem:[%s11810_s6 + $0x158] sm:$0xff]  ;;  %v8668_v34 = vld [vmem:[%s11810_s6 + $0x150] sm:$0xff] }
 0x37c   : > { %8847 = vperm.xlu1 %11707, %v8657_v21   ;;  %8842 = vperm.xlu0 %11706, %v8656_v47   ;;  %v8671_v21 = vld [vmem:[%s11810_s6 + $0x168] sm:$0xff]  ;;  %v8670_v47 = vld [vmem:[%s11810_s6 + $0x160] sm:$0xff] }
 0x380   : > { %8857 = vperm.xlu1 %11707, %v8659_v40   ;;  %8852 = vperm.xlu0 %11706, %v8658_v16   ;;  %v8673_v40 = vld [vmem:[%s11810_s6 + $0x178] sm:$0xff]  ;;  %v8672_v16 = vld [vmem:[%s11810_s6 + $0x170] sm:$0xff] }
 0x384   : > { %8867 = vperm.xlu1 %11707, %v8661_v8   ;;  %8862 = vperm.xlu0 %11706, %v8660_v57   ;;  %v8675_v8 = vld [vmem:[%s11810_s6 + $0x188] sm:$0xff]  ;;  %v8674_v57 = vld [vmem:[%s11810_s6 + $0x180] sm:$0xff] }
 0x388   : > { %8877 = vperm.xlu1 %11707, %v8663_v31   ;;  %8872 = vperm.xlu0 %11706, %v8662_v44   ;;  %v8677_v31 = vld [vmem:[%s11810_s6 + $0x198] sm:$0xff]  ;;  %v8676_v44 = vld [vmem:[%s11810_s6 + $0x190] sm:$0xff] }
 0x38c   : > { %8887 = vperm.xlu1 %11707, %v8665_v53   ;;  %8882 = vperm.xlu0 %11706, %v8664_v4   ;;  %v8679_v53 = vld [vmem:[%s11810_s6 + $0x1a8] sm:$0xff]  ;;  %v8678_v4 = vld [vmem:[%s11810_s6 + $0x1a0] sm:$0xff] }
 0x390   : > { %8897 = vperm.xlu1 %11707, %v8667_v26   ;;  %8892 = vperm.xlu0 %11706, %v8666_v41   ;;  %v8681_v26 = vld [vmem:[%s11810_s6 + $0x1b8] sm:$0xff]  ;;  %v8680_v41 = vld [vmem:[%s11810_s6 + $0x1b0] sm:$0xff] }
 0x394   : > { %8907 = vperm.xlu1 %11707, %v8669_v35   ;;  %8902 = vperm.xlu0 %11706, %v8668_v34   ;;  %v8683_v35 = vld [vmem:[%s11810_s6 + $0x1c8] sm:$0xff]  ;;  %v8682_v34 = vld [vmem:[%s11810_s6 + $0x1c0] sm:$0xff] }
 0x398   : > { %8917 = vperm.xlu1 %11707, %v8671_v21   ;;  %8912 = vperm.xlu0 %11706, %v8670_v47   ;;  %v8685_v21 = vld [vmem:[%s11810_s6 + $0x1d8] sm:$0xff]  ;;  %v8684_v47 = vld [vmem:[%s11810_s6 + $0x1d0] sm:$0xff] }
 0x39c   : > { %8927 = vperm.xlu1 %11707, %v8673_v40   ;;  %8922 = vperm.xlu0 %11706, %v8672_v16   ;;  %v8687_v40 = vld [vmem:[%s11810_s6 + $0x1e8] sm:$0xff]  ;;  %v8686_v16 = vld [vmem:[%s11810_s6 + $0x1e0] sm:$0xff] }
 0x3a0   : > { %8937 = vperm.xlu1 %11707, %v8675_v8   ;;  %8932 = vperm.xlu0 %11706, %v8674_v57   ;;  %v8689_v8 = vld [vmem:[%s11810_s6 + $0x1f8] sm:$0xff]  ;;  %v8688_v57 = vld [vmem:[%s11810_s6 + $0x1f0] sm:$0xff] }
 0x3a4   : > { %8947 = vperm.xlu1 %11707, %v8677_v31   ;;  %8942 = vperm.xlu0 %11706, %v8676_v44  }
 0x3a8   : > { %8957 = vperm.xlu1 %11707, %v8679_v53   ;;  %8952 = vperm.xlu0 %11706, %v8678_v4  }
 0x3ac   : > { %8967 = vperm.xlu1 %11707, %v8681_v26   ;;  %8962 = vperm.xlu0 %11706, %v8680_v41  }
 0x3b0   : > { %8977 = vperm.xlu1 %11707, %v8683_v35   ;;  %8972 = vperm.xlu0 %11706, %v8682_v34  }
 0x3b4   : > { %8987 = vperm.xlu1 %11707, %v8685_v21   ;;  %8982 = vperm.xlu0 %11706, %v8684_v47  }
 0x3b8   : > { %8997 = vperm.xlu1 %11707, %v8687_v40   ;;  %8992 = vperm.xlu0 %11706, %v8686_v16  }
 0x3bc   : > { %9007 = vperm.xlu1 %11707, %v8689_v8   ;;  %9002 = vperm.xlu0 %11706, %v8688_v57  }
 0x3bf   : > { %v8703_v31 = vpop.permute.xlu1 %8702  ;;  %v8693_v44 = vpop.permute.xlu0 %8692 }
 0x3c0   : > { %v9010_v53 = vmul.f32 %v8693_v44, %v13861_v33  ;;  %v9012_v41 = vmul.f32 %v8703_v31, %v13853_v24 }
 0x3c2   : > { %v9144_v34 = vmul.f32 %v9010_v53, %v9010_v53  ;;  %v9146_v42 = vmul.f32 %v9012_v41, %v9012_v41 }
 0x3c3   : > { %v8708_v4 = vpop.permute.xlu1 %8707  ;;  %v8698_v26 = vpop.permute.xlu0 %8697 }
 0x3c4   : > { %v9011_v35 = vmul.f32 %v8698_v26, %v13871_v60  ;;  %v9013_v21 = vmul.f32 %v8708_v4, %v13856_v27 }
 0x3c6   : > { %v9075_v47 = vadd.f32 %v9011_v35, %v9010_v53  ;;  %v9145_v40 = vmul.f32 %v9011_v35, %v9011_v35  ;;  %v9147_v58 = vmul.f32 %v9013_v21, %v9013_v21 }
 0x3c7   : > { %v8718_v16 = vpop.permute.xlu1 %8717  ;;  %v8713_v25 = vpop.permute.xlu0 %8712 }
 0x3c8   : > { %v9076_v8 = vadd.f32 %v9075_v47, %v9012_v41  ;;  %v9208_v57 = vadd.f32 %v9145_v40, %v9144_v34  ;;  %v9014_v7 = vmul.f32 %v8713_v25, %v13890_v55  ;;  %v9015_v44 = vmul.f32 %v8718_v16, %v13893_v51 }
 0x3ca   : > { %v9209_v33 = vadd.f32 %v9208_v57, %v9146_v42  ;;  %v9077_v0 = vadd.f32 %v9076_v8, %v9013_v21  ;;  %v9148_v11 = vmul.f32 %v9014_v7, %v9014_v7  ;;  %v9149_v53 = vmul.f32 %v9015_v44, %v9015_v44 }
 0x3cb   : > { %v8728_v24 = vpop.permute.xlu1 %8727  ;;  %v8723_v31 = vpop.permute.xlu0 %8722 }
 0x3cc   : > { %v9210_v60 = vadd.f32 %v9209_v33, %v9147_v58  ;;  %v9078_v26 = vadd.f32 %v9077_v0, %v9014_v7  ;;  %v9016_v27 = vmul.f32 %v8723_v31, %v13884_v39  ;;  %v9017_v35 = vmul.f32 %v8728_v24, %v13887_v22 }
 0x3ce   : > { %v9211_v4 = vadd.f32 %v9210_v60, %v9148_v11  ;;  %v9079_v41 = vadd.f32 %v9078_v26, %v9015_v44  ;;  %v9150_v42 = vmul.f32 %v9016_v27, %v9016_v27  ;;  %v9151_v21 = vmul.f32 %v9017_v35, %v9017_v35 }
 0x3cf   : > { %v8738_v34 = vpop.permute.xlu1 %8737  ;;  %v8733_v47 = vpop.permute.xlu0 %8732 }
 0x3d0   : > { %v9212_v55 = vadd.f32 %v9211_v4, %v9149_v53  ;;  %v9080_v25 = vadd.f32 %v9079_v41, %v9016_v27  ;;  %v9018_v51 = vmul.f32 %v8733_v47, %v13908_v43  ;;  %v9019_v58 = vmul.f32 %v8738_v34, %v13911_v1 }
 0x3d2   : > { %v9213_v40 = vadd.f32 %v9212_v55, %v9150_v42  ;;  %v9081_v0 = vadd.f32 %v9080_v25, %v9017_v35  ;;  %v9152_v11 = vmul.f32 %v9018_v51, %v9018_v51  ;;  %v9153_v57 = vmul.f32 %v9019_v58, %v9019_v58 }
 0x3d3   : > { %v8748_v7 = vpop.permute.xlu1 %8747  ;;  %v8743_v16 = vpop.permute.xlu0 %8742 }
 0x3d4   : > { %v9214_v39 = vadd.f32 %v9213_v40, %v9151_v21  ;;  %v9082_v8 = vadd.f32 %v9081_v0, %v9018_v51  ;;  %v9020_v22 = vmul.f32 %v8743_v16, %v13902_v29  ;;  %v9021_v44 = vmul.f32 %v8748_v7, %v13905_v56 }
 0x3d6   : > { %v9215_v33 = vadd.f32 %v9214_v39, %v9152_v11  ;;  %v9083_v24 = vadd.f32 %v9082_v8, %v9019_v58  ;;  %v9154_v27 = vmul.f32 %v9020_v22, %v9020_v22  ;;  %v9155_v53 = vmul.f32 %v9021_v44, %v9021_v44 }
 0x3d7   : > { %v8758_v31 = vpop.permute.xlu1 %8757  ;;  %v8753_v60 = vpop.permute.xlu0 %8752 }
 0x3d8   : > { %v9216_v43 = vadd.f32 %v9215_v33, %v9153_v57  ;;  %v9084_v26 = vadd.f32 %v9083_v24, %v9020_v22  ;;  %v9022_v1 = vmul.f32 %v8753_v60, %v13930_v28  ;;  %v9023_v35 = vmul.f32 %v8758_v31, %v13933_v37 }
 0x3da   : > { %v9217_v4 = vadd.f32 %v9216_v43, %v9154_v27  ;;  %v9085_v41 = vadd.f32 %v9084_v26, %v9021_v44  ;;  %v9156_v25 = vmul.f32 %v9022_v1, %v9022_v1  ;;  %v9157_v42 = vmul.f32 %v9023_v35, %v9023_v35 }
 0x3db   : > { %v8768_v34 = vpop.permute.xlu1 %8767  ;;  %v8763_v47 = vpop.permute.xlu0 %8762 }
 0x3dc   : > { %v9218_v29 = vadd.f32 %v9217_v4, %v9155_v53  ;;  %v9086_v55 = vadd.f32 %v9085_v41, %v9022_v1  ;;  %v9024_v56 = vmul.f32 %v8763_v47, %v13924_v38  ;;  %v9025_v21 = vmul.f32 %v8768_v34, %v13927_v9 }
 0x3de   : > { %v9219_v51 = vadd.f32 %v9218_v29, %v9156_v25  ;;  %v9087_v40 = vadd.f32 %v9086_v55, %v9023_v35  ;;  %v9158_v16 = vmul.f32 %v9024_v56, %v9024_v56  ;;  %v9159_v39 = vmul.f32 %v9025_v21, %v9025_v21 }
 0x3df   : > { %v8778_v58 = vpop.permute.xlu1 %8777  ;;  %v8773_v0 = vpop.permute.xlu0 %8772 }
 0x3e0   : > { %v9220_v28 = vadd.f32 %v9219_v51, %v9157_v42  ;;  %v9088_v7 = vadd.f32 %v9087_v40, %v9024_v56  ;;  %v9026_v37 = vmul.f32 %v8773_v0, %v13952_v61  ;;  %v9027_v11 = vmul.f32 %v8778_v58, %v13955_v15 }
 0x3e2   : > { %v9221_v8 = vadd.f32 %v9220_v28, %v9158_v16  ;;  %v9089_v22 = vadd.f32 %v9088_v7, %v9025_v21  ;;  %v9160_v24 = vmul.f32 %v9026_v37, %v9026_v37  ;;  %v9161_v31 = vmul.f32 %v9027_v11, %v9027_v11 }
 0x3e3   : > { %v8788_v57 = vpop.permute.xlu1 %8787  ;;  %v8783_v33 = vpop.permute.xlu0 %8782 }
 0x3e4   : > { %v9222_v38 = vadd.f32 %v9221_v8, %v9159_v39  ;;  %v9090_v44 = vadd.f32 %v9089_v22, %v9026_v37  ;;  %v9028_v9 = vmul.f32 %v8783_v33, %v13946_v63  ;;  %v9029_v43 = vmul.f32 %v8788_v57, %v13949_v32 }
 0x3e6   : > { %v9223_v60 = vadd.f32 %v9222_v38, %v9160_v24  ;;  %v9091_v26 = vadd.f32 %v9090_v44, %v9027_v11  ;;  %v9162_v4 = vmul.f32 %v9028_v9, %v9028_v9  ;;  %v9163_v35 = vmul.f32 %v9029_v43, %v9029_v43 }
 0x3e7   : > { %v8798_v27 = vpop.permute.xlu1 %8797  ;;  %v8793_v1 = vpop.permute.xlu0 %8792 }
 0x3e8   : > { %v9224_v61 = vadd.f32 %v9223_v60, %v9161_v31  ;;  %v9092_v53 = vadd.f32 %v9091_v26, %v9028_v9  ;;  %v9030_v15 = vmul.f32 %v8793_v1, %v13974_v3  ;;  %v9031_v34 = vmul.f32 %v8798_v27, %v13977_v5 }
 0x3ea   : > { %v9225_v41 = vadd.f32 %v9224_v61, %v9162_v4  ;;  %v9093_v47 = vadd.f32 %v9092_v53, %v9029_v43  ;;  %v9164_v56 = vmul.f32 %v9030_v15, %v9030_v15  ;;  %v9165_v42 = vmul.f32 %v9031_v34, %v9031_v34 }
 0x3eb   : > { %v8808_v29 = vpop.permute.xlu1 %8807  ;;  %v8803_v55 = vpop.permute.xlu0 %8802 }
 0x3ec   : > { %v9226_v63 = vadd.f32 %v9225_v41, %v9163_v35  ;;  %v9094_v25 = vadd.f32 %v9093_v47, %v9030_v15  ;;  %v9032_v32 = vmul.f32 %v8803_v55, %v13968_v54  ;;  %v9033_v21 = vmul.f32 %v8808_v29, %v13971_v49 }
 0x3ee   : > { %v9227_v51 = vadd.f32 %v9226_v63, %v9164_v56  ;;  %v9095_v40 = vadd.f32 %v9094_v25, %v9031_v34  ;;  %v9166_v7 = vmul.f32 %v9032_v32, %v9032_v32  ;;  %v9167_v16 = vmul.f32 %v9033_v21, %v9033_v21 }
 0x3ef   : > { %v8818_v58 = vpop.permute.xlu1 %8817  ;;  %v8813_v0 = vpop.permute.xlu0 %8812 }
 0x3f0   : > { %v9228_v3 = vadd.f32 %v9227_v51, %v9165_v42  ;;  %v9096_v28 = vadd.f32 %v9095_v40, %v9032_v32  ;;  %v9034_v5 = vmul.f32 %v8813_v0, %v13996_v2  ;;  %v9035_v39 = vmul.f32 %v8818_v58, %v13999_v45 }
 0x3f2   : > { %v9229_v37 = vadd.f32 %v9228_v3, %v9166_v7  ;;  %v9097_v8 = vadd.f32 %v9096_v28, %v9033_v21  ;;  %v9168_v33 = vmul.f32 %v9034_v5, %v9034_v5  ;;  %v9169_v38 = vmul.f32 %v9035_v39, %v9035_v39 }
 0x3f3   : > { %v8828_v11 = vpop.permute.xlu1 %8827  ;;  %v8823_v22 = vpop.permute.xlu0 %8822 }
 0x3f4   : > { %v9230_v54 = vadd.f32 %v9229_v37, %v9167_v16  ;;  %v9098_v57 = vadd.f32 %v9097_v8, %v9034_v5  ;;  %v9036_v49 = vmul.f32 %v8823_v22, %v13990_v23  ;;  %v9037_v24 = vmul.f32 %v8828_v11, %v13993_v20 }
 0x3f6   : > { %v9231_v44 = vadd.f32 %v9230_v54, %v9168_v33  ;;  %v9099_v9 = vadd.f32 %v9098_v57, %v9035_v39  ;;  %v9170_v26 = vmul.f32 %v9036_v49, %v9036_v49  ;;  %v9171_v27 = vmul.f32 %v9037_v24, %v9037_v24 }
 0x3f7   : > { %v8838_v31 = vpop.permute.xlu1 %8837  ;;  %v8833_v60 = vpop.permute.xlu0 %8832 }
 0x3f8   : > { %v9232_v2 = vadd.f32 %v9231_v44, %v9169_v38  ;;  %v9100_v43 = vadd.f32 %v9099_v9, %v9036_v49  ;;  %v9038_v45 = vmul.f32 %v8833_v60, %v14018_v46  ;;  %v9039_v61 = vmul.f32 %v8838_v31, %v14021_v30  ;;  %v14432_v31 = vld [vmem:[#allocation4_spill] sm:$0xff] }
 0x3fa   : > { %v9233_v1 = vadd.f32 %v9232_v2, %v9170_v26  ;;  %v9101_v53 = vadd.f32 %v9100_v43, %v9037_v24  ;;  %v9172_v41 = vmul.f32 %v9038_v45, %v9038_v45  ;;  %v9173_v34 = vmul.f32 %v9039_v61, %v9039_v61  ;;  %v14433_v43 = vld [vmem:[#allocation5_spill] sm:$0xff] }
 0x3fb   : > { %v8848_v4 = vpop.permute.xlu1 %8847  ;;  %v8843_v15 = vpop.permute.xlu0 %8842 }
 0x3fc   : > { %v9234_v23 = vadd.f32 %v9233_v1, %v9171_v27  ;;  %v9102_v35 = vadd.f32 %v9101_v53, %v9038_v45  ;;  %v9040_v20 = vmul.f32 %v8843_v15, %v14012_v59  ;;  %v9041_v29 = vmul.f32 %v8848_v4, %v14015_v6  ;;  %v14434_v4 = vld [vmem:[#allocation8_spill] sm:$0xff] }
 0x3fe   : > { %v9235_v47 = vadd.f32 %v9234_v23, %v9172_v41  ;;  %v9103_v55 = vadd.f32 %v9102_v35, %v9039_v61  ;;  %v9174_v32 = vmul.f32 %v9040_v20, %v9040_v20  ;;  %v9175_v42 = vmul.f32 %v9041_v29, %v9041_v29  ;;  %v14435_v35 = vld [vmem:[#allocation9_spill] sm:$0xff] }
 0x3ff   : > { %v8858_v63 = vpop.permute.xlu1 %8857  ;;  %v8853_v25 = vpop.permute.xlu0 %8852 }
 0x400   : > { %v9236_v46 = vadd.f32 %v9235_v47, %v9173_v34  ;;  %v9104_v56 = vadd.f32 %v9103_v55, %v9040_v20  ;;  %v9042_v30 = vmul.f32 %v8853_v25, %v14036_v19  ;;  %v9043_v21 = vmul.f32 %v8858_v63, %v14039_v12  ;;  %v14436_v25 = vld [vmem:[#allocation6_spill] sm:$0xff] }
 0x402   : > { %v9237_v51 = vadd.f32 %v9236_v46, %v9174_v32  ;;  %v9105_v40 = vadd.f32 %v9104_v56, %v9041_v29  ;;  %v9176_v28 = vmul.f32 %v9042_v30, %v9042_v30  ;;  %v9177_v7 = vmul.f32 %v9043_v21, %v9043_v21 }
 0x403   : > { %v8868_v58 = vpop.permute.xlu1 %8867  ;;  %v8863_v0 = vpop.permute.xlu0 %8862 }
 0x404   : > { %v9238_v59 = vadd.f32 %v9237_v51, %v9175_v42  ;;  %v9106_v3 = vadd.f32 %v9105_v40, %v9042_v30  ;;  %v9044_v6 = vmul.f32 %v8863_v0, %v14030_v36  ;;  %v9045_v16 = vmul.f32 %v8868_v58, %v14033_v48  ;;  %v14437_v30 = vld [vmem:[#allocation7_spill] sm:$0xff] }
 0x406   : > { %v9239_v5 = vadd.f32 %v9238_v59, %v9176_v28  ;;  %v9107_v37 = vadd.f32 %v9106_v3, %v9043_v21  ;;  %v9178_v22 = vmul.f32 %v9044_v6, %v9044_v6  ;;  %v9179_v54 = vmul.f32 %v9045_v16, %v9045_v16  ;;  %v14438_v3 = vld [vmem:[#allocation12_spill] sm:$0xff] }
 0x407   : > { %v8878_v39 = vpop.permute.xlu1 %8877  ;;  %v8873_v8 = vpop.permute.xlu0 %8872 }
 0x408   : > { %v9240_v19 = vadd.f32 %v9239_v5, %v9177_v7  ;;  %v9108_v11 = vadd.f32 %v9107_v37, %v9044_v6  ;;  %v9046_v12 = vmul.f32 %v8873_v8, %v14054_v62  ;;  %v9047_v33 = vmul.f32 %v8878_v39, %v14057_v50  ;;  %v14439_v5 = vld [vmem:[#allocation13_spill] sm:$0xff] }
 0x40a   : > { %v9241_v57 = vadd.f32 %v9240_v19, %v9178_v22  ;;  %v9109_v49 = vadd.f32 %v9108_v11, %v9045_v16  ;;  %v9180_v9 = vmul.f32 %v9046_v12, %v9046_v12  ;;  %v9181_v60 = vmul.f32 %v9047_v33, %v9047_v33 }
 0x40b   : > { %v8888_v38 = vpop.permute.xlu1 %8887  ;;  %v8883_v44 = vpop.permute.xlu0 %8882 }
 0x40c   : > { %v9242_v36 = vadd.f32 %v9241_v57, %v9179_v54  ;;  %v9110_v24 = vadd.f32 %v9109_v49, %v9046_v12  ;;  %v9048_v48 = vmul.f32 %v8883_v44, %v14432_v31  ;;  %v9049_v26 = vmul.f32 %v8888_v38, %v14433_v43  ;;  %v14440_v12 = vld [vmem:[#allocation10_spill] sm:$0xff]  ;;  %v14441_v49 = vld [vmem:[#allocation11_spill] sm:$0xff] }
 0x40e   : > { %v9243_v2 = vadd.f32 %v9242_v36, %v9180_v9  ;;  %v9111_v45 = vadd.f32 %v9110_v24, %v9047_v33  ;;  %v9182_v53 = vmul.f32 %v9048_v48, %v9048_v48  ;;  %v9183_v15 = vmul.f32 %v9049_v26, %v9049_v26 }
 0x40f   : > { %v8898_v27 = vpop.permute.xlu1 %8897  ;;  %v8893_v1 = vpop.permute.xlu0 %8892 }
 0x410   : > { %v9244_v62 = vadd.f32 %v9243_v2, %v9181_v60  ;;  %v9112_v61 = vadd.f32 %v9111_v45, %v9048_v48  ;;  %v9050_v50 = vmul.f32 %v8893_v1, %v14434_v4  ;;  %v9051_v41 = vmul.f32 %v8898_v27, %v14435_v35  ;;  %v14442_v4 = vld [vmem:[#allocation14_spill] sm:$0xff]  ;;  %v14443_v35 = vld [vmem:[#allocation15_spill] sm:$0xff] }
 0x412   : > { %v9245_v23 = vadd.f32 %v9244_v62, %v9182_v53  ;;  %v9113_v20 = vadd.f32 %v9112_v61, %v9049_v26  ;;  %v9184_v63 = vmul.f32 %v9050_v50, %v9050_v50  ;;  %v9185_v56 = vmul.f32 %v9051_v41, %v9051_v41 }
 0x413   : > { %v8908_v34 = vpop.permute.xlu1 %8907  ;;  %v8903_v47 = vpop.permute.xlu0 %8902 }
 0x414   : > { %v9246_v29 = vadd.f32 %v9245_v23, %v9183_v15  ;;  %v9114_v55 = vadd.f32 %v9113_v20, %v9050_v50  ;;  %v9052_v46 = vmul.f32 %v8903_v47, %v14436_v25  ;;  %v9053_v42 = vmul.f32 %v8908_v34, %v14437_v30 }
 0x416   : > { %v9247_v32 = vadd.f32 %v9246_v29, %v9184_v63  ;;  %v9115_v51 = vadd.f32 %v9114_v55, %v9051_v41  ;;  %v9186_v59 = vmul.f32 %v9052_v46, %v9052_v46  ;;  %v9187_v6 = vmul.f32 %v9053_v42, %v9053_v42 }
 0x417   : > { %v8918_v21 = vpop.permute.xlu1 %8917  ;;  %v8913_v40 = vpop.permute.xlu0 %8912 }
 0x418   : > { %v9248_v58 = vadd.f32 %v9247_v32, %v9185_v56  ;;  %v9116_v0 = vadd.f32 %v9115_v51, %v9052_v46  ;;  %v9054_v28 = vmul.f32 %v8913_v40, %v14438_v3  ;;  %v9055_v16 = vmul.f32 %v8918_v21, %v14439_v5  ;;  %v14444_v40 = vld [vmem:[#allocation16_spill] sm:$0xff]  ;;  %v14445_v3 = vld [vmem:[#allocation17_spill] sm:$0xff] }
 0x41a   : > { %v9249_v7 = vadd.f32 %v9248_v58, %v9186_v59  ;;  %v9117_v37 = vadd.f32 %v9116_v0, %v9053_v42  ;;  %v9188_v22 = vmul.f32 %v9054_v28, %v9054_v28  ;;  %v9189_v57 = vmul.f32 %v9055_v16, %v9055_v16 }
 0x41b   : > { %v8928_v39 = vpop.permute.xlu1 %8927  ;;  %v8923_v8 = vpop.permute.xlu0 %8922 }
 0x41c   : > { %v9250_v19 = vadd.f32 %v9249_v7, %v9187_v6  ;;  %v9118_v11 = vadd.f32 %v9117_v37, %v9054_v28  ;;  %v9056_v54 = vmul.f32 %v8923_v8, %v14440_v12  ;;  %v9057_v38 = vmul.f32 %v8928_v39, %v14441_v49  ;;  %v14446_v49 = vld [vmem:[#allocation18_spill] sm:$0xff] }
 0x41e   : > { %v9251_v33 = vadd.f32 %v9250_v19, %v9188_v22  ;;  %v9119_v44 = vadd.f32 %v9118_v11, %v9055_v16  ;;  %v9190_v48 = vmul.f32 %v9056_v54, %v9056_v54  ;;  %v9191_v2 = vmul.f32 %v9057_v38, %v9057_v38 }
 0x41f   : > { %v8938_v36 = vpop.permute.xlu1 %8937  ;;  %v8933_v24 = vpop.permute.xlu0 %8932 }
 0x420   : > { %v9252_v9 = vadd.f32 %v9251_v33, %v9189_v57  ;;  %v9120_v31 = vadd.f32 %v9119_v44, %v9056_v54  ;;  %v9058_v60 = vmul.f32 %v8933_v24, %v14108_v17  ;;  %v9059_v26 = vmul.f32 %v8938_v36, %v14111_v18  ;;  %v14447_v24 = vld [vmem:[#allocation19_spill] sm:$0xff] }
 0x422   : > { %v9253_v43 = vadd.f32 %v9252_v9, %v9190_v48  ;;  %v9121_v45 = vadd.f32 %v9120_v31, %v9057_v38  ;;  %v9192_v53 = vmul.f32 %v9058_v60, %v9058_v60  ;;  %v9193_v15 = vmul.f32 %v9059_v26, %v9059_v26 }
 0x423   : > { %v8948_v27 = vpop.permute.xlu1 %8947  ;;  %v8943_v1 = vpop.permute.xlu0 %8942 }
 0x424   : > { %v9254_v62 = vadd.f32 %v9253_v43, %v9191_v2  ;;  %v9122_v61 = vadd.f32 %v9121_v45, %v9058_v60  ;;  %v9060_v50 = vmul.f32 %v8943_v1, %v14442_v4  ;;  %v9061_v41 = vmul.f32 %v8948_v27, %v14443_v35  ;;  %v14449_v1 = vld [vmem:[#allocation23_spill] sm:$0xff]  ;;  %v14450_v35 = vld [vmem:[#allocation20_spill] sm:$0xff] }
 0x426   : > { %v9255_v23 = vadd.f32 %v9254_v62, %v9192_v53  ;;  %v9123_v20 = vadd.f32 %v9122_v61, %v9059_v26  ;;  %v9194_v55 = vmul.f32 %v9060_v50, %v9060_v50  ;;  %v9195_v63 = vmul.f32 %v9061_v41, %v9061_v41  ;;  %v14448_v26 = vld [vmem:[#allocation22_spill] sm:$0xff] }
 0x427   : > { %v8958_v34 = vpop.permute.xlu1 %8957  ;;  %v8953_v47 = vpop.permute.xlu0 %8952 }
 0x428   : > { %v9256_v17 = vadd.f32 %v9255_v23, %v9193_v15  ;;  %v9124_v29 = vadd.f32 %v9123_v20, %v9060_v50  ;;  %v9062_v18 = vmul.f32 %v8953_v47, %v14126_v13  ;;  %v9063_v46 = vmul.f32 %v8958_v34, %v14129_v10  ;;  %v14451_v47 = vld [vmem:[#allocation21_spill] sm:$0xff] }
 0x42a   : > { %v9257_v25 = vadd.f32 %v9256_v17, %v9194_v55  ;;  %v9125_v56 = vadd.f32 %v9124_v29, %v9061_v41  ;;  %v9196_v21 = vmul.f32 %v9062_v18, %v9062_v18  ;;  %v9197_v0 = vmul.f32 %v9063_v46, %v9063_v46 }
 0x42b   : > { %v8968_v32 = vpop.permute.xlu1 %8967  ;;  %v8963_v30 = vpop.permute.xlu0 %8962 }
 0x42c   : > { %v9258_v42 = vadd.f32 %v9257_v25, %v9195_v63  ;;  %v9126_v51 = vadd.f32 %v9125_v56, %v9062_v18  ;;  %v9064_v58 = vmul.f32 %v8963_v30, %v14444_v40  ;;  %v9065_v28 = vmul.f32 %v8968_v32, %v14445_v3 }
 0x42e   : > { %v9259_v59 = vadd.f32 %v9258_v42, %v9196_v21  ;;  %v9127_v6 = vadd.f32 %v9126_v51, %v9063_v46  ;;  %v9198_v37 = vmul.f32 %v9064_v58, %v9064_v58  ;;  %v9199_v39 = vmul.f32 %v9065_v28, %v9065_v28 }
 0x42f   : > { %v8978_v7 = vpop.permute.xlu1 %8977  ;;  %v8973_v5 = vpop.permute.xlu0 %8972 }
 0x430   : > { %v9260_v13 = vadd.f32 %v9259_v59, %v9197_v0  ;;  %v9128_v16 = vadd.f32 %v9127_v6, %v9064_v58  ;;  %v9066_v10 = vmul.f32 %v8973_v5, %v14144_v14  ;;  %v9067_v19 = vmul.f32 %v8978_v7, %v14147_v52  ;;  %v9074_v6 = vld [vmem:[%s14323_s8] sm:$0x3] }
 0x432   : > { %v9261_v8 = vadd.f32 %v9260_v13, %v9198_v37  ;;  %v9129_v11 = vadd.f32 %v9128_v16, %v9065_v28  ;;  %v9200_v33 = vmul.f32 %v9066_v10, %v9066_v10  ;;  %v9201_v44 = vmul.f32 %v9067_v19, %v9067_v19 }
 0x433   : > { %v8988_v22 = vpop.permute.xlu1 %8987  ;;  %v8983_v12 = vpop.permute.xlu0 %8982 }
 0x434   : > { %v9262_v54 = vadd.f32 %v9261_v8, %v9199_v39  ;;  %v9130_v57 = vadd.f32 %v9129_v11, %v9066_v10  ;;  %v9068_v38 = vmul.f32 %v8983_v12, %v14446_v49  ;;  %v9069_v9 = vmul.f32 %v8988_v22, %v14447_v24 }
 0x436   : > { %v9263_v36 = vadd.f32 %v9262_v54, %v9200_v33  ;;  %v9131_v31 = vadd.f32 %v9130_v57, %v9067_v19  ;;  %v9202_v43 = vmul.f32 %v9068_v38, %v9068_v38  ;;  %v9203_v45 = vmul.f32 %v9069_v9, %v9069_v9 }
 0x437   : > { %v8998_v48 = vpop.permute.xlu1 %8997  ;;  %v8993_v60 = vpop.permute.xlu0 %8992 }
 0x438   : > { %v9264_v14 = vadd.f32 %v9263_v36, %v9201_v44  ;;  %v9132_v2 = vadd.f32 %v9131_v31, %v9068_v38  ;;  %v9070_v52 = vmul.f32 %v8993_v60, %v14448_v26  ;;  %v9071_v62 = vmul.f32 %v8998_v48, %v14449_v1 }
 0x43a   : > { %v9265_v27 = vadd.f32 %v9264_v14, %v9202_v43  ;;  %v9133_v61 = vadd.f32 %v9132_v2, %v9069_v9  ;;  %v9204_v23 = vmul.f32 %v9070_v52, %v9070_v52  ;;  %v9205_v20 = vmul.f32 %v9071_v62, %v9071_v62 }
 0x43b   : > { %v9008_v53 = vpop.permute.xlu1 %9007  ;;  %v9003_v4 = vpop.permute.xlu0 %9002 }
 0x43c   : > { %v9266_v50 = vadd.f32 %v9265_v27, %v9203_v45  ;;  %v9134_v15 = vadd.f32 %v9133_v61, %v9070_v52  ;;  %v9072_v41 = vmul.f32 %v9003_v4, %v14450_v35  ;;  %v9073_v17 = vmul.f32 %v9008_v53, %v14451_v47 }
 0x43e   : > { %v9267_v34 = vadd.f32 %v9266_v50, %v9204_v23  ;;  %v9135_v29 = vadd.f32 %v9134_v15, %v9071_v62  ;;  %v9206_v63 = vmul.f32 %v9072_v41, %v9072_v41  ;;  %v9207_v25 = vmul.f32 %v9073_v17, %v9073_v17 }
 0x440   : > { %v9268_v55 = vadd.f32 %v9267_v34, %v9205_v20  ;;  %v9136_v18 = vadd.f32 %v9135_v29, %v9072_v41 }
 0x442   : > { %v9137_v46 = vadd.f32 %v9136_v18, %v9073_v17  ;;  %v9269_v56 = vadd.f32 %v9268_v55, %v9206_v63 }
 0x444   : > { %v9138_v32 = vrot.slane %v9137_v46, 4  ;;  %v9270_v30 = vadd.f32 %v9269_v56, %v9207_v25 }
 0x446   : > { %v9139_v42 = vadd.f32 %v9138_v32, %v9137_v46  ;;  %v9271_v51 = vrot.slane %v9270_v30, 4 }
 0x448   : > { %v9140_v21 = vrot.slane %v9139_v42, 2  ;;  %v9272_v40 = vadd.f32 %v9271_v51, %v9270_v30 }
 0x44a   : > { %v9141_v58 = vadd.f32 %v9140_v21, %v9139_v42  ;;  %v9273_v0 = vrot.slane %v9272_v40, 2 }
 0x44c   : > { %v9142_v59 = vrot.slane %v9141_v58, 1  ;;  %v9274_v3 = vadd.f32 %v9273_v0, %v9272_v40 }
 0x44e   : > { %v9275_v28 = vrot.slane %v9274_v3, 1  ;;  %v9143_v7 = vadd.f32 %v9142_v59, %v9141_v58 }
 0x450   : > { %v9276_v5 = vadd.f32 %v9275_v28, %v9274_v3 }
 0x452   : > { %v9278_v13 = vsel %vm1561_vm3, %v9143_v7, %v9276_v5 }
 0x453   : > { %v9279_v16 = vadd.f32 %v9278_v13, %v9074_v6 }
 0x455   : > { %9280 = vst [vmem:[%s14323_s8] sm:$0x3] %v9279_v16 }
 0x456 PF: > { %s19_s27 = sadd.s32 1, %s11714_s27  }
 0x457   : > { %p16_p6 = scmp.ge.s32.totalorder %s19_s27, 4  }
 0x459   :  { %18 = sbr.rel (!%p16_p6) target bundleno = 1 (0x1), region = 104 }

// kernel: up_forward.4
= control target key start
LH: loop header
LB: loop body
LE: loop exit
PB: predicated region body
PF: predicated region fallthrough
CT: control target
= control target key end

     0   :  { %s12071_s27 = smov 0   ;;  %s14875_s0 = inlined_call_operand.vmem [shape: bf16[2,64,128], index: 0, kind: input, shape index: {}]   ;;  %s14876_s1 = inlined_call_operand.vmem [shape: bf16[1024,128], index: 1, kind: input, shape index: {}]   ;;  %s14877_s2 = inlined_call_operand.vmem [shape: f32[1024,1], index: 2, kind: input, shape index: {}]   ;;  %s14878_s3 = inlined_call_operand.vmem [shape: bf16[9,128,128], index: 3, kind: input, shape index: {}]   ;;  %s14879_s4 = inlined_call_operand.vmem [shape: f32[1,128], index: 4, kind: input, shape index: {}]   ;;  %s14880_s5 = inlined_call_operand.vmem [shape: f32[1,128], index: 5, kind: input, shape index: {}]   ;;  %s14881_s6 = inlined_call_operand.vmem [shape: f32[1,128], index: 6, kind: input, shape index: {}]   ;;  %s14882_s7 = inlined_call_operand.vmem [shape: bf16[1024,128], index: 7, kind: output, shape index: {0}]   ;;  %s14883_s8 = inlined_call_operand.vmem [shape: f32[8,128], index: 8, kind: output, shape index: {1}]  }
   0x1 LB: > { %s12077_s28 = sadd.s32 4294967295, %s12022_s27   ;;  %p9608_p0 = scmp.ge.s32.totalorder %s12022_s27, 1  ;;  %s12022_s27 = sphi %s12071_s27, %s19_s27  }
   0x2   : > { %p282_p1 = scmp.lt.s32.totalorder %s12022_s27, 3 }
   0x4   : > { %p283_p2 = pnand %p9608_p0, %p282_p1 }
   0x6   : > { %286 = sbr.rel (%p283_p2) target bundleno = 1247 (0x4df), region = 48 }
   0xd   : > { %s9611_s29 = sshll.u32 %s12077_s28, 6  ;;  %v14884_v0 = vmov 0   ;;  %v11926_v1 = vld [vmem:[%s14878_s3 + $0x100] sm:$0xff]   ;;  %v11927_v2 = vld [vmem:[%s14878_s3 + $0x108] sm:$0xff]   ;;  %v11929_v5 = vld [vmem:[%s14878_s3 + $0x110] sm:$0xff]   ;;  %p326_p4 = scmp.lt.s32.totalorder %s12077_s28, 1 }
   0xe   : > { %11925 = vset.pattern.permute.xlu1 %v14884_v0  ;;  %11924 = vset.pattern.permute.xlu0 %v14884_v0  ;;  %p332_p3 = scmp.lt.s32.totalorder %s9611_s29, 127  ;;  %v11928_v3 = vld [vmem:[%s14878_s3] sm:$0xff]   ;;  %v11930_v4 = vld [vmem:[%s14878_s3 + $0x8] sm:$0xff]   ;;  %v11931_v10 = vld [vmem:[%s14878_s3 + $0x118] sm:$0xff]   ;;  %vm1281_vm0 = vsmask.f32 1280 }
   0xf   : > { %10986 = vmatprep.subr.bf16.mxu0 %v11926_v1  ;;  %10666 = vmatprep.subr.bf16.mxu1 %v11928_v3  ;;  %v11932_v19 = vld [vmem:[%s14878_s3 + $0x10] sm:$0xff]   ;;  %v11933_v22 = vld [vmem:[%s14878_s3 + $0x120] sm:$0xff]   ;;  %v11934_v25 = vld [vmem:[%s14878_s3 + $0x18] sm:$0xff]   ;;  %s327_s13 = scalar_select %p326_p4, %s12077_s28, 1  ;;  %vm2094_vm1 = vcmask 1040384   ;;  %vm6868_vm4 = vcmask 1046528  }
  0x10   : > { %s15213_s29 = smov (!%p332_p3, %s9611_s29), 127  ;;  %10987 = vmatpush3.bf16.msra.mxu0 %v11926_v1  ;;  %10667 = vmatpush3.bf16.msra.mxu1 %v11928_v3  ;;  %v11935_v26 = vld [vmem:[%s14878_s3 + $0x128] sm:$0xff]   ;;  %v11936_v27 = vld [vmem:[%s14878_s3 + $0x20] sm:$0xff]   ;;  %v11937_v28 = vld [vmem:[%s14878_s3 + $0x130] sm:$0xff]   ;;  %vm5092_vm2 = vsmask.f32 7424 }
  0x11   : > { %s9614_s14 = sshll.u32 %s15213_s29, 3  ;;  %10988 = vmatprep.subr.bf16.mxu0 %v11927_v2  ;;  %10668 = vmatprep.subr.bf16.mxu1 %v11930_v4  ;;  %s9891_s18 = sshll.u32 %s327_s13, 5  ;;  %v11938_v31 = vld [vmem:[%s14878_s3 + $0x28] sm:$0xff]   ;;  %v11939_v33 = vld [vmem:[%s14878_s3 + $0x138] sm:$0xff]   ;;  %v11940_v35 = vld [vmem:[%s14878_s3 + $0x30] sm:$0xff]  }
  0x12   : > { %s12102_s19 = scalar_lea.vmem %s14877_s2, %s9614_s14  ;;  %s12158_s26 = scalar_lea.vmem %s14875_s0, %s9891_s18  ;;  %v12170_v39 = vld [vmem:[%s14878_s3 + $0x140] sm:$0xff]   ;;  %v11941_v41 = vld [vmem:[%s14878_s3 + $0x38] sm:$0xff]   ;;  %vm2771_vm3 = vsmask.f32 256  ;;  %vm7545_vm5 = vsmask.f32 6400 }
  0x13   : > { %v722_v6 = vld [vmem:[%s12102_s19 + $0x10] sm:$0xff]  ;;  %v720_v7 = vld [vmem:[%s12102_s19] sm:$0xff]  ;;  %v723_v8 = vld [vmem:[%s12102_s19 + $0x18] sm:$0xff]  ;;  %s9612_s16 = sshll.u32 %s15213_s29, 2  ;;  %p9888_p5 = scmp.ne.s32.totalorder %s12077_s28, 0 }
  0x14   : > { %796 = vperm.xlu1 %11925, %v722_v6   ;;  %786 = vperm.xlu0 %11924, %v720_v7   ;;  %v721_v9 = vld [vmem:[%s12102_s19 + $0x8] sm:$0xff]  ;;  %v724_v12 = vld [vmem:[%s12102_s19 + $0x20] sm:$0xff]  ;;  %v727_v13 = vld [vmem:[%s12102_s19 + $0x38] sm:$0xff]  ;;  %s12213_s20 = scalar_lea.vmem %s14876_s1, %s9612_s16  ;;  %s14430_s11 = scalar_lea.vmem %s14882_s7, %s9612_s16 }
  0x15   : > { %10989 = vmatpush3.bf16.msra.mxu0 %v11927_v2  ;;  %10669 = vmatpush3.bf16.msra.mxu1 %v11930_v4  ;;  %v725_v11 = vld [vmem:[%s12102_s19 + $0x28] sm:$0xff]  ;;  %v726_v14 = vld [vmem:[%s12102_s19 + $0x30] sm:$0xff]  ;;  %v728_v16 = vld [vmem:[%s12102_s19 + $0x40] sm:$0xff] }
  0x16   : > { %10990 = vmatprep.subr.bf16.mxu0 %v11929_v5  ;;  %v729_v15 = vld [vmem:[%s12102_s19 + $0x48] sm:$0xff]  ;;  %v731_v17 = vld [vmem:[%s12102_s19 + $0x58] sm:$0xff]  ;;  %v730_v18 = vld [vmem:[%s12102_s19 + $0x50] sm:$0xff]  ;;  %10670 = vmatprep.subr.bf16.mxu1 %v11932_v19 }
  0x17   : > { %v733_v20 = vld [vmem:[%s12102_s19 + $0x68] sm:$0xff]  ;;  %v732_v21 = vld [vmem:[%s12102_s19 + $0x60] sm:$0xff]  ;;  %v735_v23 = vld [vmem:[%s12102_s19 + $0x78] sm:$0xff] }
  0x18   : > { %801 = vperm.xlu1 %11925, %v723_v8   ;;  %791 = vperm.xlu0 %11924, %v721_v9   ;;  %v734_v24 = vld [vmem:[%s12102_s19 + $0x70] sm:$0xff]  ;;  %v737_v29 = vld [vmem:[%s12102_s19 + $0x88] sm:$0xff]  ;;  %v736_v30 = vld [vmem:[%s12102_s19 + $0x80] sm:$0xff] }
  0x19   : > { %10991 = vmatpush3.bf16.msra.mxu0 %v11929_v5  ;;  %10671 = vmatpush3.bf16.msra.mxu1 %v11932_v19  ;;  %v739_v32 = vld [vmem:[%s12102_s19 + $0x98] sm:$0xff]  ;;  %v738_v34 = vld [vmem:[%s12102_s19 + $0x90] sm:$0xff]  ;;  %v11942_v36 = vld [vmem:[%s12158_s26] sm:$0xff]  }
  0x1a   : > { %10992 = vmatprep.subr.bf16.mxu0 %v11931_v10  ;;  %10672 = vmatprep.subr.bf16.mxu1 %v11934_v25  ;;  %v11943_v37 = vld [vmem:[%s12158_s26 + $0x8] sm:$0xff]   ;;  %366 = vst [vmem:[#allocation3] sm:$0xff] %v11942_v36  ;;  %v740_v40 = vld [vmem:[%s12102_s19 + $0xa0] sm:$0xff]  ;;  %v743_v44 = vld [vmem:[%s12102_s19 + $0xb8] sm:$0xff] }
  0x1b   : > { %v741_v38 = vld [vmem:[%s12102_s19 + $0xa8] sm:$0xff]  ;;  %367 = vst [vmem:[#allocation3 + $0x8] sm:$0xff] %v11943_v37  ;;  %v1291_v42 = vshrl.u32 %v11943_v37, 16  ;;  %v1294_v43 = vshll.u32 %v11943_v37, 16  ;;  %v742_v45 = vld [vmem:[%s12102_s19 + $0xb0] sm:$0xff]  ;;  %v12182_v46 = vld [vmem:[%s14878_s3 + $0x40] sm:$0xff]  }
  0x1c   : > { %811 = vperm.xlu1 %11925, %v725_v11   ;;  %806 = vperm.xlu0 %11924, %v724_v12   ;;  %v745_v50 = vld [vmem:[%s12102_s19 + $0xc8] sm:$0xff]  ;;  %v744_v53 = vld [vmem:[%s12102_s19 + $0xc0] sm:$0xff]  ;;  %v747_v57 = vld [vmem:[%s12102_s19 + $0xd8] sm:$0xff] }
  0x1d   : > { %10993 = vmatpush3.bf16.msra.mxu0 %v11931_v10  ;;  %10673 = vmatpush3.bf16.msra.mxu1 %v11934_v25  ;;  %v1293_v47 = vrot.slane %v1291_v42, 6  ;;  %v1296_v48 = vrot.slane %v1294_v43, 7  ;;  %v746_v59 = vld [vmem:[%s12102_s19 + $0xd0] sm:$0xff]  ;;  %v749_v61 = vld [vmem:[%s12102_s19 + $0xe8] sm:$0xff]  ;;  %v748_v62 = vld [vmem:[%s12102_s19 + $0xe0] sm:$0xff] }
  0x1e   : > { %10994 = vmatprep.subr.bf16.mxu0 %v11933_v22  ;;  %10674 = vmatprep.subr.bf16.mxu1 %v11936_v27  ;;  %v751_v63 = vld [vmem:[%s12102_s19 + $0xf8] sm:$0xff]  ;;  %v750_v1 = vld [vmem:[%s12102_s19 + $0xf0] sm:$0xff]  ;;  %v753_v2 = vld [vmem:[%s12102_s19 + $0x108] sm:$0xff] }
  0x1f   : > { %v12187_v56 = vor.u32 %v1296_v48, %v1293_v47  ;;  %v752_v3 = vld [vmem:[%s12102_s19 + $0x100] sm:$0xff]  ;;  %v755_v4 = vld [vmem:[%s12102_s19 + $0x118] sm:$0xff]  ;;  %v754_v5 = vld [vmem:[%s12102_s19 + $0x110] sm:$0xff] }
  0x20   : > { %821 = vperm.xlu1 %11925, %v727_v13   ;;  %816 = vperm.xlu0 %11924, %v726_v14   ;;  %v757_v6 = vld [vmem:[%s12102_s19 + $0x128] sm:$0xff]  ;;  %v756_v7 = vld [vmem:[%s12102_s19 + $0x120] sm:$0xff]  ;;  %v759_v8 = vld [vmem:[%s12102_s19 + $0x138] sm:$0xff] }
  0x21   : > { %10995 = vmatpush3.bf16.msra.mxu0 %v11933_v22  ;;  %10675 = vmatpush3.bf16.msra.mxu1 %v11936_v27  ;;  %v1232_v49 = vld [vmem:[#allocation3] sm:$0xc0]  ;;  %v758_v9 = vld [vmem:[%s12102_s19 + $0x130] sm:$0xff]  ;;  %v761_v10 = vld [vmem:[%s12102_s19 + $0x148] sm:$0xff] }
  0x22   : > { %10996 = vmatprep.subr.bf16.mxu0 %v11935_v26  ;;  %10676 = vmatprep.subr.bf16.mxu1 %v11938_v31  ;;  %v1283_v51 = vshrl.u32 %v1232_v49, 16  ;;  %v1286_v52 = vshll.u32 %v1232_v49, 16  ;;  %v760_v11 = vld [vmem:[%s12102_s19 + $0x140] sm:$0xff]  ;;  %v763_v12 = vld [vmem:[%s12102_s19 + $0x158] sm:$0xff]  ;;  %v762_v13 = vld [vmem:[%s12102_s19 + $0x150] sm:$0xff] }
  0x23   : > { %v10244_v14 = vld [vmem:[%s12213_s20 + $0x8] sm:$0xff]   ;;  %v10245_v19 = vld [vmem:[%s12213_s20 + $0x10] sm:$0xff]   ;;  %v767_v25 = vld [vmem:[%s12102_s19 + $0x178] sm:$0xff] }
  0x24   : > { %831 = vperm.xlu1 %11925, %v729_v15   ;;  %826 = vperm.xlu0 %11924, %v728_v16   ;;  %v1285_v54 = vrot.slane %v1283_v51, 6  ;;  %v1288_v55 = vrot.slane %v1286_v52, 7  ;;  %v9957_v15 = vld [vmem:[%s12213_s20] sm:$0xff]   ;;  %v765_v16 = vld [vmem:[%s12102_s19 + $0x168] sm:$0xff]  ;;  %v10249_v52 = vld [vmem:[%s12213_s20 + $0x30] sm:$0xff]  }
  0x25   : > { %10997 = vmatpush3.bf16.msra.mxu0 %v11935_v26  ;;  %10677 = vmatpush3.bf16.msra.mxu1 %v11938_v31  ;;  %v9958_v22 = vunpack.c.l.bf16 %v9957_v15  ;;  %v766_v26 = vld [vmem:[%s12102_s19 + $0x170] sm:$0xff]  ;;  %v12233_v27 = vld [vmem:[%s14881_s6] ss:$0 sm:$0xff]  ;;  %v769_v37 = vld [vmem:[%s12102_s19 + $0x188] sm:$0xff] }
  0x26   : > { %10998 = vmatprep.subr.bf16.mxu0 %v11937_v28  ;;  %10678 = vmatprep.subr.bf16.mxu1 %v11940_v35  ;;  %v1289_v58 = vor.u32 %v1288_v55, %v1285_v54  ;;  %v10247_v36 = vld [vmem:[%s12213_s20 + $0x20] sm:$0xff]   ;;  %v10248_v47 = vld [vmem:[%s12213_s20 + $0x28] sm:$0xff]   ;;  %v770_v54 = vld [vmem:[%s12102_s19 + $0x190] sm:$0xff] }
  0x27   : > { %v9975_v49 = vunpack.c.h.bf16 %v10247_v36  ;;  %v10260_v0 = vld [vmem:[%s12213_s20 + $0x88] sm:$0xff]  }
  0x28   : > { %841 = vperm.xlu1 %11925, %v731_v17   ;;  %836 = vperm.xlu0 %11924, %v730_v18   ;;  %v1298_v60 = vsel %vm1281_vm0, %v1289_v58, %v12187_v56  ;;  %v764_v17 = vld [vmem:[%s12102_s19 + $0x160] sm:$0xff] }
  0x29   : > { %10999 = vmatpush3.bf16.msra.mxu0 %v11937_v28  ;;  %10679 = vmatpush3.bf16.msra.mxu1 %v11940_v35  ;;  %v12224_v18 = vld [vmem:[%s14880_s5] ss:$0 sm:$0xff] }
  0x2a   : > { %11000 = vmatprep.subr.bf16.mxu0 %v11939_v33  ;;  %10680 = vmatprep.subr.bf16.mxu1 %v11941_v41  ;;  %v521_v31 = vmul.f32 %v9958_v22, %v12224_v18 }
  0x2b   : > { %10682 = vmatprep.mubr.bf16.mxu1 %v1298_v60  ;;  %v10250_v60 = vld [vmem:[%s12213_s20 + $0x38] sm:$0xff]  }
  0x2c   : > { %851 = vperm.xlu1 %11925, %v733_v20   ;;  %846 = vperm.xlu0 %11924, %v732_v21   ;;  %v9962_v20 = vunpack.c.l.bf16 %v10244_v14  ;;  %v10246_v21 = vld [vmem:[%s12213_s20 + $0x18] sm:$0xff]   ;;  %v12248_v43 = vadd.f32 %v12233_v27, %v521_v31 }
  0x2d   : > { %11001 = vmatpush3.bf16.msra.mxu0 %v11939_v33  ;;  %10681 = vmatpush3.bf16.msra.mxu1 %v11941_v41  ;;  %v9971_v33 = vunpack.c.h.bf16 %v10246_v21  ;;  %v9970_v35 = vunpack.c.l.bf16 %v10246_v21 }
  0x2e   : > { %11066 = vmatprep.subr.bf16.mxu0 %v12170_v39  ;;  %10746 = vmatprep.subr.bf16.mxu1 %v12182_v46  ;;  %v523_v28 = vmul.f32 %v9962_v20, %v12224_v18 }
  0x2f   : > { %v527_v51 = vmul.f32 %v9970_v35, %v12224_v18  ;;  %v774_v35 = vld [vmem:[%s12102_s19 + $0x1b0] sm:$0xff] }
  0x30   : > { %861 = vperm.xlu1 %11925, %v735_v23   ;;  %856 = vperm.xlu0 %11924, %v734_v24   ;;  %v9963_v23 = vunpack.c.h.bf16 %v10244_v14  ;;  %v9959_v24 = vunpack.c.h.bf16 %v9957_v15 }
  0x34   : > { %871 = vperm.xlu1 %11925, %v737_v29   ;;  %866 = vperm.xlu0 %11924, %v736_v30   ;;  %v9967_v29 = vunpack.c.h.bf16 %v10245_v19  ;;  %v9966_v30 = vunpack.c.l.bf16 %v10245_v19 }
  0x36   : > { %v526_v41 = vmul.f32 %v9967_v29, %v12224_v18  ;;  %v525_v42 = vmul.f32 %v9966_v30, %v12224_v18  ;;  %v10254_v29 = vld [vmem:[%s12213_s20 + $0x58] sm:$0xff]  }
  0x38   : > { %881 = vperm.xlu1 %11925, %v739_v32   ;;  %876 = vperm.xlu0 %11924, %v738_v34   ;;  %v524_v32 = vmul.f32 %v9963_v23, %v12224_v18  ;;  %v522_v34 = vmul.f32 %v9959_v24, %v12224_v18  ;;  %v12267_v58 = vadd.f32 %v12233_v27, %v525_v42  ;;  %v10253_v23 = vld [vmem:[%s12213_s20 + $0x50] sm:$0xff]  }
  0x3a   : > { %v12256_v48 = vadd.f32 %v12233_v27, %v522_v34  ;;  %v775_v34 = vld [vmem:[%s12102_s19 + $0x1b8] sm:$0xff] }
  0x3c   : > { %891 = vperm.xlu1 %11925, %v741_v38   ;;  %886 = vperm.xlu0 %11924, %v740_v40   ;;  %v768_v38 = vld [vmem:[%s12102_s19 + $0x180] sm:$0xff]  ;;  %v12243_v40 = vadd.f32 %v12233_v27, %v523_v28 }
  0x3e   : > { %v658_v55 = vmax.f32 %v12243_v40, 0.0 }
  0x40   : > { %901 = vperm.xlu1 %11925, %v743_v44   ;;  %896 = vperm.xlu0 %11924, %v742_v45   ;;  %v12251_v44 = vadd.f32 %v12233_v27, %v524_v32  ;;  %v528_v45 = vmul.f32 %v9971_v33, %v12224_v18 }
  0x44   : > { %911 = vperm.xlu1 %11925, %v745_v50   ;;  %906 = vperm.xlu0 %11924, %v744_v53   ;;  %v9974_v50 = vunpack.c.l.bf16 %v10247_v36  ;;  %v771_v53 = vld [vmem:[%s12102_s19 + $0x198] sm:$0xff] }
  0x48   : > { %921 = vperm.xlu1 %11925, %v747_v57   ;;  %916 = vperm.xlu0 %11924, %v746_v59   ;;  %v12264_v57 = vadd.f32 %v12233_v27, %v526_v41  ;;  %v9979_v59 = vunpack.c.h.bf16 %v10248_v47  ;;  %v9998_v41 = vunpack.c.l.bf16 %v10253_v23 }
  0x4c   : > { %931 = vperm.xlu1 %11925, %v749_v61   ;;  %926 = vperm.xlu0 %11924, %v748_v62   ;;  %v656_v61 = vmax.f32 %v12248_v43, 0.0  ;;  %v659_v62 = vmax.f32 %v12251_v44, 0.0 }
  0x50   : > { %941 = vperm.xlu1 %11925, %v751_v63   ;;  %936 = vperm.xlu0 %11924, %v750_v1   ;;  %v12273_v63 = vadd.f32 %v12233_v27, %v528_v45  ;;  %v9978_v1 = vunpack.c.l.bf16 %v10248_v47 }
  0x52   : > { %v531_v20 = vmul.f32 %v9978_v1, %v12224_v18  ;;  %v10002_v1 = vunpack.c.l.bf16 %v10254_v29 }
  0x54   : > { %951 = vperm.xlu1 %11925, %v753_v2   ;;  %946 = vperm.xlu0 %11924, %v752_v3   ;;  %v10251_v2 = vld [vmem:[%s12213_s20 + $0x40] sm:$0xff]   ;;  %v12310_v42 = vadd.f32 %v12233_v27, %v531_v20 }
  0x55   : > { %v9990_v21 = vunpack.c.l.bf16 %v10251_v2 }
  0x57   : > { %v537_v45 = vmul.f32 %v9990_v21, %v12224_v18 }
  0x58   : > { %961 = vperm.xlu1 %11925, %v755_v4   ;;  %956 = vperm.xlu0 %11924, %v754_v5   ;;  %v530_v4 = vmul.f32 %v9975_v49, %v12224_v18  ;;  %v529_v5 = vmul.f32 %v9974_v50, %v12224_v18  ;;  %v10003_v49 = vunpack.c.h.bf16 %v10254_v29  ;;  %v780_v29 = vld [vmem:[%s12102_s19 + $0x1e0] sm:$0xff] }
  0x5a   : > { %v12292_v24 = vadd.f32 %v12233_v27, %v530_v4  ;;  %v777_v4 = vld [vmem:[%s12102_s19 + $0x1c8] sm:$0xff] }
  0x5c   : > { %971 = vperm.xlu1 %11925, %v757_v6   ;;  %966 = vperm.xlu0 %11924, %v756_v7   ;;  %v9983_v6 = vunpack.c.h.bf16 %v10249_v52  ;;  %v10252_v7 = vld [vmem:[%s12213_s20 + $0x48] sm:$0xff]  }
  0x5d   : > { %v9995_v22 = vunpack.c.h.bf16 %v10252_v7  ;;  %v9994_v28 = vunpack.c.l.bf16 %v10252_v7 }
  0x5f   : > { %v540_v47 = vmul.f32 %v9995_v22, %v12224_v18 }
  0x60   : > { %981 = vperm.xlu1 %11925, %v759_v8   ;;  %976 = vperm.xlu0 %11924, %v758_v9   ;;  %v12281_v8 = vadd.f32 %v12233_v27, %v527_v51  ;;  %v9982_v9 = vunpack.c.l.bf16 %v10249_v52 }
  0x62   : > { %v533_v31 = vmul.f32 %v9982_v9, %v12224_v18 }
  0x64   : > { %991 = vperm.xlu1 %11925, %v761_v10   ;;  %986 = vperm.xlu0 %11924, %v760_v11   ;;  %v9987_v10 = vunpack.c.h.bf16 %v10250_v60  ;;  %v9986_v11 = vunpack.c.l.bf16 %v10250_v60 }
  0x66   : > { %v536_v32 = vmul.f32 %v9987_v10, %v12224_v18  ;;  %v535_v33 = vmul.f32 %v9986_v11, %v12224_v18  ;;  %v541_v10 = vmul.f32 %v9998_v41, %v12224_v18 }
  0x68   : > { %1001 = vperm.xlu1 %11925, %v763_v12   ;;  %996 = vperm.xlu0 %11924, %v762_v13   ;;  %v773_v12 = vld [vmem:[%s12102_s19 + $0x1a8] sm:$0xff]  ;;  %v772_v13 = vld [vmem:[%s12102_s19 + $0x1a0] sm:$0xff]  ;;  %v12327_v60 = vadd.f32 %v12233_v27, %v535_v33  ;;  %v779_v33 = vld [vmem:[%s12102_s19 + $0x1d8] sm:$0xff] }
  0x6c   : > { %1011 = vperm.xlu1 %11925, %v765_v16   ;;  %1006 = vperm.xlu0 %11924, %v764_v17   ;;  %v532_v16 = vmul.f32 %v9979_v59, %v12224_v18  ;;  %v9991_v17 = vunpack.c.h.bf16 %v10251_v2  ;;  %v12324_v59 = vadd.f32 %v12233_v27, %v536_v32  ;;  %v10255_v2 = vld [vmem:[%s12213_s20 + $0x60] sm:$0xff]   ;;  %v10257_v32 = vld [vmem:[%s12213_s20 + $0x70] sm:$0xff]  }
  0x6d   : > { %v10007_v22 = vunpack.c.h.bf16 %v10255_v2 }
  0x6e   : > { %v12306_v36 = vadd.f32 %v12233_v27, %v532_v16  ;;  %v544_v16 = vmul.f32 %v10003_v49, %v12224_v18  ;;  %v10014_v49 = vunpack.c.l.bf16 %v10257_v32 }
  0x70   : > { %1021 = vperm.xlu1 %11925, %v767_v25   ;;  %1016 = vperm.xlu0 %11924, %v766_v26   ;;  %v12295_v25 = vadd.f32 %v12233_v27, %v529_v5  ;;  %v534_v26 = vmul.f32 %v9983_v6, %v12224_v18  ;;  %v776_v5 = vld [vmem:[%s12102_s19 + $0x1c0] sm:$0xff]  ;;  %v782_v6 = vld [vmem:[%s12102_s19 + $0x1f0] sm:$0xff] }
  0x72   : > { %v12317_v52 = vadd.f32 %v12233_v27, %v534_v26  ;;  %v10261_v26 = vld [vmem:[%s12213_s20 + $0x90] sm:$0xff]  }
  0x73   : > { %v10030_v51 = vunpack.c.l.bf16 %v10261_v26 }
  0x74   : > { %1031 = vperm.xlu1 %11925, %v769_v37   ;;  %1026 = vperm.xlu0 %11924, %v768_v38   ;;  %v538_v37 = vmul.f32 %v9991_v17, %v12224_v18  ;;  %v9999_v38 = vunpack.c.h.bf16 %v10253_v23  ;;  %v10256_v17 = vld [vmem:[%s12213_s20 + $0x68] sm:$0xff]   ;;  %v10006_v23 = vunpack.c.l.bf16 %v10255_v2  ;;  %v10259_v2 = vld [vmem:[%s12213_s20 + $0x80] sm:$0xff]  }
  0x75   : > { %v10011_v41 = vunpack.c.h.bf16 %v10256_v17 }
  0x76   : > { %v12334_v7 = vadd.f32 %v12233_v27, %v538_v37  ;;  %v542_v9 = vmul.f32 %v9999_v38, %v12224_v18  ;;  %v12363_v38 = vadd.f32 %v12233_v27, %v541_v10  ;;  %v10015_v10 = vunpack.c.h.bf16 %v10257_v32 }
  0x77   : > { %v10027_v32 = vunpack.c.h.bf16 %v10260_v0 }
  0x78   : > { %1041 = vperm.xlu1 %11925, %v771_v53   ;;  %1036 = vperm.xlu0 %11924, %v770_v54   ;;  %v539_v53 = vmul.f32 %v9994_v28, %v12224_v18  ;;  %v12321_v54 = vadd.f32 %v12233_v27, %v533_v31  ;;  %v543_v31 = vmul.f32 %v10002_v1, %v12224_v18  ;;  %v10010_v1 = vunpack.c.l.bf16 %v10256_v17  ;;  %v781_v17 = vld [vmem:[%s12102_s19 + $0x1e8] sm:$0xff] }
  0x79   : > { %v12360_v37 = vadd.f32 %v12233_v27, %v542_v9  ;;  %v545_v9 = vmul.f32 %v10006_v23, %v12224_v18  ;;  %v548_v23 = vmul.f32 %v10011_v41, %v12224_v18  ;;  %v10023_v28 = vunpack.c.h.bf16 %v10259_v2  ;;  %v10262_v41 = vld [vmem:[%s12213_s20 + $0x98] sm:$0xff]  }
  0x7a   : > { %v12349_v21 = vadd.f32 %v12233_v27, %v539_v53  ;;  %v12369_v53 = vadd.f32 %v12233_v27, %v544_v16  ;;  %v10034_v30 = vunpack.c.l.bf16 %v10262_v41 }
  0x7b   : > { %v12391_v20 = vadd.f32 %v12233_v27, %v545_v9  ;;  %v12402_v9 = vadd.f32 %v12233_v27, %v548_v23 }
  0x7c   : > { %1051 = vperm.xlu1 %11925, %v773_v12   ;;  %1046 = vperm.xlu0 %11924, %v772_v13   ;;  %v12340_v12 = vadd.f32 %v12233_v27, %v537_v45  ;;  %v12343_v13 = vadd.f32 %v12233_v27, %v540_v47  ;;  %v10258_v45 = vld [vmem:[%s12213_s20 + $0x78] sm:$0xff]   ;;  %v12377_v47 = vadd.f32 %v12233_v27, %v543_v31  ;;  %v10022_v31 = vunpack.c.l.bf16 %v10259_v2 }
  0x7d   : > { %v10018_v16 = vunpack.c.l.bf16 %v10258_v45 }
  0x7f   : > { %v551_v11 = vmul.f32 %v10018_v16, %v12224_v18 }
  0x80   : > { %1061 = vperm.xlu1 %11925, %v775_v34   ;;  %1056 = vperm.xlu0 %11924, %v774_v35   ;;  %v778_v34 = vld [vmem:[%s12102_s19 + $0x1d0] sm:$0xff]  ;;  %v10019_v35 = vunpack.c.h.bf16 %v10258_v45 }
  0x82   : > { %v552_v2 = vmul.f32 %v10019_v35, %v12224_v18  ;;  %v10263_v35 = vld [vmem:[%s12213_s20 + $0xa0] sm:$0xff]  }
  0x84   : > { %1071 = vperm.xlu1 %11925, %v777_v4   ;;  %1066 = vperm.xlu0 %11924, %v776_v5   ;;  %v546_v5 = vmul.f32 %v10007_v22, %v12224_v18  ;;  %v550_v22 = vmul.f32 %v10015_v10, %v12224_v18  ;;  %v10026_v4 = vunpack.c.l.bf16 %v10260_v0  ;;  %v554_v10 = vmul.f32 %v10023_v28, %v12224_v18 }
  0x85   : > { %v10031_v0 = vunpack.c.h.bf16 %v10261_v26 }
  0x86   : > { %v12388_v45 = vadd.f32 %v12233_v27, %v546_v5  ;;  %v783_v5 = vld [vmem:[%s12102_s19 + $0x1f8] sm:$0xff]  ;;  %v12413_v50 = vadd.f32 %v12233_v27, %v550_v22  ;;  %v555_v23 = vmul.f32 %v10026_v4, %v12224_v18  ;;  %v12427_v22 = vadd.f32 %v12233_v27, %v554_v10 }
  0x87   : > { %v558_v4 = vmul.f32 %v10031_v0, %v12224_v18  ;;  %v10038_v0 = vunpack.c.l.bf16 %v10263_v35 }
  0x88   : > { %1081 = vperm.xlu1 %11925, %v779_v33   ;;  %1076 = vperm.xlu0 %11924, %v778_v34   ;;  %v547_v34 = vmul.f32 %v10010_v1, %v12224_v18  ;;  %v549_v1 = vmul.f32 %v10014_v49, %v12224_v18  ;;  %v556_v49 = vmul.f32 %v10027_v32, %v12224_v18  ;;  %v10035_v33 = vunpack.c.h.bf16 %v10262_v41  ;;  %v10264_v41 = vld [vmem:[%s12213_s20 + $0xa8] sm:$0xff]  }
  0x89   : > { %v557_v32 = vmul.f32 %v10030_v51, %v12224_v18  ;;  %v12441_v16 = vadd.f32 %v12233_v27, %v555_v23  ;;  %v559_v51 = vmul.f32 %v10034_v30, %v12224_v18  ;;  %v12451_v10 = vadd.f32 %v12233_v27, %v558_v4  ;;  %v11962_v4 = vld [vmem:[%s14878_s3 + $0x78] sm:$0xff]  }
  0x8a   : > { %v12418_v28 = vadd.f32 %v12233_v27, %v549_v1 }
  0x8b   : > { %14956 = vst [vmem:[#allocation6_spill] sm:$0xff] %v12441_v16  ;;  %v12454_v23 = vadd.f32 %v12233_v27, %v557_v32  ;;  %v12465_v3 = vadd.f32 %v12233_v27, %v559_v51  ;;  %v561_v32 = vmul.f32 %v10038_v0, %v12224_v18  ;;  %v11972_v0 = vld [vmem:[%s12158_s26 + $0x10] sm:$0xff]  }
  0x8c   : > { %1091 = vperm.xlu1 %11925, %v781_v17   ;;  %1086 = vperm.xlu0 %11924, %v780_v29   ;;  %v12406_v17 = vadd.f32 %v12233_v27, %v547_v34  ;;  %v553_v29 = vmul.f32 %v10022_v31, %v12224_v18  ;;  %v12421_v34 = vadd.f32 %v12233_v27, %v552_v2 }
  0x8d   : > { %v12424_v31 = vadd.f32 %v12233_v27, %v551_v11  ;;  %v12436_v2 = vadd.f32 %v12233_v27, %v556_v49  ;;  %v10043_v49 = vunpack.c.h.bf16 %v10264_v41  ;;  %384 = vst [vmem:[#allocation3 + $0x110] sm:$0xff] %v11972_v0 }
  0x8e   : > { %v12433_v1 = vadd.f32 %v12233_v27, %v553_v29 }
  0x8f   : > { %14955 = vst [vmem:[#allocation5_spill] sm:$0xff] %v12436_v2  ;;  %v14957_v2 = vmax.f32 %v12256_v48, 0.0  ;;  %v11946_v48 = vld [vmem:[%s14878_s3 + $0x148] sm:$0xff]  }
  0x90   : > { %1101 = vperm.xlu1 %11925, %v783_v5   ;;  %1096 = vperm.xlu0 %11924, %v782_v6   ;;  %v10039_v6 = vunpack.c.h.bf16 %v10263_v35  ;;  %14954 = vst [vmem:[#allocation4_spill] sm:$0xff] %v12433_v1  ;;  %v560_v5 = vmul.f32 %v10035_v33, %v12224_v18  ;;  %v10265_v33 = vld [vmem:[%s12213_s20 + $0xb0] sm:$0xff]  }
  0x92   : > { %v562_v30 = vmul.f32 %v10039_v6, %v12224_v18  ;;  %v12460_v19 = vadd.f32 %v12233_v27, %v560_v5  ;;  %v10042_v6 = vunpack.c.l.bf16 %v10264_v41  ;;  %v10047_v41 = vunpack.c.h.bf16 %v10265_v33 }
  0x93   : > { %v797_v11 = vpop.permute.xlu1 %796  ;;  %v787_v26 = vpop.permute.xlu0 %786 }
  0x94   : > { %v1106_v35 = vmul.f32 %v797_v11, %v658_v55  ;;  %v1104_v5 = vmul.f32 %v787_v26, %v656_v61  ;;  %v12479_v16 = vadd.f32 %v12233_v27, %v562_v30  ;;  %v564_v61 = vmul.f32 %v10043_v49, %v12224_v18 }
  0x95   : > { %v563_v26 = vmul.f32 %v10042_v6, %v12224_v18 }
  0x97   : > { %v802_v14 = vpop.permute.xlu1 %801  ;;  %v792_v15 = vpop.permute.xlu0 %791 }
  0x98   : > { %v1107_v29 = vmul.f32 %v802_v14, %v659_v62  ;;  %v1105_v1 = vmul.f32 %v792_v15, %v14957_v2  ;;  %v12489_v15 = vadd.f32 %v12233_v27, %v561_v32  ;;  %v10046_v2 = vunpack.c.l.bf16 %v10265_v33 }
  0x99   : > { %v566_v33 = vmul.f32 %v10047_v41, %v12224_v18  ;;  %v12507_v41 = vadd.f32 %v12233_v27, %v563_v26  ;;  %v11947_v26 = vld [vmem:[%s14878_s3 + $0x48] sm:$0xff]  }
  0x9a   : > { %v1169_v40 = vpack.c.bf16 %v1107_v29, %v1106_v35  ;;  %v1168_v55 = vpack.c.bf16 %v1105_v1, %v1104_v5  ;;  %v14958_v1 = vmax.f32 %v12264_v57, 0.0  ;;  %v14959_v29 = vmax.f32 %v12267_v58, 0.0  ;;  %v10266_v58 = vld [vmem:[%s12213_s20 + $0xb8] sm:$0xff]  }
  0x9b   : > { %v812_v44 = vpop.permute.xlu1 %811  ;;  %v807_v62 = vpop.permute.xlu0 %806  ;;  %v12500_v57 = vadd.f32 %v12233_v27, %v564_v61  ;;  %v12520_v14 = vadd.f32 %v12233_v27, %v566_v33  ;;  %v11949_v33 = vld [vmem:[%s14878_s3 + $0x158] sm:$0xff]  }
  0x9c   : > { %1201 = vst [vmem:[#allocation3 + $0x18] sm:$0xff] %v1169_v40  ;;  %1200 = vst [vmem:[#allocation3 + $0x10] sm:$0xff] %v1168_v55  ;;  %v1109_v11 = vmul.f32 %v812_v44, %v14958_v1  ;;  %v1108_v49 = vmul.f32 %v807_v62, %v14959_v29  ;;  %11002 = vmatprep.mubr.bf16.mxu0 %v1168_v55  ;;  %v1300_v30 = vshrl.u32 %v1168_v55, 16  ;;  %v1303_v35 = vshll.u32 %v1168_v55, 16 }
  0x9d   : > { %11003 = vmatmul.mubr.bf16.vlgmr.msra.gmra.mrb[0].mxu0 %v1169_v40  ;;  %v1309_v5 = vshrl.u32 %v1169_v40, 16  ;;  %v1312_v32 = vshll.u32 %v1169_v40, 16  ;;  %v11948_v40 = vld [vmem:[%s14878_s3 + $0x150] sm:$0xff]   ;;  %v14961_v29 = vmax.f32 %v12281_v8, 0.0 }
  0x9e   : > { %v1170_v6 = vpack.c.bf16 %v1109_v11, %v1108_v49  ;;  %v1302_v0 = vrot.slane %v1300_v30, 6  ;;  %v1305_v43 = vrot.slane %v1303_v35, 7  ;;  %11067 = vmatpush3.bf16.msra.mxu0 %v12170_v39  ;;  %v565_v11 = vmul.f32 %v10046_v2, %v12224_v18 }
  0x9f   : > { %v822_v44 = vpop.permute.xlu1 %821  ;;  %v817_v62 = vpop.permute.xlu0 %816  ;;  %v1311_v1 = vrot.slane %v1309_v5, 6  ;;  %v1314_v55 = vrot.slane %v1312_v32, 7  ;;  %11068 = vmatprep.subr.bf16.mxu0 %v11946_v48  ;;  %v14960_v39 = vmax.f32 %v12273_v63, 0.0  ;;  %v10051_v2 = vunpack.c.h.bf16 %v10266_v58 }
  0xa0   : > { %1202 = vst [vmem:[#allocation3 + $0x20] sm:$0xff] %v1170_v6  ;;  %v1110_v49 = vmul.f32 %v817_v62, %v14961_v29  ;;  %11006 = vmatprep.mubr.bf16.mxu0 %v1170_v6  ;;  %v1306_v30 = vor.u32 %v1305_v43, %v1302_v0  ;;  %v1318_v35 = vshrl.u32 %v1170_v6, 16  ;;  %v1321_v32 = vshll.u32 %v1170_v6, 16 }
  0xa1   : > { %v1111_v61 = vmul.f32 %v822_v44, %v14960_v39  ;;  %v12514_v5 = vor.u32 %v1314_v55, %v1311_v1  ;;  %v12531_v1 = vadd.f32 %v12233_v27, %v565_v11  ;;  %v14963_v39 = vmax.f32 %v12295_v25, 0.0 }
  0xa2   : > { %v1307_v63 = vsel %vm1281_vm0, %v12187_v56, %v1306_v30  ;;  %v1320_v8 = vrot.slane %v1318_v35, 6  ;;  %11069 = vmatpush3.bf16.msra.mxu0 %v11946_v48  ;;  %v1323_v62 = vrot.slane %v1321_v32, 7  ;;  %v10050_v56 = vunpack.c.l.bf16 %v10266_v58  ;;  %v11950_v58 = vld [vmem:[%s14878_s3 + $0x50] sm:$0xff]  }
  0xa3   : > { %v1171_v51 = vpack.c.bf16 %v1111_v61, %v1110_v49  ;;  %v832_v0 = vpop.permute.xlu1 %831  ;;  %v827_v44 = vpop.permute.xlu0 %826  ;;  %10683 = vmatmul.mubr.bf16.vlgmr.msra.gmra.mrb[0].mxu1 %v1307_v63  ;;  %v1316_v6 = vsel %vm1281_vm0, %v1306_v30, %v12514_v5  ;;  %11070 = vmatprep.subr.bf16.mxu0 %v11948_v40  ;;  %v14962_v48 = vmax.f32 %v12292_v24, 0.0  ;;  %v10267_v30 = vld [vmem:[%s12213_s20 + $0xc0] sm:$0xff]   ;;  %v568_v35 = vmul.f32 %v10051_v2, %v12224_v18 }
  0xa4   : > { %v1112_v61 = vmul.f32 %v827_v44, %v14963_v39  ;;  %10747 = vmatpush3.bf16.msra.mxu1 %v12182_v46  ;;  %10686 = vmatprep.mubr.bf16.mxu1 %v1316_v6  ;;  %v1324_v32 = vor.u32 %v1323_v62, %v1320_v8  ;;  %v10268_v44 = vld [vmem:[%s12213_s20 + $0xc8] sm:$0xff]   ;;  %v567_v24 = vmul.f32 %v10050_v56, %v12224_v18  ;;  %v10055_v25 = vunpack.c.h.bf16 %v10267_v30  ;;  %v11953_v56 = vld [vmem:[%s14878_s3 + $0x58] sm:$0xff]  }
  0xa5   : > { %1203 = vst [vmem:[#allocation3 + $0x28] sm:$0xff] %v1171_v51  ;;  %v1113_v55 = vmul.f32 %v832_v0, %v14962_v48  ;;  %v1327_v29 = vshrl.u32 %v1171_v51, 16  ;;  %v1330_v49 = vshll.u32 %v1171_v51, 16  ;;  %11007 = vmatmul.mubr.bf16.gmra.mrb[4].mxu0 %v1171_v51  ;;  %10748 = vmatprep.subr.bf16.mxu1 %v11947_v26  ;;  %v11951_v48 = vld [vmem:[%s14878_s3 + $0x160] sm:$0xff]   ;;  %v10054_v11 = vunpack.c.l.bf16 %v10267_v30 }
  0xa6   : > { %11071 = vmatpush3.bf16.msra.mxu0 %v11948_v40  ;;  %v14964_v2 = vmax.f32 %v12306_v36, 0.0  ;;  %v14965_v40 = vmax.f32 %v12310_v42, 0.0  ;;  %v10059_v36 = vunpack.c.h.bf16 %v10268_v44  ;;  %v10058_v30 = vunpack.c.l.bf16 %v10268_v44 }
  0xa7   : > { %v1172_v46 = vpack.c.bf16 %v1113_v55, %v1112_v61  ;;  %v1329_v63 = vrot.slane %v1327_v29, 6  ;;  %v1332_v0 = vrot.slane %v1330_v49, 7  ;;  %v842_v51 = vpop.permute.xlu1 %841  ;;  %v837_v6 = vpop.permute.xlu0 %836  ;;  %11072 = vmatprep.subr.bf16.mxu0 %v11949_v33  ;;  %v12562_v49 = vadd.f32 %v12233_v27, %v568_v35  ;;  %v11952_v35 = vld [vmem:[%s14878_s3 + $0x168] sm:$0xff]  }
  0xa8   : > { %v1115_v8 = vmul.f32 %v842_v51, %v14964_v2  ;;  %v1114_v62 = vmul.f32 %v837_v6, %v14965_v40  ;;  %10749 = vmatpush3.bf16.msra.mxu1 %v11947_v26  ;;  %v1325_v42 = vsel %vm1281_vm0, %v12514_v5, %v1324_v32  ;;  %v12569_v26 = vld [vmem:[%s12213_s20 + $0xd0] sm:$0xff]   ;;  %v12575_v44 = vadd.f32 %v12233_v27, %v567_v24  ;;  %v11956_v24 = vld [vmem:[%s14878_s3 + $0x60] sm:$0xff]  }
  0xa9   : > { %1204 = vst [vmem:[#allocation3 + $0x30] sm:$0xff] %v1172_v46  ;;  %11010 = vmatprep.mubr.bf16.mxu0 %v1172_v46  ;;  %v12556_v55 = vor.u32 %v1332_v0, %v1329_v63  ;;  %v1336_v61 = vshrl.u32 %v1172_v46, 16  ;;  %v1339_v29 = vshll.u32 %v1172_v46, 16  ;;  %10750 = vmatprep.subr.bf16.mxu1 %v11950_v58  ;;  %v570_v5 = vmul.f32 %v10055_v25, %v12224_v18 }
  0xaa   : > { %v1173_v51 = vpack.c.bf16 %v1115_v8, %v1114_v62  ;;  %11073 = vmatpush3.bf16.msra.mxu0 %v11949_v33  ;;  %v14966_v33 = vmax.f32 %v12317_v52, 0.0  ;;  %v14967_v40 = vmax.f32 %v12321_v54, 0.0  ;;  %v571_v52 = vmul.f32 %v10058_v30, %v12224_v18 }
  0xab   : > { %v1334_v63 = vsel %vm1281_vm0, %v1324_v32, %v12556_v55  ;;  %v1338_v0 = vrot.slane %v1336_v61, 6  ;;  %v852_v46 = vpop.permute.xlu1 %851  ;;  %v847_v6 = vpop.permute.xlu0 %846  ;;  %10687 = vmatmul.mubr.bf16.gmra.mrb[4].mxu1 %v1325_v42  ;;  %v1341_v2 = vrot.slane %v1339_v29, 7  ;;  %11074 = vmatprep.subr.bf16.mxu0 %v11951_v48  ;;  %v569_v32 = vmul.f32 %v10054_v11, %v12224_v18 }
  0xac   : > { %1205 = vst [vmem:[#allocation3 + $0x38] sm:$0xff] %v1173_v51  ;;  %v1117_v8 = vmul.f32 %v852_v46, %v14966_v33  ;;  %v1116_v62 = vmul.f32 %v847_v6, %v14967_v40  ;;  %10690 = vmatprep.mubr.bf16.mxu1 %v1334_v63  ;;  %v1345_v61 = vshrl.u32 %v1173_v51, 16  ;;  %v1348_v29 = vshll.u32 %v1173_v51, 16  ;;  %10751 = vmatpush3.bf16.msra.mxu1 %v11950_v58  ;;  %v11954_v33 = vld [vmem:[%s14878_s3 + $0x170] sm:$0xff]  }
  0xad   : > { %11011 = vmatmul.mubr.bf16.gmra.mrb[8].mxu0 %v1173_v51  ;;  %10752 = vmatprep.subr.bf16.mxu1 %v11953_v56  ;;  %v572_v11 = vmul.f32 %v10059_v36, %v12224_v18  ;;  %v10063_v42 = vunpack.c.h.bf16 %v12569_v26  ;;  %v1342_v46 = vor.u32 %v1341_v2, %v1338_v0  ;;  %v12595_v36 = vadd.f32 %v12233_v27, %v570_v5 }
  0xae   : > { %v1174_v54 = vpack.c.bf16 %v1117_v8, %v1116_v62  ;;  %v1347_v63 = vrot.slane %v1345_v61, 6  ;;  %v1350_v6 = vrot.slane %v1348_v29, 7  ;;  %11075 = vmatpush3.bf16.msra.mxu0 %v11951_v48  ;;  %v12598_v30 = vadd.f32 %v12233_v27, %v569_v32 }
  0xaf   : > { %v862_v58 = vpop.permute.xlu1 %861  ;;  %v857_v51 = vpop.permute.xlu0 %856  ;;  %11076 = vmatprep.subr.bf16.mxu0 %v11952_v35  ;;  %v10062_v0 = vunpack.c.l.bf16 %v12569_v26  ;;  %v14968_v48 = vmax.f32 %v12324_v59, 0.0  ;;  %v14969_v8 = vmax.f32 %v12327_v60, 0.0  ;;  %v12608_v32 = vadd.f32 %v12233_v27, %v572_v11  ;;  %v11958_v59 = vld [vmem:[%s14878_s3 + $0x68] sm:$0xff]   ;;  %v12622_v11 = vld [vmem:[%s12213_s20 + $0xd8] sm:$0xff]  }
  0xb0   : > { %1206 = vst [vmem:[#allocation3 + $0x40] sm:$0xff] %v1174_v54  ;;  %11014 = vmatprep.mubr.bf16.mxu0 %v1174_v54  ;;  %v12605_v61 = vor.u32 %v1350_v6, %v1347_v63  ;;  %v1354_v29 = vshrl.u32 %v1174_v54, 16  ;;  %10753 = vmatpush3.bf16.msra.mxu1 %v11953_v56  ;;  %v1357_v5 = vshll.u32 %v1174_v54, 16  ;;  %v12611_v26 = vadd.f32 %v12233_v27, %v571_v52  ;;  %v12636_v40 = vld [vmem:[#allocation3 + $0x30] sm:$0xff] }
  0xb1   : > { %v1119_v2 = vmul.f32 %v862_v58, %v14968_v48  ;;  %v1118_v62 = vmul.f32 %v857_v51, %v14969_v8  ;;  %10754 = vmatprep.subr.bf16.mxu1 %v11956_v24  ;;  %v574_v60 = vmul.f32 %v10063_v42, %v12224_v18  ;;  %v1343_v63 = vsel %vm1281_vm0, %v12556_v55, %v1342_v46  ;;  %v11955_v42 = vld [vmem:[%s14878_s3 + $0x178] sm:$0xff]  }
  0xb2   : > { %v1352_v56 = vsel %vm1281_vm0, %v1342_v46, %v12605_v61  ;;  %v1356_v54 = vrot.slane %v1354_v29, 6  ;;  %11077 = vmatpush3.bf16.msra.mxu0 %v11952_v35  ;;  %v1359_v51 = vrot.slane %v1357_v5, 7  ;;  %v573_v46 = vmul.f32 %v10062_v0, %v12224_v18 }
  0xb3   : > { %v1175_v58 = vpack.c.bf16 %v1119_v2, %v1118_v62  ;;  %v872_v52 = vpop.permute.xlu1 %871  ;;  %v867_v6 = vpop.permute.xlu0 %866  ;;  %10691 = vmatmul.mubr.bf16.gmra.mrb[8].mxu1 %v1343_v63  ;;  %11078 = vmatprep.subr.bf16.mxu0 %v11954_v33  ;;  %v14970_v35 = vmax.f32 %v12334_v7, 0.0  ;;  %v14971_v8 = vmax.f32 %v12340_v12, 0.0  ;;  %v12634_v63 = vld [vmem:[#allocation3 + $0x28] sm:$0xff]  ;;  %v12641_v7 = vadd.f32 %v12233_v27, %v574_v60  ;;  %v12655_v60 = vld [vmem:[%s14878_s3 + $0x180] sm:$0xff]  }
  0xb4   : > { %10694 = vmatprep.mubr.bf16.mxu1 %v1352_v56  ;;  %10755 = vmatpush3.bf16.msra.mxu1 %v11956_v24  ;;  %v10067_v12 = vunpack.c.h.bf16 %v12622_v11  ;;  %v11960_v56 = vld [vmem:[%s14878_s3 + $0x70] sm:$0xff]   ;;  %v12658_v48 = vadd.f32 %v12233_v27, %v573_v46 }
  0xb5   : > { %1207 = vst [vmem:[#allocation3 + $0x48] sm:$0xff] %v1175_v58  ;;  %v1121_v2 = vmul.f32 %v872_v52, %v14970_v35  ;;  %v1120_v62 = vmul.f32 %v867_v6, %v14971_v8  ;;  %v1363_v29 = vshrl.u32 %v1175_v58, 16  ;;  %v1366_v5 = vshll.u32 %v1175_v58, 16  ;;  %11015 = vmatmul.mubr.bf16.gmra.mrb[12].mxu0 %v1175_v58  ;;  %10756 = vmatprep.subr.bf16.mxu1 %v11958_v59  ;;  %v12647_v58 = vld [vmem:[#allocation3 + $0x20] sm:$0xff] }
  0xb6   : > { %v1360_v6 = vor.u32 %v1359_v51, %v1356_v54  ;;  %11079 = vmatpush3.bf16.msra.mxu0 %v11954_v33  ;;  %14972 = vst [vmem:[#allocation7_spill] sm:$0xff] %v12647_v58  ;;  %v12650_v8 = vld [vmem:[%s12213_s20 + $0xe0] sm:$0xff]   ;;  %v10066_v54 = vunpack.c.l.bf16 %v12622_v11  ;;  %v2104_v51 = vrot.slane %v12634_v63, 7  ;;  %v2106_v33 = vrot.slane %v12636_v40, 7 }
  0xb7   : > { %v1176_v52 = vpack.c.bf16 %v1121_v2, %v1120_v62  ;;  %v1365_v24 = vrot.slane %v1363_v29, 6  ;;  %v1368_v35 = vrot.slane %v1366_v5, 7  ;;  %v882_v0 = vpop.permute.xlu1 %881  ;;  %v877_v55 = vpop.permute.xlu0 %876  ;;  %11080 = vmatprep.subr.bf16.mxu0 %v11955_v42  ;;  %v14973_v2 = vmax.f32 %v12343_v13, 0.0 }
  0xb8   : > { %v14974_v29 = vmax.f32 %v12349_v21, 0.0  ;;  %10757 = vmatpush3.bf16.msra.mxu1 %v11958_v59  ;;  %v576_v43 = vmul.f32 %v10067_v12, %v12224_v18  ;;  %v10071_v11 = vunpack.c.h.bf16 %v12650_v8  ;;  %v14889_v13 = vrot.slane %v12647_v58, 7 }
  0xb9   : > { %1208 = vst [vmem:[#allocation3 + $0x50] sm:$0xff] %v1176_v52  ;;  %v1123_v62 = vmul.f32 %v882_v0, %v14973_v2  ;;  %11018 = vmatprep.mubr.bf16.mxu0 %v1176_v52  ;;  %v12667_v25 = vor.u32 %v1368_v35, %v1365_v24  ;;  %v1372_v39 = vshrl.u32 %v1176_v52, 16  ;;  %v1375_v46 = vshll.u32 %v1176_v52, 16  ;;  %10758 = vmatprep.subr.bf16.mxu1 %v11960_v56 }
  0xba   : > { %v1122_v5 = vmul.f32 %v877_v55, %v14974_v29  ;;  %v1361_v21 = vsel %vm1281_vm0, %v12605_v61, %v1360_v6  ;;  %11081 = vmatpush3.bf16.msra.mxu0 %v11955_v42  ;;  %v575_v35 = vmul.f32 %v10066_v54, %v12224_v18  ;;  %v12684_v2 = vsel %vm2094_vm1, %v14889_v13, %v2104_v51  ;;  %v10272_v13 = vld [vmem:[%s12213_s20 + $0xe8] sm:$0xff]  }
  0xbb   : > { %v1370_v55 = vsel %vm1281_vm0, %v1360_v6, %v12667_v25  ;;  %v1374_v59 = vrot.slane %v1372_v39, 6  ;;  %v892_v52 = vpop.permute.xlu1 %891  ;;  %v887_v12 = vpop.permute.xlu0 %886  ;;  %10695 = vmatmul.mubr.bf16.gmra.mrb[12].mxu1 %v1361_v21  ;;  %v1377_v24 = vrot.slane %v1375_v46, 7  ;;  %11146 = vmatprep.subr.bf16.mxu0 %v12655_v60  ;;  %14975 = vst [vmem:[#allocation8_spill] sm:$0xff] %v12684_v2  ;;  %v12689_v61 = vsel %vm2094_vm1, %v2104_v51, %v2106_v33  ;;  %v12697_v46 = vld [vmem:[#allocation3 + $0x40] sm:$0xff] }
  0xbc   : > { %v1177_v0 = vpack.c.bf16 %v1123_v62, %v1122_v5  ;;  %14976 = vst [vmem:[#allocation9_spill] sm:$0xff] %v12689_v61  ;;  %v14977_v39 = vmax.f32 %v12360_v37, 0.0  ;;  %v14978_v6 = vmax.f32 %v12363_v38, 0.0  ;;  %10698 = vmatprep.mubr.bf16.mxu1 %v1370_v55  ;;  %v12695_v5 = vld [vmem:[#allocation3 + $0x38] sm:$0xff]  ;;  %10759 = vmatpush3.bf16.msra.mxu1 %v11960_v56  ;;  %v578_v37 = vmul.f32 %v10071_v11, %v12224_v18  ;;  %v11964_v38 = vld [vmem:[%s14878_s3 + $0x80] sm:$0xff]  }
  0xbd   : > { %10760 = vmatprep.subr.bf16.mxu1 %v11962_v4  ;;  %v12708_v51 = vadd.f32 %v12233_v27, %v576_v43  ;;  %v12711_v21 = vadd.f32 %v12233_v27, %v575_v35  ;;  %v2108_v18 = vrot.slane %v12695_v5, 7  ;;  %v14979_v11 = vmax.f32 %v12369_v53, 0.0  ;;  %v12725_v35 = vld [vmem:[%s14880_s5] ss:$0 sm:$0xff] }
  0xbe   : > { %1209 = vst [vmem:[#allocation3 + $0x58] sm:$0xff] %v1177_v0  ;;  %v1125_v42 = vmul.f32 %v892_v52, %v14977_v39  ;;  %v1124_v62 = vmul.f32 %v887_v12, %v14978_v6  ;;  %v1381_v29 = vshrl.u32 %v1177_v0, 16  ;;  %v1384_v54 = vshll.u32 %v1177_v0, 16  ;;  %11019 = vmatmul.mubr.bf16.gmra.mrb[16].mxu0 %v1177_v0 }
  0xbf   : > { %v10070_v52 = vunpack.c.l.bf16 %v12650_v8  ;;  %v1378_v12 = vor.u32 %v1377_v24, %v1374_v59  ;;  %v902_v56 = vpop.permute.xlu1 %901  ;;  %v897_v0 = vpop.permute.xlu0 %896  ;;  %v14980_v59 = vmax.f32 %v12377_v47, 0.0  ;;  %v10075_v53 = vunpack.c.h.bf16 %v10272_v13 }
  0xc0   : > { %v1178_v55 = vpack.c.bf16 %v1125_v42, %v1124_v62  ;;  %v1383_v39 = vrot.slane %v1381_v29, 6  ;;  %v1386_v6 = vrot.slane %v1384_v54, 7  ;;  %v1127_v42 = vmul.f32 %v902_v56, %v14979_v11  ;;  %10761 = vmatpush3.bf16.msra.mxu1 %v11962_v4 }
  0xc1   : > { %v1126_v24 = vmul.f32 %v897_v0, %v14980_v59  ;;  %v12720_v54 = vadd.f32 %v12233_v27, %v578_v37  ;;  %v577_v8 = vmul.f32 %v12725_v35, %v10070_v52  ;;  %10826 = vmatprep.subr.bf16.mxu1 %v11964_v38  ;;  %v1379_v47 = vsel %vm1281_vm0, %v12667_v25, %v1378_v12 }
  0xc2   : > { %1210 = vst [vmem:[#allocation3 + $0x60] sm:$0xff] %v1178_v55  ;;  %11022 = vmatprep.mubr.bf16.mxu0 %v1178_v55  ;;  %v1387_v62 = vor.u32 %v1386_v6, %v1383_v39  ;;  %v1390_v29 = vshrl.u32 %v1178_v55, 16  ;;  %v1393_v43 = vshll.u32 %v1178_v55, 16  ;;  %v10074_v37 = vunpack.c.l.bf16 %v10272_v13 }
  0xc3   : > { %v1179_v56 = vpack.c.bf16 %v1127_v42, %v1126_v24  ;;  %v912_v55 = vpop.permute.xlu1 %911  ;;  %v907_v6 = vpop.permute.xlu0 %906  ;;  %10699 = vmatmul.mubr.bf16.gmra.mrb[16].mxu1 %v1379_v47  ;;  %v12734_v0 = vsel %vm2094_vm1, %v2106_v33, %v2108_v18  ;;  %v14982_v52 = vrot.slane %v12697_v46, 7  ;;  %v14984_v25 = vmax.f32 %v12388_v45, 0.0  ;;  %v12745_v24 = vld [vmem:[#allocation3 + $0x48] sm:$0xff]  ;;  %v12754_v45 = vld [vmem:[%s14881_s6] ss:$0 sm:$0xff] }
  0xc4   : > { %v1388_v39 = vsel %vm1281_vm0, %v1378_v12, %v1387_v62  ;;  %v1392_v4 = vrot.slane %v1390_v29, 6  ;;  %v1395_v27 = vrot.slane %v1393_v43, 7  ;;  %14981 = vst [vmem:[#allocation10_spill] sm:$0xff] %v12734_v0  ;;  %v14985_v11 = vmax.f32 %v12391_v20, 0.0  ;;  %v12747_v29 = vld [vmem:[#allocation3 + $0x50] sm:$0xff] }
  0xc5   : > { %v12739_v38 = vsel %vm2094_vm1, %v2108_v18, %v14982_v52  ;;  %1211 = vst [vmem:[#allocation3 + $0x68] sm:$0xff] %v1179_v56  ;;  %v1129_v12 = vmul.f32 %v912_v55, %v14984_v25  ;;  %10702 = vmatprep.mubr.bf16.mxu1 %v1388_v39  ;;  %v1399_v59 = vshrl.u32 %v1179_v56, 16  ;;  %v1402_v13 = vshll.u32 %v1179_v56, 16  ;;  %v5042_v52 = vld [vmem:[#allocation3 + $0x10] sm:$0xff] }
  0xc6   : > { %14983 = vst [vmem:[#allocation11_spill] sm:$0xff] %v12739_v38  ;;  %v1128_v42 = vmul.f32 %v907_v6, %v14985_v11  ;;  %11023 = vmatmul.mubr.bf16.gmra.mrb[20].mxu0 %v1179_v56  ;;  %v12757_v20 = vadd.f32 %v12754_v45, %v577_v8  ;;  %v580_v43 = vmul.f32 %v12725_v35, %v10075_v53  ;;  %v2112_v33 = vrot.slane %v12745_v24, 7 }
  0xc7   : > { %v1396_v39 = vor.u32 %v1395_v27, %v1392_v4  ;;  %v1401_v55 = vrot.slane %v1399_v59, 6  ;;  %v1404_v6 = vrot.slane %v1402_v13, 7  ;;  %v922_v56 = vpop.permute.xlu1 %921  ;;  %v917_v25 = vpop.permute.xlu0 %916  ;;  %v579_v18 = vmul.f32 %v12725_v35, %v10074_v37 }
  0xc8   : > { %14986 = vst [vmem:[#allocation12_spill] sm:$0xff] %v12757_v20  ;;  %v1180_v47 = vpack.c.bf16 %v1129_v12, %v1128_v42  ;;  %v14987_v8 = vmax.f32 %v12402_v9, 0.0  ;;  %v14988_v4 = vmax.f32 %v12406_v17, 0.0  ;;  %v5096_v13 = vshll.u32 %v5042_v52, 16 }
  0xc9   : > { %v1405_v12 = vor.u32 %v1404_v6, %v1401_v55  ;;  %v12770_v37 = vadd.f32 %v12754_v45, %v580_v43  ;;  %v1397_v38 = vsel %vm1281_vm0, %v1387_v62, %v1396_v39  ;;  %v14991_v6 = vrot.slane %v12697_v46, 7 }
  0xca   : > { %1212 = vst [vmem:[#allocation3 + $0x70] sm:$0xff] %v1180_v47  ;;  %v1131_v53 = vmul.f32 %v922_v56, %v14987_v8  ;;  %v1130_v27 = vmul.f32 %v917_v25, %v14988_v4  ;;  %11026 = vmatprep.mubr.bf16.mxu0 %v1180_v47  ;;  %v1408_v42 = vshrl.u32 %v1180_v47, 16  ;;  %v1411_v59 = vshll.u32 %v1180_v47, 16  ;;  %v12775_v56 = vld [vmem:[%s12213_s20 + $0xf0] sm:$0xff]  }
  0xcb   : > { %14989 = vst [vmem:[#allocation13_spill] sm:$0xff] %v12770_v37  ;;  %v1406_v61 = vsel %vm1281_vm0, %v1396_v39, %v1405_v12  ;;  %v932_v17 = vpop.permute.xlu1 %931  ;;  %v927_v25 = vpop.permute.xlu0 %926  ;;  %10703 = vmatmul.mubr.bf16.gmra.mrb[20].mxu1 %v1397_v38  ;;  %v12778_v47 = vadd.f32 %v12754_v45, %v579_v18  ;;  %v12783_v43 = vsel %vm2094_vm1, %v14991_v6, %v2112_v33  ;;  %v14993_v62 = vrot.slane %v12747_v29, 7  ;;  %v12796_v6 = vld [vmem:[#allocation3 + $0x60] sm:$0xff] }
  0xcc   : > { %v1181_v0 = vpack.c.bf16 %v1131_v53, %v1130_v27  ;;  %v1410_v9 = vrot.slane %v1408_v42, 6  ;;  %v1413_v55 = vrot.slane %v1411_v59, 7  ;;  %14992 = vst [vmem:[#allocation15_spill] sm:$0xff] %v12783_v43  ;;  %v14995_v8 = vmax.f32 %v12413_v50, 0.0  ;;  %10706 = vmatprep.mubr.bf16.mxu1 %v1406_v61  ;;  %v5043_v42 = vld [vmem:[#allocation3 + $0x18] sm:$0xff] }
  0xcd   : > { %14990 = vst [vmem:[#allocation14_spill] sm:$0xff] %v12778_v47  ;;  %v12788_v39 = vsel %vm2094_vm1, %v2112_v33, %v14993_v62  ;;  %v14996_v38 = vmax.f32 %v12418_v28, 0.0  ;;  %v12794_v59 = vld [vmem:[#allocation3 + $0x58] sm:$0xff]  ;;  %v5098_v11 = vrot.slane %v5096_v13, 1  ;;  %v5101_v43 = vshll.u32 %v5043_v42, 16 }
  0xce   : > { %14994 = vst [vmem:[#allocation16_spill] sm:$0xff] %v12788_v39  ;;  %1213 = vst [vmem:[#allocation3 + $0x78] sm:$0xff] %v1181_v0  ;;  %v1133_v53 = vmul.f32 %v932_v17, %v14995_v8  ;;  %v1417_v18 = vshrl.u32 %v1181_v0, 16  ;;  %v1420_v27 = vshll.u32 %v1181_v0, 16  ;;  %11027 = vmatmul.mubr.bf16.gmra.mrb[24].mxu0 %v1181_v0  ;;  %v1414_v8 = vor.u32 %v1413_v55, %v1410_v9 }
  0xcf   : > { %v1132_v4 = vmul.f32 %v927_v25, %v14996_v38  ;;  %v942_v61 = vpop.permute.xlu1 %941  ;;  %v937_v38 = vpop.permute.xlu0 %936  ;;  %v5094_v39 = vshrl.u32 %v5042_v52, 16  ;;  %v2116_v2 = vrot.slane %v12794_v59, 7  ;;  %v14997_v0 = vmax.f32 %v12421_v34, 0.0 }
  0xd0   : > { %v1419_v28 = vrot.slane %v1417_v18, 6  ;;  %v1422_v25 = vrot.slane %v1420_v27, 7  ;;  %v14998_v33 = vmax.f32 %v12424_v31, 0.0  ;;  %v5109_v18 = vshll.u32 %v12647_v58, 16 }
  0xd1   : > { %v1182_v17 = vpack.c.bf16 %v1133_v53, %v1132_v4  ;;  %v1135_v13 = vmul.f32 %v942_v61, %v14997_v0  ;;  %v5099_v55 = vor.u32 %v5098_v11, %v5094_v39  ;;  %v1415_v50 = vsel %vm1281_vm0, %v1405_v12, %v1414_v8  ;;  %v12825_v0 = vld [vmem:[#allocation3 + $0x68] sm:$0xff] }
  0xd2   : > { %v1134_v62 = vmul.f32 %v937_v38, %v14998_v33  ;;  %v1423_v53 = vor.u32 %v1422_v25, %v1419_v28  ;;  %v5103_v31 = vrot.slane %v5101_v43, 1  ;;  %v14999_v28 = vrot.slane %v12747_v29, 7 }
  0xd3   : > { %1214 = vst [vmem:[#allocation3 + $0x80] sm:$0xff] %v1182_v17  ;;  %11030 = vmatprep.mubr.bf16.mxu0 %v1182_v17  ;;  %v1426_v9 = vshrl.u32 %v1182_v17, 16  ;;  %v1429_v4 = vshll.u32 %v1182_v17, 16  ;;  %v952_v34 = vpop.permute.xlu1 %951  ;;  %v947_v61 = vpop.permute.xlu0 %946  ;;  %10707 = vmatmul.mubr.bf16.gmra.mrb[24].mxu1 %v1415_v50  ;;  %v15001_v39 = vrot.slane %v12796_v6, 7  ;;  %v15003_v12 = vmax.f32 %v12427_v22, 0.0 }
  0xd4   : > { %v1183_v27 = vpack.c.bf16 %v1135_v13, %v1134_v62  ;;  %v1424_v20 = vsel %vm1281_vm0, %v1414_v8, %v1423_v53  ;;  %v12814_v11 = vsel %vm2094_vm1, %v14999_v28, %v2116_v2  ;;  %v15004_v8 = vld [vmem:[#allocation4_spill] sm:$0xff]  ;;  %v12827_v13 = vld [vmem:[#allocation3 + $0x70] sm:$0xff]  ;;  %v5117_v28 = vshll.u32 %v12634_v63, 16 }
  0xd5   : > { %v1428_v37 = vrot.slane %v1426_v9, 6  ;;  %v1431_v33 = vrot.slane %v1429_v4, 7  ;;  %15000 = vst [vmem:[#allocation17_spill] sm:$0xff] %v12814_v11  ;;  %v12819_v17 = vsel %vm2094_vm1, %v2116_v2, %v15001_v39  ;;  %v1137_v62 = vmul.f32 %v952_v34, %v15003_v12  ;;  %10710 = vmatprep.mubr.bf16.mxu1 %v1424_v20 }
  0xd6   : > { %15002 = vst [vmem:[#allocation18_spill] sm:$0xff] %v12819_v17  ;;  %1215 = vst [vmem:[#allocation3 + $0x88] sm:$0xff] %v1183_v27  ;;  %v15005_v25 = vmax.f32 %v15004_v8, 0.0  ;;  %v1435_v43 = vshrl.u32 %v1183_v27, 16  ;;  %v1438_v50 = vshll.u32 %v1183_v27, 16  ;;  %11031 = vmatmul.mubr.bf16.gmra.mrb[28].mxu0 %v1183_v27  ;;  %v5104_v9 = vsel %vm5092_vm2, %v5099_v55, %v5103_v31  ;;  %v15006_v55 = vld [vmem:[#allocation5_spill] sm:$0xff] }
  0xd7   : > { %v5105_v4 = vshrl.u32 %v5043_v42, 16  ;;  %v5111_v2 = vrot.slane %v5109_v18, 1  ;;  %11082 = vmatprep.mubr.bf16.mxu0 %v5104_v9  ;;  %v1432_v22 = vor.u32 %v1431_v33, %v1428_v37  ;;  %v957_v20 = vpop.permute.xlu0 %956  ;;  %v2120_v52 = vrot.slane %v12825_v0, 7  ;;  %v15008_v17 = vld [vmem:[#allocation6_spill] sm:$0xff] }
  0xd8   : > { %v1136_v38 = vmul.f32 %v947_v61, %v15005_v25  ;;  %v1437_v34 = vrot.slane %v1435_v43, 6  ;;  %v1440_v12 = vrot.slane %v1438_v50, 7  ;;  %v962_v61 = vpop.permute.xlu1 %961  ;;  %v5113_v25 = vshrl.u32 %v12647_v58, 16 }
  0xd9   : > { %v5107_v8 = vor.u32 %v5105_v4, %v5103_v31  ;;  %v15007_v42 = vmax.f32 %v15006_v55, 0.0  ;;  %v15009_v11 = vmax.f32 %v15008_v17, 0.0  ;;  %v5119_v43 = vrot.slane %v5117_v28, 1 }
  0xda   : > { %v1184_v39 = vpack.c.bf16 %v1137_v62, %v1136_v38  ;;  %v1441_v38 = vor.u32 %v1440_v12, %v1437_v34  ;;  %v5125_v31 = vshll.u32 %v12636_v40, 16  ;;  %v1433_v4 = vsel %vm1281_vm0, %v1423_v53, %v1432_v22 }
  0xdb   : > { %v1139_v18 = vmul.f32 %v962_v61, %v15007_v42  ;;  %v1138_v62 = vmul.f32 %v957_v20, %v15009_v11  ;;  %v5112_v33 = vsel %vm5092_vm2, %v5107_v8, %v5111_v2  ;;  %v967_v55 = vpop.permute.xlu0 %966  ;;  %10711 = vmatmul.mubr.bf16.gmra.mrb[28].mxu1 %v1433_v4  ;;  %v5115_v61 = vor.u32 %v5113_v25, %v5111_v2  ;;  %v11959_v11 = vld [vmem:[%s14878_s3 + $0x188] sm:$0xff]   ;;  %v12859_v42 = vld [vmem:[#allocation3 + $0x78] sm:$0xff] }
  0xdc   : > { %1216 = vst [vmem:[#allocation3 + $0x90] sm:$0xff] %v1184_v39  ;;  %v1444_v37 = vshrl.u32 %v1184_v39, 16  ;;  %v1447_v50 = vshll.u32 %v1184_v39, 16  ;;  %v1442_v27 = vsel %vm1281_vm0, %v1432_v22, %v1441_v38  ;;  %v972_v47 = vpop.permute.xlu1 %971  ;;  %v15010_v28 = vrot.slane %v12796_v6, 7 }
  0xdd   : > { %v1185_v9 = vpack.c.bf16 %v1139_v18, %v1138_v62  ;;  %v15011_v34 = vrot.slane %v12827_v13, 7  ;;  %v15012_v22 = vmax.f32 %v12451_v10, 0.0  ;;  %v15013_v2 = vmax.f32 %v12454_v23, 0.0  ;;  %10714 = vmatprep.mubr.bf16.mxu1 %v1442_v27 }
  0xde   : > { %v1446_v58 = vrot.slane %v1444_v37, 6  ;;  %v1449_v17 = vrot.slane %v1447_v50, 7  ;;  %v12848_v39 = vsel %vm2094_vm1, %v15010_v28, %v2120_v52  ;;  %11083 = vmatmul.mubr.bf16.vlgmr.msra.gmra.mrb[0].mxu0 %v5112_v33  ;;  %v5120_v18 = vsel %vm5092_vm2, %v5115_v61, %v5119_v43  ;;  %v11961_v33 = vld [vmem:[%s14878_s3 + $0x190] sm:$0xff]  }
  0xdf   : > { %v12853_v53 = vsel %vm2094_vm1, %v2120_v52, %v15011_v34  ;;  %1217 = vst [vmem:[#allocation3 + $0x98] sm:$0xff] %v1185_v9  ;;  %v1141_v12 = vmul.f32 %v972_v47, %v15012_v22  ;;  %v1140_v20 = vmul.f32 %v967_v55, %v15013_v2  ;;  %v1453_v8 = vshrl.u32 %v1185_v9, 16  ;;  %11086 = vmatprep.mubr.bf16.mxu0 %v5120_v18  ;;  %v977_v4 = vpop.permute.xlu0 %976 }
  0xe0   : > { %v1456_v25 = vshll.u32 %v1185_v9, 16  ;;  %v5121_v62 = vshrl.u32 %v12634_v63, 16  ;;  %v5127_v37 = vrot.slane %v5125_v31, 1  ;;  %v5133_v52 = vshll.u32 %v12695_v5, 16  ;;  %11147 = vmatpush3.bf16.msra.mxu0 %v12655_v60  ;;  %v982_v27 = vpop.permute.xlu1 %981 }
  0xe1   : > { %v1186_v50 = vpack.c.bf16 %v1141_v12, %v1140_v20  ;;  %v1450_v10 = vor.u32 %v1449_v17, %v1446_v58  ;;  %v1455_v23 = vrot.slane %v1453_v8, 6  ;;  %11148 = vmatprep.subr.bf16.mxu0 %v11959_v11  ;;  %v15014_v63 = vunpack.c.h.bf16 %v12775_v56 }
  0xe2   : > { %v1458_v47 = vrot.slane %v1456_v25, 7  ;;  %v5123_v9 = vor.u32 %v5121_v62, %v5119_v43  ;;  %v15015_v55 = vunpack.c.l.bf16 %v12775_v56  ;;  %v2124_v60 = vrot.slane %v12859_v42, 7 }
  0xe3   : > { %v582_v31 = vmul.f32 %v12725_v35, %v15014_v63  ;;  %1218 = vst [vmem:[#allocation3 + $0xa0] sm:$0xff] %v1186_v50  ;;  %v15016_v61 = vmax.f32 %v12460_v19, 0.0  ;;  %v15017_v43 = vmax.f32 %v12465_v3, 0.0  ;;  %v1462_v22 = vshrl.u32 %v1186_v50, 16  ;;  %v987_v3 = vpop.permute.xlu0 %986  ;;  %v12904_v63 = vld [vmem:[%s12213_s20 + $0xf8] sm:$0xff]  }
  0xe4   : > { %v581_v58 = vmul.f32 %v12725_v35, %v15015_v55  ;;  %v1459_v34 = vor.u32 %v1458_v47, %v1455_v23  ;;  %v5128_v12 = vsel %vm5092_vm2, %v5123_v9, %v5127_v37  ;;  %v5129_v2 = vshrl.u32 %v12636_v40, 16  ;;  %11149 = vmatpush3.bf16.msra.mxu0 %v11959_v11  ;;  %v992_v19 = vpop.permute.xlu1 %991  ;;  %v11963_v40 = vld [vmem:[%s14878_s3 + $0x198] sm:$0xff]  }
  0xe5   : > { %v1143_v17 = vmul.f32 %v982_v27, %v15016_v61  ;;  %v1142_v28 = vmul.f32 %v977_v4, %v15017_v43  ;;  %v5135_v20 = vrot.slane %v5133_v52, 1  ;;  %v1465_v8 = vshll.u32 %v1186_v50, 16  ;;  %11150 = vmatprep.subr.bf16.mxu0 %v11961_v33 }
  0xe6   : > { %v1451_v25 = vsel %vm1281_vm0, %v1441_v38, %v1450_v10  ;;  %v1460_v18 = vsel %vm1281_vm0, %v1450_v10, %v1459_v34  ;;  %v1464_v62 = vrot.slane %v1462_v22, 6  ;;  %v5131_v23 = vor.u32 %v5129_v2, %v5127_v37  ;;  %11087 = vmatmul.mubr.bf16.gmra.mrb[4].mxu0 %v5128_v12 }
  0xe7   : > { %v12881_v56 = vpack.c.bf16 %v1143_v17, %v1142_v28  ;;  %10715 = vmatmul.mubr.bf16.gmra.mrb[32].mxu1 %v1451_v25  ;;  %v1467_v47 = vrot.slane %v1465_v8, 7  ;;  %v5141_v27 = vshll.u32 %v12697_v46, 16  ;;  %v15018_v38 = vrot.slane %v12827_v13, 7  ;;  %v997_v2 = vpop.permute.xlu0 %996 }
  0xe8   : > { %v15019_v11 = vmax.f32 %v12479_v16, 0.0  ;;  %v15020_v50 = vmax.f32 %v12489_v15, 0.0  ;;  %10718 = vmatprep.mubr.bf16.mxu1 %v1460_v18  ;;  %v5136_v55 = vsel %vm5092_vm2, %v5131_v23, %v5135_v20  ;;  %v5137_v61 = vshrl.u32 %v12695_v5, 16  ;;  %11151 = vmatpush3.bf16.msra.mxu0 %v11961_v33  ;;  %v1002_v12 = vpop.permute.xlu1 %1001  ;;  %v11965_v18 = vld [vmem:[%s14878_s3 + $0x1a0] sm:$0xff]  }
  0xe9   : > { %v12894_v52 = vsel %vm2094_vm1, %v15018_v38, %v2124_v60  ;;  %1219 = vst [vmem:[#allocation3 + $0xa8] sm:$0xff] %v12881_v56  ;;  %v1471_v4 = vshrl.u32 %v12881_v56, 16  ;;  %v1474_v9 = vshll.u32 %v12881_v56, 16  ;;  %v5149_v17 = vshll.u32 %v12745_v24, 16  ;;  %11090 = vmatprep.mubr.bf16.mxu0 %v5136_v55  ;;  %11152 = vmatprep.subr.bf16.mxu0 %v11963_v40 }
  0xea   : > { %v1145_v37 = vmul.f32 %v992_v19, %v15019_v11  ;;  %v1144_v10 = vmul.f32 %v987_v3, %v15020_v50  ;;  %v12910_v16 = vadd.f32 %v12754_v45, %v582_v31  ;;  %v1468_v15 = vor.u32 %v1467_v47, %v1464_v62 }
  0xeb   : > { %v1473_v28 = vrot.slane %v1471_v4, 6  ;;  %v1476_v22 = vrot.slane %v1474_v9, 7  ;;  %v5139_v8 = vor.u32 %v5137_v61, %v5135_v20  ;;  %v5143_v5 = vrot.slane %v5141_v27, 1 }
  0xec   : > { %v12912_v43 = vpack.c.bf16 %v1145_v37, %v1144_v10  ;;  %v12919_v25 = vadd.f32 %v12754_v45, %v581_v58  ;;  %v10083_v31 = vunpack.c.h.bf16 %v12904_v63  ;;  %v15021_v62 = vmax.f32 %v12500_v57, 0.0  ;;  %11153 = vmatpush3.bf16.msra.mxu0 %v11963_v40  ;;  %v1012_v50 = vpop.permute.xlu1 %1011  ;;  %v1007_v10 = vpop.permute.xlu0 %1006 }
  0xed   : > { %v15022_v33 = vmax.f32 %v12507_v41, 0.0  ;;  %v1477_v20 = vor.u32 %v1476_v22, %v1473_v28  ;;  %v5145_v58 = vshrl.u32 %v12697_v46, 16  ;;  %v5151_v47 = vrot.slane %v5149_v17, 1  ;;  %11154 = vmatprep.subr.bf16.mxu0 %v11965_v18 }
  0xee   : > { %1220 = vst [vmem:[#allocation3 + $0xb0] sm:$0xff] %v12912_v43  ;;  %v1147_v19 = vmul.f32 %v1002_v12, %v15021_v62  ;;  %v1480_v23 = vshrl.u32 %v12912_v43, 16  ;;  %v1483_v27 = vshll.u32 %v12912_v43, 16  ;;  %v5157_v38 = vshll.u32 %v12747_v29, 16  ;;  %v13252_v43 = vld [vmem:[#allocation3 + $0x38] sm:$0xff] }
  0xef   : > { %v1146_v3 = vmul.f32 %v997_v2, %v15022_v33  ;;  %v1469_v37 = vsel %vm1281_vm0, %v1459_v34, %v1468_v15  ;;  %v1478_v57 = vsel %vm1281_vm0, %v1468_v15, %v1477_v20  ;;  %v5144_v46 = vsel %vm5092_vm2, %v5139_v8, %v5143_v5  ;;  %v11967_v34 = vld [vmem:[%s14878_s3 + $0x1a8] sm:$0xff]  }
  0xf0   : > { %v1482_v41 = vrot.slane %v1480_v23, 6  ;;  %10719 = vmatmul.mubr.bf16.gmra.mrb[36].mxu1 %v1469_v37  ;;  %v5147_v55 = vor.u32 %v5145_v58, %v5143_v5  ;;  %v1485_v61 = vrot.slane %v1483_v27, 7  ;;  %v10082_v17 = vunpack.c.l.bf16 %v12904_v63  ;;  %11091 = vmatmul.mubr.bf16.gmra.mrb[8].mxu0 %v5144_v46  ;;  %v1022_v58 = vpop.permute.xlu1 %1021  ;;  %v1017_v37 = vpop.permute.xlu0 %1016 }
  0xf1   : > { %v12934_v11 = vpack.c.bf16 %v1147_v19, %v1146_v3  ;;  %v15023_v40 = vmax.f32 %v12520_v14, 0.0  ;;  %v15024_v28 = vmax.f32 %v12531_v1, 0.0  ;;  %10722 = vmatprep.mubr.bf16.mxu1 %v1478_v57  ;;  %v5153_v5 = vshrl.u32 %v12745_v24, 16  ;;  %11155 = vmatpush3.bf16.msra.mxu0 %v11965_v18 }
  0xf2   : > { %v5152_v8 = vsel %vm5092_vm2, %v5147_v55, %v5151_v47  ;;  %v5159_v62 = vrot.slane %v5157_v38, 1  ;;  %v5165_v19 = vshll.u32 %v12794_v59, 16  ;;  %v1486_v14 = vor.u32 %v1485_v61, %v1482_v41  ;;  %11156 = vmatprep.subr.bf16.mxu0 %v11967_v34  ;;  %v11969_v41 = vld [vmem:[%s14878_s3 + $0x1b0] sm:$0xff]   ;;  %v12975_v61 = vld [vmem:[#allocation3 + $0x80] sm:$0xff] }
  0xf3   : > { %1221 = vst [vmem:[#allocation3 + $0xb8] sm:$0xff] %v12934_v11  ;;  %v1149_v15 = vmul.f32 %v1012_v50, %v15023_v40  ;;  %v1148_v22 = vmul.f32 %v1007_v10, %v15024_v28  ;;  %v14904_v12 = vshrl.u32 %v12934_v11, 16  ;;  %v1492_v2 = vshll.u32 %v12934_v11, 16  ;;  %11094 = vmatprep.mubr.bf16.mxu0 %v5152_v8 }
  0xf4   : > { %v5155_v57 = vor.u32 %v5153_v5, %v5151_v47  ;;  %v5161_v50 = vshrl.u32 %v12747_v29, 16  ;;  %v5173_v24 = vshll.u32 %v12796_v6, 16  ;;  %v717_v38 = vmax.f32 %v12910_v16, 0.0 }
  0xf5   : > { %v12957_v33 = vpack.c.bf16 %v1149_v15, %v1148_v22  ;;  %v1491_v1 = vrot.slane %v14904_v12, 6  ;;  %v1494_v3 = vrot.slane %v1492_v2, 7  ;;  %v15025_v10 = vmax.f32 %v12562_v49, 0.0  ;;  %11157 = vmatpush3.bf16.msra.mxu0 %v11967_v34 }
  0xf6   : > { %v15026_v18 = vmax.f32 %v12575_v44, 0.0  ;;  %v5160_v40 = vsel %vm5092_vm2, %v5155_v57, %v5159_v62  ;;  %v5163_v15 = vor.u32 %v5161_v50, %v5159_v62  ;;  %v5167_v28 = vrot.slane %v5165_v19, 1  ;;  %11158 = vmatprep.subr.bf16.mxu0 %v11969_v41 }
  0xf7   : > { %1222 = vst [vmem:[#allocation3 + $0xc0] sm:$0xff] %v12957_v33  ;;  %v1151_v46 = vmul.f32 %v1022_v58, %v15025_v10  ;;  %v1495_v47 = vor.u32 %v1494_v3, %v1491_v1  ;;  %v14903_v29 = vshrl.u32 %v12957_v33, 16  ;;  %v1501_v22 = vshll.u32 %v12957_v33, 16  ;;  %v1032_v1 = vpop.permute.xlu1 %1031  ;;  %v1027_v3 = vpop.permute.xlu0 %1026 }
  0xf8   : > { %v1150_v55 = vmul.f32 %v1017_v37, %v15026_v18  ;;  %v1487_v5 = vsel %vm1281_vm0, %v1477_v20, %v1486_v14  ;;  %v5169_v62 = vshrl.u32 %v12794_v59, 16  ;;  %v12988_v19 = vrot.slane %v5173_v24, 1  ;;  %v11971_v20 = vld [vmem:[%s14878_s3 + $0x1b8] sm:$0xff]   ;;  %11095 = vmatmul.mubr.bf16.gmra.mrb[12].mxu0 %v5160_v40  ;;  %v13012_v40 = vld [vmem:[#allocation3 + $0x88] sm:$0xff] }
  0xf9   : > { %v1496_v49 = vsel %vm1281_vm0, %v1486_v14, %v1495_v47  ;;  %v1500_v44 = vrot.slane %v14903_v29, 6  ;;  %10723 = vmatmul.mubr.bf16.gmra.mrb[40].mxu1 %v1487_v5  ;;  %v1503_v58 = vrot.slane %v1501_v22, 7  ;;  %v2126_v14 = vrot.slane %v12975_v61, 7  ;;  %11159 = vmatpush3.bf16.msra.mxu0 %v11969_v41  ;;  %v13028_v41 = vld [vmem:[%s14878_s3 + $0x1c0] sm:$0xff]  }
  0xfa   : > { %v12979_v8 = vpack.c.bf16 %v1151_v46, %v1150_v55  ;;  %v15027_v34 = vmax.f32 %v12595_v36, 0.0  ;;  %v15028_v57 = vmax.f32 %v12598_v30, 0.0  ;;  %10726 = vmatprep.mubr.bf16.mxu1 %v1496_v49  ;;  %v5168_v10 = vsel %vm5092_vm2, %v5163_v15, %v5167_v28  ;;  %11160 = vmatprep.subr.bf16.mxu0 %v11971_v20 }
  0xfb   : > { %v5171_v46 = vor.u32 %v5169_v62, %v5167_v28  ;;  %v5181_v18 = vshll.u32 %v12825_v0, 16  ;;  %v584_v55 = vmul.f32 %v12725_v35, %v10083_v31  ;;  %11098 = vmatprep.mubr.bf16.mxu0 %v5168_v10  ;;  %v1504_v30 = vor.u32 %v1503_v58, %v1500_v44  ;;  %v1042_v15 = vpop.permute.xlu1 %1041  ;;  %v1037_v28 = vpop.permute.xlu0 %1036 }
  0xfc   : > { %1223 = vst [vmem:[#allocation3 + $0xc8] sm:$0xff] %v12979_v8  ;;  %v1153_v37 = vmul.f32 %v1032_v1, %v15027_v34  ;;  %v1152_v50 = vmul.f32 %v1027_v3, %v15028_v57  ;;  %v14898_v59 = vshrl.u32 %v12979_v8, 16  ;;  %v14905_v24 = vshll.u32 %v12979_v8, 16 }
  0xfd   : > { %v5176_v1 = vsel %vm5092_vm2, %v5171_v46, %v12988_v19  ;;  %v5177_v31 = vshrl.u32 %v12796_v6, 16  ;;  %v583_v44 = vmul.f32 %v12725_v35, %v10082_v17  ;;  %v13023_v3 = vsel %vm2094_vm1, %v2124_v60, %v2126_v14  ;;  %11161 = vmatpush3.bf16.msra.mxu0 %v11971_v20 }
  0xfe   : > { %v13006_v36 = vpack.c.bf16 %v1153_v37, %v1152_v50  ;;  %v1509_v5 = vrot.slane %v14898_v59, 6  ;;  %v1512_v49 = vrot.slane %v14905_v24, 7  ;;  %v15029_v58 = vmax.f32 %v12608_v32, 0.0  ;;  %11226 = vmatprep.subr.bf16.mxu0 %v13028_v41 }
  0xff   : > { %v15030_v63 = vmax.f32 %v12611_v26, 0.0  ;;  %v5183_v34 = vrot.slane %v5181_v18, 1  ;;  %v5189_v37 = vshll.u32 %v12827_v13, 16  ;;  %v2128_v57 = vrot.slane %v13012_v40, 7  ;;  %v1052_v46 = vpop.permute.xlu1 %1051 }
 0x100   : > { %1224 = vst [vmem:[#allocation3 + $0xd0] sm:$0xff] %v13006_v36  ;;  %v1155_v6 = vmul.f32 %v1042_v15, %v15029_v58  ;;  %v1513_v35 = vor.u32 %v1512_v49, %v1509_v5  ;;  %v14895_v17 = vshrl.u32 %v13006_v36, 16  ;;  %v14902_v60 = vshll.u32 %v13006_v36, 16  ;;  %v1047_v5 = vpop.permute.xlu0 %1046  ;;  %11099 = vmatmul.mubr.bf16.gmra.mrb[16].mxu0 %v5176_v1 }
 0x101   : > { %v1154_v62 = vmul.f32 %v1037_v28, %v15030_v63  ;;  %v1505_v10 = vsel %vm1281_vm0, %v1495_v47, %v1504_v30  ;;  %v5179_v18 = vor.u32 %v5177_v31, %v12988_v19  ;;  %v5185_v15 = vshrl.u32 %v12825_v0, 16 }
 0x102   : > { %v1514_v32 = vsel %vm1281_vm0, %v1504_v30, %v1513_v35  ;;  %v1518_v26 = vrot.slane %v14895_v17, 6  ;;  %10727 = vmatmul.mubr.bf16.gmra.mrb[44].mxu1 %v1505_v10  ;;  %v1521_v49 = vrot.slane %v14902_v60, 7  ;;  %v13052_v47 = vsel %vm2094_vm1, %v2126_v14, %v2128_v57 }
 0x103   : > { %v13039_v50 = vpack.c.bf16 %v1155_v6, %v1154_v62  ;;  %v15031_v20 = vmax.f32 %v12641_v7, 0.0  ;;  %v15032_v28 = vmax.f32 %v12658_v48, 0.0  ;;  %10730 = vmatprep.mubr.bf16.mxu1 %v1514_v32  ;;  %v13063_v6 = vsel %vm5092_vm2, %v5179_v18, %v5183_v34  ;;  %v1062_v1 = vpop.permute.xlu1 %1061 }
 0x104   : > { %v1522_v14 = vor.u32 %v1521_v49, %v1518_v26  ;;  %v5191_v63 = vrot.slane %v5189_v37, 1  ;;  %v5197_v62 = vshll.u32 %v12859_v42, 16  ;;  %11102 = vmatprep.mubr.bf16.mxu0 %v13063_v6  ;;  %v716_v48 = vmax.f32 %v12919_v25, 0.0  ;;  %v13081_v49 = vld [vmem:[#allocation3 + $0x90] sm:$0xff] }
 0x105   : > { %1225 = vst [vmem:[#allocation3 + $0xd8] sm:$0xff] %v13039_v50  ;;  %v1157_v30 = vmul.f32 %v1052_v46, %v15031_v20  ;;  %v1156_v31 = vmul.f32 %v1047_v5, %v15032_v28  ;;  %v14894_v58 = vshrl.u32 %v13039_v50, 16  ;;  %v14901_v0 = vshll.u32 %v13039_v50, 16  ;;  %v1057_v46 = vpop.permute.xlu0 %1056 }
 0x106   : > { %v5187_v5 = vor.u32 %v5185_v15, %v5183_v34  ;;  %v5193_v26 = vshrl.u32 %v12827_v13, 16  ;;  %v13076_v37 = vadd.f32 %v12754_v45, %v584_v55  ;;  %v13079_v18 = vadd.f32 %v12754_v45, %v583_v44  ;;  %v13089_v13 = vld [vmem:[#allocation3 + $0x98] sm:$0xff] }
 0x107   : > { %v13066_v10 = vpack.c.bf16 %v1157_v30, %v1156_v31  ;;  %v1527_v7 = vrot.slane %v14894_v58, 6  ;;  %v1530_v32 = vrot.slane %v14901_v0, 7  ;;  %v15033_v20 = vmax.f32 %v12708_v51, 0.0 }
 0x108   : > { %v15034_v28 = vmax.f32 %v12711_v21, 0.0  ;;  %v1523_v55 = vsel %vm1281_vm0, %v1513_v35, %v1522_v14  ;;  %v13093_v45 = vsel %vm5092_vm2, %v5187_v5, %v5191_v63  ;;  %v5199_v44 = vrot.slane %v5197_v62, 1 }
 0x109   : > { %1226 = vst [vmem:[#allocation3 + $0xe0] sm:$0xff] %v13066_v10  ;;  %v1159_v30 = vmul.f32 %v1062_v1, %v15033_v20  ;;  %v1531_v58 = vor.u32 %v1530_v32, %v1527_v7  ;;  %v14896_v34 = vshrl.u32 %v13066_v10, 16  ;;  %v14897_v15 = vshll.u32 %v13066_v10, 16  ;;  %v1072_v32 = vpop.permute.xlu1 %1071  ;;  %v1067_v1 = vpop.permute.xlu0 %1066  ;;  %11103 = vmatmul.mubr.bf16.gmra.mrb[20].mxu0 %v13093_v45 }
 0x10a   : > { %v1158_v31 = vmul.f32 %v1057_v46, %v15034_v28  ;;  %v2130_v7 = vrot.slane %v13081_v49, 7  ;;  %10731 = vmatmul.mubr.bf16.gmra.mrb[48].mxu1 %v1523_v55  ;;  %v5195_v46 = vor.u32 %v5193_v26, %v5191_v63  ;;  %v5205_v62 = vshll.u32 %v12975_v61, 16 }
 0x10b   : > { %v1532_v51 = vsel %vm1281_vm0, %v1522_v14, %v1531_v58  ;;  %v1536_v21 = vrot.slane %v14896_v34, 6  ;;  %v1539_v35 = vrot.slane %v14897_v15, 7  ;;  %v2132_v5 = vrot.slane %v13089_v13, 7 }
 0x10c   : > { %v13096_v17 = vpack.c.bf16 %v1159_v30, %v1158_v31  ;;  %v15035_v14 = vmax.f32 %v12720_v54, 0.0  ;;  %v15036_v30 = vld [vmem:[#allocation12_spill] sm:$0xff]  ;;  %10734 = vmatprep.mubr.bf16.mxu1 %v1532_v51  ;;  %v13115_v26 = vsel %vm5092_vm2, %v5195_v46, %v5199_v44  ;;  %v719_v55 = vmax.f32 %v13076_v37, 0.0 }
 0x10d   : > { %v15037_v28 = vmax.f32 %v15036_v30, 0.0  ;;  %v5213_v15 = vshll.u32 %v13012_v40, 16  ;;  %v13122_v54 = vsel %vm2094_vm1, %v2128_v57, %v2130_v7  ;;  %11106 = vmatprep.mubr.bf16.mxu0 %v13115_v26  ;;  %v1540_v51 = vor.u32 %v1539_v35, %v1536_v21  ;;  %v1077_v37 = vpop.permute.xlu0 %1076  ;;  %v15038_v21 = vld [vmem:[#allocation13_spill] sm:$0xff] }
 0x10e   : > { %1227 = vst [vmem:[#allocation3 + $0xe8] sm:$0xff] %v13096_v17  ;;  %v1161_v20 = vmul.f32 %v1072_v32, %v15035_v14  ;;  %v14899_v34 = vshrl.u32 %v13096_v17, 16  ;;  %v14900_v63 = vshll.u32 %v13096_v17, 16  ;;  %v1082_v14 = vpop.permute.xlu1 %1081  ;;  %v718_v30 = vmax.f32 %v13079_v18, 0.0 }
 0x10f   : > { %v1160_v31 = vmul.f32 %v1067_v1, %v15037_v28  ;;  %v5201_v28 = vshrl.u32 %v12859_v42, 16  ;;  %v5207_v59 = vrot.slane %v5205_v62, 1  ;;  %v13136_v57 = vsel %vm2094_vm1, %v2130_v7, %v2132_v5 }
 0x110   : > { %v1545_v1 = vrot.slane %v14899_v34, 6  ;;  %v1548_v46 = vrot.slane %v14900_v63, 7  ;;  %v15039_v35 = vmax.f32 %v15038_v21, 0.0  ;;  %v5209_v42 = vshrl.u32 %v12975_v61, 16 }
 0x111   : > { %v13124_v32 = vpack.c.bf16 %v1161_v20, %v1160_v31  ;;  %v15040_v31 = vld [vmem:[#allocation14_spill] sm:$0xff]  ;;  %v5203_v18 = vor.u32 %v5201_v28, %v5199_v44  ;;  %v5215_v62 = vrot.slane %v5213_v15, 1  ;;  %v1541_v7 = vsel %vm1281_vm0, %v1531_v58, %v1540_v51 }
 0x112   : > { %v1163_v20 = vmul.f32 %v1082_v14, %v15039_v35  ;;  %v15041_v34 = vmax.f32 %v15040_v31, 0.0  ;;  %v1549_v0 = vor.u32 %v1548_v46, %v1545_v1  ;;  %v1092_v21 = vpop.permute.xlu1 %1091  ;;  %10735 = vmatmul.mubr.bf16.gmra.mrb[52].mxu1 %v1541_v7  ;;  %v5211_v44 = vor.u32 %v5209_v42, %v5207_v59 }
 0x113   : > { %1228 = vst [vmem:[#allocation3 + $0xf0] sm:$0xff] %v13124_v32  ;;  %v14911_v60 = vshrl.u32 %v13124_v32, 16  ;;  %v14914_v29 = vshll.u32 %v13124_v32, 16  ;;  %v13153_v1 = vsel %vm5092_vm2, %v5203_v18, %v5207_v59  ;;  %v5221_v15 = vshll.u32 %v13081_v49, 16 }
 0x114   : > { %v1162_v63 = vmul.f32 %v1077_v37, %v15041_v34  ;;  %v1550_v24 = vsel %vm1281_vm0, %v1540_v51, %v1549_v0  ;;  %v1087_v34 = vpop.permute.xlu0 %1086  ;;  %v1165_v58 = vmul.f32 %v1092_v21, %v717_v38  ;;  %v13165_v37 = vld [vmem:[#allocation3 + $0xa0] sm:$0xff]  ;;  %11107 = vmatmul.mubr.bf16.gmra.mrb[24].mxu0 %v13153_v1  ;;  %v13169_v59 = vsel %vm5092_vm2, %v5211_v44, %v5215_v62 }
 0x115   : > { %v1554_v14 = vrot.slane %v14911_v60, 6  ;;  %v1557_v61 = vrot.slane %v14914_v29, 7  ;;  %10738 = vmatprep.mubr.bf16.mxu1 %v1550_v24  ;;  %v5229_v28 = vshll.u32 %v13089_v13, 16  ;;  %11110 = vmatprep.mubr.bf16.mxu0 %v13169_v59  ;;  %v5223_v31 = vrot.slane %v5221_v15, 1  ;;  %v2011_v15 = vld [vmem:[#allocation3] sm:$0x80] }
 0x116   : > { %v13146_v12 = vpack.c.bf16 %v1163_v20, %v1162_v63  ;;  %v1164_v63 = vmul.f32 %v1087_v34, %v716_v48  ;;  %v1102_v24 = vpop.permute.xlu1 %1101  ;;  %v5217_v20 = vshrl.u32 %v13012_v40, 16  ;;  %v14906_v18 = vrot.slane %v13165_v37, 7 }
 0x117   : > { %v1558_v16 = vor.u32 %v1557_v61, %v1554_v14  ;;  %v1167_v42 = vmul.f32 %v1102_v24, %v719_v55  ;;  %v5225_v14 = vshrl.u32 %v13081_v49, 16  ;;  %v5231_v44 = vrot.slane %v5229_v28, 1  ;;  %v13206_v24 = vld [vmem:[#allocation3 + $0x8] sm:$0xff] }
 0x118   : > { %1229 = vst [vmem:[#allocation3 + $0xf8] sm:$0xff] %v13146_v12  ;;  %v14910_v51 = vshrl.u32 %v13146_v12, 16  ;;  %v14913_v46 = vshll.u32 %v13146_v12, 16  ;;  %v13172_v35 = vpack.c.bf16 %v1165_v58, %v1164_v63  ;;  %v1097_v48 = vpop.permute.xlu0 %1096  ;;  %v5219_v34 = vor.u32 %v5217_v20, %v5215_v62 }
 0x119   : > { %v1166_v7 = vmul.f32 %v1097_v48, %v718_v30  ;;  %v5237_v61 = vshll.u32 %v13165_v37, 16  ;;  %v1559_v63 = vsel %vm1281_vm0, %v1549_v0, %v1558_v16  ;;  %v13193_v55 = vsel %vm2094_vm1, %v2132_v5, %v14906_v18 }
 0x11a   : > { %v1563_v25 = vrot.slane %v14910_v51, 6  ;;  %v1566_v38 = vrot.slane %v14913_v46, 7  ;;  %1230 = vst [vmem:[#allocation3 + $0x100] sm:$0xff] %v13172_v35  ;;  %10739 = vmatmul.mubr.bf16.gmra.mrb[56].mxu1 %v1559_v63  ;;  %v5227_v30 = vor.u32 %v5225_v14, %v5223_v31  ;;  %v13197_v49 = vsel %vm5092_vm2, %v5219_v34, %v5223_v31 }
 0x11b   : > { %v13184_v58 = vpack.c.bf16 %v1167_v42, %v1166_v7  ;;  %v5239_v62 = vrot.slane %v5237_v61, 1  ;;  %v5241_v5 = vshrl.u32 %v13165_v37, 16  ;;  %v2095_v20 = vrot.slane %v2011_v15, 7 }
 0x11c   : > { %v1567_v21 = vor.u32 %v1566_v38, %v1563_v25  ;;  %11111 = vmatmul.mubr.bf16.gmra.mrb[28].mxu0 %v13197_v49  ;;  %v13201_v0 = vsel %vm5092_vm2, %v5227_v30, %v5231_v44  ;;  %v5233_v38 = vshrl.u32 %v13089_v13, 16  ;;  %v5247_v34 = vrot.slane %v1474_v9, 1  ;;  %v13223_v9 = vld [vmem:[#allocation3 + $0x10] sm:$0xff] }
 0x11d   : > { %1231 = vst [vmem:[#allocation3 + $0x108] sm:$0xff] %v13184_v58  ;;  %11114 = vmatprep.mubr.bf16.mxu0 %v13201_v0  ;;  %v13208_v48 = vor.u32 %v5241_v5, %v5239_v62  ;;  %v2096_v14 = vrot.slane %v13206_v24, 7  ;;  %v5255_v15 = vrot.slane %v1483_v27, 1  ;;  %v13230_v5 = vld [vmem:[#allocation3 + $0x28] sm:$0xff]  ;;  %v15044_v51 = vshrl.u32 %v12957_v33, 16 }
 0x11e   : > { %v1568_v40 = vsel %vm1281_vm0, %v1558_v16, %v1567_v21  ;;  %v5235_v7 = vor.u32 %v5233_v38, %v5231_v44  ;;  %v5251_v38 = vor.u32 %v5247_v34, %v1471_v4  ;;  %v11966_v4 = vld [vmem:[%s14878_s3 + $0x88] sm:$0xff]   ;;  %v14920_v33 = vshll.u32 %v13252_v43, 16 }
 0x11f   : > { %10742 = vmatprep.mubr.bf16.mxu1 %v1568_v40  ;;  %v13216_v40 = vld [vmem:[#allocation3 + $0x18] sm:$0xff]  ;;  %v5248_v13 = vsel %vm5092_vm2, %v13208_v48, %v5247_v34  ;;  %v2097_v30 = vsel %vm2094_vm1, %v2095_v20, %v2096_v14  ;;  %v5259_v27 = vor.u32 %v5255_v15, %v1480_v23 }
 0x120   : > { %v13214_v63 = vsel %vm5092_vm2, %v5235_v7, %v5239_v62  ;;  %v14909_v62 = vshrl.u32 %v13216_v40, 16  ;;  %v14912_v20 = vshll.u32 %v13216_v40, 16 }
 0x121   : > { %v1264_v28 = vld [vmem:[#allocation3 + $0x100] sm:$0x7f] }
 0x122   : > { %v1570_v16 = vshrl.u32 %v1264_v28, 16  ;;  %v1573_v25 = vshll.u32 %v1264_v28, 16  ;;  %v13228_v28 = vld [vmem:[#allocation3 + $0x20] sm:$0xff]  ;;  %v2795_v7 = vrot.slane %v14909_v62, 7 }
 0x124   : > { %v1572_v31 = vrot.slane %v1570_v16, 6  ;;  %v1575_v42 = vrot.slane %v1573_v25, 7  ;;  %11115 = vmatmul.mubr.bf16.gmra.mrb[32].mxu0 %v13214_v63  ;;  %v5263_v16 = vrot.slane %v1492_v2, 1  ;;  %v2098_v25 = vrot.slane %v13223_v9, 7 }
 0x125   : > { %11118 = vmatprep.mubr.bf16.mxu0 %v5248_v13  ;;  %v5256_v2 = vsel %vm5092_vm2, %v5251_v38, %v5255_v15  ;;  %v13256_v23 = vor.u32 %v14912_v20, %v2795_v7  ;;  %v14916_v15 = vshll.u32 %v13230_v5, 16 }
 0x126   : > { %v1576_v61 = vor.u32 %v1575_v42, %v1572_v31  ;;  %v14907_v31 = vshrl.u32 %v13228_v28, 16  ;;  %v14908_v42 = vshrl.u32 %v13230_v5, 16  ;;  %v5264_v56 = vsel %vm5092_vm2, %v5259_v27, %v5263_v16  ;;  %v13265_v27 = vld [vmem:[#allocation3 + $0x40] sm:$0xff] }
 0x127   : > { %v2099_v34 = vsel %vm2094_vm1, %v2096_v14, %v2098_v25  ;;  %v14921_v20 = vshrl.u32 %v13265_v27, 16 }
 0x128   : > { %v1577_v44 = vsel %vm1281_vm0, %v1567_v21, %v1576_v61  ;;  %v2100_v21 = vrot.slane %v13216_v40, 7  ;;  %v13246_v61 = vld [vmem:[#allocation3 + $0x30] sm:$0xff]  ;;  %v2811_v14 = vrot.slane %v14908_v42, 7 }
 0x129   : > { %10743 = vmatmul.mubr.bf16.gmra.mrb[60].mxu1 %v1577_v44  ;;  %v14915_v44 = vshll.u32 %v13228_v28, 16  ;;  %v14918_v38 = vshrl.u32 %v13246_v61, 16 }
 0x12a   : > { %10762 = vmatprep.mubr.bf16.mxu1 %v2097_v30  ;;  %v2101_v13 = vsel %vm2094_vm1, %v2098_v25, %v2100_v21  ;;  %v5271_v30 = vrot.slane %v1501_v22, 1  ;;  %v12004_v25 = vld [vmem:[%s14878_s3 + $0x80] sm:$0xff]   ;;  %v14917_v22 = vshrl.u32 %v13252_v43, 16 }
 0x12c   : > { %11119 = vmatmul.mubr.bf16.gmra.mrb[36].mxu0 %v5256_v2  ;;  %v2803_v2 = vrot.slane %v14907_v31, 7  ;;  %v11968_v31 = vld [vmem:[%s14878_s3 + $0x90] sm:$0xff]   ;;  %v5275_v60 = vor.u32 %v5271_v30, %v15044_v51 }
 0x12d   : > { %11122 = vmatprep.mubr.bf16.mxu0 %v5264_v56  ;;  %v13275_v56 = vld [vmem:[#allocation3 + $0x48] sm:$0xff]  ;;  %v13303_v51 = vld [vmem:[#allocation3 + $0x50] sm:$0xff] }
 0x12e   : > { %v2806_v42 = vor.u32 %v14915_v44, %v2803_v2 }
 0x130   : > { %v13294_v29 = vsel %vm2771_vm3, %v2795_v7, %v2806_v42 }
 0x131   : > { %10763 = vmatmul.mubr.bf16.vlgmr.msra.gmra.mrb[0].mxu1 %v2099_v34  ;;  %v15042_v34 = vshll.u32 %v12979_v8, 16  ;;  %15045 = vst [vmem:[#allocation4_spill] sm:$0xff] %v13294_v29 }
 0x132   : > { %10827 = vmatpush3.bf16.msra.mxu1 %v12004_v25  ;;  %10766 = vmatprep.mubr.bf16.mxu1 %v2101_v13  ;;  %v2814_v25 = vor.u32 %v14916_v15, %v2811_v14  ;;  %v15043_v13 = vshrl.u32 %v12934_v11, 16  ;;  %v2819_v15 = vrot.slane %v14918_v38, 7 }
 0x133   : > { %v5279_v18 = vrot.slane %v15042_v34, 1  ;;  %10828 = vmatprep.subr.bf16.mxu1 %v11966_v4  ;;  %v14919_v34 = vshll.u32 %v13246_v61, 16 }
 0x134   : > { %v5267_v62 = vor.u32 %v5263_v16, %v15043_v13  ;;  %v13297_v44 = vsel %vm2771_vm3, %v2803_v2, %v2814_v25  ;;  %v2827_v16 = vrot.slane %v14917_v22, 7  ;;  %v15047_v13 = vld [vmem:[#allocation7_spill] sm:$0xff]  ;;  %v15049_v2 = vshll.u32 %v13006_v36, 16 }
 0x135   : > { %15046 = vst [vmem:[#allocation5_spill] sm:$0xff] %v13297_v44  ;;  %v15048_v46 = vrot.slane %v15047_v13, 7  ;;  %v5280_v7 = vsel %vm5092_vm2, %v5275_v60, %v5279_v18  ;;  %v14922_v13 = vshll.u32 %v13265_v27, 16  ;;  %v2835_v60 = vrot.slane %v14921_v20, 7 }
 0x136   : > { %v5272_v11 = vsel %vm5092_vm2, %v5267_v62, %v5271_v30  ;;  %10829 = vmatpush3.bf16.msra.mxu1 %v11966_v4  ;;  %v11970_v62 = vld [vmem:[%s14878_s3 + $0x98] sm:$0xff]   ;;  %v2822_v30 = vor.u32 %v14919_v34, %v2819_v15  ;;  %v5287_v25 = vrot.slane %v15049_v2, 1  ;;  %v15052_v2 = vld [vmem:[#allocation8_spill] sm:$0xff]  ;;  %v15054_v20 = vshll.u32 %v13039_v50, 16 }
 0x137   : > { %v2103_v42 = vsel %vm2094_vm1, %v2100_v21, %v15048_v46  ;;  %11123 = vmatmul.mubr.bf16.gmra.mrb[40].mxu0 %v5272_v11  ;;  %10830 = vmatprep.subr.bf16.mxu1 %v11968_v31  ;;  %v13314_v4 = vld [vmem:[#allocation3 + $0x58] sm:$0xff]  ;;  %v2830_v46 = vor.u32 %v14920_v33, %v2827_v16  ;;  %v14925_v21 = vshll.u32 %v13275_v56, 16  ;;  %v15059_v34 = vshrl.u32 %v13303_v51, 16 }
 0x138   : > { %11126 = vmatprep.mubr.bf16.mxu0 %v5280_v7  ;;  %v13328_v22 = vsel %vm2771_vm3, %v2811_v14, %v2822_v30  ;;  %v15051_v7 = vshrl.u32 %v13275_v56, 16  ;;  %v5295_v11 = vrot.slane %v15054_v20, 1  ;;  %v11973_v14 = vld [vmem:[%s14878_s3 + $0xa0] sm:$0xff]  }
 0x139   : > { %10767 = vmatmul.mubr.bf16.gmra.mrb[4].mxu1 %v2103_v42  ;;  %15050 = vst [vmem:[#allocation6_spill] sm:$0xff] %v13328_v22  ;;  %v13335_v33 = vsel %vm2771_vm3, %v2819_v15, %v2830_v46  ;;  %v2838_v42 = vor.u32 %v14922_v13, %v2835_v60  ;;  %v15057_v46 = vshrl.u32 %v13006_v36, 16  ;;  %v14924_v13 = vshll.u32 %v13303_v51, 16 }
 0x13a   : > { %v2843_v38 = vrot.slane %v15051_v7, 7  ;;  %10770 = vmatprep.mubr.bf16.mxu1 %v15052_v2  ;;  %10831 = vmatpush3.bf16.msra.mxu1 %v11968_v31  ;;  %15053 = vst [vmem:[#allocation12_spill] sm:$0xff] %v13335_v33  ;;  %v15055_v31 = vshrl.u32 %v12979_v8, 16  ;;  %v2851_v33 = vrot.slane %v15059_v34, 7  ;;  %v14923_v8 = vshll.u32 %v13314_v4, 16 }
 0x13b   : > { %10832 = vmatprep.subr.bf16.mxu1 %v11970_v62  ;;  %v13349_v15 = vsel %vm2771_vm3, %v2827_v16, %v2838_v42  ;;  %v5291_v2 = vor.u32 %v5287_v25, %v15057_v46  ;;  %v15063_v42 = vshll.u32 %v13066_v10, 16  ;;  %v15067_v46 = vshll.u32 %v13096_v17, 16 }
 0x13c   : > { %v2846_v30 = vor.u32 %v14925_v21, %v2843_v38  ;;  %v5283_v7 = vor.u32 %v5279_v18, %v15055_v31  ;;  %15056 = vst [vmem:[#allocation13_spill] sm:$0xff] %v13349_v15  ;;  %v15060_v18 = vshrl.u32 %v13314_v4, 16  ;;  %v2854_v34 = vor.u32 %v14924_v13, %v2851_v33  ;;  %v15065_v31 = vld [vmem:[#allocation10_spill] sm:$0xff]  ;;  %v13426_v21 = vld [vmem:[#allocation3 + $0xb8] sm:$0xff] }
 0x13d   : > { %v5296_v36 = vsel %vm5092_vm2, %v5291_v2, %v5295_v11  ;;  %v5311_v2 = vrot.slane %v15067_v46, 1 }
 0x13e   : > { %v13355_v20 = vsel %vm2771_vm3, %v2835_v60, %v2846_v30  ;;  %v5288_v22 = vsel %vm5092_vm2, %v5283_v7, %v5287_v25  ;;  %10833 = vmatpush3.bf16.msra.mxu1 %v11970_v62  ;;  %v13363_v16 = vrot.slane %v15060_v18, 7  ;;  %v11975_v60 = vld [vmem:[%s14878_s3 + $0xa8] sm:$0xff]   ;;  %v13378_v30 = vsel %vm2771_vm3, %v2843_v38, %v2854_v34  ;;  %v11977_v18 = vld [vmem:[%s14878_s3 + $0xb0] sm:$0xff]  }
 0x13f   : > { %15058 = vst [vmem:[#allocation14_spill] sm:$0xff] %v13355_v20  ;;  %11127 = vmatmul.mubr.bf16.gmra.mrb[44].mxu0 %v5288_v22  ;;  %10834 = vmatprep.subr.bf16.mxu1 %v11973_v14  ;;  %v15062_v25 = vld [vmem:[#allocation9_spill] sm:$0xff]  ;;  %v5303_v22 = vrot.slane %v15063_v42, 1  ;;  %15064 = vst [vmem:[#allocation8_spill] sm:$0xff] %v13378_v30  ;;  %v15069_v38 = vshrl.u32 %v13066_v10, 16  ;;  %v5333_v42 = vshll.u32 %v13172_v35, 16 }
 0x140   : > { %15061 = vst [vmem:[#allocation7_spill] sm:$0xff] %v13363_v16  ;;  %11130 = vmatprep.mubr.bf16.mxu0 %v5296_v36  ;;  %v2862_v62 = vor.u32 %v14923_v8, %v13363_v16  ;;  %v15068_v36 = vshrl.u32 %v13039_v50, 16  ;;  %v11979_v50 = vld [vmem:[%s14878_s3 + $0xb8] sm:$0xff]   ;;  %v15071_v10 = vshll.u32 %v13124_v32, 16  ;;  %v5337_v8 = vshrl.u32 %v13172_v35, 16 }
 0x141   : > { %10771 = vmatmul.mubr.bf16.gmra.mrb[8].mxu1 %v15062_v25  ;;  %v5307_v34 = vor.u32 %v5303_v22, %v15069_v38  ;;  %v15073_v38 = vld [vmem:[#allocation15_spill] sm:$0xff] }
 0x142   : > { %10774 = vmatprep.mubr.bf16.mxu1 %v15065_v31  ;;  %10835 = vmatpush3.bf16.msra.mxu1 %v11973_v14  ;;  %v13382_v7 = vsel %vm2771_vm3, %v2851_v33, %v2862_v62  ;;  %v5299_v25 = vor.u32 %v5295_v11, %v15068_v36  ;;  %v5074_v33 = vld [vmem:[#allocation3 + $0x110] sm:$0x1]  ;;  %v5341_v31 = vshll.u32 %v13184_v58, 16  ;;  %v15070_v11 = vld [vmem:[#allocation11_spill] sm:$0xff]  ;;  %v5319_v46 = vrot.slane %v15071_v10, 1 }
 0x143   : > { %15066 = vst [vmem:[#allocation9_spill] sm:$0xff] %v13382_v7  ;;  %10836 = vmatprep.subr.bf16.mxu1 %v11975_v60  ;;  %v5312_v62 = vsel %vm5092_vm2, %v5307_v34, %v5311_v2  ;;  %v15074_v34 = vshll.u32 %v13216_v40, 16  ;;  %v13418_v10 = vld [vmem:[#allocation3 + $0xb0] sm:$0xff]  ;;  %v5345_v7 = vshrl.u32 %v13184_v58, 16 }
 0x144   : > { %v5304_v14 = vsel %vm5092_vm2, %v5299_v25, %v5303_v22  ;;  %v15072_v22 = vshll.u32 %v13146_v12, 16  ;;  %v5349_v25 = vshll.u32 %v5074_v33, 16  ;;  %v5343_v13 = vrot.slane %v5341_v31, 1 }
 0x145   : > { %v14929_v58 = vshrl.u32 %v13418_v10, 16 }
 0x146   : > { %10837 = vmatpush3.bf16.msra.mxu1 %v11975_v60  ;;  %v5327_v36 = vrot.slane %v15072_v22, 1  ;;  %v5335_v60 = vrot.slane %v5333_v42, 1  ;;  %v15075_v42 = vshrl.u32 %v13096_v17, 16  ;;  %v15076_v22 = vshrl.u32 %v13124_v32, 16 }
 0x147   : > { %11131 = vmatmul.mubr.bf16.gmra.mrb[48].mxu0 %v5304_v14  ;;  %10838 = vmatprep.subr.bf16.mxu1 %v11977_v18  ;;  %v5969_v14 = vrot.slane %v15074_v34, 1  ;;  %v13424_v34 = vrot.slane %v5349_v25, 1  ;;  %v15078_v17 = vshrl.u32 %v13216_v40, 16  ;;  %v5347_v40 = vor.u32 %v5345_v7, %v5343_v13  ;;  %v13454_v7 = vld [vmem:[#allocation3 + $0xd8] sm:$0xff] }
 0x148   : > { %11134 = vmatprep.mubr.bf16.mxu0 %v5312_v62  ;;  %v13409_v62 = vld [vmem:[#allocation3 + $0xa8] sm:$0xff]  ;;  %v5315_v33 = vor.u32 %v5311_v2, %v15075_v42  ;;  %v5339_v31 = vor.u32 %v5337_v8, %v5335_v60  ;;  %v13438_v42 = vld [vmem:[#allocation3 + $0xc0] sm:$0xff] }
 0x149   : > { %10775 = vmatmul.mubr.bf16.gmra.mrb[12].mxu1 %v15070_v11  ;;  %v13414_v11 = vld [vmem:[%s14878_s3 + $0xc0] sm:$0xff]   ;;  %v13432_v2 = vor.u32 %v5969_v14, %v15078_v17  ;;  %v14928_v32 = vshrl.u32 %v13409_v62, 16  ;;  %v6880_v17 = vrot.slane %v13275_v56, 1  ;;  %v15087_v15 = vshrl.u32 %v13438_v42, 16 }
 0x14a   : > { %10778 = vmatprep.mubr.bf16.mxu1 %v15073_v38  ;;  %10839 = vmatpush3.bf16.msra.mxu1 %v11977_v18  ;;  %v5323_v38 = vor.u32 %v5319_v46, %v15076_v22  ;;  %v15077_v18 = vshrl.u32 %v13146_v12, 16  ;;  %v5320_v16 = vsel %vm5092_vm2, %v5315_v33, %v5319_v46  ;;  %v5344_v25 = vsel %vm5092_vm2, %v5339_v31, %v5343_v13  ;;  %v13442_v46 = vld [vmem:[#allocation3 + $0xc8] sm:$0xff]  ;;  %v15079_v14 = vld [vmem:[#allocation16_spill] sm:$0xff] }
 0x14b   : > { %10840 = vmatprep.subr.bf16.mxu1 %v11979_v50  ;;  %v14930_v33 = vshll.u32 %v13409_v62, 16  ;;  %v15080_v13 = vld [vmem:[#allocation17_spill] sm:$0xff]  ;;  %v2939_v31 = vrot.slane %v14928_v32, 7 }
 0x14c   : > { %v5331_v35 = vor.u32 %v5327_v36, %v15077_v18  ;;  %v5328_v12 = vsel %vm5092_vm2, %v5323_v38, %v5327_v36  ;;  %v6878_v36 = vrot.slane %v13265_v27, 1  ;;  %v2947_v38 = vrot.slane %v14929_v58, 7 }
 0x14d   : > { %v15085_v18 = vshll.u32 %v13418_v10, 16 }
 0x14e   : > { %10841 = vmatpush3.bf16.msra.mxu1 %v11979_v50  ;;  %v5336_v8 = vsel %vm5092_vm2, %v5331_v35, %v5335_v60  ;;  %v14931_v50 = vshrl.u32 %v13426_v21, 16  ;;  %v13448_v60 = vld [vmem:[#allocation3 + $0xd0] sm:$0xff]  ;;  %v13476_v22 = vsel %vm6868_vm4, %v6878_v36, %v6880_v17 }
 0x14f   : > { %11135 = vmatmul.mubr.bf16.gmra.mrb[52].mxu0 %v5320_v16  ;;  %10906 = vmatprep.subr.bf16.mxu1 %v13414_v11  ;;  %v14927_v16 = vrot.slane %v13252_v43, 1  ;;  %15083 = vst [vmem:[#allocation15_spill] sm:$0xff] %v13476_v22  ;;  %v2950_v30 = vor.u32 %v15085_v18, %v2947_v38  ;;  %v15086_v22 = vshll.u32 %v13426_v21, 16 }
 0x150   : > { %11138 = vmatprep.mubr.bf16.mxu0 %v5328_v12  ;;  %v2955_v32 = vrot.slane %v14931_v50, 7  ;;  %v13480_v12 = vld [vmem:[#allocation3 + $0xe0] sm:$0xff]  ;;  %v15090_v50 = vshrl.u32 %v13442_v46, 16 }
 0x151   : > { %10779 = vmatmul.mubr.bf16.gmra.mrb[16].mxu1 %v15079_v14  ;;  %v13460_v35 = vsel %vm6868_vm4, %v14927_v16, %v6878_v36  ;;  %v13473_v16 = vor.u32 %v14930_v33, %v2939_v31  ;;  %v13482_v14 = vld [vmem:[#allocation3 + $0xe8] sm:$0xff]  ;;  %v14932_v33 = vrot.slane %v13314_v4, 1  ;;  %v13503_v18 = vsel %vm2771_vm3, %v2939_v31, %v2950_v30  ;;  %v15093_v31 = vld [vmem:[#allocation18_spill] sm:$0xff] }
 0x152   : > { %10782 = vmatprep.mubr.bf16.mxu1 %v15080_v13  ;;  %15081 = vst [vmem:[#allocation10_spill] sm:$0xff] %v13460_v35  ;;  %v6882_v13 = vrot.slane %v13303_v51, 1  ;;  %v2958_v20 = vor.u32 %v15086_v22, %v2955_v32  ;;  %v2963_v35 = vrot.slane %v15087_v15, 7  ;;  %15088 = vst [vmem:[#allocation17_spill] sm:$0xff] %v13503_v18  ;;  %v2971_v44 = vrot.slane %v15090_v50, 7 }
 0x153   : > { %15082 = vst [vmem:[#allocation11_spill] sm:$0xff] %v13473_v16  ;;  %v13491_v16 = vld [vmem:[#allocation3 + $0xf0] sm:$0xff]  ;;  %v15096_v15 = vshrl.u32 %v13454_v7, 16 }
 0x154   : > { %v13486_v58 = vsel %vm6868_vm4, %v6880_v17, %v6882_v13  ;;  %v13499_v17 = vld [vmem:[#allocation3 + $0xf8] sm:$0xff]  ;;  %v13508_v36 = vsel %vm6868_vm4, %v6882_v13, %v14932_v33  ;;  %v13521_v13 = vld [vmem:[#allocation3 + $0x100] sm:$0xff]  ;;  %v15094_v33 = vshll.u32 %v13442_v46, 16 }
 0x155   : > { %15084 = vst [vmem:[#allocation16_spill] sm:$0xff] %v13486_v58  ;;  %15089 = vst [vmem:[#allocation19_spill] sm:$0xff] %v13508_v36  ;;  %v15092_v58 = vshll.u32 %v13438_v42, 16  ;;  %v2987_v36 = vrot.slane %v15096_v15, 7  ;;  %v15100_v15 = vshll.u32 %v13448_v60, 16 }
 0x156   : > { %v2974_v50 = vor.u32 %v15094_v33, %v2971_v44  ;;  %v15107_v33 = vshrl.u32 %v13499_v17, 16 }
 0x157   : > { %11139 = vmatmul.mubr.bf16.gmra.mrb[56].mxu0 %v5336_v8  ;;  %v13515_v8 = vsel %vm2771_vm3, %v2947_v38, %v2958_v20  ;;  %v2966_v30 = vor.u32 %v15092_v58, %v2963_v35  ;;  %v5352_v20 = vsel %vm5092_vm2, %v5347_v40, %v13424_v34  ;;  %v15097_v58 = vshll.u32 %v13228_v28, 16 }
 0x158   : > { %11142 = vmatprep.mubr.bf16.mxu0 %v5344_v25  ;;  %15091 = vst [vmem:[#allocation20_spill] sm:$0xff] %v13515_v8  ;;  %v15095_v25 = vshrl.u32 %v13448_v60, 16  ;;  %v14933_v34 = vshll.u32 %v13499_v17, 16  ;;  %v15105_v40 = vshll.u32 %v13480_v12, 16 }
 0x159   : > { %10783 = vmatmul.mubr.bf16.gmra.mrb[20].mxu1 %v15093_v31  ;;  %v5974_v38 = vrot.slane %v15097_v58, 1  ;;  %v13536_v18 = vsel %vm2771_vm3, %v2955_v32, %v2966_v30  ;;  %v15102_v58 = vshrl.u32 %v13480_v12, 16  ;;  %v15103_v32 = vshrl.u32 %v13482_v14, 16 }
 0x15a   : > { %v2979_v22 = vrot.slane %v15095_v25, 7  ;;  %10786 = vmatprep.mubr.bf16.mxu1 %v12848_v39  ;;  %15098 = vst [vmem:[#allocation18_spill] sm:$0xff] %v13536_v18  ;;  %v13540_v25 = vsel %vm2771_vm3, %v2963_v35, %v2974_v50  ;;  %v15101_v39 = vshll.u32 %v13454_v7, 16  ;;  %v3019_v18 = vrot.slane %v15107_v33, 7 }
 0x15b   : > { %15099 = vst [vmem:[#allocation21_spill] sm:$0xff] %v13540_v25  ;;  %v2995_v31 = vrot.slane %v15102_v58, 7  ;;  %v3003_v30 = vrot.slane %v15103_v32, 7  ;;  %v15106_v58 = vshll.u32 %v13482_v14, 16 }
 0x15c   : > { %v2982_v8 = vor.u32 %v15100_v15, %v2979_v22  ;;  %v2990_v29 = vor.u32 %v15101_v39, %v2987_v36  ;;  %v15104_v15 = vshrl.u32 %v13491_v16, 16 }
 0x15d   : > { %v2998_v25 = vor.u32 %v15105_v40, %v2995_v31  ;;  %v3006_v32 = vor.u32 %v15106_v58, %v3003_v30  ;;  %v3022_v58 = vor.u32 %v14933_v34, %v3019_v18 }
 0x15e   : > { %v13554_v35 = vsel %vm2771_vm3, %v2971_v44, %v2982_v8  ;;  %v13557_v50 = vsel %vm2771_vm3, %v2979_v22, %v2990_v29  ;;  %v3011_v39 = vrot.slane %v15104_v15, 7  ;;  %v5975_v29 = vsel %vm5092_vm2, %v13432_v2, %v5974_v38 }
 0x15f   : > { %11143 = vmatmul.mubr.bf16.gmra.mrb[60].mxu0 %v5352_v20  ;;  %v15108_v22 = vshll.u32 %v13491_v16, 16  ;;  %v13574_v15 = vsel %vm2771_vm3, %v2987_v36, %v2998_v25  ;;  %v13577_v40 = vsel %vm2771_vm3, %v2995_v31, %v3006_v32  ;;  %v15109_v20 = vshrl.u32 %v13521_v13, 16  ;;  %v11989_v36 = vld [vmem:[%s12158_s26 + $0x18] sm:$0xff]  }
 0x160   : > { %11162 = vmatprep.mubr.bf16.mxu0 %v5975_v29  ;;  %v15110_v2 = vshll.u32 %v13230_v5, 16  ;;  %v13592_v31 = vsel %vm2771_vm3, %v3011_v39, %v3022_v58  ;;  %v15111_v25 = vshll.u32 %v13521_v13, 16  ;;  %v15112_v29 = vshll.u32 %v13246_v61, 16  ;;  %385 = vst [vmem:[#allocation3 + $0x118] sm:$0xff] %v11989_v36 }
 0x161   : > { %v3014_v8 = vor.u32 %v15108_v22, %v3011_v39  ;;  %v3027_v33 = vrot.slane %v15109_v20, 7  ;;  %10787 = vmatmul.mubr.bf16.gmra.mrb[24].mxu1 %v12853_v53  ;;  %v15113_v53 = vshrl.u32 %v13228_v28, 16  ;;  %v11976_v39 = vld [vmem:[%s14878_s3 + $0x1c8] sm:$0xff]   ;;  %v15117_v36 = vshrl.u32 %v13246_v61, 16 }
 0x162   : > { %v5982_v44 = vrot.slane %v15110_v2, 1  ;;  %10790 = vmatprep.mubr.bf16.mxu1 %v12894_v52  ;;  %v5990_v20 = vrot.slane %v15112_v29, 1 }
 0x163   : > { %v13587_v22 = vsel %vm2771_vm3, %v3003_v30, %v3014_v8  ;;  %v3030_v32 = vor.u32 %v15111_v25, %v3027_v33  ;;  %v5978_v34 = vor.u32 %v15113_v53, %v5974_v38  ;;  %v15114_v30 = vshrl.u32 %v13230_v5, 16  ;;  %v11978_v33 = vld [vmem:[%s14878_s3 + $0x1d0] sm:$0xff]  }
 0x164   : > { %v5994_v25 = vor.u32 %v15117_v36, %v5990_v20 }
 0x165   : > { %v13601_v2 = vsel %vm2771_vm3, %v3019_v18, %v3030_v32  ;;  %v5986_v52 = vor.u32 %v15114_v30, %v5982_v44  ;;  %v5983_v8 = vsel %vm5092_vm2, %v5978_v34, %v5982_v44  ;;  %v15115_v18 = vshll.u32 %v13252_v43, 16  ;;  %v11980_v32 = vld [vmem:[%s14878_s3 + $0x1d8] sm:$0xff]   ;;  %v11982_v30 = vld [vmem:[%s14878_s3 + $0x1e0] sm:$0xff]  }
 0x166   : > { %v15116_v34 = vshll.u32 %v13265_v27, 16 }
 0x167   : > { %11163 = vmatmul.mubr.bf16.vlgmr.msra.gmra.mrb[0].mxu0 %v5983_v8  ;;  %v5991_v58 = vsel %vm5092_vm2, %v5986_v52, %v5990_v20  ;;  %v5998_v38 = vrot.slane %v15115_v18, 1  ;;  %v15119_v20 = vshll.u32 %v13275_v56, 16  ;;  %v13636_v52 = vld [vmem:[#allocation3 + $0x108] sm:$0xff] }
 0x168   : > { %11166 = vmatprep.mubr.bf16.mxu0 %v5991_v58  ;;  %11227 = vmatpush3.bf16.msra.mxu0 %v13028_v41  ;;  %v6006_v44 = vrot.slane %v15116_v34, 1  ;;  %v15118_v41 = vshrl.u32 %v13252_v43, 16  ;;  %v15121_v58 = vshrl.u32 %v13265_v27, 16  ;;  %v11984_v34 = vld [vmem:[%s14878_s3 + $0x1e8] sm:$0xff]   ;;  %v6928_v36 = vrot.slane %v13636_v52, 1 }
 0x169   : > { %10791 = vmatmul.mubr.bf16.gmra.mrb[28].mxu1 %v13023_v3  ;;  %11228 = vmatprep.subr.bf16.mxu0 %v11976_v39  ;;  %v5999_v29 = vsel %vm5092_vm2, %v5994_v25, %v5998_v38  ;;  %v6014_v53 = vrot.slane %v15119_v20, 1  ;;  %v15125_v20 = vshrl.u32 %v13303_v51, 16 }
 0x16a   : > { %10794 = vmatprep.mubr.bf16.mxu1 %v13052_v47  ;;  %v6002_v3 = vor.u32 %v15118_v41, %v5998_v38  ;;  %v6010_v18 = vor.u32 %v15121_v58, %v6006_v44  ;;  %v15122_v38 = vshrl.u32 %v13275_v56, 16 }
 0x16c   : > { %11229 = vmatpush3.bf16.msra.mxu0 %v11976_v39  ;;  %v6007_v47 = vsel %vm5092_vm2, %v6002_v3, %v6006_v44  ;;  %v15120_v39 = vshll.u32 %v13303_v51, 16  ;;  %v6015_v25 = vsel %vm5092_vm2, %v6010_v18, %v6014_v53  ;;  %v15123_v44 = vrot.slane %v13165_v37, 7 }
 0x16d   : > { %11230 = vmatprep.subr.bf16.mxu0 %v11978_v33  ;;  %v15124_v3 = vshll.u32 %v13314_v4, 16  ;;  %v15126_v37 = vshrl.u32 %v13314_v4, 16 }
 0x16e   : > { %v6022_v8 = vrot.slane %v15120_v39, 1  ;;  %v11988_v39 = vld [vmem:[%s14878_s3 + $0x1f8] sm:$0xff]  }
 0x16f   : > { %11167 = vmatmul.mubr.bf16.gmra.mrb[4].mxu0 %v5999_v29  ;;  %v11986_v29 = vld [vmem:[%s14878_s3 + $0x1f0] sm:$0xff]  }
 0x170   : > { %11170 = vmatprep.mubr.bf16.mxu0 %v6007_v47  ;;  %11231 = vmatpush3.bf16.msra.mxu0 %v11978_v33  ;;  %v6018_v33 = vor.u32 %v15122_v38, %v6014_v53  ;;  %v2138_v47 = vrot.slane %v13418_v10, 7  ;;  %v6026_v53 = vor.u32 %v15125_v20, %v6022_v8  ;;  %v13685_v38 = vld [vmem:[%s14878_s3 + $0x200] sm:$0xff]  }
 0x171   : > { %10795 = vmatmul.mubr.bf16.gmra.mrb[32].mxu1 %v13122_v54  ;;  %11232 = vmatprep.subr.bf16.mxu0 %v11980_v32  ;;  %v2136_v54 = vrot.slane %v13409_v62, 7 }
 0x172   : > { %10798 = vmatprep.mubr.bf16.mxu1 %v13136_v57  ;;  %v6926_v57 = vrot.slane %v13521_v13, 1  ;;  %v6023_v27 = vsel %vm5092_vm2, %v6018_v33, %v6022_v8  ;;  %v2142_v33 = vrot.slane %v13438_v42, 7 }
 0x173   : > { %v2137_v41 = vsel %vm2094_vm1, %v15123_v44, %v2136_v54  ;;  %v2139_v51 = vsel %vm2094_vm1, %v2136_v54, %v2138_v47 }
 0x174   : > { %11233 = vmatpush3.bf16.msra.mxu0 %v11980_v32  ;;  %v13657_v56 = vsel %vm6868_vm4, %v6926_v57, %v6928_v36  ;;  %v6030_v32 = vrot.slane %v15124_v3, 1 }
 0x175   : > { %11234 = vmatprep.subr.bf16.mxu0 %v11982_v30 }
 0x176   : > { %v6031_v58 = vsel %vm5092_vm2, %v6026_v53, %v6030_v32 }
 0x177   : > { %11171 = vmatmul.mubr.bf16.gmra.mrb[8].mxu0 %v6015_v25  ;;  %v2146_v25 = vrot.slane %v13448_v60, 7 }
 0x178   : > { %11174 = vmatprep.mubr.bf16.mxu0 %v6023_v27  ;;  %11235 = vmatpush3.bf16.msra.mxu0 %v11982_v30  ;;  %v6034_v30 = vor.u32 %v15126_v37, %v6030_v32  ;;  %v2148_v27 = vrot.slane %v13454_v7, 7  ;;  %v2721_v32 = vld [vmem:[#allocation3] sm:$0x80]  ;;  %v15127_v37 = vshll.u32 %v13409_v62, 16 }
 0x179   : > { %10799 = vmatmul.mubr.bf16.gmra.mrb[36].mxu1 %v13193_v55  ;;  %11236 = vmatprep.subr.bf16.mxu0 %v11984_v34  ;;  %v2140_v55 = vrot.slane %v13426_v21, 7  ;;  %v2773_v20 = vshrl.u32 %v2721_v32, 16 }
 0x17a   : > { %10802 = vmatprep.mubr.bf16.mxu1 %v2137_v41  ;;  %v6039_v18 = vsel %vm5092_vm2, %v6034_v30, %v12988_v19  ;;  %v2152_v41 = vrot.slane %v13482_v14, 7  ;;  %v6110_v30 = vrot.slane %v15127_v37, 1  ;;  %v15136_v37 = vshrl.u32 %v13438_v42, 16 }
 0x17b   : > { %v2141_v8 = vsel %vm2094_vm1, %v2138_v47, %v2140_v55  ;;  %v2143_v19 = vsel %vm2094_vm1, %v2140_v55, %v2142_v33  ;;  %v2777_v47 = vshrl.u32 %v13206_v24, 16  ;;  %v2043_v55 = vld [vmem:[#allocation3 + $0x100] sm:$0x7f] }
 0x17c   : > { %11237 = vmatpush3.bf16.msra.mxu0 %v11984_v34  ;;  %v2144_v34 = vrot.slane %v13442_v46, 7 }
 0x17d   : > { %11238 = vmatprep.subr.bf16.mxu0 %v11986_v29 }
 0x17e   : > { %v2145_v54 = vsel %vm2094_vm1, %v2142_v33, %v2144_v34  ;;  %v2147_v44 = vsel %vm2094_vm1, %v2144_v34, %v2146_v25  ;;  %v15129_v33 = vshrl.u32 %v13409_v62, 16  ;;  %v6111_v34 = vsel %vm5092_vm2, %v13208_v48, %v6110_v30 }
 0x17f   : > { %11175 = vmatmul.mubr.bf16.gmra.mrb[12].mxu0 %v6031_v58  ;;  %v15128_v58 = vshll.u32 %v13418_v10, 16  ;;  %v2788_v62 = vshll.u32 %v13223_v9, 16 }
 0x180   : > { %11178 = vmatprep.mubr.bf16.mxu0 %v6039_v18  ;;  %11239 = vmatpush3.bf16.msra.mxu0 %v11986_v29  ;;  %v2156_v29 = vrot.slane %v13499_v17, 7 }
 0x181   : > { %10803 = vmatmul.mubr.bf16.gmra.mrb[40].mxu1 %v2139_v51  ;;  %11240 = vmatprep.subr.bf16.mxu0 %v11988_v39  ;;  %v6118_v18 = vrot.slane %v15128_v58, 1 }
 0x182   : > { %10806 = vmatprep.mubr.bf16.mxu1 %v2141_v8  ;;  %v2158_v8 = vrot.slane %v2043_v55, 7  ;;  %v11985_v55 = vld [vmem:[%s14878_s3 + $0xd0] sm:$0xff]  }
 0x184   : > { %11241 = vmatpush3.bf16.msra.mxu0 %v11988_v39  ;;  %v2779_v39 = vrot.slane %v2777_v47, 7 }
 0x185   : > { %11306 = vmatprep.subr.bf16.mxu0 %v13685_v38 }
 0x187   : > { %11179 = vmatmul.mubr.bf16.gmra.mrb[16].mxu0 %v13063_v6  ;;  %v2149_v6 = vsel %vm2094_vm1, %v2146_v25, %v2148_v27  ;;  %v2159_v25 = vsel %vm2094_vm1, %v2156_v29, %v2158_v8  ;;  %v15140_v8 = vld [vmem:[#allocation5_spill] sm:$0xff] }
 0x188   : > { %11182 = vmatprep.mubr.bf16.mxu0 %v13093_v45  ;;  %v2150_v45 = vrot.slane %v13480_v12, 7 }
 0x189   : > { %10807 = vmatmul.mubr.bf16.gmra.mrb[44].mxu1 %v2143_v19 }
 0x18a   : > { %10810 = vmatprep.mubr.bf16.mxu1 %v2145_v54  ;;  %v2151_v3 = vsel %vm2094_vm1, %v2148_v27, %v2150_v45 }
 0x18f   : > { %11183 = vmatmul.mubr.bf16.gmra.mrb[20].mxu0 %v13115_v26  ;;  %v2153_v26 = vsel %vm2094_vm1, %v2150_v45, %v2152_v41  ;;  %v15131_v45 = vshll.u32 %v13438_v42, 16  ;;  %v15139_v42 = vshll.u32 %v13454_v7, 16 }
 0x190   : > { %11186 = vmatprep.mubr.bf16.mxu0 %v13153_v1  ;;  %v2154_v1 = vrot.slane %v13491_v16, 7 }
 0x191   : > { %10811 = vmatmul.mubr.bf16.gmra.mrb[48].mxu1 %v2147_v44  ;;  %v15130_v44 = vshll.u32 %v13426_v21, 16 }
 0x192   : > { %10814 = vmatprep.mubr.bf16.mxu1 %v2149_v6  ;;  %v2155_v53 = vsel %vm2094_vm1, %v2152_v41, %v2154_v1  ;;  %v6134_v41 = vrot.slane %v15131_v45, 1  ;;  %v15146_v45 = vld [vmem:[#allocation12_spill] sm:$0xff] }
 0x193   : > { %v6126_v6 = vrot.slane %v15130_v44, 1  ;;  %v11992_v44 = vld [vmem:[%s14878_s3 + $0xe8] sm:$0xff]  }
 0x197   : > { %11187 = vmatmul.mubr.bf16.gmra.mrb[24].mxu0 %v13169_v59  ;;  %v2780_v59 = vshll.u32 %v13206_v24, 16  ;;  %v2785_v24 = vshrl.u32 %v13223_v9, 16 }
 0x198   : > { %11190 = vmatprep.mubr.bf16.mxu0 %v13197_v49  ;;  %v2157_v49 = vsel %vm2094_vm1, %v2154_v1, %v2156_v29  ;;  %v15133_v1 = vshrl.u32 %v13426_v21, 16 }
 0x199   : > { %10815 = vmatmul.mubr.bf16.gmra.mrb[52].mxu1 %v2151_v3  ;;  %v2782_v51 = vor.u32 %v2780_v59, %v2779_v39  ;;  %v2787_v27 = vrot.slane %v2785_v24, 7  ;;  %v15132_v3 = vshrl.u32 %v13418_v10, 16  ;;  %v15134_v59 = vshll.u32 %v13442_v46, 16 }
 0x19a   : > { %10818 = vmatprep.mubr.bf16.mxu1 %v2153_v26  ;;  %v6130_v32 = vor.u32 %v15133_v1, %v6126_v6  ;;  %v15149_v1 = vshrl.u32 %v13482_v14, 16 }
 0x19b   : > { %v2790_v48 = vor.u32 %v2788_v62, %v2787_v27  ;;  %v6122_v26 = vor.u32 %v15132_v3, %v6118_v18  ;;  %v2799_v10 = vsel %vm2771_vm3, %v2787_v27, %v13256_v23  ;;  %v6142_v21 = vrot.slane %v15134_v59, 1  ;;  %v15152_v59 = vld [vmem:[#allocation14_spill] sm:$0xff] }
 0x19c   : > { %v6135_v47 = vsel %vm5092_vm2, %v6130_v32, %v6134_v41  ;;  %v15148_v3 = vshrl.u32 %v13480_v12, 16 }
 0x19d   : > { %v6127_v29 = vsel %vm5092_vm2, %v6122_v26, %v6126_v6  ;;  %v2791_v9 = vsel %vm2771_vm3, %v2779_v39, %v2790_v48  ;;  %v15137_v39 = vshrl.u32 %v13442_v46, 16  ;;  %v15141_v46 = vshll.u32 %v13480_v12, 16  ;;  %v15144_v6 = vld [vmem:[#allocation6_spill] sm:$0xff] }
 0x19e   : > { %v11994_v48 = vld [vmem:[%s14878_s3 + $0xf0] sm:$0xff]   ;;  %v15151_v12 = vshll.u32 %v13499_v17, 16 }
 0x19f   : > { %11191 = vmatmul.mubr.bf16.gmra.mrb[28].mxu0 %v13201_v0  ;;  %v2775_v0 = vrot.slane %v2773_v20, 7  ;;  %v11983_v20 = vld [vmem:[%s14878_s3 + $0xc8] sm:$0xff]   ;;  %v6146_v23 = vor.u32 %v15137_v39, %v6142_v21  ;;  %v6166_v24 = vrot.slane %v15141_v46, 1 }
 0x1a0   : > { %11194 = vmatprep.mubr.bf16.mxu0 %v13214_v63  ;;  %v6114_v63 = vor.u32 %v15129_v33, %v6110_v30  ;;  %v6138_v30 = vor.u32 %v15136_v37, %v6134_v41  ;;  %v11990_v33 = vld [vmem:[%s14878_s3 + $0xe0] sm:$0xff]   ;;  %v6204_v37 = vshll.u32 %v13636_v52, 16 }
 0x1a1   : > { %10819 = vmatmul.mubr.bf16.gmra.mrb[56].mxu1 %v2155_v53  ;;  %v2783_v54 = vsel %vm2771_vm3, %v2775_v0, %v2782_v51  ;;  %v15135_v53 = vshll.u32 %v13448_v60, 16  ;;  %v15138_v0 = vld [vmem:[#allocation4_spill] sm:$0xff]  ;;  %v6158_v51 = vrot.slane %v15139_v42, 1  ;;  %v6170_v26 = vor.u32 %v15148_v3, %v6166_v24 }
 0x1a2   : > { %10822 = vmatprep.mubr.bf16.mxu1 %v2157_v49  ;;  %v6119_v19 = vsel %vm5092_vm2, %v6114_v63, %v6118_v18  ;;  %v6143_v58 = vsel %vm5092_vm2, %v6138_v30, %v6142_v21  ;;  %v11987_v18 = vld [vmem:[%s14878_s3 + $0xd8] sm:$0xff]   ;;  %v15142_v63 = vshrl.u32 %v13448_v60, 16  ;;  %v15145_v60 = vshll.u32 %v13482_v14, 16  ;;  %v13802_v21 = vld [vmem:[#allocation3 + $0x68] sm:$0xff] }
 0x1a3   : > { %v6150_v49 = vrot.slane %v15135_v53, 1  ;;  %v6190_v14 = vrot.slane %v15151_v12, 1  ;;  %v15153_v53 = vshll.u32 %v13521_v13, 16  ;;  %v15154_v30 = vshrl.u32 %v13491_v16, 16 }
 0x1a4   : > { %v6174_v62 = vrot.slane %v15145_v60, 1 }
 0x1a6   : > { %v6178_v32 = vor.u32 %v15149_v1, %v6174_v62 }
 0x1a7   : > { %11195 = vmatmul.mubr.bf16.gmra.mrb[32].mxu0 %v6111_v34  ;;  %v6154_v34 = vor.u32 %v15142_v63, %v6150_v49  ;;  %v6208_v63 = vshrl.u32 %v13636_v52, 16 }
 0x1a8   : > { %11198 = vmatprep.mubr.bf16.mxu0 %v6119_v19  ;;  %v15143_v19 = vshrl.u32 %v13454_v7, 16  ;;  %v15147_v7 = vshll.u32 %v13491_v16, 16  ;;  %v13818_v16 = vld [vmem:[%s14878_s3 + $0x100] sm:$0xff]  }
 0x1a9   : > { %10823 = vmatmul.mubr.bf16.gmra.mrb[60].mxu1 %v2159_v25  ;;  %v6159_v25 = vsel %vm5092_vm2, %v6154_v34, %v6158_v51  ;;  %v13824_v34 = vld [vmem:[#allocation3 + $0x70] sm:$0xff] }
 0x1aa   : > { %10842 = vmatprep.mubr.bf16.mxu1 %v2783_v54  ;;  %v6162_v54 = vor.u32 %v15143_v19, %v6158_v51  ;;  %v6182_v41 = vrot.slane %v15147_v7, 1  ;;  %v6206_v51 = vrot.slane %v6204_v37, 1  ;;  %v5946_v19 = vld [vmem:[#allocation3 + $0x118] sm:$0x1]  ;;  %v2881_v7 = vshrl.u32 %v13824_v34, 16  ;;  %v13848_v37 = vld [vmem:[#allocation3 + $0x88] sm:$0xff] }
 0x1ac   : > { %v6167_v27 = vsel %vm5092_vm2, %v6162_v54, %v6166_v24  ;;  %v6186_v39 = vor.u32 %v15154_v30, %v6182_v41  ;;  %v15157_v54 = vld [vmem:[#allocation9_spill] sm:$0xff] }
 0x1af   : > { %11199 = vmatmul.mubr.bf16.gmra.mrb[36].mxu0 %v6127_v29  ;;  %v6175_v29 = vsel %vm5092_vm2, %v6170_v26, %v6174_v62  ;;  %v15158_v62 = vshrl.u32 %v13521_v13, 16 }
 0x1b0   : > { %11202 = vmatprep.mubr.bf16.mxu0 %v6135_v47  ;;  %v6183_v47 = vsel %vm5092_vm2, %v6178_v32, %v6182_v41 }
 0x1b1   : > { %10843 = vmatmul.mubr.bf16.vlgmr.msra.gmra.mrb[0].mxu1 %v2791_v9  ;;  %v13796_v9 = vld [vmem:[#allocation3 + $0x60] sm:$0xff] }
 0x1b2   : > { %10907 = vmatpush3.bf16.msra.mxu1 %v13414_v11  ;;  %10846 = vmatprep.mubr.bf16.mxu1 %v2799_v10  ;;  %v6151_v11 = vsel %vm5092_vm2, %v6146_v23, %v6150_v49  ;;  %v15150_v10 = vld [vmem:[#allocation13_spill] sm:$0xff]  ;;  %v6198_v49 = vrot.slane %v15153_v53, 1  ;;  %v15155_v23 = vshrl.u32 %v13499_v17, 16  ;;  %v15156_v17 = vld [vmem:[#allocation8_spill] sm:$0xff]  ;;  %v2868_v24 = vshll.u32 %v13796_v9, 16 }
 0x1b3   : > { %10908 = vmatprep.subr.bf16.mxu1 %v11983_v20  ;;  %v13844_v53 = vld [vmem:[#allocation3 + $0x80] sm:$0xff] }
 0x1b6   : > { %10909 = vmatpush3.bf16.msra.mxu1 %v11983_v20  ;;  %v11996_v20 = vld [vmem:[%s14878_s3 + $0xf8] sm:$0xff]  }
 0x1b7   : > { %11203 = vmatmul.mubr.bf16.gmra.mrb[40].mxu0 %v6143_v58  ;;  %10910 = vmatprep.subr.bf16.mxu1 %v11985_v55  ;;  %v6194_v58 = vor.u32 %v15155_v23, %v6190_v14 }
 0x1b8   : > { %11206 = vmatprep.mubr.bf16.mxu0 %v6151_v11  ;;  %v2873_v11 = vshrl.u32 %v13802_v21, 16 }
 0x1b9   : > { %10847 = vmatmul.mubr.bf16.gmra.mrb[4].mxu1 %v15138_v0  ;;  %v6199_v0 = vsel %vm5092_vm2, %v6194_v58, %v6198_v49 }
 0x1ba   : > { %10850 = vmatprep.mubr.bf16.mxu1 %v15140_v8  ;;  %10911 = vmatpush3.bf16.msra.mxu1 %v11985_v55  ;;  %v2865_v55 = vshrl.u32 %v13796_v9, 16  ;;  %v12005_v8 = vld [vmem:[#allocation3 + $0x110] sm:$0xff] }
 0x1bb   : > { %10912 = vmatprep.subr.bf16.mxu1 %v11987_v18  ;;  %v6212_v46 = vshll.u32 %v12005_v8, 16  ;;  %v6216_v41 = vshrl.u32 %v12005_v8, 16 }
 0x1bc   : > { %v2867_v42 = vrot.slane %v2865_v55, 7  ;;  %v6785_v55 = vld [vmem:[#allocation3 + $0x18] sm:$0xfe] }
 0x1bd   : > { %v6214_v60 = vrot.slane %v6212_v46, 1 }
 0x1be   : > { %10913 = vmatpush3.bf16.msra.mxu1 %v11987_v18  ;;  %v6191_v18 = vsel %vm5092_vm2, %v6186_v39, %v6190_v14  ;;  %v6870_v39 = vrot.slane %v13228_v28, 1 }
 0x1bf   : > { %11207 = vmatmul.mubr.bf16.gmra.mrb[44].mxu0 %v6159_v25  ;;  %10914 = vmatprep.subr.bf16.mxu1 %v11990_v33  ;;  %v13827_v25 = vld [vmem:[#allocation3 + $0x78] sm:$0xff] }
 0x1c0   : > { %11210 = vmatprep.mubr.bf16.mxu0 %v6167_v27  ;;  %v13829_v27 = vor.u32 %v2868_v24, %v2867_v42  ;;  %v2889_v26 = vshrl.u32 %v13827_v25, 16  ;;  %v2892_v30 = vshll.u32 %v13827_v25, 16  ;;  %v13863_v24 = vld [vmem:[#allocation3 + $0x90] sm:$0xff] }
 0x1c1   : > { %10851 = vmatmul.mubr.bf16.gmra.mrb[8].mxu1 %v15144_v6  ;;  %v6210_v6 = vor.u32 %v6208_v63, %v6206_v51  ;;  %v2900_v63 = vshll.u32 %v13844_v53, 16 }
 0x1c2   : > { %10854 = vmatprep.mubr.bf16.mxu1 %v15146_v45  ;;  %10915 = vmatpush3.bf16.msra.mxu1 %v11990_v33  ;;  %v2875_v33 = vrot.slane %v2873_v11, 7  ;;  %v6202_v45 = vor.u32 %v15158_v62, %v6198_v49  ;;  %v2884_v49 = vshll.u32 %v13824_v34, 16  ;;  %v2897_v11 = vshrl.u32 %v13844_v53, 16 }
 0x1c3   : > { %10916 = vmatprep.subr.bf16.mxu1 %v11992_v44  ;;  %v6215_v32 = vsel %vm5092_vm2, %v6210_v6, %v6214_v60 }
 0x1c4   : > { %v6207_v1 = vsel %vm5092_vm2, %v6202_v45, %v6206_v51  ;;  %v2899_v46 = vrot.slane %v2897_v11, 7 }
 0x1c6   : > { %10917 = vmatpush3.bf16.msra.mxu1 %v11992_v44  ;;  %v2876_v44 = vshll.u32 %v13802_v21, 16  ;;  %v2902_v6 = vor.u32 %v2900_v63, %v2899_v46  ;;  %v12000_v63 = vld [vmem:[%s14878_s3 + $0x230] sm:$0xff]  }
 0x1c7   : > { %11211 = vmatmul.mubr.bf16.gmra.mrb[48].mxu0 %v6175_v29  ;;  %10918 = vmatprep.subr.bf16.mxu1 %v11994_v48  ;;  %v15159_v29 = vld [vmem:[#allocation7_spill] sm:$0xff] }
 0x1c8   : > { %11214 = vmatprep.mubr.bf16.mxu0 %v6183_v47  ;;  %v2878_v3 = vor.u32 %v2876_v44, %v2875_v33  ;;  %v2871_v47 = vsel %vm2771_vm3, %v15159_v29, %v13829_v27  ;;  %v6874_v44 = vrot.slane %v13246_v61, 1  ;;  %v2916_v29 = vshll.u32 %v13863_v24, 16 }
 0x1c9   : > { %10855 = vmatmul.mubr.bf16.gmra.mrb[12].mxu1 %v15150_v10  ;;  %v6218_v10 = vor.u32 %v6216_v41, %v6214_v60  ;;  %v2913_v60 = vshrl.u32 %v13863_v24, 16 }
 0x1ca   : > { %10858 = vmatprep.mubr.bf16.mxu1 %v15152_v59  ;;  %10919 = vmatpush3.bf16.msra.mxu1 %v11994_v48  ;;  %v6220_v48 = vshll.u32 %v5946_v19, 16  ;;  %v13842_v14 = vsel %vm2771_vm3, %v2867_v42, %v2878_v3  ;;  %v2891_v59 = vrot.slane %v2889_v26, 7  ;;  %v2905_v42 = vshrl.u32 %v13848_v37, 16 }
 0x1cb   : > { %10920 = vmatprep.subr.bf16.mxu1 %v11996_v20  ;;  %v6872_v19 = vrot.slane %v13230_v5, 1  ;;  %v2915_v61 = vrot.slane %v2913_v60, 7 }
 0x1cc   : > { %v6222_v12 = vrot.slane %v6220_v48, 1  ;;  %v13880_v48 = vsel %vm2771_vm3, %v2891_v59, %v2902_v6  ;;  %v15166_v6 = vrot.slane %v13314_v4, 1  ;;  %v15169_v4 = vld [vmem:[#allocation18_spill] sm:$0xff] }
 0x1cd   : > { %v6873_v41 = vsel %vm6868_vm4, %v6870_v39, %v6872_v19  ;;  %v6875_v5 = vsel %vm6868_vm4, %v6872_v19, %v6874_v44  ;;  %v6886_v19 = vrot.slane %v13796_v9, 1  ;;  %v6888_v9 = vrot.slane %v13802_v21, 1 }
 0x1ce   : > { %10921 = vmatpush3.bf16.msra.mxu1 %v11996_v20  ;;  %v2883_v20 = vrot.slane %v2881_v7, 7  ;;  %v6223_v58 = vsel %vm5092_vm2, %v6218_v10, %v6222_v12  ;;  %v11993_v7 = vld [vmem:[%s14878_s3 + $0x208] sm:$0xff]   ;;  %v11997_v12 = vld [vmem:[%s14878_s3 + $0x218] sm:$0xff]  }
 0x1cf   : > { %11215 = vmatmul.mubr.bf16.gmra.mrb[52].mxu0 %v6191_v18  ;;  %11386 = vmatprep.subr.bf16.mxu1 %v13818_v16  ;;  %v2894_v18 = vor.u32 %v2892_v30, %v2891_v59  ;;  %v15160_v59 = vrot.slane %v13252_v43, 1  ;;  %v15161_v30 = vld [vmem:[#allocation10_spill] sm:$0xff]  ;;  %v11998_v43 = vld [vmem:[%s14878_s3 + $0x220] sm:$0xff]   ;;  %v6887_v60 = vsel %vm6868_vm4, %v15166_v6, %v6886_v19 }
 0x1d0   : > { %11218 = vmatprep.mubr.bf16.mxu0 %v6199_v0  ;;  %v2886_v23 = vor.u32 %v2884_v49, %v2883_v20  ;;  %v6869_v0 = vrot.slane %v6785_v55, 1 }
 0x1d1   : > { %10859 = vmatmul.mubr.bf16.gmra.mrb[16].mxu1 %v15156_v17  ;;  %v13861_v28 = vsel %vm2771_vm3, %v2883_v20, %v2894_v18  ;;  %v2907_v17 = vrot.slane %v2905_v42, 7  ;;  %v6877_v49 = vsel %vm6868_vm4, %v6874_v44, %v15160_v59  ;;  %v11999_v18 = vld [vmem:[%s14878_s3 + $0x228] sm:$0xff]   ;;  %v15165_v44 = vld [vmem:[#allocation19_spill] sm:$0xff]  ;;  %v13967_v59 = vld [vmem:[#allocation3 + $0xb0] sm:$0xff] }
 0x1d2   : > { %10862 = vmatprep.mubr.bf16.mxu1 %v15157_v54  ;;  %v6871_v51 = vsel %vm6868_vm4, %v6869_v0, %v6870_v39  ;;  %v13857_v8 = vsel %vm2771_vm3, %v2875_v33, %v2886_v23  ;;  %v13868_v54 = vld [vmem:[#allocation3 + $0x98] sm:$0xff]  ;;  %v2908_v33 = vshll.u32 %v13848_v37, 16 }
 0x1d3   : > { %v2921_v45 = vshrl.u32 %v13868_v54, 16  ;;  %v15162_v0 = vld [vmem:[#allocation15_spill] sm:$0xff] }
 0x1d4   : > { %v2910_v62 = vor.u32 %v2908_v33, %v2907_v17  ;;  %v12001_v33 = vld [vmem:[%s14878_s3 + $0x238] sm:$0xff]  }
 0x1d5   : > { %v2923_v26 = vrot.slane %v2921_v45, 7  ;;  %v15168_v45 = vld [vmem:[#allocation20_spill] sm:$0xff] }
 0x1d6   : > { %v13885_v3 = vsel %vm2771_vm3, %v2899_v46, %v2910_v62  ;;  %v15164_v46 = vld [vmem:[#allocation11_spill] sm:$0xff]  ;;  %v15167_v62 = vld [vmem:[#allocation17_spill] sm:$0xff] }
 0x1d7   : > { %11219 = vmatmul.mubr.bf16.gmra.mrb[56].mxu0 %v6207_v1  ;;  %v13887_v1 = vld [vmem:[#allocation3 + $0xa0] sm:$0xff] }
 0x1d8   : > { %11222 = vmatprep.mubr.bf16.mxu0 %v6215_v32  ;;  %v11995_v32 = vld [vmem:[%s14878_s3 + $0x210] sm:$0xff]   ;;  %v2929_v20 = vshrl.u32 %v13887_v1, 16 }
 0x1d9   : > { %10863 = vmatmul.mubr.bf16.gmra.mrb[20].mxu1 %v2871_v47  ;;  %v2924_v47 = vshll.u32 %v13868_v54, 16 }
 0x1da   : > { %10866 = vmatprep.mubr.bf16.mxu1 %v13842_v14  ;;  %v13906_v39 = vrot.slane %v2929_v20, 7  ;;  %v3594_v20 = vld [vmem:[#allocation3 + $0x10] sm:$0xff] }
 0x1db   : > { %v2926_v10 = vor.u32 %v2924_v47, %v2923_v26  ;;  %v6898_v47 = vrot.slane %v13863_v24, 1 }
 0x1dd   : > { %v13910_v23 = vsel %vm2771_vm3, %v2915_v61, %v2926_v10  ;;  %v3593_v10 = vld [vmem:[#allocation3 + $0x8] sm:$0x80] }
 0x1df   : > { %11223 = vmatmul.mubr.bf16.gmra.mrb[60].mxu0 %v6223_v58  ;;  %v2932_v58 = vshll.u32 %v13887_v1, 16 }
 0x1e0   : > { %11242 = vmatprep.mubr.bf16.mxu0 %v6871_v51  ;;  %v15163_v51 = vld [vmem:[#allocation16_spill] sm:$0xff] }
 0x1e1   : > { %10867 = vmatmul.mubr.bf16.gmra.mrb[24].mxu1 %v13857_v8  ;;  %v2934_v11 = vor.u32 %v2932_v58, %v13906_v39 }
 0x1e2   : > { %10870 = vmatprep.mubr.bf16.mxu1 %v13861_v28 }
 0x1e3   : > { %v13923_v42 = vsel %vm2771_vm3, %v2923_v26, %v2934_v11  ;;  %v6892_v26 = vrot.slane %v13827_v25, 1 }
 0x1e7   : > { %11243 = vmatmul.mubr.bf16.vlgmr.msra.gmra.mrb[0].mxu0 %v6873_v41  ;;  %v6889_v41 = vsel %vm6868_vm4, %v6886_v19, %v6888_v9 }
 0x1e8   : > { %11246 = vmatprep.mubr.bf16.mxu0 %v6875_v5  ;;  %11307 = vmatpush3.bf16.msra.mxu0 %v13685_v38  ;;  %v2918_v38 = vor.u32 %v2916_v29, %v2915_v61  ;;  %v15170_v61 = vld [vmem:[#allocation21_spill] sm:$0xff] }
 0x1e9   : > { %10871 = vmatmul.mubr.bf16.gmra.mrb[28].mxu1 %v13880_v48  ;;  %11308 = vmatprep.subr.bf16.mxu0 %v11993_v7 }
 0x1ea   : > { %10874 = vmatprep.mubr.bf16.mxu1 %v13885_v3  ;;  %v13903_v55 = vsel %vm2771_vm3, %v2907_v17, %v2918_v38  ;;  %v2943_v17 = vsel %vm2771_vm3, %v13906_v39, %v15164_v46  ;;  %v13978_v46 = vld [vmem:[#allocation3 + $0xb8] sm:$0xff] }
 0x1eb   : > { %v6908_v6 = vrot.slane %v13978_v46, 1 }
 0x1ec   : > { %11309 = vmatpush3.bf16.msra.mxu0 %v11993_v7  ;;  %v6890_v7 = vrot.slane %v13824_v34, 1  ;;  %v6896_v34 = vrot.slane %v13848_v37, 1 }
 0x1ed   : > { %11310 = vmatprep.subr.bf16.mxu0 %v11995_v32 }
 0x1ee   : > { %v6891_v5 = vsel %vm6868_vm4, %v6888_v9, %v6890_v7  ;;  %v6893_v29 = vsel %vm6868_vm4, %v6890_v7, %v6892_v26  ;;  %v6899_v25 = vsel %vm6868_vm4, %v6896_v34, %v6898_v47 }
 0x1ef   : > { %11247 = vmatmul.mubr.bf16.gmra.mrb[4].mxu0 %v6877_v49  ;;  %v13972_v49 = vld [vmem:[#allocation3 + $0x20] sm:$0xff] }
 0x1f0   : > { %11250 = vmatprep.mubr.bf16.mxu0 %v15161_v30  ;;  %11311 = vmatpush3.bf16.msra.mxu0 %v11995_v32  ;;  %v6894_v32 = vrot.slane %v13844_v53, 1  ;;  %v6900_v53 = vrot.slane %v13868_v54, 1  ;;  %v3595_v54 = vld [vmem:[#allocation3 + $0x18] sm:$0xff]  ;;  %v3651_v30 = vshll.u32 %v3594_v20, 16 }
 0x1f1   : > { %10875 = vmatmul.mubr.bf16.gmra.mrb[32].mxu1 %v13903_v55  ;;  %11312 = vmatprep.subr.bf16.mxu0 %v11997_v12  ;;  %v3656_v58 = vshrl.u32 %v3595_v54, 16 }
 0x1f2   : > { %10878 = vmatprep.mubr.bf16.mxu1 %v13910_v23  ;;  %v6895_v21 = vsel %vm6868_vm4, %v6892_v26, %v6894_v32  ;;  %v6897_v38 = vsel %vm6868_vm4, %v6894_v32, %v6896_v34  ;;  %v6901_v37 = vsel %vm6868_vm4, %v6898_v47, %v6900_v53  ;;  %v14009_v47 = vld [vmem:[#allocation3 + $0x38] sm:$0xff] }
 0x1f4   : > { %11313 = vmatpush3.bf16.msra.mxu0 %v11997_v12  ;;  %v13965_v12 = vld [vmem:[#allocation3 + $0xa8] sm:$0xff] }
 0x1f5   : > { %11314 = vmatprep.subr.bf16.mxu0 %v11998_v43 }
 0x1f7   : > { %11251 = vmatmul.mubr.bf16.gmra.mrb[8].mxu0 %v15162_v0  ;;  %v3664_v0 = vshrl.u32 %v13972_v49, 16 }
 0x1f8   : > { %11254 = vmatprep.mubr.bf16.mxu0 %v15163_v51  ;;  %11315 = vmatpush3.bf16.msra.mxu0 %v11998_v43  ;;  %v6906_v43 = vrot.slane %v13967_v59, 1 }
 0x1f9   : > { %10879 = vmatmul.mubr.bf16.gmra.mrb[36].mxu1 %v13923_v42  ;;  %11316 = vmatprep.subr.bf16.mxu0 %v11999_v18  ;;  %v3666_v19 = vrot.slane %v3664_v0, 7 }
 0x1fa   : > { %10882 = vmatprep.mubr.bf16.mxu1 %v2943_v17  ;;  %v13980_v17 = vld [vmem:[#allocation3 + $0xc0] sm:$0xff] }
 0x1fc   : > { %11317 = vmatpush3.bf16.msra.mxu0 %v11999_v18 }
 0x1fd   : > { %11318 = vmatprep.subr.bf16.mxu0 %v12000_v63 }
 0x1ff   : > { %11255 = vmatmul.mubr.bf16.gmra.mrb[12].mxu0 %v15165_v44  ;;  %v3659_v44 = vshll.u32 %v3595_v54, 16  ;;  %v14029_v54 = vld [vmem:[#allocation3 + $0xd8] sm:$0xff] }
 0x200   : > { %11258 = vmatprep.mubr.bf16.mxu0 %v6887_v60  ;;  %11319 = vmatpush3.bf16.msra.mxu0 %v12000_v63  ;;  %v13989_v60 = vld [vmem:[#allocation3 + $0x30] sm:$0xff] }
 0x201   : > { %10883 = vmatmul.mubr.bf16.gmra.mrb[40].mxu1 %v15167_v62  ;;  %11320 = vmatprep.subr.bf16.mxu0 %v12001_v33  ;;  %v3667_v62 = vshll.u32 %v13972_v49, 16 }
 0x202   : > { %10886 = vmatprep.mubr.bf16.mxu1 %v15168_v45  ;;  %v6910_v45 = vrot.slane %v13980_v17, 1 }
 0x203   : > { %v3669_v7 = vor.u32 %v3667_v62, %v3666_v19 }
 0x204   : > { %11321 = vmatpush3.bf16.msra.mxu0 %v12001_v33  ;;  %v13986_v33 = vld [vmem:[#allocation3 + $0x28] sm:$0xff] }
 0x207   : > { %11259 = vmatmul.mubr.bf16.gmra.mrb[16].mxu0 %v6889_v41  ;;  %v3680_v41 = vshrl.u32 %v13989_v60, 16 }
 0x208   : > { %11262 = vmatprep.mubr.bf16.mxu0 %v6891_v5  ;;  %v6909_v5 = vsel %vm6868_vm4, %v6906_v43, %v6908_v6 }
 0x209   : > { %10887 = vmatmul.mubr.bf16.gmra.mrb[44].mxu1 %v15169_v4  ;;  %v6911_v4 = vsel %vm6868_vm4, %v6908_v6, %v6910_v45  ;;  %v3682_v34 = vrot.slane %v3680_v41, 7  ;;  %v12009_v6 = vld [vmem:[%s14878_s3 + $0x118] sm:$0xff]  }
 0x20a   : > { %10890 = vmatprep.mubr.bf16.mxu1 %v15170_v61  ;;  %v13999_v61 = vld [vmem:[#allocation3 + $0xc8] sm:$0xff] }
 0x20f   : > { %11263 = vmatmul.mubr.bf16.gmra.mrb[20].mxu0 %v6893_v29  ;;  %v14004_v29 = vld [vmem:[#allocation3 + $0xd0] sm:$0xff] }
 0x210   : > { %11266 = vmatprep.mubr.bf16.mxu0 %v6895_v21 }
 0x211   : > { %10891 = vmatmul.mubr.bf16.gmra.mrb[48].mxu1 %v13554_v35  ;;  %v6902_v35 = vrot.slane %v13887_v1, 1  ;;  %v6904_v1 = vrot.slane %v13965_v12, 1 }
 0x212   : > { %10894 = vmatprep.mubr.bf16.mxu1 %v13557_v50  ;;  %v3648_v50 = vshrl.u32 %v3594_v20, 16  ;;  %v3683_v20 = vshll.u32 %v13989_v60, 16 }
 0x213   : > { %v6903_v24 = vsel %vm6868_vm4, %v6900_v53, %v6902_v35  ;;  %v6905_v51 = vsel %vm6868_vm4, %v6902_v35, %v6904_v1  ;;  %v14014_v53 = vld [vmem:[#allocation3 + $0x40] sm:$0xff]  ;;  %v6914_v35 = vrot.slane %v14004_v29, 1 }
 0x217   : > { %11267 = vmatmul.mubr.bf16.gmra.mrb[24].mxu0 %v6897_v38  ;;  %v3675_v38 = vshll.u32 %v13986_v33, 16 }
 0x218   : > { %11270 = vmatprep.mubr.bf16.mxu0 %v6899_v25  ;;  %v6912_v25 = vrot.slane %v13999_v61, 1 }
 0x219   : > { %10895 = vmatmul.mubr.bf16.gmra.mrb[52].mxu1 %v13574_v15  ;;  %v3644_v15 = vshrl.u32 %v3593_v10, 16  ;;  %v3685_v10 = vor.u32 %v3683_v20, %v3682_v34  ;;  %v7569_v49 = vrot.slane %v3675_v38, 2 }
 0x21a   : > { %10898 = vmatprep.mubr.bf16.mxu1 %v13577_v40  ;;  %v3650_v40 = vrot.slane %v3648_v50, 7  ;;  %v12007_v50 = vld [vmem:[%s14878_s3 + $0x108] sm:$0xff]  }
 0x21b   : > { %v3646_v11 = vrot.slane %v3644_v15, 7  ;;  %v6913_v15 = vsel %vm6868_vm4, %v6910_v45, %v6912_v25 }
 0x21c   : > { %v3653_v18 = vor.u32 %v3651_v30, %v3650_v40 }
 0x21e   : > { %v3654_v63 = vsel %vm2771_vm3, %v3646_v11, %v3653_v18 }
 0x21f   : > { %11271 = vmatmul.mubr.bf16.gmra.mrb[28].mxu0 %v6901_v37 }
 0x220   : > { %11274 = vmatprep.mubr.bf16.mxu0 %v6903_v24  ;;  %v3696_v24 = vshrl.u32 %v14014_v53, 16 }
 0x221   : > { %10899 = vmatmul.mubr.bf16.gmra.mrb[56].mxu1 %v13587_v22  ;;  %v6907_v22 = vsel %vm6868_vm4, %v6904_v1, %v6906_v43  ;;  %v12008_v1 = vld [vmem:[%s14878_s3 + $0x110] sm:$0xff]  }
 0x222   : > { %10902 = vmatprep.mubr.bf16.mxu1 %v13592_v31  ;;  %v3658_v31 = vrot.slane %v3656_v58, 7  ;;  %v14037_v58 = vld [vmem:[#allocation3 + $0xe0] sm:$0xff]  ;;  %v3698_v18 = vrot.slane %v3696_v24, 7  ;;  %v7593_v60 = vrot.slane %v3696_v24, 1 }
 0x224   : > { %v3661_v9 = vor.u32 %v3659_v44, %v3658_v31  ;;  %v3670_v21 = vsel %vm2771_vm3, %v3658_v31, %v3669_v7  ;;  %v6916_v31 = vrot.slane %v14029_v54, 1  ;;  %v6918_v44 = vrot.slane %v14037_v58, 1 }
 0x226   : > { %v3662_v26 = vsel %vm2771_vm3, %v3650_v40, %v3661_v9  ;;  %v6915_v40 = vsel %vm6868_vm4, %v6912_v25, %v6914_v35 }
 0x227   : > { %11275 = vmatmul.mubr.bf16.gmra.mrb[32].mxu0 %v6905_v51  ;;  %v14042_v51 = vld [vmem:[#allocation3 + $0x48] sm:$0xff] }
 0x228   : > { %11278 = vmatprep.mubr.bf16.mxu0 %v6907_v22  ;;  %v3691_v22 = vshll.u32 %v14009_v47, 16  ;;  %v3704_v9 = vshrl.u32 %v14042_v51, 16 }
 0x229   : > { %10903 = vmatmul.mubr.bf16.gmra.mrb[60].mxu1 %v13601_v2  ;;  %v3672_v2 = vshrl.u32 %v13986_v33, 16 }
 0x22a   : > { %10922 = vmatprep.mubr.bf16.mxu1 %v3654_v63  ;;  %v14046_v63 = vld [vmem:[#allocation3 + $0x50] sm:$0xff] }
 0x22b   : > { %v3674_v32 = vrot.slane %v3672_v2, 7 }
 0x22d   : > { %v3677_v37 = vor.u32 %v3675_v38, %v3674_v32  ;;  %v3686_v11 = vsel %vm2771_vm3, %v3674_v32, %v3685_v10  ;;  %v14061_v32 = vld [vmem:[#allocation3 + $0xe8] sm:$0xff]  ;;  %v7587_v38 = vrot.slane %v3691_v22, 2 }
 0x22f   : > { %11279 = vmatmul.mubr.bf16.gmra.mrb[36].mxu0 %v6909_v5  ;;  %v3678_v30 = vsel %vm2771_vm3, %v3666_v19, %v3677_v37  ;;  %v3699_v19 = vshll.u32 %v14014_v53, 16  ;;  %v3712_v5 = vshrl.u32 %v14046_v63, 16  ;;  %v14069_v37 = vld [vmem:[#allocation3 + $0xf0] sm:$0xff] }
 0x230   : > { %11282 = vmatprep.mubr.bf16.mxu0 %v6911_v4  ;;  %v6917_v4 = vsel %vm6868_vm4, %v6914_v35, %v6916_v31 }
 0x231   : > { %10923 = vmatmul.mubr.bf16.vlgmr.msra.gmra.mrb[0].mxu1 %v3662_v26  ;;  %v3701_v7 = vor.u32 %v3699_v19, %v3698_v18  ;;  %v6919_v26 = vsel %vm6868_vm4, %v6916_v31, %v6918_v44  ;;  %v3714_v10 = vrot.slane %v3712_v5, 7 }
 0x232   : > { %11394 = vmatpush3.bf16.msra.mxu1 %v13818_v16  ;;  %10926 = vmatprep.mubr.bf16.mxu1 %v3670_v21  ;;  %v3688_v16 = vshrl.u32 %v14009_v47, 16  ;;  %v12010_v21 = vld [vmem:[%s14878_s3 + $0x120] sm:$0xff]   ;;  %v3808_v47 = vshrl.u32 %v13967_v59, 16 }
 0x233   : > { %11387 = vmatprep.subr.bf16.mxu1 %v12007_v50 }
 0x234   : > { %v3690_v43 = vrot.slane %v3688_v16, 7  ;;  %v7584_v33 = vrot.slane %v3688_v16, 1  ;;  %v3800_v16 = vshrl.u32 %v13965_v12, 16 }
 0x236   : > { %11395 = vmatpush3.bf16.msra.mxu1 %v12007_v50  ;;  %v3693_v45 = vor.u32 %v3691_v22, %v3690_v43  ;;  %v3706_v50 = vrot.slane %v3704_v9, 7  ;;  %v3702_v35 = vsel %vm2771_vm3, %v3690_v43, %v3701_v7 }
 0x237   : > { %11283 = vmatmul.mubr.bf16.gmra.mrb[40].mxu0 %v6913_v15  ;;  %11388 = vmatprep.subr.bf16.mxu1 %v12008_v1  ;;  %v14074_v15 = vld [vmem:[#allocation3 + $0x58] sm:$0xff] }
 0x238   : > { %11286 = vmatprep.mubr.bf16.mxu0 %v6915_v40  ;;  %v3694_v25 = vsel %vm2771_vm3, %v3682_v34, %v3693_v45  ;;  %v3707_v40 = vshll.u32 %v14042_v51, 16  ;;  %v3715_v34 = vshll.u32 %v14046_v63, 16  ;;  %v3720_v31 = vshrl.u32 %v14074_v15, 16 }
 0x239   : > { %10927 = vmatmul.mubr.bf16.gmra.mrb[4].mxu1 %v3678_v30  ;;  %v6922_v30 = vrot.slane %v14069_v37, 1  ;;  %v3810_v51 = vrot.slane %v3808_v47, 7 }
 0x23a   : > { %10930 = vmatprep.mubr.bf16.mxu1 %v3686_v11  ;;  %11396 = vmatpush3.bf16.msra.mxu1 %v12008_v1  ;;  %v6920_v1 = vrot.slane %v14061_v32, 1  ;;  %v12011_v11 = vld [vmem:[%s14878_s3 + $0x128] sm:$0xff]   ;;  %v3709_v43 = vor.u32 %v3707_v40, %v3706_v50  ;;  %v7605_v53 = vrot.slane %v3707_v40, 2 }
 0x23b   : > { %11389 = vmatprep.subr.bf16.mxu1 %v12009_v6 }
 0x23c   : > { %v6921_v45 = vsel %vm6868_vm4, %v6918_v44, %v6920_v1  ;;  %v6923_v7 = vsel %vm6868_vm4, %v6920_v1, %v6922_v30 }
 0x23e   : > { %11397 = vmatpush3.bf16.msra.mxu1 %v12009_v6  ;;  %v3717_v6 = vor.u32 %v3715_v34, %v3714_v10 }
 0x23f   : > { %11287 = vmatmul.mubr.bf16.gmra.mrb[44].mxu0 %v6917_v4  ;;  %11390 = vmatprep.subr.bf16.mxu1 %v12010_v21  ;;  %v14090_v4 = vld [vmem:[#allocation3 + $0xf8] sm:$0xff] }
 0x240   : > { %11290 = vmatprep.mubr.bf16.mxu0 %v6919_v26  ;;  %v12012_v26 = vld [vmem:[%s14878_s3 + $0x130] sm:$0xff]   ;;  %v3718_v44 = vsel %vm2771_vm3, %v3706_v50, %v3717_v6  ;;  %v6924_v1 = vrot.slane %v14090_v4, 1 }
 0x241   : > { %10931 = vmatmul.mubr.bf16.gmra.mrb[8].mxu1 %v3694_v25  ;;  %v3722_v25 = vrot.slane %v3720_v31, 7 }
 0x242   : > { %10934 = vmatprep.mubr.bf16.mxu1 %v3702_v35  ;;  %11398 = vmatpush3.bf16.msra.mxu1 %v12010_v21  ;;  %v3710_v21 = vsel %vm2771_vm3, %v3698_v18, %v3709_v43  ;;  %v3723_v35 = vshll.u32 %v14074_v15, 16  ;;  %v6925_v43 = vsel %vm6868_vm4, %v6922_v30, %v6924_v1  ;;  %v6927_v50 = vsel %vm6868_vm4, %v6924_v1, %v6926_v57  ;;  %v6817_v30 = vld [vmem:[#allocation3 + $0x118] sm:$0x1] }
 0x243   : > { %11391 = vmatprep.subr.bf16.mxu1 %v12011_v11  ;;  %v7557_v57 = vrot.slane %v3664_v0, 1 }
 0x244   : > { %v3725_v18 = vor.u32 %v3723_v35, %v3722_v25 }
 0x246   : > { %11399 = vmatpush3.bf16.msra.mxu1 %v12011_v11  ;;  %v12013_v11 = vld [vmem:[%s14878_s3 + $0x138] sm:$0xff]   ;;  %v3726_v6 = vsel %vm2771_vm3, %v3714_v10, %v3725_v18  ;;  %v7560_v10 = vrot.slane %v3667_v62, 2 }
 0x247   : > { %11291 = vmatmul.mubr.bf16.gmra.mrb[48].mxu0 %v6921_v45  ;;  %11392 = vmatprep.subr.bf16.mxu1 %v12012_v26  ;;  %v14111_v45 = vld [vmem:[#allocation3 + $0x110] sm:$0xff] }
 0x248   : > { %11294 = vmatprep.mubr.bf16.mxu0 %v6923_v7  ;;  %v3734_v7 = vsel %vm2771_vm3, %v3722_v25, %v13829_v27  ;;  %v6932_v27 = vrot.slane %v6817_v30, 1  ;;  %v7561_v18 = vor.u32 %v7560_v10, %v7557_v57  ;;  %v3824_v30 = vshrl.u32 %v13980_v17, 16 }
 0x249   : > { %10935 = vmatmul.mubr.bf16.gmra.mrb[12].mxu1 %v3710_v21  ;;  %v6930_v21 = vrot.slane %v14111_v45, 1 }
 0x24a   : > { %10938 = vmatprep.mubr.bf16.mxu1 %v3718_v44  ;;  %11400 = vmatpush3.bf16.msra.mxu1 %v12012_v26  ;;  %v7495_v26 = vld [vmem:[#allocation3 + $0x18] sm:$0xfe]  ;;  %v3826_v15 = vrot.slane %v3824_v30, 7 }
 0x24b   : > { %11393 = vmatprep.subr.bf16.mxu1 %v12013_v11  ;;  %v7547_v44 = vshrl.u32 %v7495_v26, 16  ;;  %v6931_v13 = vsel %vm6868_vm4, %v6928_v36, %v6930_v21  ;;  %v7566_v36 = vrot.slane %v3672_v2, 1 }
 0x24d   : > { %v7549_v25 = vrot.slane %v7547_v44, 1  ;;  %v7570_v62 = vor.u32 %v7569_v49, %v7566_v36  ;;  %v7620_v44 = vrot.slane %v3720_v31, 1  ;;  %v3827_v49 = vshll.u32 %v13980_v17, 16 }
 0x24e   : > { %11401 = vmatpush3.bf16.msra.mxu1 %v12013_v11  ;;  %v7550_v11 = vshll.u32 %v7495_v26, 16 }
 0x24f   : > { %11295 = vmatmul.mubr.bf16.gmra.mrb[52].mxu0 %v6925_v43  ;;  %v7571_v2 = vsel %vm7545_vm5, %v7561_v18, %v7570_v62 }
 0x250   : > { %11298 = vmatprep.mubr.bf16.mxu0 %v6927_v50  ;;  %v7552_v1 = vrot.slane %v7550_v11, 2  ;;  %v7602_v50 = vrot.slane %v3704_v9, 1  ;;  %v3803_v9 = vshll.u32 %v13965_v12, 16  ;;  %v7623_v11 = vrot.slane %v3723_v35, 2 }
 0x251   : > { %10939 = vmatmul.mubr.bf16.gmra.mrb[16].mxu1 %v3726_v6  ;;  %v7504_v6 = vld [vmem:[#allocation3 + $0x60] sm:$0xff]  ;;  %v3819_v35 = vshll.u32 %v13978_v46, 16 }
 0x252   : > { %10942 = vmatprep.mubr.bf16.mxu1 %v3734_v7  ;;  %v7553_v52 = vor.u32 %v7552_v1, %v7549_v25  ;;  %v7606_v40 = vor.u32 %v7605_v53, %v7602_v50  ;;  %v7627_v63 = vshrl.u32 %v7504_v6, 16  ;;  %v7508_v53 = vld [vmem:[#allocation3 + $0x80] sm:$0xff] }
 0x254   : > { %v7562_v0 = vsel %vm7545_vm5, %v7553_v52, %v7561_v18  ;;  %v7629_v57 = vrot.slane %v7627_v63, 1  ;;  %v7506_v18 = vld [vmem:[#allocation3 + $0x70] sm:$0xff]  ;;  %v7663_v63 = vshrl.u32 %v7508_v53, 16 }
 0x257   : > { %11299 = vmatmul.mubr.bf16.gmra.mrb[56].mxu0 %v13657_v56  ;;  %v6933_v56 = vsel %vm6868_vm4, %v6930_v21, %v6932_v27  ;;  %v3816_v21 = vshrl.u32 %v13978_v46, 16  ;;  %v7505_v27 = vld [vmem:[#allocation3 + $0x68] sm:$0xff] }
 0x258   : > { %11302 = vmatprep.mubr.bf16.mxu0 %v6931_v13  ;;  %v7636_v52 = vshrl.u32 %v7505_v27, 16  ;;  %v7639_v36 = vshll.u32 %v7505_v27, 16  ;;  %v7665_v27 = vrot.slane %v7663_v63, 1 }
 0x259   : > { %10943 = vmatmul.mubr.bf16.gmra.mrb[20].mxu1 %v13842_v14  ;;  %v7575_v14 = vrot.slane %v3680_v41, 1  ;;  %v3818_v1 = vrot.slane %v3816_v21, 7 }
 0x25a   : > { %10946 = vmatprep.mubr.bf16.mxu1 %v13857_v8  ;;  %v7578_v8 = vrot.slane %v3683_v20, 2 }
 0x25c   : > { %v7579_v43 = vor.u32 %v7578_v8, %v7575_v14  ;;  %v7648_v14 = vshll.u32 %v7506_v18, 16  ;;  %v3821_v8 = vor.u32 %v3819_v35, %v3818_v1 }
 0x25e   : > { %v7580_v41 = vsel %vm7545_vm5, %v7570_v62, %v7579_v43  ;;  %v3832_v62 = vshrl.u32 %v13999_v61, 16 }
 0x25f   : > { %11303 = vmatmul.mubr.bf16.gmra.mrb[60].mxu0 %v6933_v56  ;;  %v7624_v56 = vor.u32 %v7623_v11, %v7620_v44  ;;  %v3856_v44 = vshrl.u32 %v14037_v58, 16 }
 0x260   : > { %11322 = vmatprep.mubr.bf16.mxu0 %v7562_v0  ;;  %v7645_v0 = vshrl.u32 %v7506_v18, 16  ;;  %v3834_v50 = vrot.slane %v3832_v62, 7 }
 0x261   : > { %10947 = vmatmul.mubr.bf16.gmra.mrb[24].mxu1 %v13861_v28  ;;  %v7596_v28 = vrot.slane %v3699_v19, 2  ;;  %v3802_v19 = vrot.slane %v3800_v16, 7 }
 0x262   : > { %10950 = vmatprep.mubr.bf16.mxu1 %v13880_v48  ;;  %v7588_v48 = vor.u32 %v7587_v38, %v7584_v33  ;;  %v7638_v38 = vrot.slane %v7636_v52, 1 }
 0x263   : > { %v7597_v20 = vor.u32 %v7596_v28, %v7593_v60  ;;  %v3805_v26 = vor.u32 %v3803_v9, %v3802_v19  ;;  %v7647_v28 = vrot.slane %v7645_v0, 1 }
 0x264   : > { %v7589_v22 = vsel %vm7545_vm5, %v7579_v43, %v7588_v48  ;;  %v3829_v43 = vor.u32 %v3827_v49, %v3826_v15 }
 0x265   : > { %v7598_v24 = vsel %vm7545_vm5, %v7588_v48, %v7597_v20  ;;  %v3806_v25 = vsel %vm2771_vm3, %v13906_v39, %v3805_v26  ;;  %v7650_v48 = vrot.slane %v7648_v14, 2 }
 0x267   : > { %11323 = vmatmul.mubr.bf16.vlgmr.msra.gmra.mrb[0].mxu0 %v7571_v2  ;;  %v3840_v2 = vshrl.u32 %v14004_v29, 16 }
 0x268   : > { %11326 = vmatprep.mubr.bf16.mxu0 %v7580_v41  ;;  %v7641_v41 = vrot.slane %v7639_v36, 2  ;;  %v3858_v36 = vrot.slane %v3856_v44, 7 }
 0x269   : > { %10951 = vmatmul.mubr.bf16.gmra.mrb[28].mxu1 %v13885_v3  ;;  %v7611_v3 = vrot.slane %v3712_v5, 1  ;;  %v3811_v5 = vshll.u32 %v13967_v59, 16 }
 0x26a   : > { %10954 = vmatprep.mubr.bf16.mxu1 %v13903_v55  ;;  %v7614_v55 = vrot.slane %v3715_v34, 2  ;;  %v7630_v34 = vshll.u32 %v7504_v6, 16 }
 0x26c   : > { %v7615_v7 = vor.u32 %v7614_v55, %v7611_v3  ;;  %v7632_v10 = vrot.slane %v7630_v34, 2  ;;  %v3842_v3 = vrot.slane %v3840_v2, 7  ;;  %v3835_v55 = vshll.u32 %v13999_v61, 16 }
 0x26d   : > { %v7666_v34 = vshll.u32 %v7508_v53, 16 }
 0x26e   : > { %v7616_v13 = vsel %vm7545_vm5, %v7606_v40, %v7615_v7  ;;  %v7633_v39 = vor.u32 %v7632_v10, %v7629_v57  ;;  %v7625_v33 = vsel %vm7545_vm5, %v7615_v7, %v7624_v56  ;;  %v3843_v7 = vshll.u32 %v14004_v29, 16 }
 0x26f   : > { %11327 = vmatmul.mubr.bf16.gmra.mrb[4].mxu0 %v7589_v22  ;;  %v3822_v22 = vsel %vm2771_vm3, %v3810_v51, %v3821_v8  ;;  %v3837_v26 = vor.u32 %v3835_v55, %v3834_v50 }
 0x270   : > { %11330 = vmatprep.mubr.bf16.mxu0 %v7598_v24  ;;  %v7634_v60 = vsel %vm7545_vm5, %v7624_v56, %v7633_v39  ;;  %v3830_v24 = vsel %vm2771_vm3, %v3818_v1, %v3829_v43  ;;  %v7509_v1 = vld [vmem:[#allocation3 + $0x88] sm:$0xff]  ;;  %v14218_v56 = vld [vmem:[#allocation3 + $0x90] sm:$0xff] }
 0x271   : > { %10955 = vmatmul.mubr.bf16.gmra.mrb[32].mxu1 %v13910_v23  ;;  %v3813_v23 = vor.u32 %v3811_v5, %v3810_v51  ;;  %v7651_v51 = vor.u32 %v7650_v48, %v7647_v28  ;;  %v3838_v18 = vsel %vm2771_vm3, %v3826_v15, %v3837_v26  ;;  %v7672_v14 = vshrl.u32 %v7509_v1, 16 }
 0x272   : > { %10958 = vmatprep.mubr.bf16.mxu1 %v13923_v42  ;;  %v7607_v42 = vsel %vm7545_vm5, %v7597_v20, %v7606_v40  ;;  %v7507_v20 = vld [vmem:[#allocation3 + $0x78] sm:$0xff]  ;;  %v7675_v8 = vshll.u32 %v7509_v1, 16  ;;  %v3859_v15 = vshll.u32 %v14037_v58, 16  ;;  %v3872_v48 = vshrl.u32 %v14069_v37, 16 }
 0x273   : > { %v3814_v31 = vsel %vm2771_vm3, %v3802_v19, %v3813_v23  ;;  %v7642_v19 = vor.u32 %v7641_v41, %v7638_v38  ;;  %v7654_v6 = vshrl.u32 %v7507_v20, 16  ;;  %v7657_v40 = vshll.u32 %v7507_v20, 16 }
 0x274   : > { %v3848_v23 = vshrl.u32 %v14029_v54, 16  ;;  %v7684_v38 = vshll.u32 %v14218_v56, 16  ;;  %v3861_v28 = vor.u32 %v3859_v15, %v3858_v36  ;;  %v3874_v26 = vrot.slane %v3872_v48, 7 }
 0x275   : > { %v7643_v11 = vsel %vm7545_vm5, %v7633_v39, %v7642_v19  ;;  %v7659_v57 = vrot.slane %v7657_v40, 2  ;;  %v7652_v10 = vsel %vm7545_vm5, %v7642_v19, %v7651_v51  ;;  %v3851_v39 = vshll.u32 %v14029_v54, 16 }
 0x276   : > { %v7686_v19 = vrot.slane %v7684_v38, 2 }
 0x277   : > { %11331 = vmatmul.mubr.bf16.gmra.mrb[8].mxu0 %v7607_v42  ;;  %v3845_v42 = vor.u32 %v3843_v7, %v3842_v3 }
 0x278   : > { %11334 = vmatprep.mubr.bf16.mxu0 %v7616_v13  ;;  %v7656_v13 = vrot.slane %v7654_v6, 1  ;;  %v14235_v6 = vld [vmem:[#allocation3 + $0x98] sm:$0xff] }
 0x279   : > { %10959 = vmatmul.mubr.bf16.gmra.mrb[36].mxu1 %v3806_v25  ;;  %v7668_v25 = vrot.slane %v7666_v34, 2  ;;  %v3846_v52 = vsel %vm2771_vm3, %v3834_v50, %v3845_v42  ;;  %v7677_v50 = vrot.slane %v7675_v8, 2  ;;  %v14240_v34 = vld [vmem:[#allocation3 + $0xa0] sm:$0xff]  ;;  %v3867_v42 = vshll.u32 %v14061_v32, 16 }
 0x27a   : > { %10962 = vmatprep.mubr.bf16.mxu1 %v3814_v31  ;;  %v3850_v31 = vrot.slane %v3848_v23, 7  ;;  %v7660_v0 = vor.u32 %v7659_v57, %v7656_v13  ;;  %v14246_v13 = vld [vmem:[#allocation3 + $0x100] sm:$0xff]  ;;  %v7693_v57 = vshll.u32 %v14235_v6, 16  ;;  %v7702_v1 = vshll.u32 %v14240_v34, 16 }
 0x27b   : > { %v7669_v43 = vor.u32 %v7668_v25, %v7665_v27  ;;  %v7699_v25 = vshrl.u32 %v14240_v34, 16 }
 0x27c   : > { %v3853_v41 = vor.u32 %v3851_v39, %v3850_v31  ;;  %v7661_v20 = vsel %vm7545_vm5, %v7651_v51, %v7660_v0  ;;  %v3862_v51 = vsel %vm2771_vm3, %v3850_v31, %v3861_v28  ;;  %v3880_v31 = vshrl.u32 %v14090_v4, 16 }
 0x27d   : > { %v7670_v53 = vsel %vm7545_vm5, %v7660_v0, %v7669_v43  ;;  %v3888_v0 = vshrl.u32 %v14246_v13, 16  ;;  %v7704_v28 = vrot.slane %v7702_v1, 2 }
 0x27e   : > { %v3854_v40 = vsel %vm2771_vm3, %v3842_v3, %v3853_v41  ;;  %v7690_v3 = vshrl.u32 %v14235_v6, 16  ;;  %v7701_v41 = vrot.slane %v7699_v25, 1  ;;  %v7713_v25 = vrot.slane %v3803_v9, 2 }
 0x27f   : > { %11335 = vmatmul.mubr.bf16.gmra.mrb[12].mxu0 %v7625_v33  ;;  %v7681_v33 = vshrl.u32 %v14218_v56, 16 }
 0x280   : > { %11338 = vmatprep.mubr.bf16.mxu0 %v7634_v60  ;;  %v3864_v60 = vshrl.u32 %v14061_v32, 16  ;;  %v7692_v8 = vrot.slane %v7690_v3, 1 }
 0x281   : > { %10963 = vmatmul.mubr.bf16.gmra.mrb[40].mxu1 %v3822_v22  ;;  %v7674_v22 = vrot.slane %v7672_v14, 1 }
 0x282   : > { %10966 = vmatprep.mubr.bf16.mxu1 %v3830_v24  ;;  %v7683_v24 = vrot.slane %v7681_v33, 1  ;;  %v3866_v63 = vrot.slane %v3864_v60, 7  ;;  %v7695_v33 = vrot.slane %v7693_v57, 2  ;;  %v7710_v57 = vrot.slane %v3800_v16, 1 }
 0x284   : > { %v7687_v27 = vor.u32 %v7686_v19, %v7683_v24  ;;  %v3883_v24 = vshll.u32 %v14090_v4, 16  ;;  %v7696_v19 = vor.u32 %v7695_v33, %v7692_v8  ;;  %v7714_v8 = vor.u32 %v7713_v25, %v7710_v57 }
 0x285   : > { %v7785_v57 = vrot.slane %v3867_v42, 2 }
 0x286   : > { %v7697_v3 = vsel %vm7545_vm5, %v7687_v27, %v7696_v19 }
 0x287   : > { %11339 = vmatmul.mubr.bf16.gmra.mrb[16].mxu0 %v7643_v11  ;;  %v7678_v11 = vor.u32 %v7677_v50, %v7674_v22  ;;  %v3882_v22 = vrot.slane %v3880_v31, 7 }
 0x288   : > { %11342 = vmatprep.mubr.bf16.mxu0 %v7652_v10  ;;  %v3875_v10 = vshll.u32 %v14069_v37, 16 }
 0x289   : > { %10967 = vmatmul.mubr.bf16.gmra.mrb[44].mxu1 %v3838_v18  ;;  %v3869_v18 = vor.u32 %v3867_v42, %v3866_v63  ;;  %v7679_v14 = vsel %vm7545_vm5, %v7669_v43, %v7678_v11  ;;  %v7688_v38 = vsel %vm7545_vm5, %v7678_v11, %v7687_v27  ;;  %v14267_v43 = vld [vmem:[#allocation3 + $0x108] sm:$0xff]  ;;  %v7800_v42 = vrot.slane %v3880_v31, 1 }
 0x28a   : > { %10970 = vmatprep.mubr.bf16.mxu1 %v3846_v52  ;;  %v3877_v52 = vor.u32 %v3875_v10, %v3874_v26  ;;  %v3896_v11 = vshrl.u32 %v14267_v43, 16  ;;  %v3899_v9 = vshll.u32 %v14267_v43, 16  ;;  %v7825_v31 = vshrl.u32 %v14111_v45, 16 }
 0x28c   : > { %v3878_v50 = vsel %vm2771_vm3, %v3866_v63, %v3877_v52  ;;  %v7722_v52 = vrot.slane %v3811_v5, 2  ;;  %v3898_v27 = vrot.slane %v3896_v11, 7  ;;  %v7728_v5 = vrot.slane %v3816_v21, 1 }
 0x28f   : > { %11343 = vmatmul.mubr.bf16.gmra.mrb[20].mxu0 %v7661_v20  ;;  %v3870_v20 = vsel %vm2771_vm3, %v3858_v36, %v3869_v18  ;;  %v3885_v36 = vor.u32 %v3883_v24, %v3882_v22  ;;  %v7719_v18 = vrot.slane %v3808_v47, 1  ;;  %v3901_v47 = vor.u32 %v3899_v9, %v3898_v27 }
 0x290   : > { %11346 = vmatprep.mubr.bf16.mxu0 %v7670_v53  ;;  %v3890_v53 = vrot.slane %v3888_v0, 7  ;;  %v7827_v27 = vrot.slane %v7825_v31, 1 }
 0x291   : > { %10971 = vmatmul.mubr.bf16.gmra.mrb[48].mxu1 %v3854_v40  ;;  %v3891_v40 = vshll.u32 %v14246_v13, 16  ;;  %v7723_v33 = vor.u32 %v7722_v52, %v7719_v18  ;;  %v7527_v52 = vld [vmem:[#allocation3 + $0x118] sm:$0x3] }
 0x292   : > { %10974 = vmatprep.mubr.bf16.mxu1 %v3862_v51  ;;  %v7705_v51 = vor.u32 %v7704_v28, %v7701_v41  ;;  %v7737_v28 = vrot.slane %v3824_v30, 1 }
 0x293   : > { %v3893_v63 = vor.u32 %v3891_v40, %v3890_v53  ;;  %v7724_v41 = vsel %vm7545_vm5, %v7714_v8, %v7723_v33 }
 0x294   : > { %v7706_v1 = vsel %vm7545_vm5, %v7696_v19, %v7705_v51 }
 0x295   : > { %v3894_v16 = vsel %vm2771_vm3, %v3882_v22, %v3893_v63  ;;  %v3902_v22 = vsel %vm2771_vm3, %v3890_v53, %v3901_v47  ;;  %v7758_v53 = vrot.slane %v3843_v7, 2  ;;  %v7767_v63 = vrot.slane %v3851_v39, 2 }
 0x296   : > { %v7773_v7 = vrot.slane %v3856_v44, 1  ;;  %v7782_v39 = vrot.slane %v3864_v60, 1 }
 0x297   : > { %11347 = vmatmul.mubr.bf16.gmra.mrb[24].mxu0 %v7679_v14  ;;  %v3886_v14 = vsel %vm2771_vm3, %v3874_v26, %v3885_v36  ;;  %v7731_v26 = vrot.slane %v3819_v35, 2  ;;  %v7746_v35 = vrot.slane %v3832_v62, 1 }
 0x298   : > { %11350 = vmatprep.mubr.bf16.mxu0 %v7688_v38  ;;  %v7715_v38 = vsel %vm7545_vm5, %v7705_v51, %v7714_v8  ;;  %v7749_v51 = vrot.slane %v3835_v55, 2  ;;  %v7764_v55 = vrot.slane %v3848_v23, 1  ;;  %v7837_v8 = vshll.u32 %v7527_v52, 16 }
 0x299   : > { %10975 = vmatmul.mubr.bf16.gmra.mrb[52].mxu1 %v3870_v20  ;;  %v7740_v20 = vrot.slane %v3827_v49, 2  ;;  %v7755_v49 = vrot.slane %v3840_v2, 1 }
 0x29a   : > { %10978 = vmatprep.mubr.bf16.mxu1 %v3878_v50  ;;  %v7732_v50 = vor.u32 %v7731_v26, %v7728_v5 }
 0x29b   : > { %v7741_v21 = vor.u32 %v7740_v20, %v7737_v28  ;;  %v7759_v36 = vor.u32 %v7758_v53, %v7755_v49 }
 0x29c   : > { %v7733_v19 = vsel %vm7545_vm5, %v7723_v33, %v7732_v50 }
 0x29d   : > { %v7742_v30 = vsel %vm7545_vm5, %v7732_v50, %v7741_v21 }
 0x29f   : > { %11351 = vmatmul.mubr.bf16.gmra.mrb[28].mxu0 %v7697_v3 }
 0x2a0   : > { %11354 = vmatprep.mubr.bf16.mxu0 %v7706_v1  ;;  %v7803_v1 = vrot.slane %v3883_v24, 2  ;;  %v7828_v24 = vshll.u32 %v14111_v45, 16 }
 0x2a1   : > { %10979 = vmatmul.mubr.bf16.gmra.mrb[56].mxu1 %v3886_v14 }
 0x2a2   : > { %10982 = vmatprep.mubr.bf16.mxu1 %v3894_v16  ;;  %v7834_v16 = vshrl.u32 %v7527_v52, 16 }
 0x2a4   : > { %v7836_v47 = vrot.slane %v7834_v16, 1 }
 0x2a7   : > { %11355 = vmatmul.mubr.bf16.gmra.mrb[32].mxu0 %v7715_v38  ;;  %v7839_v38 = vrot.slane %v7837_v8, 2 }
 0x2a8   : > { %11358 = vmatprep.mubr.bf16.mxu0 %v7724_v41 }
 0x2a9   : > { %10983 = vmatmul.mubr.bf16.gmra.mrb[60].mxu1 %v3902_v22  ;;  %v7840_v5 = vor.u32 %v7839_v38, %v7836_v47 }
 0x2aa   : > { %11034 = vmatprep.mubr.bf16.mxu1 %v14218_v56  ;;  %v7750_v56 = vor.u32 %v7749_v51, %v7746_v35 }
 0x2ac   : > { %v7751_v62 = vsel %vm7545_vm5, %v7741_v21, %v7750_v56  ;;  %v7760_v2 = vsel %vm7545_vm5, %v7750_v56, %v7759_v36 }
 0x2af   : > { %11359 = vmatmul.mubr.bf16.gmra.mrb[36].mxu0 %v7733_v19 }
 0x2b0   : > { %11362 = vmatprep.mubr.bf16.mxu0 %v7742_v30 }
 0x2b1   : > { %11035 = vmatmul.mubr.bf16.vlgmr.msra.gmra.mrb[32].mxu1 %v14235_v6  ;;  %v7776_v6 = vrot.slane %v3859_v15, 2  ;;  %v7791_v15 = vrot.slane %v3872_v48, 1 }
 0x2b2   : > { %11038 = vmatprep.mubr.bf16.mxu1 %v14240_v34  ;;  %v7768_v34 = vor.u32 %v7767_v63, %v7764_v55 }
 0x2b3   : > { %v7777_v3 = vor.u32 %v7776_v6, %v7773_v7 }
 0x2b4   : > { %v7769_v23 = vsel %vm7545_vm5, %v7759_v36, %v7768_v34 }
 0x2b5   : > { %v7778_v44 = vsel %vm7545_vm5, %v7768_v34, %v7777_v3 }
 0x2b7   : > { %11363 = vmatmul.mubr.bf16.gmra.mrb[40].mxu0 %v7751_v62 }
 0x2b8   : > { %11366 = vmatprep.mubr.bf16.mxu0 %v7760_v2 }
 0x2b9   : > { %11039 = vmatmul.mubr.bf16.gmra.mrb[36].mxu1 %v13965_v12  ;;  %v7794_v12 = vrot.slane %v3875_v10, 2  ;;  %v7809_v10 = vrot.slane %v3888_v0, 1  ;;  %v7818_v0 = vrot.slane %v3896_v11, 1 }
 0x2ba   : > { %11042 = vmatprep.mubr.bf16.mxu1 %v13967_v59  ;;  %v7786_v59 = vor.u32 %v7785_v57, %v7782_v39 }
 0x2bb   : > { %v7795_v25 = vor.u32 %v7794_v12, %v7791_v15 }
 0x2bc   : > { %v7787_v60 = vsel %vm7545_vm5, %v7777_v3, %v7786_v59 }
 0x2bd   : > { %v7796_v48 = vsel %vm7545_vm5, %v7786_v59, %v7795_v25 }
 0x2bf   : > { %11367 = vmatmul.mubr.bf16.gmra.mrb[44].mxu0 %v7769_v23 }
 0x2c0   : > { %11370 = vmatprep.mubr.bf16.mxu0 %v7778_v44  ;;  %v14408_v44 = vld [vmem:[%s14879_s4] ss:$0 sm:$0xff] }
 0x2c1   : > { %11043 = vmatmul.mubr.bf16.gmra.mrb[40].mxu1 %v13978_v46  ;;  %v7812_v46 = vrot.slane %v3891_v40, 2  ;;  %v7821_v40 = vrot.slane %v3899_v9, 2 }
 0x2c2   : > { %11046 = vmatprep.mubr.bf16.mxu1 %v13980_v17  ;;  %v7804_v17 = vor.u32 %v7803_v1, %v7800_v42 }
 0x2c3   : > { %v7813_v18 = vor.u32 %v7812_v46, %v7809_v10  ;;  %v7822_v45 = vor.u32 %v7821_v40, %v7818_v0 }
 0x2c4   : > { %v7805_v14 = vsel %vm7545_vm5, %v7795_v25, %v7804_v17 }
 0x2c5   : > { %v7823_v11 = vsel %vm7545_vm5, %v7813_v18, %v7822_v45 }
 0x2c7   : > { %11371 = vmatmul.mubr.bf16.gmra.mrb[48].mxu0 %v7787_v60 }
 0x2c8   : > { %11374 = vmatprep.mubr.bf16.mxu0 %v7796_v48 }
 0x2c9   : > { %11047 = vmatmul.mubr.bf16.gmra.mrb[44].mxu1 %v13999_v61  ;;  %v7814_v61 = vsel %vm7545_vm5, %v7804_v17, %v7813_v18 }
 0x2ca   : > { %11050 = vmatprep.mubr.bf16.mxu1 %v14004_v29  ;;  %v7830_v29 = vrot.slane %v7828_v24, 2 }
 0x2cc   : > { %v7831_v33 = vor.u32 %v7830_v29, %v7827_v27 }
 0x2ce   : > { %v7832_v9 = vsel %vm7545_vm5, %v7822_v45, %v7831_v33  ;;  %v7841_v26 = vsel %vm7545_vm5, %v7831_v33, %v7840_v5 }
 0x2cf   : > { %11375 = vmatmul.mubr.bf16.gmra.mrb[52].mxu0 %v7805_v14 }
 0x2d0   : > { %11378 = vmatprep.mubr.bf16.mxu0 %v7814_v61 }
 0x2d1   : > { %11051 = vmatmul.mubr.bf16.gmra.mrb[48].mxu1 %v14029_v54 }
 0x2d2   : > { %11054 = vmatprep.mubr.bf16.mxu1 %v14037_v58 }
 0x2d7   : > { %11379 = vmatmul.mubr.bf16.gmra.mrb[56].mxu0 %v7823_v11 }
 0x2d8   : > { %11382 = vmatprep.mubr.bf16.mxu0 %v7832_v9 }
 0x2d9   : > { %11055 = vmatmul.mubr.bf16.gmra.mrb[52].mxu1 %v14061_v32 }
 0x2da   : > { %11058 = vmatprep.mubr.bf16.mxu1 %v14069_v37 }
 0x2df   : > { %11383 = vmatmul.mubr.bf16.gmra.mrb[60].mxu0 %v7841_v26 }
 0x2e1   : > { %11059 = vmatmul.mubr.bf16.gmra.mrb[56].mxu1 %v14090_v4 }
 0x2e2   : > { %11062 = vmatprep.mubr.bf16.mxu1 %v14246_v13 }
 0x2e9   : > { %11063 = vmatmul.mubr.bf16.gmra.mrb[60].mxu1 %v14267_v43 }
 0x304   : > { %v10924_v54 = vpop.f32.mrb[0].mxu1 }
 0x305   : > { %v4017_v58 = vpop.f32.mrb[1].mxu1 }
 0x306   : > { %v10925_v41 = vpop.f32.mrb[2].mxu1 }
 0x307   : > { %v4020_v28 = vpop.f32.mrb[3].mxu1 }
 0x30c   : > { %v10928_v20 = vpop.f32.mrb[4].mxu1 }
 0x30d   : > { %v4033_v22 = vpop.f32.mrb[5].mxu1 }
 0x30e   : > { %v10929_v50 = vpop.f32.mrb[6].mxu1 }
 0x30f   : > { %v4036_v21 = vpop.f32.mrb[7].mxu1 }
 0x314   : > { %v10932_v32 = vpop.f32.mrb[8].mxu1 }
 0x315   : > { %v4049_v19 = vpop.f32.mrb[9].mxu1 }
 0x316   : > { %v10933_v37 = vpop.f32.mrb[10].mxu1 }
 0x317   : > { %v4052_v35 = vpop.f32.mrb[11].mxu1 }
 0x31c   : > { %v14371_v51 = vpop.f32.mrb[12].mxu1 }
 0x31d   : > { %v14373_v30 = vpop.f32.mrb[13].mxu1 }
 0x31e   : > { %v14375_v4 = vpop.f32.mrb[14].mxu1 }
 0x31f   : > { %v14377_v13 = vpop.f32.mrb[15].mxu1 }
 0x324   : > { %v14379_v43 = vpop.f32.mrb[16].mxu1 }
 0x325   : > { %v14381_v49 = vpop.f32.mrb[17].mxu1 }
 0x326   : > { %v14383_v53 = vpop.f32.mrb[18].mxu1 }
 0x327   : > { %v14385_v56 = vpop.f32.mrb[19].mxu1 }
 0x32c   : > { %v14387_v36 = vpop.f32.mrb[20].mxu1 }
 0x32d   : > { %v14389_v62 = vpop.f32.mrb[21].mxu1 }
 0x32e   : > { %v14391_v55 = vpop.f32.mrb[22].mxu1 }
 0x32f   : > { %v14393_v63 = vpop.f32.mrb[23].mxu1 }
 0x334   : > { %v14395_v2 = vpop.f32.mrb[24].mxu1 }
 0x335   : > { %v14397_v7 = vpop.f32.mrb[25].mxu1 }
 0x336   : > { %v14399_v6 = vpop.f32.mrb[26].mxu1 }
 0x337   : > { %v14401_v34 = vpop.f32.mrb[27].mxu1 }
 0x33a   : > { %v11324_v3 = vpop.f32.mrb[0].mxu0 }
 0x33b   : > { %v11402_v23 = vadd.f32 %v11324_v3, %v10924_v54  ;;  %v7956_v39 = vpop.f32.mrb[1].mxu0 }
 0x33c   : > { %v14403_v57 = vpop.f32.mrb[28].mxu1  ;;  %v11403_v15 = vadd.f32 %v7956_v39, %v4017_v58  ;;  %v11325_v12 = vpop.f32.mrb[2].mxu0 }
 0x33d   : > { %v14410_v59 = vpop.f32.mrb[29].mxu1  ;;  %v11404_v25 = vadd.f32 %v11325_v12, %v10925_v41  ;;  %v7959_v60 = vpop.f32.mrb[3].mxu0  ;;  %v14415_v48 = vadd.f32 %v11402_v23, %v14408_v44 }
 0x33e   : > { %v14412_v42 = vpop.f32.mrb[30].mxu1  ;;  %v11405_v1 = vadd.f32 %v7959_v60, %v4020_v28  ;;  %v14423_v17 = vadd.f32 %v11403_v15, %v14408_v44 }
 0x33f   : > { %v14417_v10 = vpop.f32.mrb[31].mxu1  ;;  %v14420_v46 = vadd.f32 %v11404_v25, %v14408_v44 }
 0x340   : > { %v14433_v18 = vadd.f32 %v11405_v1, %v14408_v44 }
 0x341   : > { %v10092_v31 = vpack.c.bf16 %v14420_v46, %v14415_v48 }
 0x342   : > { %v10087_v24 = vpack.c.bf16 %v14433_v18, %v14423_v17  ;;  %v11328_v52 = vpop.f32.mrb[4].mxu0 }
 0x343   : > { %10275 = vst [vmem:[%s14430_s11 + $0x8] sm:$0xff] %v10092_v31   ;;  %v11406_v14 = vadd.f32 %v11328_v52, %v10928_v20  ;;  %v7972_v0 = vpop.f32.mrb[5].mxu0 }
 0x344   : > { %10088 = vst [vmem:[%s14430_s11] sm:$0xff] %v10087_v24   ;;  %v11407_v40 = vadd.f32 %v7972_v0, %v4033_v22  ;;  %v11329_v61 = vpop.f32.mrb[6].mxu0 }
 0x345   : > { %v11408_v27 = vadd.f32 %v11329_v61, %v10929_v50  ;;  %v7975_v29 = vpop.f32.mrb[7].mxu0  ;;  %v14442_v8 = vadd.f32 %v11406_v14, %v14408_v44 }
 0x346   : > { %v11409_v16 = vadd.f32 %v7975_v29, %v4036_v21  ;;  %v14448_v33 = vadd.f32 %v11407_v40, %v14408_v44 }
 0x347   : > { %v14445_v45 = vadd.f32 %v11408_v27, %v14408_v44 }
 0x348   : > { %v14451_v47 = vadd.f32 %v11409_v16, %v14408_v44 }
 0x349   : > { %v10102_v38 = vpack.c.bf16 %v14445_v45, %v14442_v8 }
 0x34a   : > { %v10097_v11 = vpack.c.bf16 %v14451_v47, %v14448_v33  ;;  %v11332_v9 = vpop.f32.mrb[8].mxu0 }
 0x34b   : > { %10277 = vst [vmem:[%s14430_s11 + $0x18] sm:$0xff] %v10102_v38   ;;  %v11410_v5 = vadd.f32 %v11332_v9, %v10932_v32  ;;  %v7988_v26 = vpop.f32.mrb[9].mxu0 }
 0x34c   : > { %10276 = vst [vmem:[%s14430_s11 + $0x10] sm:$0xff] %v10097_v11   ;;  %v11411_v54 = vadd.f32 %v7988_v26, %v4049_v19  ;;  %v11333_v58 = vpop.f32.mrb[10].mxu0 }
 0x34d   : > { %v11412_v41 = vadd.f32 %v11333_v58, %v10933_v37  ;;  %v7991_v28 = vpop.f32.mrb[11].mxu0  ;;  %v14460_v22 = vadd.f32 %v11410_v5, %v14408_v44 }
 0x34e   : > { %v11413_v20 = vadd.f32 %v7991_v28, %v4052_v35  ;;  %v14466_v21 = vadd.f32 %v11411_v54, %v14408_v44 }
 0x34f   : > { %v14463_v50 = vadd.f32 %v11412_v41, %v14408_v44 }
 0x350   : > { %v14469_v3 = vadd.f32 %v11413_v20, %v14408_v44 }
 0x351   : > { %v10112_v32 = vpack.c.bf16 %v14463_v50, %v14460_v22 }
 0x352   : > { %v10107_v19 = vpack.c.bf16 %v14469_v3, %v14466_v21  ;;  %v11336_v37 = vpop.f32.mrb[12].mxu0 }
 0x353   : > { %10279 = vst [vmem:[%s14430_s11 + $0x28] sm:$0xff] %v10112_v32   ;;  %v11414_v35 = vadd.f32 %v11336_v37, %v14371_v51  ;;  %v8004_v23 = vpop.f32.mrb[13].mxu0 }
 0x354   : > { %10278 = vst [vmem:[%s14430_s11 + $0x20] sm:$0xff] %v10107_v19   ;;  %v11415_v39 = vadd.f32 %v8004_v23, %v14373_v30  ;;  %v11337_v15 = vpop.f32.mrb[14].mxu0 }
 0x355   : > { %v11416_v12 = vadd.f32 %v11337_v15, %v14375_v4  ;;  %v8007_v25 = vpop.f32.mrb[15].mxu0  ;;  %v14482_v1 = vadd.f32 %v11414_v35, %v14408_v44 }
 0x356   : > { %v11417_v60 = vadd.f32 %v8007_v25, %v14377_v13  ;;  %v14488_v24 = vadd.f32 %v11415_v39, %v14408_v44 }
 0x357   : > { %v14485_v31 = vadd.f32 %v11416_v12, %v14408_v44 }
 0x358   : > { %v14491_v51 = vadd.f32 %v11417_v60, %v14408_v44 }
 0x359   : > { %v10122_v30 = vpack.c.bf16 %v14485_v31, %v14482_v1 }
 0x35a   : > { %v10117_v4 = vpack.c.bf16 %v14491_v51, %v14488_v24  ;;  %v11340_v52 = vpop.f32.mrb[16].mxu0 }
 0x35b   : > { %10281 = vst [vmem:[%s14430_s11 + $0x38] sm:$0xff] %v10122_v30   ;;  %v11418_v13 = vadd.f32 %v11340_v52, %v14379_v43  ;;  %v8020_v14 = vpop.f32.mrb[17].mxu0 }
 0x35c   : > { %10280 = vst [vmem:[%s14430_s11 + $0x30] sm:$0xff] %v10117_v4   ;;  %v11419_v0 = vadd.f32 %v8020_v14, %v14381_v49  ;;  %v11341_v40 = vpop.f32.mrb[18].mxu0 }
 0x35d   : > { %v11420_v61 = vadd.f32 %v11341_v40, %v14383_v53  ;;  %v8023_v27 = vpop.f32.mrb[19].mxu0  ;;  %v14504_v16 = vadd.f32 %v11418_v13, %v14408_v44 }
 0x35e   : > { %v11421_v29 = vadd.f32 %v8023_v27, %v14385_v56  ;;  %v14510_v11 = vadd.f32 %v11419_v0, %v14408_v44 }
 0x35f   : > { %v14507_v38 = vadd.f32 %v11420_v61, %v14408_v44 }
 0x360   : > { %v14513_v43 = vadd.f32 %v11421_v29, %v14408_v44 }
 0x361   : > { %v10132_v49 = vpack.c.bf16 %v14507_v38, %v14504_v16 }
 0x362   : > { %v10127_v53 = vpack.c.bf16 %v14513_v43, %v14510_v11  ;;  %v11344_v9 = vpop.f32.mrb[20].mxu0 }
 0x363   : > { %10283 = vst [vmem:[%s14430_s11 + $0x48] sm:$0xff] %v10132_v49   ;;  %v11422_v56 = vadd.f32 %v11344_v9, %v14387_v36  ;;  %v8036_v5 = vpop.f32.mrb[21].mxu0 }
 0x364   : > { %10282 = vst [vmem:[%s14430_s11 + $0x40] sm:$0xff] %v10127_v53   ;;  %v11423_v26 = vadd.f32 %v8036_v5, %v14389_v62  ;;  %v11345_v54 = vpop.f32.mrb[22].mxu0 }
 0x365   : > { %v11424_v58 = vadd.f32 %v11345_v54, %v14391_v55  ;;  %v8039_v41 = vpop.f32.mrb[23].mxu0  ;;  %v14526_v20 = vadd.f32 %v11422_v56, %v14408_v44 }
 0x366   : > { %v11425_v28 = vadd.f32 %v8039_v41, %v14393_v63  ;;  %v14532_v19 = vadd.f32 %v11423_v26, %v14408_v44 }
 0x367   : > { %v14529_v32 = vadd.f32 %v11424_v58, %v14408_v44 }
 0x368   : > { %v14535_v36 = vadd.f32 %v11425_v28, %v14408_v44 }
 0x369   : > { %v10142_v62 = vpack.c.bf16 %v14529_v32, %v14526_v20 }
 0x36a   : > { %v10137_v55 = vpack.c.bf16 %v14535_v36, %v14532_v19  ;;  %v11348_v37 = vpop.f32.mrb[24].mxu0 }
 0x36b   : > { %10285 = vst [vmem:[%s14430_s11 + $0x58] sm:$0xff] %v10142_v62   ;;  %v11426_v63 = vadd.f32 %v11348_v37, %v14395_v2  ;;  %v8052_v35 = vpop.f32.mrb[25].mxu0 }
 0x36c   : > { %10284 = vst [vmem:[%s14430_s11 + $0x50] sm:$0xff] %v10137_v55   ;;  %v11427_v23 = vadd.f32 %v8052_v35, %v14397_v7  ;;  %v11349_v39 = vpop.f32.mrb[26].mxu0 }
 0x36d   : > { %v11428_v15 = vadd.f32 %v11349_v39, %v14399_v6  ;;  %v8055_v12 = vpop.f32.mrb[27].mxu0  ;;  %v14548_v60 = vadd.f32 %v11426_v63, %v14408_v44 }
 0x36e   : > { %v11429_v25 = vadd.f32 %v8055_v12, %v14401_v34  ;;  %v14554_v4 = vadd.f32 %v11427_v23, %v14408_v44 }
 0x36f   : > { %v14551_v30 = vadd.f32 %v11428_v15, %v14408_v44 }
 0x370   : > { %v14557_v2 = vadd.f32 %v11429_v25, %v14408_v44 }
 0x371   : > { %v10152_v7 = vpack.c.bf16 %v14551_v30, %v14548_v60 }
 0x372   : > { %v10147_v6 = vpack.c.bf16 %v14557_v2, %v14554_v4  ;;  %v11352_v52 = vpop.f32.mrb[28].mxu0 }
 0x373   : > { %10287 = vst [vmem:[%s14430_s11 + $0x68] sm:$0xff] %v10152_v7   ;;  %v11430_v34 = vadd.f32 %v11352_v52, %v14403_v57  ;;  %v8068_v13 = vpop.f32.mrb[29].mxu0 }
 0x374   : > { %10286 = vst [vmem:[%s14430_s11 + $0x60] sm:$0xff] %v10147_v6   ;;  %v11431_v14 = vadd.f32 %v8068_v13, %v14410_v59  ;;  %v11353_v0 = vpop.f32.mrb[30].mxu0 }
 0x375   : > { %v11432_v40 = vadd.f32 %v11353_v0, %v14412_v42  ;;  %v8071_v61 = vpop.f32.mrb[31].mxu0  ;;  %v14570_v29 = vadd.f32 %v11430_v34, %v14408_v44 }
 0x376   : > { %v11433_v27 = vadd.f32 %v8071_v61, %v14417_v10  ;;  %v14576_v53 = vadd.f32 %v11431_v14, %v14408_v44 }
 0x377   : > { %v14573_v49 = vadd.f32 %v11432_v40, %v14408_v44 }
 0x378   : > { %v14579_v57 = vadd.f32 %v11433_v27, %v14408_v44 }
 0x379   : > { %v10162_v59 = vpack.c.bf16 %v14573_v49, %v14570_v29 }
 0x37a   : > { %v10157_v42 = vpack.c.bf16 %v14579_v57, %v14576_v53  ;;  %v11356_v9 = vpop.f32.mrb[32].mxu0 }
 0x37b   : > { %10289 = vst [vmem:[%s14430_s11 + $0x78] sm:$0xff] %v10162_v59   ;;  %v8084_v10 = vpop.f32.mrb[33].mxu0 }
 0x37c   : > { %10288 = vst [vmem:[%s14430_s11 + $0x70] sm:$0xff] %v10157_v42   ;;  %v11357_v56 = vpop.f32.mrb[34].mxu0 }
 0x37d   : > { %v8087_v5 = vpop.f32.mrb[35].mxu0 }
 0x382   : > { %v11360_v26 = vpop.f32.mrb[36].mxu0 }
 0x383   : > { %v8100_v54 = vpop.f32.mrb[37].mxu0 }
 0x384   : > { %v11036_v58 = vpop.f32.mrb[32].mxu1  ;;  %v11361_v41 = vpop.f32.mrb[38].mxu0 }
 0x385   : > { %v11434_v28 = vadd.f32 %v11356_v9, %v11036_v58  ;;  %v4723_v62 = vpop.f32.mrb[33].mxu1  ;;  %v8103_v55 = vpop.f32.mrb[39].mxu0 }
 0x386   : > { %v11435_v37 = vadd.f32 %v8084_v10, %v4723_v62  ;;  %v11037_v63 = vpop.f32.mrb[34].mxu1 }
 0x387   : > { %v11436_v35 = vadd.f32 %v11357_v56, %v11037_v63  ;;  %v4726_v23 = vpop.f32.mrb[35].mxu1  ;;  %v14588_v15 = vadd.f32 %v11434_v28, %v14408_v44 }
 0x388   : > { %v11437_v39 = vadd.f32 %v8087_v5, %v4726_v23  ;;  %v14594_v25 = vadd.f32 %v11435_v37, %v14408_v44 }
 0x389   : > { %v14591_v12 = vadd.f32 %v11436_v35, %v14408_v44 }
 0x38a   : > { %v14597_v7 = vadd.f32 %v11437_v39, %v14408_v44  ;;  %v11364_v6 = vpop.f32.mrb[40].mxu0 }
 0x38b   : > { %v10172_v52 = vpack.c.bf16 %v14591_v12, %v14588_v15  ;;  %v8116_v34 = vpop.f32.mrb[41].mxu0 }
 0x38c   : > { %v10167_v13 = vpack.c.bf16 %v14597_v7, %v14594_v25  ;;  %v11040_v14 = vpop.f32.mrb[36].mxu1  ;;  %v11365_v0 = vpop.f32.mrb[42].mxu0 }
 0x38d   : > { %10291 = vst [vmem:[%s14430_s11 + $0x88] sm:$0xff] %v10172_v52   ;;  %v11438_v40 = vadd.f32 %v11360_v26, %v11040_v14  ;;  %v4739_v61 = vpop.f32.mrb[37].mxu1  ;;  %v8119_v27 = vpop.f32.mrb[43].mxu0 }
 0x38e   : > { %10290 = vst [vmem:[%s14430_s11 + $0x80] sm:$0xff] %v10167_v13   ;;  %v11439_v59 = vadd.f32 %v8100_v54, %v4739_v61  ;;  %v11041_v42 = vpop.f32.mrb[38].mxu1 }
 0x38f   : > { %v11440_v9 = vadd.f32 %v11361_v41, %v11041_v42  ;;  %v4742_v10 = vpop.f32.mrb[39].mxu1  ;;  %v14606_v5 = vadd.f32 %v11438_v40, %v14408_v44 }
 0x390   : > { %v11441_v56 = vadd.f32 %v8103_v55, %v4742_v10  ;;  %v14612_v28 = vadd.f32 %v11439_v59, %v14408_v44 }
 0x391   : > { %v14609_v58 = vadd.f32 %v11440_v9, %v14408_v44 }
 0x392   : > { %v14615_v26 = vadd.f32 %v11441_v56, %v14408_v44  ;;  %v11368_v62 = vpop.f32.mrb[44].mxu0 }
 0x393   : > { %v10182_v54 = vpack.c.bf16 %v14609_v58, %v14606_v5  ;;  %v8132_v41 = vpop.f32.mrb[45].mxu0 }
 0x394   : > { %v10177_v55 = vpack.c.bf16 %v14615_v26, %v14612_v28  ;;  %v11044_v37 = vpop.f32.mrb[40].mxu1  ;;  %v11369_v63 = vpop.f32.mrb[46].mxu0 }
 0x395   : > { %10293 = vst [vmem:[%s14430_s11 + $0x98] sm:$0xff] %v10182_v54   ;;  %v11442_v35 = vadd.f32 %v11364_v6, %v11044_v37  ;;  %v4755_v23 = vpop.f32.mrb[41].mxu1  ;;  %v8135_v39 = vpop.f32.mrb[47].mxu0 }
 0x396   : > { %10292 = vst [vmem:[%s14430_s11 + $0x90] sm:$0xff] %v10177_v55   ;;  %v11443_v52 = vadd.f32 %v8116_v34, %v4755_v23  ;;  %v11045_v13 = vpop.f32.mrb[42].mxu1 }
 0x397   : > { %v11444_v14 = vadd.f32 %v11365_v0, %v11045_v13  ;;  %v4758_v40 = vpop.f32.mrb[43].mxu1  ;;  %v14624_v59 = vadd.f32 %v11442_v35, %v14408_v44 }
 0x398   : > { %v11445_v61 = vadd.f32 %v8119_v27, %v4758_v40  ;;  %v14630_v9 = vadd.f32 %v11443_v52, %v14408_v44 }
 0x399   : > { %15171 = vst [vmem:[#allocation4_spill] sm:$0xff] %v14624_v59  ;;  %v14627_v42 = vadd.f32 %v11444_v14, %v14408_v44 }
 0x39a   : > { %v14633_v6 = vadd.f32 %v11445_v61, %v14408_v44  ;;  %v11372_v10 = vpop.f32.mrb[48].mxu0 }
 0x39b   : > { %15172 = vst [vmem:[#allocation5_spill] sm:$0xff] %v14627_v42  ;;  %v10192_v34 = vpack.c.bf16 %v14627_v42, %v14624_v59  ;;  %v8148_v0 = vpop.f32.mrb[49].mxu0 }
 0x39c   : > { %15173 = vst [vmem:[#allocation6_spill] sm:$0xff] %v14633_v6  ;;  %v10187_v27 = vpack.c.bf16 %v14633_v6, %v14630_v9  ;;  %v11048_v56 = vpop.f32.mrb[44].mxu1  ;;  %v11373_v54 = vpop.f32.mrb[50].mxu0 }
 0x39d   : > { %10295 = vst [vmem:[%s14430_s11 + $0xa8] sm:$0xff] %v10192_v34   ;;  %v11446_v55 = vadd.f32 %v11368_v62, %v11048_v56  ;;  %v4771_v37 = vpop.f32.mrb[45].mxu1  ;;  %v8151_v35 = vpop.f32.mrb[51].mxu0 }
 0x39e   : > { %10294 = vst [vmem:[%s14430_s11 + $0xa0] sm:$0xff] %v10187_v27   ;;  %v11447_v23 = vadd.f32 %v8132_v41, %v4771_v37  ;;  %v11049_v52 = vpop.f32.mrb[46].mxu1 }
 0x39f   : > { %v11448_v13 = vadd.f32 %v11369_v63, %v11049_v52  ;;  %v4774_v14 = vpop.f32.mrb[47].mxu1  ;;  %v14642_v61 = vadd.f32 %v11446_v55, %v14408_v44 }
 0x3a0   : > { %v11449_v40 = vadd.f32 %v8135_v39, %v4774_v14  ;;  %v14648_v59 = vadd.f32 %v11447_v23, %v14408_v44 }
 0x3a1   : > { %15174 = vst [vmem:[#allocation12_spill] sm:$0xff] %v14642_v61  ;;  %v14645_v42 = vadd.f32 %v11448_v13, %v14408_v44 }
 0x3a2   : > { %15176 = vst [vmem:[#allocation14_spill] sm:$0xff] %v14648_v59  ;;  %v14651_v62 = vadd.f32 %v11449_v40, %v14408_v44  ;;  %v11376_v34 = vpop.f32.mrb[52].mxu0 }
 0x3a3   : > { %15175 = vst [vmem:[#allocation13_spill] sm:$0xff] %v14645_v42  ;;  %v10202_v41 = vpack.c.bf16 %v14645_v42, %v14642_v61  ;;  %v8164_v63 = vpop.f32.mrb[53].mxu0 }
 0x3a4   : > { %15177 = vst [vmem:[#allocation8_spill] sm:$0xff] %v14651_v62  ;;  %v10197_v39 = vpack.c.bf16 %v14651_v62, %v14648_v59  ;;  %v11052_v27 = vpop.f32.mrb[48].mxu1  ;;  %v11377_v56 = vpop.f32.mrb[54].mxu0 }
 0x3a5   : > { %10297 = vst [vmem:[%s14430_s11 + $0xb8] sm:$0xff] %v10202_v41   ;;  %v11450_v55 = vadd.f32 %v11372_v10, %v11052_v27  ;;  %v4787_v37 = vpop.f32.mrb[49].mxu1  ;;  %v8167_v52 = vpop.f32.mrb[55].mxu0 }
 0x3a6   : > { %10296 = vst [vmem:[%s14430_s11 + $0xb0] sm:$0xff] %v10197_v39   ;;  %v11451_v23 = vadd.f32 %v8148_v0, %v4787_v37  ;;  %v11053_v13 = vpop.f32.mrb[50].mxu1 }
 0x3a7   : > { %v11452_v14 = vadd.f32 %v11373_v54, %v11053_v13  ;;  %v4790_v40 = vpop.f32.mrb[51].mxu1  ;;  %v14660_v42 = vadd.f32 %v11450_v55, %v14408_v44 }
 0x3a8   : > { %v11453_v6 = vadd.f32 %v8151_v35, %v4790_v40  ;;  %v14666_v62 = vadd.f32 %v11451_v23, %v14408_v44 }
 0x3a9   : > { %15178 = vst [vmem:[#allocation9_spill] sm:$0xff] %v14660_v42  ;;  %v14663_v61 = vadd.f32 %v11452_v14, %v14408_v44 }
 0x3aa   : > { %15180 = vst [vmem:[#allocation10_spill] sm:$0xff] %v14666_v62  ;;  %v14669_v10 = vadd.f32 %v11453_v6, %v14408_v44  ;;  %v11380_v41 = vpop.f32.mrb[56].mxu0 }
 0x3ab   : > { %15179 = vst [vmem:[#allocation7_spill] sm:$0xff] %v14663_v61  ;;  %v10212_v0 = vpack.c.bf16 %v14663_v61, %v14660_v42  ;;  %v8180_v54 = vpop.f32.mrb[57].mxu0 }
 0x3ac   : > { %15181 = vst [vmem:[#allocation15_spill] sm:$0xff] %v14669_v10  ;;  %v10207_v35 = vpack.c.bf16 %v14669_v10, %v14666_v62  ;;  %v11056_v39 = vpop.f32.mrb[52].mxu1  ;;  %v11381_v27 = vpop.f32.mrb[58].mxu0 }
 0x3ad   : > { %10299 = vst [vmem:[%s14430_s11 + $0xc8] sm:$0xff] %v10212_v0   ;;  %v11454_v55 = vadd.f32 %v11376_v34, %v11056_v39  ;;  %v4803_v37 = vpop.f32.mrb[53].mxu1  ;;  %v8183_v13 = vpop.f32.mrb[59].mxu0 }
 0x3ae   : > { %10298 = vst [vmem:[%s14430_s11 + $0xc0] sm:$0xff] %v10207_v35   ;;  %v11455_v23 = vadd.f32 %v8164_v63, %v4803_v37  ;;  %v11057_v14 = vpop.f32.mrb[54].mxu1 }
 0x3af   : > { %v11456_v6 = vadd.f32 %v11377_v56, %v11057_v14  ;;  %v4806_v40 = vpop.f32.mrb[55].mxu1  ;;  %v14678_v61 = vadd.f32 %v11454_v55, %v14408_v44 }
 0x3b0   : > { %v11457_v59 = vadd.f32 %v8167_v52, %v4806_v40  ;;  %v14684_v10 = vadd.f32 %v11455_v23, %v14408_v44 }
 0x3b1   : > { %15182 = vst [vmem:[#allocation16_spill] sm:$0xff] %v14678_v61  ;;  %v14681_v42 = vadd.f32 %v11456_v6, %v14408_v44 }
 0x3b2   : > { %v14687_v34 = vadd.f32 %v11457_v59, %v14408_v44  ;;  %v11384_v0 = vpop.f32.mrb[60].mxu0 }
 0x3b3   : > { %15183 = vst [vmem:[#allocation11_spill] sm:$0xff] %v14681_v42  ;;  %v10222_v63 = vpack.c.bf16 %v14681_v42, %v14678_v61  ;;  %v8196_v56 = vpop.f32.mrb[61].mxu0 }
 0x3b4   : > { %15184 = vst [vmem:[#allocation19_spill] sm:$0xff] %v14687_v34  ;;  %v10217_v52 = vpack.c.bf16 %v14687_v34, %v14684_v10  ;;  %v11060_v35 = vpop.f32.mrb[56].mxu1  ;;  %v11385_v39 = vpop.f32.mrb[62].mxu0 }
 0x3b5   : > { %10301 = vst [vmem:[%s14430_s11 + $0xd8] sm:$0xff] %v10222_v63   ;;  %v11458_v55 = vadd.f32 %v11380_v41, %v11060_v35  ;;  %v4819_v37 = vpop.f32.mrb[57].mxu1  ;;  %v8199_v14 = vpop.f32.mrb[63].mxu0 }
 0x3b6   : > { %10300 = vst [vmem:[%s14430_s11 + $0xd0] sm:$0xff] %v10217_v52   ;;  %v11459_v23 = vadd.f32 %v8180_v54, %v4819_v37  ;;  %v11061_v59 = vpop.f32.mrb[58].mxu1 }
 0x3b7   : > { %v11460_v6 = vadd.f32 %v11381_v27, %v11061_v59  ;;  %v4822_v40 = vpop.f32.mrb[59].mxu1  ;;  %v14696_v42 = vadd.f32 %v11458_v55, %v14408_v44 }
 0x3b8   : > { %v11461_v62 = vadd.f32 %v8183_v13, %v4822_v40  ;;  %v14702_v34 = vadd.f32 %v11459_v23, %v14408_v44 }
 0x3b9   : > { %15185 = vst [vmem:[#allocation17_spill] sm:$0xff] %v14696_v42  ;;  %v14699_v61 = vadd.f32 %v11460_v6, %v14408_v44 }
 0x3ba   : > { %v14705_v41 = vadd.f32 %v11461_v62, %v14408_v44 }
 0x3bb   : > { %15186 = vst [vmem:[#allocation20_spill] sm:$0xff] %v14699_v61  ;;  %v10232_v63 = vpack.c.bf16 %v14699_v61, %v14696_v42 }
 0x3bc   : > { %v10227_v54 = vpack.c.bf16 %v14705_v41, %v14702_v34  ;;  %v11064_v27 = vpop.f32.mrb[60].mxu1 }
 0x3bd   : > { %10303 = vst [vmem:[%s14430_s11 + $0xe8] sm:$0xff] %v10232_v63   ;;  %v11462_v13 = vadd.f32 %v11384_v0, %v11064_v27  ;;  %v4835_v52 = vpop.f32.mrb[61].mxu1 }
 0x3be   : > { %10302 = vst [vmem:[%s14430_s11 + $0xe0] sm:$0xff] %v10227_v54   ;;  %v11463_v35 = vadd.f32 %v8196_v56, %v4835_v52  ;;  %v11065_v55 = vpop.f32.mrb[62].mxu1 }
 0x3bf   : > { %v11464_v37 = vadd.f32 %v11385_v39, %v11065_v55  ;;  %v4838_v23 = vpop.f32.mrb[63].mxu1  ;;  %v14714_v62 = vadd.f32 %v11462_v13, %v14408_v44  ;;  %v12025_v39 = vmov (!%p9888_p5), 0.0  }
 0x3c0   : > { %v11465_v59 = vadd.f32 %v8199_v14, %v4838_v23  ;;  %v14720_v40 = vadd.f32 %v11463_v35, %v14408_v44  ;;  %8861 = sbr.rel (%p9888_p5) target bundleno = 967 (0x3c7), region = 52  ;;  %8862 = vst [vmem:[%s14883_s8] sm:$0xff] (!%p9888_p5), %v12025_v39 }
 0x3c1   : > { %15187 = vst [vmem:[#allocation18_spill] sm:$0xff] %v14714_v62  ;;  %v14717_v6 = vadd.f32 %v11464_v37, %v14408_v44 }
 0x3c2   : > { %15189 = vst [vmem:[#allocation22_spill] sm:$0xff] %v14720_v40  ;;  %v14723_v63 = vadd.f32 %v11465_v59, %v14408_v44 }
 0x3c3   : > { %15188 = vst [vmem:[#allocation21_spill] sm:$0xff] %v14717_v6  ;;  %v10242_v0 = vpack.c.bf16 %v14717_v6, %v14714_v62 }
 0x3c4   : > { %15190 = vst [vmem:[#allocation23_spill] sm:$0xff] %v14723_v63  ;;  %v10237_v56 = vpack.c.bf16 %v14723_v63, %v14720_v40 }
 0x3c5   : > { %10305 = vst [vmem:[%s14430_s11 + $0xf8] sm:$0xff] %v10242_v0  }
 0x3c6   : > { %10304 = vst [vmem:[%s14430_s11 + $0xf0] sm:$0xff] %v10237_v56  }
 0x3c7 PF: > { %v15191_v14 = vmov 0   ;;  %v8865_v44 = vld [vmem:[%s12102_s19 + $0x10] sm:$0xff]  ;;  %v8863_v54 = vld [vmem:[%s12102_s19] sm:$0xff]  ;;  %v8866_v27 = vld [vmem:[%s12102_s19 + $0x18] sm:$0xff] }
 0x3c8   : > { %12015 = vset.pattern.permute.xlu1 %v15191_v14  ;;  %12014 = vset.pattern.permute.xlu0 %v15191_v14  ;;  %v8864_v13 = vld [vmem:[%s12102_s19 + $0x8] sm:$0xff]  ;;  %v8867_v35 = vld [vmem:[%s12102_s19 + $0x20] sm:$0xff]  ;;  %v8870_v55 = vld [vmem:[%s12102_s19 + $0x38] sm:$0xff] }
 0x3c9   : > { %8939 = vperm.xlu1 %12015, %v8865_v44   ;;  %8929 = vperm.xlu0 %12014, %v8863_v54   ;;  %v8868_v52 = vld [vmem:[%s12102_s19 + $0x28] sm:$0xff]  ;;  %v8869_v37 = vld [vmem:[%s12102_s19 + $0x30] sm:$0xff]  ;;  %v8871_v59 = vld [vmem:[%s12102_s19 + $0x40] sm:$0xff] }
 0x3ca   : > { %v8872_v23 = vld [vmem:[%s12102_s19 + $0x48] sm:$0xff]  ;;  %v8874_v0 = vld [vmem:[%s12102_s19 + $0x58] sm:$0xff]  ;;  %v8873_v56 = vld [vmem:[%s12102_s19 + $0x50] sm:$0xff] }
 0x3cb   : > { %v8876_v39 = vld [vmem:[%s12102_s19 + $0x68] sm:$0xff]  ;;  %v8875_v14 = vld [vmem:[%s12102_s19 + $0x60] sm:$0xff]  ;;  %v8878_v44 = vld [vmem:[%s12102_s19 + $0x78] sm:$0xff] }
 0x3cc   : > { %v8877_v54 = vld [vmem:[%s12102_s19 + $0x70] sm:$0xff] }
 0x3cd   : > { %8944 = vperm.xlu1 %12015, %v8866_v27   ;;  %8934 = vperm.xlu0 %12014, %v8864_v13   ;;  %v8880_v27 = vld [vmem:[%s12102_s19 + $0x88] sm:$0xff]  ;;  %v8879_v13 = vld [vmem:[%s12102_s19 + $0x80] sm:$0xff] }
 0x3d1   : > { %8954 = vperm.xlu1 %12015, %v8868_v52   ;;  %8949 = vperm.xlu0 %12014, %v8867_v35   ;;  %v8882_v52 = vld [vmem:[%s12102_s19 + $0x98] sm:$0xff]  ;;  %v8881_v35 = vld [vmem:[%s12102_s19 + $0x90] sm:$0xff] }
 0x3d5   : > { %8964 = vperm.xlu1 %12015, %v8870_v55   ;;  %8959 = vperm.xlu0 %12014, %v8869_v37   ;;  %v8884_v55 = vld [vmem:[%s12102_s19 + $0xa8] sm:$0xff]  ;;  %v8883_v37 = vld [vmem:[%s12102_s19 + $0xa0] sm:$0xff] }
 0x3d9   : > { %8974 = vperm.xlu1 %12015, %v8872_v23   ;;  %8969 = vperm.xlu0 %12014, %v8871_v59   ;;  %v8886_v23 = vld [vmem:[%s12102_s19 + $0xb8] sm:$0xff]  ;;  %v8885_v59 = vld [vmem:[%s12102_s19 + $0xb0] sm:$0xff] }
 0x3dd   : > { %8984 = vperm.xlu1 %12015, %v8874_v0   ;;  %8979 = vperm.xlu0 %12014, %v8873_v56   ;;  %v8888_v0 = vld [vmem:[%s12102_s19 + $0xc8] sm:$0xff]  ;;  %v8887_v56 = vld [vmem:[%s12102_s19 + $0xc0] sm:$0xff] }
 0x3e1   : > { %8994 = vperm.xlu1 %12015, %v8876_v39   ;;  %8989 = vperm.xlu0 %12014, %v8875_v14   ;;  %v8890_v39 = vld [vmem:[%s12102_s19 + $0xd8] sm:$0xff]  ;;  %v8889_v14 = vld [vmem:[%s12102_s19 + $0xd0] sm:$0xff] }
 0x3e5   : > { %9004 = vperm.xlu1 %12015, %v8878_v44   ;;  %8999 = vperm.xlu0 %12014, %v8877_v54   ;;  %v8892_v44 = vld [vmem:[%s12102_s19 + $0xe8] sm:$0xff]  ;;  %v8891_v54 = vld [vmem:[%s12102_s19 + $0xe0] sm:$0xff] }
 0x3e9   : > { %9014 = vperm.xlu1 %12015, %v8880_v27   ;;  %9009 = vperm.xlu0 %12014, %v8879_v13   ;;  %v8894_v27 = vld [vmem:[%s12102_s19 + $0xf8] sm:$0xff]  ;;  %v8893_v13 = vld [vmem:[%s12102_s19 + $0xf0] sm:$0xff] }
 0x3ed   : > { %9024 = vperm.xlu1 %12015, %v8882_v52   ;;  %9019 = vperm.xlu0 %12014, %v8881_v35   ;;  %v8896_v52 = vld [vmem:[%s12102_s19 + $0x108] sm:$0xff]  ;;  %v8895_v35 = vld [vmem:[%s12102_s19 + $0x100] sm:$0xff] }
 0x3f1   : > { %9034 = vperm.xlu1 %12015, %v8884_v55   ;;  %9029 = vperm.xlu0 %12014, %v8883_v37   ;;  %v8898_v55 = vld [vmem:[%s12102_s19 + $0x118] sm:$0xff]  ;;  %v8897_v37 = vld [vmem:[%s12102_s19 + $0x110] sm:$0xff] }
 0x3f5   : > { %9044 = vperm.xlu1 %12015, %v8886_v23   ;;  %9039 = vperm.xlu0 %12014, %v8885_v59   ;;  %v8900_v23 = vld [vmem:[%s12102_s19 + $0x128] sm:$0xff]  ;;  %v8899_v59 = vld [vmem:[%s12102_s19 + $0x120] sm:$0xff] }
 0x3f9   : > { %9054 = vperm.xlu1 %12015, %v8888_v0   ;;  %9049 = vperm.xlu0 %12014, %v8887_v56   ;;  %v8902_v0 = vld [vmem:[%s12102_s19 + $0x138] sm:$0xff]  ;;  %v8901_v56 = vld [vmem:[%s12102_s19 + $0x130] sm:$0xff] }
 0x3fd   : > { %9064 = vperm.xlu1 %12015, %v8890_v39   ;;  %9059 = vperm.xlu0 %12014, %v8889_v14   ;;  %v8904_v39 = vld [vmem:[%s12102_s19 + $0x148] sm:$0xff]  ;;  %v8903_v14 = vld [vmem:[%s12102_s19 + $0x140] sm:$0xff] }
 0x401   : > { %9074 = vperm.xlu1 %12015, %v8892_v44   ;;  %9069 = vperm.xlu0 %12014, %v8891_v54   ;;  %v8906_v44 = vld [vmem:[%s12102_s19 + $0x158] sm:$0xff]  ;;  %v8905_v54 = vld [vmem:[%s12102_s19 + $0x150] sm:$0xff] }
 0x405   : > { %9084 = vperm.xlu1 %12015, %v8894_v27   ;;  %9079 = vperm.xlu0 %12014, %v8893_v13   ;;  %v8908_v27 = vld [vmem:[%s12102_s19 + $0x168] sm:$0xff]  ;;  %v8907_v13 = vld [vmem:[%s12102_s19 + $0x160] sm:$0xff] }
 0x409   : > { %9094 = vperm.xlu1 %12015, %v8896_v52   ;;  %9089 = vperm.xlu0 %12014, %v8895_v35   ;;  %v8910_v52 = vld [vmem:[%s12102_s19 + $0x178] sm:$0xff]  ;;  %v8909_v35 = vld [vmem:[%s12102_s19 + $0x170] sm:$0xff] }
 0x40d   : > { %9104 = vperm.xlu1 %12015, %v8898_v55   ;;  %9099 = vperm.xlu0 %12014, %v8897_v37   ;;  %v8912_v55 = vld [vmem:[%s12102_s19 + $0x188] sm:$0xff]  ;;  %v8911_v37 = vld [vmem:[%s12102_s19 + $0x180] sm:$0xff] }
 0x411   : > { %9114 = vperm.xlu1 %12015, %v8900_v23   ;;  %9109 = vperm.xlu0 %12014, %v8899_v59   ;;  %v8914_v23 = vld [vmem:[%s12102_s19 + $0x198] sm:$0xff]  ;;  %v8913_v59 = vld [vmem:[%s12102_s19 + $0x190] sm:$0xff] }
 0x415   : > { %9124 = vperm.xlu1 %12015, %v8902_v0   ;;  %9119 = vperm.xlu0 %12014, %v8901_v56   ;;  %v8916_v0 = vld [vmem:[%s12102_s19 + $0x1a8] sm:$0xff]  ;;  %v8915_v56 = vld [vmem:[%s12102_s19 + $0x1a0] sm:$0xff] }
 0x419   : > { %9134 = vperm.xlu1 %12015, %v8904_v39   ;;  %9129 = vperm.xlu0 %12014, %v8903_v14   ;;  %v8918_v39 = vld [vmem:[%s12102_s19 + $0x1b8] sm:$0xff]  ;;  %v8917_v14 = vld [vmem:[%s12102_s19 + $0x1b0] sm:$0xff] }
 0x41d   : > { %9144 = vperm.xlu1 %12015, %v8906_v44   ;;  %9139 = vperm.xlu0 %12014, %v8905_v54   ;;  %v8920_v44 = vld [vmem:[%s12102_s19 + $0x1c8] sm:$0xff]  ;;  %v8919_v54 = vld [vmem:[%s12102_s19 + $0x1c0] sm:$0xff] }
 0x421   : > { %9154 = vperm.xlu1 %12015, %v8908_v27   ;;  %9149 = vperm.xlu0 %12014, %v8907_v13   ;;  %v8922_v27 = vld [vmem:[%s12102_s19 + $0x1d8] sm:$0xff]  ;;  %v8921_v13 = vld [vmem:[%s12102_s19 + $0x1d0] sm:$0xff] }
 0x425   : > { %9164 = vperm.xlu1 %12015, %v8910_v52   ;;  %9159 = vperm.xlu0 %12014, %v8909_v35   ;;  %v8924_v52 = vld [vmem:[%s12102_s19 + $0x1e8] sm:$0xff]  ;;  %v8923_v35 = vld [vmem:[%s12102_s19 + $0x1e0] sm:$0xff] }
 0x429   : > { %9174 = vperm.xlu1 %12015, %v8912_v55   ;;  %9169 = vperm.xlu0 %12014, %v8911_v37   ;;  %v8926_v55 = vld [vmem:[%s12102_s19 + $0x1f8] sm:$0xff]  ;;  %v8925_v37 = vld [vmem:[%s12102_s19 + $0x1f0] sm:$0xff] }
 0x42d   : > { %9184 = vperm.xlu1 %12015, %v8914_v23   ;;  %9179 = vperm.xlu0 %12014, %v8913_v59  }
 0x431   : > { %9194 = vperm.xlu1 %12015, %v8916_v0   ;;  %9189 = vperm.xlu0 %12014, %v8915_v56  }
 0x435   : > { %9204 = vperm.xlu1 %12015, %v8918_v39   ;;  %9199 = vperm.xlu0 %12014, %v8917_v14  }
 0x439   : > { %9214 = vperm.xlu1 %12015, %v8920_v44   ;;  %9209 = vperm.xlu0 %12014, %v8919_v54  }
 0x43d   : > { %9224 = vperm.xlu1 %12015, %v8922_v27   ;;  %9219 = vperm.xlu0 %12014, %v8921_v13  }
 0x441   : > { %9234 = vperm.xlu1 %12015, %v8924_v52   ;;  %9229 = vperm.xlu0 %12014, %v8923_v35  }
 0x445   : > { %9244 = vperm.xlu1 %12015, %v8926_v55   ;;  %9239 = vperm.xlu0 %12014, %v8925_v37  }
 0x448   : > { %v8940_v23 = vpop.permute.xlu1 %8939  ;;  %v8930_v59 = vpop.permute.xlu0 %8929 }
 0x449   : > { %v9247_v0 = vmul.f32 %v8930_v59, %v14423_v17  ;;  %v9249_v14 = vmul.f32 %v8940_v23, %v14415_v48 }
 0x44b   : > { %v9381_v54 = vmul.f32 %v9247_v0, %v9247_v0  ;;  %v9383_v62 = vmul.f32 %v9249_v14, %v9249_v14 }
 0x44c   : > { %v8945_v56 = vpop.permute.xlu1 %8944  ;;  %v8935_v39 = vpop.permute.xlu0 %8934 }
 0x44d   : > { %v9248_v44 = vmul.f32 %v8935_v39, %v14433_v18  ;;  %v9250_v27 = vmul.f32 %v8945_v56, %v14420_v46 }
 0x44f   : > { %v9312_v13 = vadd.f32 %v9248_v44, %v9247_v0  ;;  %v9382_v52 = vmul.f32 %v9248_v44, %v9248_v44  ;;  %v9384_v40 = vmul.f32 %v9250_v27, %v9250_v27 }
 0x450   : > { %v8955_v35 = vpop.permute.xlu1 %8954  ;;  %v8950_v6 = vpop.permute.xlu0 %8949 }
 0x451   : > { %v9313_v55 = vadd.f32 %v9312_v13, %v9249_v14  ;;  %v9445_v37 = vadd.f32 %v9382_v52, %v9381_v54  ;;  %v9251_v63 = vmul.f32 %v8950_v6, %v14448_v33  ;;  %v9252_v59 = vmul.f32 %v8955_v35, %v14451_v47 }
 0x453   : > { %v9446_v17 = vadd.f32 %v9445_v37, %v9383_v62  ;;  %v9314_v61 = vadd.f32 %v9313_v55, %v9250_v27  ;;  %v9385_v42 = vmul.f32 %v9251_v63, %v9251_v63  ;;  %v9386_v0 = vmul.f32 %v9252_v59, %v9252_v59 }
 0x454   : > { %v8965_v48 = vpop.permute.xlu1 %8964  ;;  %v8960_v23 = vpop.permute.xlu0 %8959 }
 0x455   : > { %v9447_v18 = vadd.f32 %v9446_v17, %v9384_v40  ;;  %v9315_v39 = vadd.f32 %v9314_v61, %v9251_v63  ;;  %v9253_v46 = vmul.f32 %v8960_v23, %v14442_v8  ;;  %v9254_v44 = vmul.f32 %v8965_v48, %v14445_v45 }
 0x457   : > { %v9448_v56 = vadd.f32 %v9447_v18, %v9385_v42  ;;  %v9316_v14 = vadd.f32 %v9315_v39, %v9252_v59  ;;  %v9387_v62 = vmul.f32 %v9253_v46, %v9253_v46  ;;  %v9388_v27 = vmul.f32 %v9254_v44, %v9254_v44 }
 0x458   : > { %v8975_v54 = vpop.permute.xlu1 %8974  ;;  %v8970_v13 = vpop.permute.xlu0 %8969 }
 0x459   : > { %v9449_v33 = vadd.f32 %v9448_v56, %v9386_v0  ;;  %v9317_v6 = vadd.f32 %v9316_v14, %v9253_v46  ;;  %v9255_v47 = vmul.f32 %v8970_v13, %v14466_v21  ;;  %v9256_v40 = vmul.f32 %v8975_v54, %v14469_v3 }
 0x45b   : > { %v9450_v52 = vadd.f32 %v9449_v33, %v9387_v62  ;;  %v9318_v61 = vadd.f32 %v9317_v6, %v9254_v44  ;;  %v9389_v42 = vmul.f32 %v9255_v47, %v9255_v47  ;;  %v9390_v37 = vmul.f32 %v9256_v40, %v9256_v40 }
 0x45c   : > { %v8985_v63 = vpop.permute.xlu1 %8984  ;;  %v8980_v35 = vpop.permute.xlu0 %8979 }
 0x45d   : > { %v9451_v8 = vadd.f32 %v9450_v52, %v9388_v27  ;;  %v9319_v55 = vadd.f32 %v9318_v61, %v9255_v47  ;;  %v9257_v45 = vmul.f32 %v8980_v35, %v14460_v22  ;;  %v9258_v59 = vmul.f32 %v8985_v63, %v14463_v50 }
 0x45f   : > { %v9452_v17 = vadd.f32 %v9451_v8, %v9389_v42  ;;  %v9320_v48 = vadd.f32 %v9319_v55, %v9256_v40  ;;  %v9391_v46 = vmul.f32 %v9257_v45, %v9257_v45  ;;  %v9392_v0 = vmul.f32 %v9258_v59, %v9258_v59 }
 0x460   : > { %v8995_v23 = vpop.permute.xlu1 %8994  ;;  %v8990_v18 = vpop.permute.xlu0 %8989 }
 0x461   : > { %v9453_v21 = vadd.f32 %v9452_v17, %v9390_v37  ;;  %v9321_v39 = vadd.f32 %v9320_v48, %v9257_v45  ;;  %v9259_v3 = vmul.f32 %v8990_v18, %v14488_v24  ;;  %v9260_v44 = vmul.f32 %v8995_v23, %v14491_v51 }
 0x463   : > { %v9454_v56 = vadd.f32 %v9453_v21, %v9391_v46  ;;  %v9322_v14 = vadd.f32 %v9321_v39, %v9258_v59  ;;  %v9393_v6 = vmul.f32 %v9259_v3, %v9259_v3  ;;  %v9394_v62 = vmul.f32 %v9260_v44, %v9260_v44 }
 0x464   : > { %v9005_v54 = vpop.permute.xlu1 %9004  ;;  %v9000_v13 = vpop.permute.xlu0 %8999 }
 0x465   : > { %v9455_v22 = vadd.f32 %v9454_v56, %v9392_v0  ;;  %v9323_v33 = vadd.f32 %v9322_v14, %v9259_v3  ;;  %v9261_v50 = vmul.f32 %v9000_v13, %v14482_v1  ;;  %v9262_v27 = vmul.f32 %v9005_v54, %v14485_v31 }
 0x467   : > { %v9456_v47 = vadd.f32 %v9455_v22, %v9393_v6  ;;  %v9324_v52 = vadd.f32 %v9323_v33, %v9260_v44  ;;  %v9395_v35 = vmul.f32 %v9261_v50, %v9261_v50  ;;  %v9396_v8 = vmul.f32 %v9262_v27, %v9262_v27 }
 0x468   : > { %v9015_v40 = vpop.permute.xlu1 %9014  ;;  %v9010_v61 = vpop.permute.xlu0 %9009 }
 0x469   : > { %v9457_v24 = vadd.f32 %v9456_v47, %v9394_v62  ;;  %v9325_v63 = vadd.f32 %v9324_v52, %v9261_v50  ;;  %v9263_v51 = vmul.f32 %v9010_v61, %v14510_v11  ;;  %v9264_v42 = vmul.f32 %v9015_v40, %v14513_v43 }
 0x46b   : > { %v9458_v55 = vadd.f32 %v9457_v24, %v9395_v35  ;;  %v9326_v45 = vadd.f32 %v9325_v63, %v9262_v27  ;;  %v9397_v48 = vmul.f32 %v9263_v51, %v9263_v51  ;;  %v9398_v23 = vmul.f32 %v9264_v42, %v9264_v42 }
 0x46c   : > { %v9025_v37 = vpop.permute.xlu1 %9024  ;;  %v9020_v17 = vpop.permute.xlu0 %9019 }
 0x46d   : > { %v9459_v1 = vadd.f32 %v9458_v55, %v9396_v8  ;;  %v9327_v59 = vadd.f32 %v9326_v45, %v9263_v51  ;;  %v9265_v31 = vmul.f32 %v9020_v17, %v14504_v16  ;;  %v9266_v21 = vmul.f32 %v9025_v37, %v14507_v38 }
 0x46f   : > { %v9460_v18 = vadd.f32 %v9459_v1, %v9397_v48  ;;  %v9328_v39 = vadd.f32 %v9327_v59, %v9264_v42  ;;  %v9399_v56 = vmul.f32 %v9265_v31, %v9265_v31  ;;  %v9400_v44 = vmul.f32 %v9266_v21, %v9266_v21 }
 0x470   : > { %v9035_v46 = vpop.permute.xlu1 %9034  ;;  %v9030_v3 = vpop.permute.xlu0 %9029 }
 0x471   : > { %v9461_v11 = vadd.f32 %v9460_v18, %v9398_v23  ;;  %v9329_v0 = vadd.f32 %v9328_v39, %v9265_v31  ;;  %v9267_v43 = vmul.f32 %v9030_v3, %v14532_v19  ;;  %v9268_v54 = vmul.f32 %v9035_v46, %v14535_v36 }
 0x473   : > { %v9462_v14 = vadd.f32 %v9461_v11, %v9399_v56  ;;  %v9330_v13 = vadd.f32 %v9329_v0, %v9266_v21  ;;  %v9401_v50 = vmul.f32 %v9267_v43, %v9267_v43  ;;  %v9402_v62 = vmul.f32 %v9268_v54, %v9268_v54 }
 0x474   : > { %v9045_v22 = vpop.permute.xlu1 %9044  ;;  %v9040_v33 = vpop.permute.xlu0 %9039 }
 0x475   : > { %v9463_v16 = vadd.f32 %v9462_v14, %v9400_v44  ;;  %v9331_v6 = vadd.f32 %v9330_v13, %v9267_v43  ;;  %v9269_v38 = vmul.f32 %v9040_v33, %v14526_v20  ;;  %v9270_v27 = vmul.f32 %v9045_v22, %v14529_v32 }
 0x477   : > { %v9464_v47 = vadd.f32 %v9463_v16, %v9401_v50  ;;  %v9332_v52 = vadd.f32 %v9331_v6, %v9268_v54  ;;  %v9403_v63 = vmul.f32 %v9269_v38, %v9269_v38  ;;  %v9404_v35 = vmul.f32 %v9270_v27, %v9270_v27 }
 0x478   : > { %v9055_v40 = vpop.permute.xlu1 %9054  ;;  %v9050_v61 = vpop.permute.xlu0 %9049 }
 0x479   : > { %v9465_v19 = vadd.f32 %v9464_v47, %v9402_v62  ;;  %v9333_v24 = vadd.f32 %v9332_v52, %v9269_v38  ;;  %v9271_v36 = vmul.f32 %v9050_v61, %v14554_v4  ;;  %v9272_v8 = vmul.f32 %v9055_v40, %v14557_v2 }
 0x47b   : > { %v9466_v51 = vadd.f32 %v9465_v19, %v9403_v63  ;;  %v9334_v55 = vadd.f32 %v9333_v24, %v9270_v27  ;;  %v9405_v17 = vmul.f32 %v9271_v36, %v9271_v36  ;;  %v9406_v1 = vmul.f32 %v9272_v8, %v9272_v8 }
 0x47c   : > { %v9065_v42 = vpop.permute.xlu1 %9064  ;;  %v9060_v45 = vpop.permute.xlu0 %9059 }
 0x47d   : > { %v9467_v20 = vadd.f32 %v9466_v51, %v9404_v35  ;;  %v9335_v37 = vadd.f32 %v9334_v55, %v9271_v36  ;;  %v9273_v32 = vmul.f32 %v9060_v45, %v14548_v60  ;;  %v9274_v48 = vmul.f32 %v9065_v42, %v14551_v30 }
 0x47f   : > { %v9468_v59 = vadd.f32 %v9467_v20, %v9405_v17  ;;  %v9336_v31 = vadd.f32 %v9335_v37, %v9272_v8  ;;  %v9407_v39 = vmul.f32 %v9273_v32, %v9273_v32  ;;  %v9408_v46 = vmul.f32 %v9274_v48, %v9274_v48 }
 0x480   : > { %v9075_v23 = vpop.permute.xlu1 %9074  ;;  %v9070_v18 = vpop.permute.xlu0 %9069 }
 0x481   : > { %v9469_v4 = vadd.f32 %v9468_v59, %v9406_v1  ;;  %v9337_v21 = vadd.f32 %v9336_v31, %v9273_v32  ;;  %v9275_v2 = vmul.f32 %v9070_v18, %v14576_v53  ;;  %v9276_v11 = vmul.f32 %v9075_v23, %v14579_v57 }
 0x483   : > { %v9470_v3 = vadd.f32 %v9469_v4, %v9407_v39  ;;  %v9338_v0 = vadd.f32 %v9337_v21, %v9274_v48  ;;  %v9409_v14 = vmul.f32 %v9275_v2, %v9275_v2  ;;  %v9410_v54 = vmul.f32 %v9276_v11, %v9276_v11 }
 0x484   : > { %v9085_v56 = vpop.permute.xlu1 %9084  ;;  %v9080_v43 = vpop.permute.xlu0 %9079 }
 0x485   : > { %v9471_v60 = vadd.f32 %v9470_v3, %v9408_v46  ;;  %v9339_v44 = vadd.f32 %v9338_v0, %v9275_v2  ;;  %v9277_v30 = vmul.f32 %v9080_v43, %v14570_v29  ;;  %v9278_v22 = vmul.f32 %v9085_v56, %v14573_v49  ;;  %v15192_v56 = vld [vmem:[#allocation6_spill] sm:$0xff] }
 0x487   : > { %v9472_v13 = vadd.f32 %v9471_v60, %v9409_v14  ;;  %v9340_v33 = vadd.f32 %v9339_v44, %v9276_v11  ;;  %v9411_v38 = vmul.f32 %v9277_v30, %v9277_v30  ;;  %v9412_v62 = vmul.f32 %v9278_v22, %v9278_v22 }
 0x488   : > { %v9095_v16 = vpop.permute.xlu1 %9094  ;;  %v9090_v6 = vpop.permute.xlu0 %9089 }
 0x489   : > { %v9473_v53 = vadd.f32 %v9472_v13, %v9410_v54  ;;  %v9341_v50 = vadd.f32 %v9340_v33, %v9277_v30  ;;  %v9279_v57 = vmul.f32 %v9090_v6, %v14594_v25  ;;  %v9280_v27 = vmul.f32 %v9095_v16, %v14597_v7  ;;  %v15193_v13 = vld [vmem:[#allocation4_spill] sm:$0xff]  ;;  %v15194_v16 = vld [vmem:[#allocation5_spill] sm:$0xff] }
 0x48b   : > { %v9474_v47 = vadd.f32 %v9473_v53, %v9411_v38  ;;  %v9342_v52 = vadd.f32 %v9341_v50, %v9278_v22  ;;  %v9413_v24 = vmul.f32 %v9279_v57, %v9279_v57  ;;  %v9414_v63 = vmul.f32 %v9280_v27, %v9280_v27 }
 0x48c   : > { %v9105_v40 = vpop.permute.xlu1 %9104  ;;  %v9100_v61 = vpop.permute.xlu0 %9099 }
 0x48d   : > { %v9475_v29 = vadd.f32 %v9474_v47, %v9412_v62  ;;  %v9343_v19 = vadd.f32 %v9342_v52, %v9279_v57  ;;  %v9281_v49 = vmul.f32 %v9100_v61, %v14588_v15  ;;  %v9282_v35 = vmul.f32 %v9105_v40, %v14591_v12  ;;  %v15195_v47 = vld [vmem:[#allocation14_spill] sm:$0xff]  ;;  %v15196_v61 = vld [vmem:[#allocation8_spill] sm:$0xff] }
 0x48f   : > { %v9476_v36 = vadd.f32 %v9475_v29, %v9413_v24  ;;  %v9344_v51 = vadd.f32 %v9343_v19, %v9280_v27  ;;  %v9415_v45 = vmul.f32 %v9281_v49, %v9281_v49  ;;  %v9416_v20 = vmul.f32 %v9282_v35, %v9282_v35 }
 0x490   : > { %v9115_v8 = vpop.permute.xlu1 %9114  ;;  %v9110_v55 = vpop.permute.xlu0 %9109 }
 0x491   : > { %v9477_v25 = vadd.f32 %v9476_v36, %v9414_v63  ;;  %v9345_v42 = vadd.f32 %v9344_v51, %v9281_v49  ;;  %v9283_v7 = vmul.f32 %v9110_v55, %v14612_v28  ;;  %v9284_v17 = vmul.f32 %v9115_v8, %v14615_v26  ;;  %v15197_v51 = vld [vmem:[#allocation12_spill] sm:$0xff] }
 0x493   : > { %v9478_v37 = vadd.f32 %v9477_v25, %v9415_v45  ;;  %v9346_v32 = vadd.f32 %v9345_v42, %v9282_v35  ;;  %v9417_v31 = vmul.f32 %v9283_v7, %v9283_v7  ;;  %v9418_v23 = vmul.f32 %v9284_v17, %v9284_v17  ;;  %v15198_v42 = vld [vmem:[#allocation13_spill] sm:$0xff] }
 0x494   : > { %v9125_v1 = vpop.permute.xlu1 %9124  ;;  %v9120_v59 = vpop.permute.xlu0 %9119 }
 0x495   : > { %v9479_v15 = vadd.f32 %v9478_v37, %v9416_v20  ;;  %v9347_v48 = vadd.f32 %v9346_v32, %v9283_v7  ;;  %v9285_v12 = vmul.f32 %v9120_v59, %v14606_v5  ;;  %v9286_v4 = vmul.f32 %v9125_v1, %v14609_v58  ;;  %v15199_v59 = vld [vmem:[#allocation10_spill] sm:$0xff] }
 0x497   : > { %v9480_v18 = vadd.f32 %v9479_v15, %v9417_v31  ;;  %v9348_v21 = vadd.f32 %v9347_v48, %v9284_v17  ;;  %v9419_v3 = vmul.f32 %v9285_v12, %v9285_v12  ;;  %v9420_v11 = vmul.f32 %v9286_v4, %v9286_v4 }
 0x498   : > { %v9135_v39 = vpop.permute.xlu1 %9134  ;;  %v9130_v2 = vpop.permute.xlu0 %9129 }
 0x499   : > { %v9481_v28 = vadd.f32 %v9480_v18, %v9418_v23  ;;  %v9349_v46 = vadd.f32 %v9348_v21, %v9285_v12  ;;  %v9287_v26 = vmul.f32 %v9130_v2, %v14630_v9  ;;  %v9288_v43 = vmul.f32 %v9135_v39, %v15192_v56  ;;  %v15200_v12 = vld [vmem:[#allocation15_spill] sm:$0xff] }
 0x49b   : > { %v9482_v0 = vadd.f32 %v9481_v28, %v9419_v3  ;;  %v9350_v60 = vadd.f32 %v9349_v46, %v9286_v4  ;;  %v9421_v54 = vmul.f32 %v9287_v26, %v9287_v26  ;;  %v9422_v22 = vmul.f32 %v9288_v43, %v9288_v43  ;;  %v15201_v46 = vld [vmem:[#allocation9_spill] sm:$0xff] }
 0x49c   : > { %v9145_v44 = vpop.permute.xlu1 %9144  ;;  %v9140_v14 = vpop.permute.xlu0 %9139 }
 0x49d   : > { %v9483_v5 = vadd.f32 %v9482_v0, %v9420_v11  ;;  %v9351_v30 = vadd.f32 %v9350_v60, %v9287_v26  ;;  %v9289_v58 = vmul.f32 %v9140_v14, %v15193_v13  ;;  %v9290_v6 = vmul.f32 %v9145_v44, %v15194_v16  ;;  %v15202_v0 = vld [vmem:[#allocation7_spill] sm:$0xff] }
 0x49f   : > { %v9484_v33 = vadd.f32 %v9483_v5, %v9421_v54  ;;  %v9352_v53 = vadd.f32 %v9351_v30, %v9288_v43  ;;  %v9423_v62 = vmul.f32 %v9289_v58, %v9289_v58  ;;  %v9424_v52 = vmul.f32 %v9290_v6, %v9290_v6 }
 0x4a0   : > { %v9155_v50 = vpop.permute.xlu1 %9154  ;;  %v9150_v38 = vpop.permute.xlu0 %9149 }
 0x4a1   : > { %v9485_v9 = vadd.f32 %v9484_v33, %v9422_v22  ;;  %v9353_v57 = vadd.f32 %v9352_v53, %v9289_v58  ;;  %v9291_v27 = vmul.f32 %v9150_v38, %v15195_v47  ;;  %v9292_v29 = vmul.f32 %v9155_v50, %v15196_v61  ;;  %v15203_v22 = vld [vmem:[#allocation19_spill] sm:$0xff] }
 0x4a3   : > { %v9486_v40 = vadd.f32 %v9485_v9, %v9423_v62  ;;  %v9354_v19 = vadd.f32 %v9353_v57, %v9290_v6  ;;  %v9425_v35 = vmul.f32 %v9291_v27, %v9291_v27  ;;  %v9426_v55 = vmul.f32 %v9292_v29, %v9292_v29  ;;  %v15204_v57 = vld [vmem:[#allocation16_spill] sm:$0xff] }
 0x4a4   : > { %v9165_v24 = vpop.permute.xlu1 %9164  ;;  %v9160_v49 = vpop.permute.xlu0 %9159 }
 0x4a5   : > { %v9487_v63 = vadd.f32 %v9486_v40, %v9424_v52  ;;  %v9355_v36 = vadd.f32 %v9354_v19, %v9291_v27  ;;  %v9293_v8 = vmul.f32 %v9160_v49, %v15197_v51  ;;  %v9294_v45 = vmul.f32 %v9165_v24, %v15198_v42  ;;  %v15205_v52 = vld [vmem:[#allocation11_spill] sm:$0xff] }
 0x4a7   : > { %v9488_v25 = vadd.f32 %v9487_v63, %v9425_v35  ;;  %v9356_v7 = vadd.f32 %v9355_v36, %v9292_v29  ;;  %v9427_v1 = vmul.f32 %v9293_v8, %v9293_v8  ;;  %v9428_v48 = vmul.f32 %v9294_v45, %v9294_v45 }
 0x4a8   : > { %v9175_v20 = vpop.permute.xlu1 %9174  ;;  %v9170_v37 = vpop.permute.xlu0 %9169 }
 0x4a9   : > { %v9489_v17 = vadd.f32 %v9488_v25, %v9426_v55  ;;  %v9357_v32 = vadd.f32 %v9356_v7, %v9293_v8  ;;  %v9295_v15 = vmul.f32 %v9170_v37, %v15199_v59  ;;  %v9296_v23 = vmul.f32 %v9175_v20, %v15200_v12  ;;  %v15206_v20 = vld [vmem:[#allocation17_spill] sm:$0xff] }
 0x4ab   : > { %v9490_v31 = vadd.f32 %v9489_v17, %v9427_v1  ;;  %v9358_v18 = vadd.f32 %v9357_v32, %v9294_v45  ;;  %v9429_v28 = vmul.f32 %v9295_v15, %v9295_v15  ;;  %v9430_v26 = vmul.f32 %v9296_v23, %v9296_v23  ;;  %v15207_v1 = vld [vmem:[#allocation20_spill] sm:$0xff] }
 0x4ac   : > { %v9185_v4 = vpop.permute.xlu1 %9184  ;;  %v9180_v21 = vpop.permute.xlu0 %9179 }
 0x4ad   : > { %v9491_v39 = vadd.f32 %v9490_v31, %v9428_v48  ;;  %v9359_v2 = vadd.f32 %v9358_v18, %v9295_v15  ;;  %v9297_v3 = vmul.f32 %v9180_v21, %v15201_v46  ;;  %v9298_v56 = vmul.f32 %v9185_v4, %v15202_v0  ;;  %v15208_v18 = vld [vmem:[#allocation22_spill] sm:$0xff] }
 0x4af   : > { %v9492_v11 = vadd.f32 %v9491_v39, %v9429_v28  ;;  %v9360_v43 = vadd.f32 %v9359_v2, %v9296_v23  ;;  %v9431_v30 = vmul.f32 %v9297_v3, %v9297_v3  ;;  %v9432_v13 = vmul.f32 %v9298_v56, %v9298_v56  ;;  %v15209_v39 = vld [vmem:[#allocation23_spill] sm:$0xff] }
 0x4b0   : > { %v9195_v60 = vpop.permute.xlu1 %9194  ;;  %v9190_v44 = vpop.permute.xlu0 %9189 }
 0x4b1   : > { %v9493_v14 = vadd.f32 %v9492_v11, %v9430_v26  ;;  %v9361_v5 = vadd.f32 %v9360_v43, %v9297_v3  ;;  %v9299_v54 = vmul.f32 %v9190_v44, %v14684_v10  ;;  %v9300_v33 = vmul.f32 %v9195_v60, %v15203_v22 }
 0x4b3   : > { %v9494_v58 = vadd.f32 %v9493_v14, %v9431_v30  ;;  %v9362_v16 = vadd.f32 %v9361_v5, %v9298_v56  ;;  %v9433_v9 = vmul.f32 %v9299_v54, %v9299_v54  ;;  %v9434_v47 = vmul.f32 %v9300_v33, %v9300_v33  ;;  %v15210_v56 = vld [vmem:[#allocation18_spill] sm:$0xff]  ;;  %v15211_v14 = vld [vmem:[#allocation21_spill] sm:$0xff] }
 0x4b4   : > { %v9205_v6 = vpop.permute.xlu1 %9204  ;;  %v9200_v53 = vpop.permute.xlu0 %9199 }
 0x4b5   : > { %v9495_v50 = vadd.f32 %v9494_v58, %v9432_v13  ;;  %v9363_v38 = vadd.f32 %v9362_v16, %v9299_v54  ;;  %v9301_v62 = vmul.f32 %v9200_v53, %v15204_v57  ;;  %v9302_v40 = vmul.f32 %v9205_v6, %v15205_v52 }
 0x4b7   : > { %v9496_v27 = vadd.f32 %v9495_v50, %v9433_v9  ;;  %v9364_v61 = vadd.f32 %v9363_v38, %v9300_v33  ;;  %v9435_v49 = vmul.f32 %v9301_v62, %v9301_v62  ;;  %v9436_v36 = vmul.f32 %v9302_v40, %v9302_v40 }
 0x4b8   : > { %v9215_v29 = vpop.permute.xlu1 %9214  ;;  %v9210_v19 = vpop.permute.xlu0 %9209 }
 0x4b9   : > { %v9497_v10 = vadd.f32 %v9496_v27, %v9434_v47  ;;  %v9365_v24 = vadd.f32 %v9364_v61, %v9301_v62  ;;  %v9303_v63 = vmul.f32 %v9210_v19, %v14702_v34  ;;  %v9304_v51 = vmul.f32 %v9215_v29, %v14705_v41  ;;  %v9311_v61 = vld [vmem:[%s14883_s8] sm:$0x3] }
 0x4bb   : > { %v9498_v35 = vadd.f32 %v9497_v10, %v9435_v49  ;;  %v9366_v8 = vadd.f32 %v9365_v24, %v9302_v40  ;;  %v9437_v7 = vmul.f32 %v9303_v63, %v9303_v63  ;;  %v9438_v17 = vmul.f32 %v9304_v51, %v9304_v51 }
 0x4bc   : > { %v9225_v55 = vpop.permute.xlu1 %9224  ;;  %v9220_v25 = vpop.permute.xlu0 %9219 }
 0x4bd   : > { %v9499_v42 = vadd.f32 %v9498_v35, %v9436_v36  ;;  %v9367_v45 = vadd.f32 %v9366_v8, %v9303_v63  ;;  %v9305_v37 = vmul.f32 %v9220_v25, %v15206_v20  ;;  %v9306_v59 = vmul.f32 %v9225_v55, %v15207_v1 }
 0x4bf   : > { %v9500_v32 = vadd.f32 %v9499_v42, %v9437_v7  ;;  %v9368_v15 = vadd.f32 %v9367_v45, %v9304_v51  ;;  %v9439_v23 = vmul.f32 %v9305_v37, %v9305_v37  ;;  %v9440_v4 = vmul.f32 %v9306_v59, %v9306_v59 }
 0x4c0   : > { %v9235_v48 = vpop.permute.xlu1 %9234  ;;  %v9230_v31 = vpop.permute.xlu0 %9229 }
 0x4c1   : > { %v9501_v34 = vadd.f32 %v9500_v32, %v9438_v17  ;;  %v9369_v12 = vadd.f32 %v9368_v15, %v9305_v37  ;;  %v9307_v41 = vmul.f32 %v9230_v31, %v15208_v18  ;;  %v9308_v2 = vmul.f32 %v9235_v48, %v15209_v39 }
 0x4c3   : > { %v9502_v21 = vadd.f32 %v9501_v34, %v9439_v23  ;;  %v9370_v28 = vadd.f32 %v9369_v12, %v9306_v59  ;;  %v9441_v0 = vmul.f32 %v9307_v41, %v9307_v41  ;;  %v9442_v60 = vmul.f32 %v9308_v2, %v9308_v2 }
 0x4c4   : > { %v9245_v46 = vpop.permute.xlu1 %9244  ;;  %v9240_v3 = vpop.permute.xlu0 %9239 }
 0x4c5   : > { %v9503_v26 = vadd.f32 %v9502_v21, %v9440_v4  ;;  %v9371_v11 = vadd.f32 %v9370_v28, %v9307_v41  ;;  %v9309_v43 = vmul.f32 %v9240_v3, %v15210_v56  ;;  %v9310_v5 = vmul.f32 %v9245_v46, %v15211_v14 }
 0x4c7   : > { %v9504_v44 = vadd.f32 %v9503_v26, %v9441_v0  ;;  %v9372_v30 = vadd.f32 %v9371_v11, %v9308_v2  ;;  %v9443_v58 = vmul.f32 %v9309_v43, %v9309_v43  ;;  %v9444_v22 = vmul.f32 %v9310_v5, %v9310_v5 }
 0x4c9   : > { %v9505_v54 = vadd.f32 %v9504_v44, %v9442_v60  ;;  %v9373_v13 = vadd.f32 %v9372_v30, %v9309_v43 }
 0x4cb   : > { %v9374_v33 = vadd.f32 %v9373_v13, %v9310_v5  ;;  %v9506_v16 = vadd.f32 %v9505_v54, %v9443_v58 }
 0x4cd   : > { %v9375_v6 = vrot.slane %v9374_v33, 4  ;;  %v9507_v53 = vadd.f32 %v9506_v16, %v9444_v22 }
 0x4cf   : > { %v9376_v50 = vadd.f32 %v9375_v6, %v9374_v33  ;;  %v9508_v38 = vrot.slane %v9507_v53, 4 }
 0x4d1   : > { %v9377_v9 = vrot.slane %v9376_v50, 2  ;;  %v9509_v57 = vadd.f32 %v9508_v38, %v9507_v53 }
 0x4d3   : > { %v9378_v62 = vadd.f32 %v9377_v9, %v9376_v50  ;;  %v9510_v47 = vrot.slane %v9509_v57, 2 }
 0x4d5   : > { %v9379_v27 = vrot.slane %v9378_v62, 1  ;;  %v9511_v52 = vadd.f32 %v9510_v47, %v9509_v57 }
 0x4d7   : > { %v9512_v40 = vrot.slane %v9511_v52, 1  ;;  %v9380_v29 = vadd.f32 %v9379_v27, %v9378_v62 }
 0x4d9   : > { %v9513_v19 = vadd.f32 %v9512_v40, %v9511_v52 }
 0x4db   : > { %v9515_v10 = vsel %vm2094_vm1, %v9380_v29, %v9513_v19 }
 0x4dc   : > { %v9516_v24 = vadd.f32 %v9515_v10, %v9311_v61 }
 0x4de   : > { %9517 = vst [vmem:[%s14883_s8] sm:$0x3] %v9516_v24 }
 0x4df PF: > { %s19_s27 = sadd.s32 1, %s12022_s27  }
 0x4e0   : > { %p16_p6 = scmp.ge.s32.totalorder %s19_s27, 4  }
 0x4e2   :  { %18 = sbr.rel (!%p16_p6) target bundleno = 1 (0x1), region = 104 }

</bundles_post_ra>
